<compile_context>
chip_gen: v7x
topology: tpu7x:2x2x1
jax: 0.10.0
libtpu: 0.0.40
codegen_flags: <defaults>
</compile_context>

<pallas_src>
import functools

import jax
import jax.numpy as jnp
from jax.experimental import pallas as pl
from jax.experimental.pallas import tpu as pltpu


# ---------------------------------------------------------------------------
# Fused  W @ patches_T  + shift -> activation   Pallas kernel (lane-dense out)
# ---------------------------------------------------------------------------
def _fused_matmul_kernel(w_ref, a_ref, shift_ref, o_ref, *, act):
    # w_ref: (Cout, K) bf16   a_ref: (K, tm) bf16
    # shift_ref: (Cout, 1) f32   o_ref: (Cout, tm)
    y = jnp.dot(w_ref[...], a_ref[...], preferred_element_type=jnp.float32)
    y = y + shift_ref[...]
    if act == "leaky":
        y = jnp.where(y > 0, y, 0.2 * y)
    elif act == "sigmoid":
        y = 1.0 / (1.0 + jnp.exp(-y))
    o_ref[...] = y.astype(o_ref.dtype)


def _pick_tm(M):
    # Largest power-of-two tile (<= 8192) that divides M and still leaves at
    # least 2 grid steps (feeds both v7x TensorCores on the big layers).
    for tm in (8192, 4096, 2048, 1024, 512, 256, 128):
        if M % tm == 0 and M // tm >= 2:
            return tm
    return M  # tiny tail layers: single full block (exempt from (8,128) rule)


def fused_matmul_T(w_mat, a_T, shift, act, out_dtype):
    """w_mat: (Cout, K) bf16; a_T: (K, M) bf16; shift: (Cout, 1) f32."""
    Cout, K = w_mat.shape
    Kb, M = a_T.shape
    assert K == Kb
    tm = _pick_tm(M)
    grid = (M // tm,)
    kernel = functools.partial(_fused_matmul_kernel, act=act)
    return pl.pallas_call(
        kernel,
        out_shape=jax.ShapeDtypeStruct((Cout, M), out_dtype),
        grid_spec=pltpu.PrefetchScalarGridSpec(
            num_scalar_prefetch=0,
            grid=grid,
            in_specs=[
                pl.BlockSpec((Cout, K), lambda i: (0, 0)),   # weights (resident)
                pl.BlockSpec((K, tm), lambda i: (0, i)),     # lane-dense M tile
                pl.BlockSpec((Cout, 1), lambda i: (0, 0)),   # per-channel shift
            ],
            out_specs=pl.BlockSpec((Cout, tm), lambda i: (0, i)),
        ),
        compiler_params=pltpu.CompilerParams(
            dimension_semantics=("parallel",)),
    )(w_mat, a_T, shift)


# ---------------------------------------------------------------------------
# Transposed im2col glue (plain JAX): builds (k*k*C, N*Hout*Wout) directly
# ---------------------------------------------------------------------------
def extract_patches_T(x_cnhw, ksize, stride, pad):
    # x: (C, N, H, W); returns patches_T (k*k*C, M) with row order (kh, kw, c)
    C, N, H, W = x_cnhw.shape
    if pad:
        x_cnhw = jnp.pad(x_cnhw, ((0, 0), (0, 0), (pad, pad), (pad, pad)))
    Hp, Wp = H + 2 * pad, W + 2 * pad
    Hout = (Hp - ksize) // stride + 1
    Wout = (Wp - ksize) // stride + 1
    taps = []
    for kh in range(ksize):
        for kw in range(ksize):
            taps.append(x_cnhw[:, :, kh:kh + stride * Hout:stride,
                                      kw:kw + stride * Wout:stride])
    # (k*k, C, N, Hout, Wout): one XLA fusion writes the bf16 patch slab in the
    # exact (K, M) orientation the kernel reads (no separate transpose pass).
    patches = jnp.stack(taps, axis=0)
    return patches.reshape(ksize * ksize * C, N * Hout * Wout), Hout, Wout


def conv_block(x_cnhw, w_torch, scale, shift, *, stride, pad, act, out_dtype):
    """x: (Cin, N, H, W) bf16; w_torch: (Cout, Cin, k, k) PyTorch layout."""
    Cin, N, H, W = x_cnhw.shape
    Cout, Cin_w, k, _ = w_torch.shape
    assert Cin == Cin_w
    patches_T, Hout, Wout = extract_patches_T(x_cnhw, k, stride, pad)
    # (Cout, Cin, kh, kw) -> (Cout, kh, kw, Cin) -> (Cout, K); fold BN scale.
    w_mat = jnp.transpose(w_torch, (0, 2, 3, 1)).reshape(Cout, k * k * Cin)
    w_mat = (w_mat * scale[:, None]).astype(jnp.bfloat16)
    y = fused_matmul_T(w_mat,
                       patches_T.astype(jnp.bfloat16),
                       shift.reshape(Cout, 1).astype(jnp.float32),
                       act, out_dtype)
    return y.reshape(Cout, N, Hout, Wout)


# ---------------------------------------------------------------------------
# Parameter init (deterministic, shapes match the PyTorch module's __init__)
# ---------------------------------------------------------------------------
def init_params(key, n_colors, n_features):
    eps = 1e-5
    chans = [n_colors] + list(n_features) + [1]
    layers = []
    keys = jax.random.split(key, 4 * (len(chans) - 1))
    for i in range(len(chans) - 1):
        cin, cout = chans[i], chans[i + 1]
        kw_, kg, km, kv = keys[4 * i:4 * i + 4]
        w = 0.02 * jax.random.normal(kw_, (cout, cin, 4, 4), jnp.float32)
        is_first = (i == 0)
        is_last = (i == len(chans) - 2)
        if is_first or is_last:
            # no BatchNorm on the first and last conv
            scale = jnp.ones((cout,), jnp.float32)
            shift = jnp.zeros((cout,), jnp.float32)
        else:
            gamma = 1.0 + 0.02 * jax.random.normal(kg, (cout,), jnp.float32)
            beta = jnp.zeros((cout,), jnp.float32)
            running_mean = 0.1 * jax.random.normal(km, (cout,), jnp.float32)
            running_var = 1.0 + jnp.abs(0.1 * jax.random.normal(kv, (cout,), jnp.float32))
            scale = gamma / jnp.sqrt(running_var + eps)
            shift = beta - running_mean * scale
        if is_last:
            stride, pad, act = 1, 0, "sigmoid"
        else:
            stride, pad, act = 2, 1, "leaky"
        layers.append(dict(w=w, scale=scale, shift=shift,
                           stride=stride, pad=pad, act=act))
    return layers


# ---------------------------------------------------------------------------
# Forward pass (matches Discriminator_dcgan.forward)
# ---------------------------------------------------------------------------
def discriminator_dcgan_forward(params, x_nchw):
    # accept NCHW like PyTorch; run channels-first (C, N, H, W) bf16 internally
    x = jnp.transpose(x_nchw, (1, 0, 2, 3)).astype(jnp.bfloat16)
    n_layers = len(params)
    for li, layer in enumerate(params):
        is_last = (li == n_layers - 1)
        x = conv_block(x, layer["w"], layer["scale"], layer["shift"],
                       stride=layer["stride"], pad=layer["pad"],
                       act=layer["act"],
                       out_dtype=jnp.float32 if is_last else jnp.bfloat16)
    # after final 4x4 valid conv: (1, N, 1, 1); Flatten -> (N, 1)
    _, N, _, _ = x.shape
    return jnp.transpose(x, (1, 0, 2, 3)).reshape(N, -1)


if __name__ == "__main__":
    key = jax.random.PRNGKey(0)
    k_param, k_input = jax.random.split(key)

    N_colors = 3
    N_features = [4, 4, 4, 4, 4, 4, 4]          # 7 feature stages (small)
    # architecture requires 512x512 input (7 stride-2 convs -> 4x4 -> final 4x4 conv -> 1x1)
    x = jax.random.normal(k_input, (2, N_colors, 512, 512), jnp.float32)  # NCHW

    params = init_params(k_param, N_colors, N_features)

    fwd = jax.jit(lambda inp: discriminator_dcgan_forward(params, inp))
    out = jax.block_until_ready(fwd(x))

    assert out.shape == (2, 1), out.shape
    assert bool(jnp.all(jnp.isfinite(out)))
    assert bool(jnp.all((out >= 0.0) & (out <= 1.0)))  # sigmoid range
    print("KERNEL_OK")
</pallas_src>

<mosaic_0001>
module attributes {stable_mosaic.version = 11 : i64} {
  func.func @_fused_matmul_kernel(%arg0: i32, %arg1: memref<4x48xbf16, #tpu.memory_space<vmem>>, %arg2: memref<48x8192xbf16, #tpu.memory_space<vmem>>, %arg3: memref<4x1xf32, #tpu.memory_space<vmem>>, %arg4: memref<4x8192xbf16, #tpu.memory_space<vmem>>) attributes {dimension_semantics = [#tpu.dimension_semantics<parallel>], iteration_bounds = array<i64: 16>, scalar_prefetch = 0 : i64, scratch_operands = 0 : i64, tpu.core_type = #tpu.core_type<tc>, window_params = [{pipeline_mode = #tpu.pipeline_mode<synchronous>, transform_indices = @transform_0, window_bounds = array<i64: 4, 48>}, {transform_indices = @transform_1, window_bounds = array<i64: 48, 8192>}, {pipeline_mode = #tpu.pipeline_mode<synchronous>, transform_indices = @transform_2, window_bounds = array<i64: 4, 1>}, {transform_indices = @transform_3, window_bounds = array<i64: 4, 8192>}]} {
    %c0 = arith.constant 0 : index
    %c0_0 = arith.constant 0 : index
    %0 = vector.load %arg1[%c0, %c0_0] : memref<4x48xbf16, #tpu.memory_space<vmem>>, vector<4x48xbf16>
    %c0_1 = arith.constant 0 : index
    %c0_2 = arith.constant 0 : index
    %1 = vector.load %arg2[%c0_1, %c0_2] : memref<48x8192xbf16, #tpu.memory_space<vmem>>, vector<48x8192xbf16>
    %cst = arith.constant dense<0.000000e+00> : vector<4x8192xf32>
    %2 = tpu.matmul %0, %1, %cst {dimension_numbers = #tpu.dot_dimension_numbers<[1], [0], [0], [1], [0, 0, 1, 1], [], []>} : vector<4x48xbf16>, vector<48x8192xbf16>, vector<4x8192xf32> -> vector<4x8192xf32>
    %c0_3 = arith.constant 0 : index
    %c0_4 = arith.constant 0 : index
    %3 = vector.load %arg3[%c0_3, %c0_4] : memref<4x1xf32, #tpu.memory_space<vmem>>, vector<4x1xf32>
    %4 = vector.broadcast %3 : vector<4x1xf32> to vector<4x8192xf32>
    %5 = arith.addf %2, %4 : vector<4x8192xf32>
    %cst_5 = arith.constant 0.000000e+00 : f32
    %6 = vector.broadcast %cst_5 : f32 to vector<4x8192xf32>
    %7 = arith.cmpf ogt, %5, %6 : vector<4x8192xf32>
    %cst_6 = arith.constant 2.000000e-01 : f32
    %8 = vector.broadcast %cst_6 : f32 to vector<4x8192xf32>
    %9 = arith.mulf %8, %5 : vector<4x8192xf32>
    %10 = arith.select %7, %5, %9 : vector<4x8192xi1>, vector<4x8192xf32>
    %11 = arith.truncf %10 : vector<4x8192xf32> to vector<4x8192xbf16>
    %c0_7 = arith.constant 0 : index
    %c0_8 = arith.constant 0 : index
    %12 = vector.load %arg4[%c0_7, %c0_8] : memref<4x8192xbf16, #tpu.memory_space<vmem>>, vector<4x8192xbf16>
    tpu.vector_store %arg4[%c0_7, %c0_8], %11 {strides = array<i32>} : memref<4x8192xbf16, #tpu.memory_space<vmem>>, vector<4x8192xbf16>,
    return
  }
  func.func @transform_0(%arg0: i32) -> (i32, i32) {
    %c0_i32 = arith.constant 0 : i32
    %c0_i32_0 = arith.constant 0 : i32
    %c0_i32_1 = arith.constant 0 : i32
    return %c0_i32, %c0_i32_0 : i32, i32
  }
  func.func @transform_1(%arg0: i32) -> (i32, i32) {
    %c0_i32 = arith.constant 0 : i32
    %c0_i32_0 = arith.constant 0 : i32
    return %c0_i32, %arg0 : i32, i32
  }
  func.func @transform_2(%arg0: i32) -> (i32, i32) {
    %c0_i32 = arith.constant 0 : i32
    %c0_i32_0 = arith.constant 0 : i32
    %c0_i32_1 = arith.constant 0 : i32
    return %c0_i32, %c0_i32_0 : i32, i32
  }
  func.func @transform_3(%arg0: i32) -> (i32, i32) {
    %c0_i32 = arith.constant 0 : i32
    %c0_i32_0 = arith.constant 0 : i32
    return %c0_i32, %arg0 : i32, i32
  }
}

module attributes {stable_mosaic.version = 11 : i64} {
  func.func @_fused_matmul_kernel(%arg0: i32, %arg1: memref<4x64xbf16, #tpu.memory_space<vmem>>, %arg2: memref<64x8192xbf16, #tpu.memory_space<vmem>>, %arg3: memref<4x1xf32, #tpu.memory_space<vmem>>, %arg4: memref<4x8192xbf16, #tpu.memory_space<vmem>>) attributes {dimension_semantics = [#tpu.dimension_semantics<parallel>], iteration_bounds = array<i64: 4>, scalar_prefetch = 0 : i64, scratch_operands = 0 : i64, tpu.core_type = #tpu.core_type<tc>, window_params = [{pipeline_mode = #tpu.pipeline_mode<synchronous>, transform_indices = @transform_0, window_bounds = array<i64: 4, 64>}, {transform_indices = @transform_1, window_bounds = array<i64: 64, 8192>}, {pipeline_mode = #tpu.pipeline_mode<synchronous>, transform_indices = @transform_2, window_bounds = array<i64: 4, 1>}, {transform_indices = @transform_3, window_bounds = array<i64: 4, 8192>}]} {
    %c0 = arith.constant 0 : index
    %c0_0 = arith.constant 0 : index
    %0 = vector.load %arg1[%c0, %c0_0] : memref<4x64xbf16, #tpu.memory_space<vmem>>, vector<4x64xbf16>
    %c0_1 = arith.constant 0 : index
    %c0_2 = arith.constant 0 : index
    %1 = vector.load %arg2[%c0_1, %c0_2] : memref<64x8192xbf16, #tpu.memory_space<vmem>>, vector<64x8192xbf16>
    %cst = arith.constant dense<0.000000e+00> : vector<4x8192xf32>
    %2 = tpu.matmul %0, %1, %cst {dimension_numbers = #tpu.dot_dimension_numbers<[1], [0], [0], [1], [0, 0, 1, 1], [], []>} : vector<4x64xbf16>, vector<64x8192xbf16>, vector<4x8192xf32> -> vector<4x8192xf32>
    %c0_3 = arith.constant 0 : index
    %c0_4 = arith.constant 0 : index
    %3 = vector.load %arg3[%c0_3, %c0_4] : memref<4x1xf32, #tpu.memory_space<vmem>>, vector<4x1xf32>
    %4 = vector.broadcast %3 : vector<4x1xf32> to vector<4x8192xf32>
    %5 = arith.addf %2, %4 : vector<4x8192xf32>
    %cst_5 = arith.constant 0.000000e+00 : f32
    %6 = vector.broadcast %cst_5 : f32 to vector<4x8192xf32>
    %7 = arith.cmpf ogt, %5, %6 : vector<4x8192xf32>
    %cst_6 = arith.constant 2.000000e-01 : f32
    %8 = vector.broadcast %cst_6 : f32 to vector<4x8192xf32>
    %9 = arith.mulf %8, %5 : vector<4x8192xf32>
    %10 = arith.select %7, %5, %9 : vector<4x8192xi1>, vector<4x8192xf32>
    %11 = arith.truncf %10 : vector<4x8192xf32> to vector<4x8192xbf16>
    %c0_7 = arith.constant 0 : index
    %c0_8 = arith.constant 0 : index
    %12 = vector.load %arg4[%c0_7, %c0_8] : memref<4x8192xbf16, #tpu.memory_space<vmem>>, vector<4x8192xbf16>
    tpu.vector_store %arg4[%c0_7, %c0_8], %11 {strides = array<i32>} : memref<4x8192xbf16, #tpu.memory_space<vmem>>, vector<4x8192xbf16>,
    return
  }
  func.func @transform_0(%arg0: i32) -> (i32, i32) {
    %c0_i32 = arith.constant 0 : i32
    %c0_i32_0 = arith.constant 0 : i32
    %c0_i32_1 = arith.constant 0 : i32
    return %c0_i32, %c0_i32_0 : i32, i32
  }
  func.func @transform_1(%arg0: i32) -> (i32, i32) {
    %c0_i32 = arith.constant 0 : i32
    %c0_i32_0 = arith.constant 0 : i32
    return %c0_i32, %arg0 : i32, i32
  }
  func.func @transform_2(%arg0: i32) -> (i32, i32) {
    %c0_i32 = arith.constant 0 : i32
    %c0_i32_0 = arith.constant 0 : i32
    %c0_i32_1 = arith.constant 0 : i32
    return %c0_i32, %c0_i32_0 : i32, i32
  }
  func.func @transform_3(%arg0: i32) -> (i32, i32) {
    %c0_i32 = arith.constant 0 : i32
    %c0_i32_0 = arith.constant 0 : i32
    return %c0_i32, %arg0 : i32, i32
  }
}

module attributes {stable_mosaic.version = 11 : i64} {
  func.func @_fused_matmul_kernel(%arg0: i32, %arg1: memref<4x64xbf16, #tpu.memory_space<vmem>>, %arg2: memref<64x4096xbf16, #tpu.memory_space<vmem>>, %arg3: memref<4x1xf32, #tpu.memory_space<vmem>>, %arg4: memref<4x4096xbf16, #tpu.memory_space<vmem>>) attributes {dimension_semantics = [#tpu.dimension_semantics<parallel>], iteration_bounds = array<i64: 2>, scalar_prefetch = 0 : i64, scratch_operands = 0 : i64, tpu.core_type = #tpu.core_type<tc>, window_params = [{pipeline_mode = #tpu.pipeline_mode<synchronous>, transform_indices = @transform_0, window_bounds = array<i64: 4, 64>}, {transform_indices = @transform_1, window_bounds = array<i64: 64, 4096>}, {pipeline_mode = #tpu.pipeline_mode<synchronous>, transform_indices = @transform_2, window_bounds = array<i64: 4, 1>}, {transform_indices = @transform_3, window_bounds = array<i64: 4, 4096>}]} {
    %c0 = arith.constant 0 : index
    %c0_0 = arith.constant 0 : index
    %0 = vector.load %arg1[%c0, %c0_0] : memref<4x64xbf16, #tpu.memory_space<vmem>>, vector<4x64xbf16>
    %c0_1 = arith.constant 0 : index
    %c0_2 = arith.constant 0 : index
    %1 = vector.load %arg2[%c0_1, %c0_2] : memref<64x4096xbf16, #tpu.memory_space<vmem>>, vector<64x4096xbf16>
    %cst = arith.constant dense<0.000000e+00> : vector<4x4096xf32>
    %2 = tpu.matmul %0, %1, %cst {dimension_numbers = #tpu.dot_dimension_numbers<[1], [0], [0], [1], [0, 0, 1, 1], [], []>} : vector<4x64xbf16>, vector<64x4096xbf16>, vector<4x4096xf32> -> vector<4x4096xf32>
    %c0_3 = arith.constant 0 : index
    %c0_4 = arith.constant 0 : index
    %3 = vector.load %arg3[%c0_3, %c0_4] : memref<4x1xf32, #tpu.memory_space<vmem>>, vector<4x1xf32>
    %4 = vector.broadcast %3 : vector<4x1xf32> to vector<4x4096xf32>
    %5 = arith.addf %2, %4 : vector<4x4096xf32>
    %cst_5 = arith.constant 0.000000e+00 : f32
    %6 = vector.broadcast %cst_5 : f32 to vector<4x4096xf32>
    %7 = arith.cmpf ogt, %5, %6 : vector<4x4096xf32>
    %cst_6 = arith.constant 2.000000e-01 : f32
    %8 = vector.broadcast %cst_6 : f32 to vector<4x4096xf32>
    %9 = arith.mulf %8, %5 : vector<4x4096xf32>
    %10 = arith.select %7, %5, %9 : vector<4x4096xi1>, vector<4x4096xf32>
    %11 = arith.truncf %10 : vector<4x4096xf32> to vector<4x4096xbf16>
    %c0_7 = arith.constant 0 : index
    %c0_8 = arith.constant 0 : index
    %12 = vector.load %arg4[%c0_7, %c0_8] : memref<4x4096xbf16, #tpu.memory_space<vmem>>, vector<4x4096xbf16>
    tpu.vector_store %arg4[%c0_7, %c0_8], %11 {strides = array<i32>} : memref<4x4096xbf16, #tpu.memory_space<vmem>>, vector<4x4096xbf16>,
    return
  }
  func.func @transform_0(%arg0: i32) -> (i32, i32) {
    %c0_i32 = arith.constant 0 : i32
    %c0_i32_0 = arith.constant 0 : i32
    %c0_i32_1 = arith.constant 0 : i32
    return %c0_i32, %c0_i32_0 : i32, i32
  }
  func.func @transform_1(%arg0: i32) -> (i32, i32) {
    %c0_i32 = arith.constant 0 : i32
    %c0_i32_0 = arith.constant 0 : i32
    return %c0_i32, %arg0 : i32, i32
  }
  func.func @transform_2(%arg0: i32) -> (i32, i32) {
    %c0_i32 = arith.constant 0 : i32
    %c0_i32_0 = arith.constant 0 : i32
    %c0_i32_1 = arith.constant 0 : i32
    return %c0_i32, %c0_i32_0 : i32, i32
  }
  func.func @transform_3(%arg0: i32) -> (i32, i32) {
    %c0_i32 = arith.constant 0 : i32
    %c0_i32_0 = arith.constant 0 : i32
    return %c0_i32, %arg0 : i32, i32
  }
}

module attributes {stable_mosaic.version = 11 : i64} {
  func.func @_fused_matmul_kernel(%arg0: i32, %arg1: memref<4x64xbf16, #tpu.memory_space<vmem>>, %arg2: memref<64x1024xbf16, #tpu.memory_space<vmem>>, %arg3: memref<4x1xf32, #tpu.memory_space<vmem>>, %arg4: memref<4x1024xbf16, #tpu.memory_space<vmem>>) attributes {dimension_semantics = [#tpu.dimension_semantics<parallel>], iteration_bounds = array<i64: 2>, scalar_prefetch = 0 : i64, scratch_operands = 0 : i64, tpu.core_type = #tpu.core_type<tc>, window_params = [{pipeline_mode = #tpu.pipeline_mode<synchronous>, transform_indices = @transform_0, window_bounds = array<i64: 4, 64>}, {transform_indices = @transform_1, window_bounds = array<i64: 64, 1024>}, {pipeline_mode = #tpu.pipeline_mode<synchronous>, transform_indices = @transform_2, window_bounds = array<i64: 4, 1>}, {transform_indices = @transform_3, window_bounds = array<i64: 4, 1024>}]} {
    %c0 = arith.constant 0 : index
    %c0_0 = arith.constant 0 : index
    %0 = vector.load %arg1[%c0, %c0_0] : memref<4x64xbf16, #tpu.memory_space<vmem>>, vector<4x64xbf16>
    %c0_1 = arith.constant 0 : index
    %c0_2 = arith.constant 0 : index
    %1 = vector.load %arg2[%c0_1, %c0_2] : memref<64x1024xbf16, #tpu.memory_space<vmem>>, vector<64x1024xbf16>
    %cst = arith.constant dense<0.000000e+00> : vector<4x1024xf32>
    %2 = tpu.matmul %0, %1, %cst {dimension_numbers = #tpu.dot_dimension_numbers<[1], [0], [0], [1], [0, 0, 1, 1], [], []>} : vector<4x64xbf16>, vector<64x1024xbf16>, vector<4x1024xf32> -> vector<4x1024xf32>
    %c0_3 = arith.constant 0 : index
    %c0_4 = arith.constant 0 : index
    %3 = vector.load %arg3[%c0_3, %c0_4] : memref<4x1xf32, #tpu.memory_space<vmem>>, vector<4x1xf32>
    %4 = vector.broadcast %3 : vector<4x1xf32> to vector<4x1024xf32>
    %5 = arith.addf %2, %4 : vector<4x1024xf32>
    %cst_5 = arith.constant 0.000000e+00 : f32
    %6 = vector.broadcast %cst_5 : f32 to vector<4x1024xf32>
    %7 = arith.cmpf ogt, %5, %6 : vector<4x1024xf32>
    %cst_6 = arith.constant 2.000000e-01 : f32
    %8 = vector.broadcast %cst_6 : f32 to vector<4x1024xf32>
    %9 = arith.mulf %8, %5 : vector<4x1024xf32>
    %10 = arith.select %7, %5, %9 : vector<4x1024xi1>, vector<4x1024xf32>
    %11 = arith.truncf %10 : vector<4x1024xf32> to vector<4x1024xbf16>
    %c0_7 = arith.constant 0 : index
    %c0_8 = arith.constant 0 : index
    %12 = vector.load %arg4[%c0_7, %c0_8] : memref<4x1024xbf16, #tpu.memory_space<vmem>>, vector<4x1024xbf16>
    tpu.vector_store %arg4[%c0_7, %c0_8], %11 {strides = array<i32>} : memref<4x1024xbf16, #tpu.memory_space<vmem>>, vector<4x1024xbf16>,
    return
  }
  func.func @transform_0(%arg0: i32) -> (i32, i32) {
    %c0_i32 = arith.constant 0 : i32
    %c0_i32_0 = arith.constant 0 : i32
    %c0_i32_1 = arith.constant 0 : i32
    return %c0_i32, %c0_i32_0 : i32, i32
  }
  func.func @transform_1(%arg0: i32) -> (i32, i32) {
    %c0_i32 = arith.constant 0 : i32
    %c0_i32_0 = arith.constant 0 : i32
    return %c0_i32, %arg0 : i32, i32
  }
  func.func @transform_2(%arg0: i32) -> (i32, i32) {
    %c0_i32 = arith.constant 0 : i32
    %c0_i32_0 = arith.constant 0 : i32
    %c0_i32_1 = arith.constant 0 : i32
    return %c0_i32, %c0_i32_0 : i32, i32
  }
  func.func @transform_3(%arg0: i32) -> (i32, i32) {
    %c0_i32 = arith.constant 0 : i32
    %c0_i32_0 = arith.constant 0 : i32
    return %c0_i32, %arg0 : i32, i32
  }
}

module attributes {stable_mosaic.version = 11 : i64} {
  func.func @_fused_matmul_kernel(%arg0: i32, %arg1: memref<4x64xbf16, #tpu.memory_space<vmem>>, %arg2: memref<64x256xbf16, #tpu.memory_space<vmem>>, %arg3: memref<4x1xf32, #tpu.memory_space<vmem>>, %arg4: memref<4x256xbf16, #tpu.memory_space<vmem>>) attributes {dimension_semantics = [#tpu.dimension_semantics<parallel>], iteration_bounds = array<i64: 2>, scalar_prefetch = 0 : i64, scratch_operands = 0 : i64, tpu.core_type = #tpu.core_type<tc>, window_params = [{pipeline_mode = #tpu.pipeline_mode<synchronous>, transform_indices = @transform_0, window_bounds = array<i64: 4, 64>}, {transform_indices = @transform_1, window_bounds = array<i64: 64, 256>}, {pipeline_mode = #tpu.pipeline_mode<synchronous>, transform_indices = @transform_2, window_bounds = array<i64: 4, 1>}, {transform_indices = @transform_3, window_bounds = array<i64: 4, 256>}]} {
    %c0 = arith.constant 0 : index
    %c0_0 = arith.constant 0 : index
    %0 = vector.load %arg1[%c0, %c0_0] : memref<4x64xbf16, #tpu.memory_space<vmem>>, vector<4x64xbf16>
    %c0_1 = arith.constant 0 : index
    %c0_2 = arith.constant 0 : index
    %1 = vector.load %arg2[%c0_1, %c0_2] : memref<64x256xbf16, #tpu.memory_space<vmem>>, vector<64x256xbf16>
    %cst = arith.constant dense<0.000000e+00> : vector<4x256xf32>
    %2 = tpu.matmul %0, %1, %cst {dimension_numbers = #tpu.dot_dimension_numbers<[1], [0], [0], [1], [0, 0, 1, 1], [], []>} : vector<4x64xbf16>, vector<64x256xbf16>, vector<4x256xf32> -> vector<4x256xf32>
    %c0_3 = arith.constant 0 : index
    %c0_4 = arith.constant 0 : index
    %3 = vector.load %arg3[%c0_3, %c0_4] : memref<4x1xf32, #tpu.memory_space<vmem>>, vector<4x1xf32>
    %4 = vector.broadcast %3 : vector<4x1xf32> to vector<4x256xf32>
    %5 = arith.addf %2, %4 : vector<4x256xf32>
    %cst_5 = arith.constant 0.000000e+00 : f32
    %6 = vector.broadcast %cst_5 : f32 to vector<4x256xf32>
    %7 = arith.cmpf ogt, %5, %6 : vector<4x256xf32>
    %cst_6 = arith.constant 2.000000e-01 : f32
    %8 = vector.broadcast %cst_6 : f32 to vector<4x256xf32>
    %9 = arith.mulf %8, %5 : vector<4x256xf32>
    %10 = arith.select %7, %5, %9 : vector<4x256xi1>, vector<4x256xf32>
    %11 = arith.truncf %10 : vector<4x256xf32> to vector<4x256xbf16>
    %c0_7 = arith.constant 0 : index
    %c0_8 = arith.constant 0 : index
    %12 = vector.load %arg4[%c0_7, %c0_8] : memref<4x256xbf16, #tpu.memory_space<vmem>>, vector<4x256xbf16>
    tpu.vector_store %arg4[%c0_7, %c0_8], %11 {strides = array<i32>} : memref<4x256xbf16, #tpu.memory_space<vmem>>, vector<4x256xbf16>,
    return
  }
  func.func @transform_0(%arg0: i32) -> (i32, i32) {
    %c0_i32 = arith.constant 0 : i32
    %c0_i32_0 = arith.constant 0 : i32
    %c0_i32_1 = arith.constant 0 : i32
    return %c0_i32, %c0_i32_0 : i32, i32
  }
  func.func @transform_1(%arg0: i32) -> (i32, i32) {
    %c0_i32 = arith.constant 0 : i32
    %c0_i32_0 = arith.constant 0 : i32
    return %c0_i32, %arg0 : i32, i32
  }
  func.func @transform_2(%arg0: i32) -> (i32, i32) {
    %c0_i32 = arith.constant 0 : i32
    %c0_i32_0 = arith.constant 0 : i32
    %c0_i32_1 = arith.constant 0 : i32
    return %c0_i32, %c0_i32_0 : i32, i32
  }
  func.func @transform_3(%arg0: i32) -> (i32, i32) {
    %c0_i32 = arith.constant 0 : i32
    %c0_i32_0 = arith.constant 0 : i32
    return %c0_i32, %arg0 : i32, i32
  }
}

module attributes {stable_mosaic.version = 11 : i64} {
  func.func @_fused_matmul_kernel(%arg0: i32, %arg1: memref<4x64xbf16, #tpu.memory_space<vmem>>, %arg2: memref<64x128xbf16, #tpu.memory_space<vmem>>, %arg3: memref<4x1xf32, #tpu.memory_space<vmem>>, %arg4: memref<4x128xbf16, #tpu.memory_space<vmem>>) attributes {dimension_semantics = [#tpu.dimension_semantics<parallel>], iteration_bounds = array<i64: 1>, scalar_prefetch = 0 : i64, scratch_operands = 0 : i64, tpu.core_type = #tpu.core_type<tc>, window_params = [{pipeline_mode = #tpu.pipeline_mode<synchronous>, transform_indices = @transform_0, window_bounds = array<i64: 4, 64>}, {transform_indices = @transform_1, window_bounds = array<i64: 64, 128>}, {pipeline_mode = #tpu.pipeline_mode<synchronous>, transform_indices = @transform_2, window_bounds = array<i64: 4, 1>}, {transform_indices = @transform_3, window_bounds = array<i64: 4, 128>}]} {
    %c0 = arith.constant 0 : index
    %c0_0 = arith.constant 0 : index
    %0 = vector.load %arg1[%c0, %c0_0] : memref<4x64xbf16, #tpu.memory_space<vmem>>, vector<4x64xbf16>
    %c0_1 = arith.constant 0 : index
    %c0_2 = arith.constant 0 : index
    %1 = vector.load %arg2[%c0_1, %c0_2] : memref<64x128xbf16, #tpu.memory_space<vmem>>, vector<64x128xbf16>
    %cst = arith.constant dense<0.000000e+00> : vector<4x128xf32>
    %2 = tpu.matmul %0, %1, %cst {dimension_numbers = #tpu.dot_dimension_numbers<[1], [0], [0], [1], [0, 0, 1, 1], [], []>} : vector<4x64xbf16>, vector<64x128xbf16>, vector<4x128xf32> -> vector<4x128xf32>
    %c0_3 = arith.constant 0 : index
    %c0_4 = arith.constant 0 : index
    %3 = vector.load %arg3[%c0_3, %c0_4] : memref<4x1xf32, #tpu.memory_space<vmem>>, vector<4x1xf32>
    %4 = vector.broadcast %3 : vector<4x1xf32> to vector<4x128xf32>
    %5 = arith.addf %2, %4 : vector<4x128xf32>
    %cst_5 = arith.constant 0.000000e+00 : f32
    %6 = vector.broadcast %cst_5 : f32 to vector<4x128xf32>
    %7 = arith.cmpf ogt, %5, %6 : vector<4x128xf32>
    %cst_6 = arith.constant 2.000000e-01 : f32
    %8 = vector.broadcast %cst_6 : f32 to vector<4x128xf32>
    %9 = arith.mulf %8, %5 : vector<4x128xf32>
    %10 = arith.select %7, %5, %9 : vector<4x128xi1>, vector<4x128xf32>
    %11 = arith.truncf %10 : vector<4x128xf32> to vector<4x128xbf16>
    %c0_7 = arith.constant 0 : index
    %c0_8 = arith.constant 0 : index
    %12 = vector.load %arg4[%c0_7, %c0_8] : memref<4x128xbf16, #tpu.memory_space<vmem>>, vector<4x128xbf16>
    tpu.vector_store %arg4[%c0_7, %c0_8], %11 {strides = array<i32>} : memref<4x128xbf16, #tpu.memory_space<vmem>>, vector<4x128xbf16>,
    return
  }
  func.func @transform_0(%arg0: i32) -> (i32, i32) {
    %c0_i32 = arith.constant 0 : i32
    %c0_i32_0 = arith.constant 0 : i32
    %c0_i32_1 = arith.constant 0 : i32
    return %c0_i32, %c0_i32_0 : i32, i32
  }
  func.func @transform_1(%arg0: i32) -> (i32, i32) {
    %c0_i32 = arith.constant 0 : i32
    %c0_i32_0 = arith.constant 0 : i32
    return %c0_i32, %arg0 : i32, i32
  }
  func.func @transform_2(%arg0: i32) -> (i32, i32) {
    %c0_i32 = arith.constant 0 : i32
    %c0_i32_0 = arith.constant 0 : i32
    %c0_i32_1 = arith.constant 0 : i32
    return %c0_i32, %c0_i32_0 : i32, i32
  }
  func.func @transform_3(%arg0: i32) -> (i32, i32) {
    %c0_i32 = arith.constant 0 : i32
    %c0_i32_0 = arith.constant 0 : i32
    return %c0_i32, %arg0 : i32, i32
  }
}

module attributes {stable_mosaic.version = 11 : i64} {
  func.func @_fused_matmul_kernel(%arg0: i32, %arg1: memref<4x64xbf16, #tpu.memory_space<vmem>>, %arg2: memref<64x32xbf16, #tpu.memory_space<vmem>>, %arg3: memref<4x1xf32, #tpu.memory_space<vmem>>, %arg4: memref<4x32xbf16, #tpu.memory_space<vmem>>) attributes {dimension_semantics = [#tpu.dimension_semantics<parallel>], iteration_bounds = array<i64: 1>, scalar_prefetch = 0 : i64, scratch_operands = 0 : i64, tpu.core_type = #tpu.core_type<tc>, window_params = [{pipeline_mode = #tpu.pipeline_mode<synchronous>, transform_indices = @transform_0, window_bounds = array<i64: 4, 64>}, {transform_indices = @transform_1, window_bounds = array<i64: 64, 32>}, {pipeline_mode = #tpu.pipeline_mode<synchronous>, transform_indices = @transform_2, window_bounds = array<i64: 4, 1>}, {transform_indices = @transform_3, window_bounds = array<i64: 4, 32>}]} {
    %c0 = arith.constant 0 : index
    %c0_0 = arith.constant 0 : index
    %0 = vector.load %arg1[%c0, %c0_0] : memref<4x64xbf16, #tpu.memory_space<vmem>>, vector<4x64xbf16>
    %c0_1 = arith.constant 0 : index
    %c0_2 = arith.constant 0 : index
    %1 = vector.load %arg2[%c0_1, %c0_2] : memref<64x32xbf16, #tpu.memory_space<vmem>>, vector<64x32xbf16>
    %cst = arith.constant dense<0.000000e+00> : vector<4x32xf32>
    %2 = tpu.matmul %0, %1, %cst {dimension_numbers = #tpu.dot_dimension_numbers<[1], [0], [0], [1], [0, 0, 1, 1], [], []>} : vector<4x64xbf16>, vector<64x32xbf16>, vector<4x32xf32> -> vector<4x32xf32>
    %c0_3 = arith.constant 0 : index
    %c0_4 = arith.constant 0 : index
    %3 = vector.load %arg3[%c0_3, %c0_4] : memref<4x1xf32, #tpu.memory_space<vmem>>, vector<4x1xf32>
    %4 = vector.broadcast %3 : vector<4x1xf32> to vector<4x32xf32>
    %5 = arith.addf %2, %4 : vector<4x32xf32>
    %cst_5 = arith.constant 0.000000e+00 : f32
    %6 = vector.broadcast %cst_5 : f32 to vector<4x32xf32>
    %7 = arith.cmpf ogt, %5, %6 : vector<4x32xf32>
    %cst_6 = arith.constant 2.000000e-01 : f32
    %8 = vector.broadcast %cst_6 : f32 to vector<4x32xf32>
    %9 = arith.mulf %8, %5 : vector<4x32xf32>
    %10 = arith.select %7, %5, %9 : vector<4x32xi1>, vector<4x32xf32>
    %11 = arith.truncf %10 : vector<4x32xf32> to vector<4x32xbf16>
    %c0_7 = arith.constant 0 : index
    %c0_8 = arith.constant 0 : index
    %12 = vector.load %arg4[%c0_7, %c0_8] : memref<4x32xbf16, #tpu.memory_space<vmem>>, vector<4x32xbf16>
    tpu.vector_store %arg4[%c0_7, %c0_8], %11 {strides = array<i32>} : memref<4x32xbf16, #tpu.memory_space<vmem>>, vector<4x32xbf16>,
    return
  }
  func.func @transform_0(%arg0: i32) -> (i32, i32) {
    %c0_i32 = arith.constant 0 : i32
    %c0_i32_0 = arith.constant 0 : i32
    %c0_i32_1 = arith.constant 0 : i32
    return %c0_i32, %c0_i32_0 : i32, i32
  }
  func.func @transform_1(%arg0: i32) -> (i32, i32) {
    %c0_i32 = arith.constant 0 : i32
    %c0_i32_0 = arith.constant 0 : i32
    return %c0_i32, %arg0 : i32, i32
  }
  func.func @transform_2(%arg0: i32) -> (i32, i32) {
    %c0_i32 = arith.constant 0 : i32
    %c0_i32_0 = arith.constant 0 : i32
    %c0_i32_1 = arith.constant 0 : i32
    return %c0_i32, %c0_i32_0 : i32, i32
  }
  func.func @transform_3(%arg0: i32) -> (i32, i32) {
    %c0_i32 = arith.constant 0 : i32
    %c0_i32_0 = arith.constant 0 : i32
    return %c0_i32, %arg0 : i32, i32
  }
}

module attributes {stable_mosaic.version = 11 : i64} {
  func.func @_fused_matmul_kernel(%arg0: i32, %arg1: memref<1x64xbf16, #tpu.memory_space<vmem>>, %arg2: memref<64x2xbf16, #tpu.memory_space<vmem>>, %arg3: memref<1x1xf32, #tpu.memory_space<vmem>>, %arg4: memref<1x2xf32, #tpu.memory_space<vmem>>) attributes {dimension_semantics = [#tpu.dimension_semantics<parallel>], iteration_bounds = array<i64: 1>, scalar_prefetch = 0 : i64, scratch_operands = 0 : i64, tpu.core_type = #tpu.core_type<tc>, window_params = [{pipeline_mode = #tpu.pipeline_mode<synchronous>, transform_indices = @transform_0, window_bounds = array<i64: 1, 64>}, {transform_indices = @transform_1, window_bounds = array<i64: 64, 2>}, {pipeline_mode = #tpu.pipeline_mode<synchronous>, transform_indices = @transform_2, window_bounds = array<i64: 1, 1>}, {transform_indices = @transform_3, window_bounds = array<i64: 1, 2>}]} {
    %c0 = arith.constant 0 : index
    %c0_0 = arith.constant 0 : index
    %0 = vector.load %arg1[%c0, %c0_0] : memref<1x64xbf16, #tpu.memory_space<vmem>>, vector<1x64xbf16>
    %c0_1 = arith.constant 0 : index
    %c0_2 = arith.constant 0 : index
    %1 = vector.load %arg2[%c0_1, %c0_2] : memref<64x2xbf16, #tpu.memory_space<vmem>>, vector<64x2xbf16>
    %cst = arith.constant dense<0.000000e+00> : vector<1x2xf32>
    %2 = tpu.matmul %0, %1, %cst {dimension_numbers = #tpu.dot_dimension_numbers<[1], [0], [0], [1], [0, 0, 1, 1], [], []>} : vector<1x64xbf16>, vector<64x2xbf16>, vector<1x2xf32> -> vector<1x2xf32>
    %c0_3 = arith.constant 0 : index
    %c0_4 = arith.constant 0 : index
    %3 = vector.load %arg3[%c0_3, %c0_4] : memref<1x1xf32, #tpu.memory_space<vmem>>, vector<1x1xf32>
    %4 = vector.broadcast %3 : vector<1x1xf32> to vector<1x2xf32>
    %5 = arith.addf %2, %4 : vector<1x2xf32>
    %cst_5 = arith.constant 0.000000e+00 : f32
    %6 = vector.broadcast %cst_5 : f32 to vector<1x2xf32>
    %7 = arith.subf %6, %5 : vector<1x2xf32>
    %8 = math.exp %7 : vector<1x2xf32>
    %cst_6 = arith.constant 1.000000e+00 : f32
    %9 = vector.broadcast %cst_6 : f32 to vector<1x2xf32>
    %10 = arith.addf %9, %8 : vector<1x2xf32>
    %cst_7 = arith.constant 1.000000e+00 : f32
    %11 = vector.broadcast %cst_7 : f32 to vector<1x2xf32>
    %12 = arith.divf %11, %10 : vector<1x2xf32>
    %c0_8 = arith.constant 0 : index
    %c0_9 = arith.constant 0 : index
    %13 = vector.load %arg4[%c0_8, %c0_9] : memref<1x2xf32, #tpu.memory_space<vmem>>, vector<1x2xf32>
    tpu.vector_store %arg4[%c0_8, %c0_9], %12 {strides = array<i32>} : memref<1x2xf32, #tpu.memory_space<vmem>>, vector<1x2xf32>,
    return
  }
  func.func @transform_0(%arg0: i32) -> (i32, i32) {
    %c0_i32 = arith.constant 0 : i32
    %c0_i32_0 = arith.constant 0 : i32
    %c0_i32_1 = arith.constant 0 : i32
    return %c0_i32, %c0_i32_0 : i32, i32
  }
  func.func @transform_1(%arg0: i32) -> (i32, i32) {
    %c0_i32 = arith.constant 0 : i32
    %c0_i32_0 = arith.constant 0 : i32
    return %c0_i32, %arg0 : i32, i32
  }
  func.func @transform_2(%arg0: i32) -> (i32, i32) {
    %c0_i32 = arith.constant 0 : i32
    %c0_i32_0 = arith.constant 0 : i32
    %c0_i32_1 = arith.constant 0 : i32
    return %c0_i32, %c0_i32_0 : i32, i32
  }
  func.func @transform_3(%arg0: i32) -> (i32, i32) {
    %c0_i32 = arith.constant 0 : i32
    %c0_i32_0 = arith.constant 0 : i32
    return %c0_i32, %arg0 : i32, i32
  }
}

</mosaic_0001>

<bundles_post_ra>
// kernel: _lambda_.8
= control target key start
LH: loop header
LB: loop body
LE: loop exit
PB: predicated region body
PF: predicated region fallthrough
CT: control target
= control target key end

     0   :  { %s4081_s12 = smov 0   ;;  %s4083_s13 = smov 0   ;;  %s4943_s0 = inlined_call_operand.vmem [shape: bf16[4,48], index: 0, kind: input, shape index: {}]   ;;  %s4944_s1 = inlined_call_operand.vmem [shape: bf16[48,131072], index: 1, kind: input, shape index: {}]   ;;  %s4945_s2 = inlined_call_operand.vmem [shape: f32[4,1], index: 2, kind: input, shape index: {}]   ;;  %s4946_s3 = inlined_call_operand.vmem [shape: bf16[4,131072], index: 3, kind: output, shape index: {}]  }
   0x1   :  { %s4085_s14 = smov 0  }
   0x2 LB: > { %s3737_s15 = sadd.s32 4294967295, %s4057_s14   ;;  %s4098_s16 = sadd.s32 1, %s4057_s14   ;;  %s4057_s14 = sphi %s4085_s14, %s4949_s14   ;;  %s4053_s13 = sphi %s4083_s13, %s4948_s13   ;;  %s4049_s12 = sphi %s4081_s12, %s4947_s12  }
   0x3   : > { %s38_s17 = ssub.s32 %s4057_s14, %s4098_s16  ;;  %s41_s18 = sadd.s32 1, %s4053_s13 }
   0x4   : > { %p39_p0 = scmp.eq.s32.totalorder %s38_s17, 0  ;;  %p48_p1 = scmp.ne.s32.totalorder %s4053_s13, %s4049_s12 }
   0x5   : > { %p49_p2 = scmp.eq.s32.totalorder %s4057_s14, 0  ;;  %p3740_p4 = scmp.ge.s32.totalorder %s4057_s14, 16 }
   0x6   : > { %s4107_s19 = scalar_select %p39_p0, %s4053_s13, %s41_s18  }
   0x7   : > { %p50_p3 = por %p49_p2, %p48_p1  ;;  %127 = sbr.rel (%p3740_p4) target bundleno = 115 (0x73), region = 24 }
   0xe   : > { %130 = sbr.rel (!%p50_p3) target bundleno = 115 (0x73), region = 28  ;;  %s132_s20 = sand.u32 (%p50_p3), 1, %s4053_s13  }
   0xf   : > { %s4004_s21 = sshll.u32 (%p50_p3), %s4057_s14, 8  ;;  %s4005_s22 = smul.u32 (%p50_p3), 1536, %s132_s20 }
  0x10   : > { %s4115_s25 = scalar_lea.vmem (%p50_p3), %s4944_s1, %s4004_s21 }
  0x11   : > { %v150_v0 = vld [vmem:[%s4115_s25] sm:$0xff] (%p50_p3)  ;;  %v152_v1 = vld [vmem:[%s4115_s25 + $0x8] sm:$0xff] (%p50_p3)  ;;  %v154_v2 = vld [vmem:[%s4115_s25 + $0x10] sm:$0xff] (%p50_p3)  ;;  %s4123_s26 = scalar_lea.vmem (%p50_p3), [#allocation2], %s4005_s22 }
  0x12   : > { %v156_v3 = vld [vmem:[%s4115_s25 + $0x18] sm:$0xff] (%p50_p3)  ;;  %v158_v4 = vld [vmem:[%s4115_s25 + $0x20] sm:$0xff] (%p50_p3)  ;;  %v160_v5 = vld [vmem:[%s4115_s25 + $0x28] sm:$0xff] (%p50_p3)  ;;  %151 = vst [vmem:[%s4123_s26] sm:$0xff] (%p50_p3), %v150_v0 }
  0x13   : > { %153 = vst [vmem:[%s4123_s26 + $0x8] sm:$0xff] (%p50_p3), %v152_v1  ;;  %155 = vst [vmem:[%s4123_s26 + $0x10] sm:$0xff] (%p50_p3), %v154_v2  ;;  %v162_v6 = vld [vmem:[%s4115_s25 + $0x30] sm:$0xff] (%p50_p3)  ;;  %v164_v7 = vld [vmem:[%s4115_s25 + $0x38] sm:$0xff] (%p50_p3) }
  0x14   : > { %157 = vst [vmem:[%s4123_s26 + $0x18] sm:$0xff] (%p50_p3), %v156_v3  ;;  %159 = vst [vmem:[%s4123_s26 + $0x20] sm:$0xff] (%p50_p3), %v158_v4  ;;  %v166_v8 = vld [vmem:[%s4115_s25 + $0x40] sm:$0xff] (%p50_p3)  ;;  %v168_v9 = vld [vmem:[%s4115_s25 + $0x48] sm:$0xff] (%p50_p3) }
  0x15   : > { %161 = vst [vmem:[%s4123_s26 + $0x28] sm:$0xff] %v160_v5  ;;  %163 = vst [vmem:[%s4123_s26 + $0x30] sm:$0xff] %v162_v6  ;;  %v170_v10 = vld [vmem:[%s4115_s25 + $0x50] sm:$0xff]  ;;  %v172_v11 = vld [vmem:[%s4115_s25 + $0x58] sm:$0xff] }
  0x16   : > { %165 = vst [vmem:[%s4123_s26 + $0x38] sm:$0xff] %v164_v7  ;;  %167 = vst [vmem:[%s4123_s26 + $0x40] sm:$0xff] %v166_v8  ;;  %v174_v12 = vld [vmem:[%s4115_s25 + $0x60] sm:$0xff]  ;;  %v176_v13 = vld [vmem:[%s4115_s25 + $0x68] sm:$0xff] }
  0x17   : > { %169 = vst [vmem:[%s4123_s26 + $0x48] sm:$0xff] %v168_v9  ;;  %171 = vst [vmem:[%s4123_s26 + $0x50] sm:$0xff] %v170_v10  ;;  %v178_v14 = vld [vmem:[%s4115_s25 + $0x70] sm:$0xff]  ;;  %v180_v15 = vld [vmem:[%s4115_s25 + $0x78] sm:$0xff] }
  0x18   : > { %173 = vst [vmem:[%s4123_s26 + $0x58] sm:$0xff] %v172_v11  ;;  %175 = vst [vmem:[%s4123_s26 + $0x60] sm:$0xff] %v174_v12  ;;  %v182_v16 = vld [vmem:[%s4115_s25 + $0x80] sm:$0xff]  ;;  %v184_v17 = vld [vmem:[%s4115_s25 + $0x88] sm:$0xff] }
  0x19   : > { %177 = vst [vmem:[%s4123_s26 + $0x68] sm:$0xff] %v176_v13  ;;  %179 = vst [vmem:[%s4123_s26 + $0x70] sm:$0xff] %v178_v14  ;;  %v186_v18 = vld [vmem:[%s4115_s25 + $0x90] sm:$0xff]  ;;  %v188_v19 = vld [vmem:[%s4115_s25 + $0x98] sm:$0xff] }
  0x1a   : > { %181 = vst [vmem:[%s4123_s26 + $0x78] sm:$0xff] %v180_v15  ;;  %183 = vst [vmem:[%s4123_s26 + $0x80] sm:$0xff] %v182_v16  ;;  %v190_v20 = vld [vmem:[%s4115_s25 + $0xa0] sm:$0xff]  ;;  %v192_v21 = vld [vmem:[%s4115_s25 + $0xa8] sm:$0xff] }
  0x1b   : > { %185 = vst [vmem:[%s4123_s26 + $0x88] sm:$0xff] %v184_v17  ;;  %187 = vst [vmem:[%s4123_s26 + $0x90] sm:$0xff] %v186_v18  ;;  %v194_v22 = vld [vmem:[%s4115_s25 + $0xb0] sm:$0xff]  ;;  %v196_v23 = vld [vmem:[%s4115_s25 + $0xb8] sm:$0xff] }
  0x1c   : > { %189 = vst [vmem:[%s4123_s26 + $0x98] sm:$0xff] %v188_v19  ;;  %191 = vst [vmem:[%s4123_s26 + $0xa0] sm:$0xff] %v190_v20  ;;  %v198_v24 = vld [vmem:[%s4115_s25 + $0xc0] sm:$0xff]  ;;  %v200_v25 = vld [vmem:[%s4115_s25 + $0xc8] sm:$0xff] }
  0x1d   : > { %193 = vst [vmem:[%s4123_s26 + $0xa8] sm:$0xff] %v192_v21  ;;  %195 = vst [vmem:[%s4123_s26 + $0xb0] sm:$0xff] %v194_v22  ;;  %v202_v26 = vld [vmem:[%s4115_s25 + $0xd0] sm:$0xff]  ;;  %v204_v27 = vld [vmem:[%s4115_s25 + $0xd8] sm:$0xff] }
  0x1e   : > { %197 = vst [vmem:[%s4123_s26 + $0xb8] sm:$0xff] %v196_v23  ;;  %199 = vst [vmem:[%s4123_s26 + $0xc0] sm:$0xff] %v198_v24  ;;  %v206_v28 = vld [vmem:[%s4115_s25 + $0xe0] sm:$0xff]  ;;  %v208_v29 = vld [vmem:[%s4115_s25 + $0xe8] sm:$0xff] }
  0x1f   : > { %201 = vst [vmem:[%s4123_s26 + $0xc8] sm:$0xff] %v200_v25  ;;  %203 = vst [vmem:[%s4123_s26 + $0xd0] sm:$0xff] %v202_v26  ;;  %v210_v30 = vld [vmem:[%s4115_s25 + $0xf0] sm:$0xff]  ;;  %v212_v31 = vld [vmem:[%s4115_s25 + $0xf8] sm:$0xff] }
  0x20   : > { %205 = vst [vmem:[%s4123_s26 + $0xd8] sm:$0xff] %v204_v27  ;;  %207 = vst [vmem:[%s4123_s26 + $0xe0] sm:$0xff] %v206_v28  ;;  %v214_v32 = vld [vmem:[%s4115_s25 + $0x1000] sm:$0xff]  ;;  %v216_v33 = vld [vmem:[%s4115_s25 + $0x1008] sm:$0xff] }
  0x21   : > { %209 = vst [vmem:[%s4123_s26 + $0xe8] sm:$0xff] %v208_v29  ;;  %211 = vst [vmem:[%s4123_s26 + $0xf0] sm:$0xff] %v210_v30  ;;  %v218_v34 = vld [vmem:[%s4115_s25 + $0x1010] sm:$0xff]  ;;  %v220_v35 = vld [vmem:[%s4115_s25 + $0x1018] sm:$0xff] }
  0x22   : > { %213 = vst [vmem:[%s4123_s26 + $0xf8] sm:$0xff] %v212_v31  ;;  %215 = vst [vmem:[%s4123_s26 + $0x100] sm:$0xff] %v214_v32  ;;  %v222_v36 = vld [vmem:[%s4115_s25 + $0x1020] sm:$0xff]  ;;  %v224_v37 = vld [vmem:[%s4115_s25 + $0x1028] sm:$0xff] }
  0x23   : > { %217 = vst [vmem:[%s4123_s26 + $0x108] sm:$0xff] %v216_v33  ;;  %219 = vst [vmem:[%s4123_s26 + $0x110] sm:$0xff] %v218_v34  ;;  %v226_v38 = vld [vmem:[%s4115_s25 + $0x1030] sm:$0xff]  ;;  %v228_v39 = vld [vmem:[%s4115_s25 + $0x1038] sm:$0xff] }
  0x24   : > { %221 = vst [vmem:[%s4123_s26 + $0x118] sm:$0xff] %v220_v35  ;;  %223 = vst [vmem:[%s4123_s26 + $0x120] sm:$0xff] %v222_v36  ;;  %v230_v40 = vld [vmem:[%s4115_s25 + $0x1040] sm:$0xff]  ;;  %v232_v41 = vld [vmem:[%s4115_s25 + $0x1048] sm:$0xff] }
  0x25   : > { %225 = vst [vmem:[%s4123_s26 + $0x128] sm:$0xff] %v224_v37  ;;  %227 = vst [vmem:[%s4123_s26 + $0x130] sm:$0xff] %v226_v38  ;;  %v234_v42 = vld [vmem:[%s4115_s25 + $0x1050] sm:$0xff]  ;;  %v236_v43 = vld [vmem:[%s4115_s25 + $0x1058] sm:$0xff] }
  0x26   : > { %229 = vst [vmem:[%s4123_s26 + $0x138] sm:$0xff] %v228_v39  ;;  %231 = vst [vmem:[%s4123_s26 + $0x140] sm:$0xff] %v230_v40  ;;  %v238_v44 = vld [vmem:[%s4115_s25 + $0x1060] sm:$0xff]  ;;  %v240_v45 = vld [vmem:[%s4115_s25 + $0x1068] sm:$0xff] }
  0x27   : > { %233 = vst [vmem:[%s4123_s26 + $0x148] sm:$0xff] %v232_v41  ;;  %235 = vst [vmem:[%s4123_s26 + $0x150] sm:$0xff] %v234_v42  ;;  %v242_v46 = vld [vmem:[%s4115_s25 + $0x1070] sm:$0xff]  ;;  %v244_v47 = vld [vmem:[%s4115_s25 + $0x1078] sm:$0xff] }
  0x28   : > { %237 = vst [vmem:[%s4123_s26 + $0x158] sm:$0xff] %v236_v43  ;;  %239 = vst [vmem:[%s4123_s26 + $0x160] sm:$0xff] %v238_v44  ;;  %v246_v48 = vld [vmem:[%s4115_s25 + $0x1080] sm:$0xff]  ;;  %v248_v49 = vld [vmem:[%s4115_s25 + $0x1088] sm:$0xff] }
  0x29   : > { %241 = vst [vmem:[%s4123_s26 + $0x168] sm:$0xff] %v240_v45  ;;  %243 = vst [vmem:[%s4123_s26 + $0x170] sm:$0xff] %v242_v46  ;;  %v250_v50 = vld [vmem:[%s4115_s25 + $0x1090] sm:$0xff]  ;;  %v252_v51 = vld [vmem:[%s4115_s25 + $0x1098] sm:$0xff] }
  0x2a   : > { %245 = vst [vmem:[%s4123_s26 + $0x178] sm:$0xff] %v244_v47  ;;  %247 = vst [vmem:[%s4123_s26 + $0x180] sm:$0xff] %v246_v48  ;;  %v254_v52 = vld [vmem:[%s4115_s25 + $0x10a0] sm:$0xff]  ;;  %v256_v53 = vld [vmem:[%s4115_s25 + $0x10a8] sm:$0xff] }
  0x2b   : > { %249 = vst [vmem:[%s4123_s26 + $0x188] sm:$0xff] %v248_v49  ;;  %251 = vst [vmem:[%s4123_s26 + $0x190] sm:$0xff] %v250_v50  ;;  %v258_v54 = vld [vmem:[%s4115_s25 + $0x10b0] sm:$0xff]  ;;  %v260_v55 = vld [vmem:[%s4115_s25 + $0x10b8] sm:$0xff] }
  0x2c   : > { %253 = vst [vmem:[%s4123_s26 + $0x198] sm:$0xff] %v252_v51  ;;  %255 = vst [vmem:[%s4123_s26 + $0x1a0] sm:$0xff] %v254_v52  ;;  %v262_v56 = vld [vmem:[%s4115_s25 + $0x10c0] sm:$0xff]  ;;  %v264_v57 = vld [vmem:[%s4115_s25 + $0x10c8] sm:$0xff] }
  0x2d   : > { %257 = vst [vmem:[%s4123_s26 + $0x1a8] sm:$0xff] %v256_v53  ;;  %259 = vst [vmem:[%s4123_s26 + $0x1b0] sm:$0xff] %v258_v54  ;;  %v266_v58 = vld [vmem:[%s4115_s25 + $0x10d0] sm:$0xff]  ;;  %v268_v59 = vld [vmem:[%s4115_s25 + $0x10d8] sm:$0xff] }
  0x2e   : > { %261 = vst [vmem:[%s4123_s26 + $0x1b8] sm:$0xff] %v260_v55  ;;  %263 = vst [vmem:[%s4123_s26 + $0x1c0] sm:$0xff] %v262_v56  ;;  %v270_v60 = vld [vmem:[%s4115_s25 + $0x10e0] sm:$0xff]  ;;  %v272_v61 = vld [vmem:[%s4115_s25 + $0x10e8] sm:$0xff] }
  0x2f   : > { %265 = vst [vmem:[%s4123_s26 + $0x1c8] sm:$0xff] %v264_v57  ;;  %267 = vst [vmem:[%s4123_s26 + $0x1d0] sm:$0xff] %v266_v58  ;;  %v274_v62 = vld [vmem:[%s4115_s25 + $0x10f0] sm:$0xff]  ;;  %v276_v63 = vld [vmem:[%s4115_s25 + $0x10f8] sm:$0xff] }
  0x30   : > { %269 = vst [vmem:[%s4123_s26 + $0x1d8] sm:$0xff] %v268_v59  ;;  %271 = vst [vmem:[%s4123_s26 + $0x1e0] sm:$0xff] %v270_v60  ;;  %v278_v0 = vld [vmem:[%s4115_s25 + $0x2000] sm:$0xff]  ;;  %v280_v1 = vld [vmem:[%s4115_s25 + $0x2008] sm:$0xff] }
  0x31   : > { %273 = vst [vmem:[%s4123_s26 + $0x1e8] sm:$0xff] %v272_v61  ;;  %275 = vst [vmem:[%s4123_s26 + $0x1f0] sm:$0xff] %v274_v62  ;;  %v282_v2 = vld [vmem:[%s4115_s25 + $0x2010] sm:$0xff]  ;;  %v284_v3 = vld [vmem:[%s4115_s25 + $0x2018] sm:$0xff] }
  0x32   : > { %277 = vst [vmem:[%s4123_s26 + $0x1f8] sm:$0xff] %v276_v63  ;;  %279 = vst [vmem:[%s4123_s26 + $0x200] sm:$0xff] %v278_v0  ;;  %v286_v4 = vld [vmem:[%s4115_s25 + $0x2020] sm:$0xff]  ;;  %v288_v5 = vld [vmem:[%s4115_s25 + $0x2028] sm:$0xff] }
  0x33   : > { %281 = vst [vmem:[%s4123_s26 + $0x208] sm:$0xff] %v280_v1  ;;  %283 = vst [vmem:[%s4123_s26 + $0x210] sm:$0xff] %v282_v2  ;;  %v290_v6 = vld [vmem:[%s4115_s25 + $0x2030] sm:$0xff]  ;;  %v292_v7 = vld [vmem:[%s4115_s25 + $0x2038] sm:$0xff] }
  0x34   : > { %285 = vst [vmem:[%s4123_s26 + $0x218] sm:$0xff] %v284_v3  ;;  %287 = vst [vmem:[%s4123_s26 + $0x220] sm:$0xff] %v286_v4  ;;  %v294_v8 = vld [vmem:[%s4115_s25 + $0x2040] sm:$0xff]  ;;  %v296_v9 = vld [vmem:[%s4115_s25 + $0x2048] sm:$0xff] }
  0x35   : > { %289 = vst [vmem:[%s4123_s26 + $0x228] sm:$0xff] %v288_v5  ;;  %291 = vst [vmem:[%s4123_s26 + $0x230] sm:$0xff] %v290_v6  ;;  %v298_v10 = vld [vmem:[%s4115_s25 + $0x2050] sm:$0xff]  ;;  %v300_v11 = vld [vmem:[%s4115_s25 + $0x2058] sm:$0xff] }
  0x36   : > { %293 = vst [vmem:[%s4123_s26 + $0x238] sm:$0xff] %v292_v7  ;;  %295 = vst [vmem:[%s4123_s26 + $0x240] sm:$0xff] %v294_v8  ;;  %v302_v12 = vld [vmem:[%s4115_s25 + $0x2060] sm:$0xff]  ;;  %v304_v13 = vld [vmem:[%s4115_s25 + $0x2068] sm:$0xff] }
  0x37   : > { %297 = vst [vmem:[%s4123_s26 + $0x248] sm:$0xff] %v296_v9  ;;  %299 = vst [vmem:[%s4123_s26 + $0x250] sm:$0xff] %v298_v10  ;;  %v306_v14 = vld [vmem:[%s4115_s25 + $0x2070] sm:$0xff]  ;;  %v308_v15 = vld [vmem:[%s4115_s25 + $0x2078] sm:$0xff] }
  0x38   : > { %301 = vst [vmem:[%s4123_s26 + $0x258] sm:$0xff] %v300_v11  ;;  %303 = vst [vmem:[%s4123_s26 + $0x260] sm:$0xff] %v302_v12  ;;  %v310_v16 = vld [vmem:[%s4115_s25 + $0x2080] sm:$0xff]  ;;  %v312_v17 = vld [vmem:[%s4115_s25 + $0x2088] sm:$0xff] }
  0x39   : > { %305 = vst [vmem:[%s4123_s26 + $0x268] sm:$0xff] %v304_v13  ;;  %307 = vst [vmem:[%s4123_s26 + $0x270] sm:$0xff] %v306_v14  ;;  %v314_v18 = vld [vmem:[%s4115_s25 + $0x2090] sm:$0xff]  ;;  %v316_v19 = vld [vmem:[%s4115_s25 + $0x2098] sm:$0xff] }
  0x3a   : > { %309 = vst [vmem:[%s4123_s26 + $0x278] sm:$0xff] %v308_v15  ;;  %311 = vst [vmem:[%s4123_s26 + $0x280] sm:$0xff] %v310_v16  ;;  %v318_v20 = vld [vmem:[%s4115_s25 + $0x20a0] sm:$0xff]  ;;  %v320_v21 = vld [vmem:[%s4115_s25 + $0x20a8] sm:$0xff] }
  0x3b   : > { %313 = vst [vmem:[%s4123_s26 + $0x288] sm:$0xff] %v312_v17  ;;  %315 = vst [vmem:[%s4123_s26 + $0x290] sm:$0xff] %v314_v18  ;;  %v322_v22 = vld [vmem:[%s4115_s25 + $0x20b0] sm:$0xff]  ;;  %v324_v23 = vld [vmem:[%s4115_s25 + $0x20b8] sm:$0xff] }
  0x3c   : > { %317 = vst [vmem:[%s4123_s26 + $0x298] sm:$0xff] %v316_v19  ;;  %319 = vst [vmem:[%s4123_s26 + $0x2a0] sm:$0xff] %v318_v20  ;;  %v326_v24 = vld [vmem:[%s4115_s25 + $0x20c0] sm:$0xff]  ;;  %v328_v25 = vld [vmem:[%s4115_s25 + $0x20c8] sm:$0xff] }
  0x3d   : > { %321 = vst [vmem:[%s4123_s26 + $0x2a8] sm:$0xff] %v320_v21  ;;  %323 = vst [vmem:[%s4123_s26 + $0x2b0] sm:$0xff] %v322_v22  ;;  %v330_v26 = vld [vmem:[%s4115_s25 + $0x20d0] sm:$0xff]  ;;  %v332_v27 = vld [vmem:[%s4115_s25 + $0x20d8] sm:$0xff] }
  0x3e   : > { %325 = vst [vmem:[%s4123_s26 + $0x2b8] sm:$0xff] %v324_v23  ;;  %327 = vst [vmem:[%s4123_s26 + $0x2c0] sm:$0xff] %v326_v24  ;;  %v334_v28 = vld [vmem:[%s4115_s25 + $0x20e0] sm:$0xff]  ;;  %v336_v29 = vld [vmem:[%s4115_s25 + $0x20e8] sm:$0xff] }
  0x3f   : > { %329 = vst [vmem:[%s4123_s26 + $0x2c8] sm:$0xff] %v328_v25  ;;  %331 = vst [vmem:[%s4123_s26 + $0x2d0] sm:$0xff] %v330_v26  ;;  %v338_v30 = vld [vmem:[%s4115_s25 + $0x20f0] sm:$0xff]  ;;  %v340_v31 = vld [vmem:[%s4115_s25 + $0x20f8] sm:$0xff] }
  0x40   : > { %333 = vst [vmem:[%s4123_s26 + $0x2d8] sm:$0xff] %v332_v27  ;;  %335 = vst [vmem:[%s4123_s26 + $0x2e0] sm:$0xff] %v334_v28  ;;  %v342_v32 = vld [vmem:[%s4115_s25 + $0x3000] sm:$0xff]  ;;  %v344_v33 = vld [vmem:[%s4115_s25 + $0x3008] sm:$0xff] }
  0x41   : > { %337 = vst [vmem:[%s4123_s26 + $0x2e8] sm:$0xff] %v336_v29  ;;  %339 = vst [vmem:[%s4123_s26 + $0x2f0] sm:$0xff] %v338_v30  ;;  %v346_v34 = vld [vmem:[%s4115_s25 + $0x3010] sm:$0xff]  ;;  %v348_v35 = vld [vmem:[%s4115_s25 + $0x3018] sm:$0xff] }
  0x42   : > { %341 = vst [vmem:[%s4123_s26 + $0x2f8] sm:$0xff] %v340_v31  ;;  %343 = vst [vmem:[%s4123_s26 + $0x300] sm:$0xff] %v342_v32  ;;  %v350_v36 = vld [vmem:[%s4115_s25 + $0x3020] sm:$0xff]  ;;  %v352_v37 = vld [vmem:[%s4115_s25 + $0x3028] sm:$0xff] }
  0x43   : > { %345 = vst [vmem:[%s4123_s26 + $0x308] sm:$0xff] %v344_v33  ;;  %347 = vst [vmem:[%s4123_s26 + $0x310] sm:$0xff] %v346_v34  ;;  %v354_v38 = vld [vmem:[%s4115_s25 + $0x3030] sm:$0xff]  ;;  %v356_v39 = vld [vmem:[%s4115_s25 + $0x3038] sm:$0xff] }
  0x44   : > { %349 = vst [vmem:[%s4123_s26 + $0x318] sm:$0xff] %v348_v35  ;;  %351 = vst [vmem:[%s4123_s26 + $0x320] sm:$0xff] %v350_v36  ;;  %v358_v40 = vld [vmem:[%s4115_s25 + $0x3040] sm:$0xff]  ;;  %v360_v41 = vld [vmem:[%s4115_s25 + $0x3048] sm:$0xff] }
  0x45   : > { %353 = vst [vmem:[%s4123_s26 + $0x328] sm:$0xff] %v352_v37  ;;  %355 = vst [vmem:[%s4123_s26 + $0x330] sm:$0xff] %v354_v38  ;;  %v362_v42 = vld [vmem:[%s4115_s25 + $0x3050] sm:$0xff]  ;;  %v364_v43 = vld [vmem:[%s4115_s25 + $0x3058] sm:$0xff] }
  0x46   : > { %357 = vst [vmem:[%s4123_s26 + $0x338] sm:$0xff] %v356_v39  ;;  %359 = vst [vmem:[%s4123_s26 + $0x340] sm:$0xff] %v358_v40  ;;  %v366_v44 = vld [vmem:[%s4115_s25 + $0x3060] sm:$0xff]  ;;  %v368_v45 = vld [vmem:[%s4115_s25 + $0x3068] sm:$0xff] }
  0x47   : > { %361 = vst [vmem:[%s4123_s26 + $0x348] sm:$0xff] %v360_v41  ;;  %363 = vst [vmem:[%s4123_s26 + $0x350] sm:$0xff] %v362_v42  ;;  %v370_v46 = vld [vmem:[%s4115_s25 + $0x3070] sm:$0xff]  ;;  %v372_v47 = vld [vmem:[%s4115_s25 + $0x3078] sm:$0xff] }
  0x48   : > { %365 = vst [vmem:[%s4123_s26 + $0x358] sm:$0xff] %v364_v43  ;;  %367 = vst [vmem:[%s4123_s26 + $0x360] sm:$0xff] %v366_v44  ;;  %v374_v48 = vld [vmem:[%s4115_s25 + $0x3080] sm:$0xff]  ;;  %v376_v49 = vld [vmem:[%s4115_s25 + $0x3088] sm:$0xff] }
  0x49   : > { %369 = vst [vmem:[%s4123_s26 + $0x368] sm:$0xff] %v368_v45  ;;  %371 = vst [vmem:[%s4123_s26 + $0x370] sm:$0xff] %v370_v46  ;;  %v378_v50 = vld [vmem:[%s4115_s25 + $0x3090] sm:$0xff]  ;;  %v380_v51 = vld [vmem:[%s4115_s25 + $0x3098] sm:$0xff] }
  0x4a   : > { %373 = vst [vmem:[%s4123_s26 + $0x378] sm:$0xff] %v372_v47  ;;  %375 = vst [vmem:[%s4123_s26 + $0x380] sm:$0xff] %v374_v48  ;;  %v382_v52 = vld [vmem:[%s4115_s25 + $0x30a0] sm:$0xff]  ;;  %v384_v53 = vld [vmem:[%s4115_s25 + $0x30a8] sm:$0xff] }
  0x4b   : > { %377 = vst [vmem:[%s4123_s26 + $0x388] sm:$0xff] %v376_v49  ;;  %379 = vst [vmem:[%s4123_s26 + $0x390] sm:$0xff] %v378_v50  ;;  %v386_v54 = vld [vmem:[%s4115_s25 + $0x30b0] sm:$0xff]  ;;  %v388_v55 = vld [vmem:[%s4115_s25 + $0x30b8] sm:$0xff] }
  0x4c   : > { %381 = vst [vmem:[%s4123_s26 + $0x398] sm:$0xff] %v380_v51  ;;  %383 = vst [vmem:[%s4123_s26 + $0x3a0] sm:$0xff] %v382_v52  ;;  %v390_v56 = vld [vmem:[%s4115_s25 + $0x30c0] sm:$0xff]  ;;  %v392_v57 = vld [vmem:[%s4115_s25 + $0x30c8] sm:$0xff] }
  0x4d   : > { %385 = vst [vmem:[%s4123_s26 + $0x3a8] sm:$0xff] %v384_v53  ;;  %387 = vst [vmem:[%s4123_s26 + $0x3b0] sm:$0xff] %v386_v54  ;;  %v394_v58 = vld [vmem:[%s4115_s25 + $0x30d0] sm:$0xff]  ;;  %v396_v59 = vld [vmem:[%s4115_s25 + $0x30d8] sm:$0xff] }
  0x4e   : > { %389 = vst [vmem:[%s4123_s26 + $0x3b8] sm:$0xff] %v388_v55  ;;  %391 = vst [vmem:[%s4123_s26 + $0x3c0] sm:$0xff] %v390_v56  ;;  %v398_v60 = vld [vmem:[%s4115_s25 + $0x30e0] sm:$0xff]  ;;  %v400_v61 = vld [vmem:[%s4115_s25 + $0x30e8] sm:$0xff] }
  0x4f   : > { %393 = vst [vmem:[%s4123_s26 + $0x3c8] sm:$0xff] %v392_v57  ;;  %395 = vst [vmem:[%s4123_s26 + $0x3d0] sm:$0xff] %v394_v58  ;;  %v402_v62 = vld [vmem:[%s4115_s25 + $0x30f0] sm:$0xff]  ;;  %v404_v63 = vld [vmem:[%s4115_s25 + $0x30f8] sm:$0xff] }
  0x50   : > { %397 = vst [vmem:[%s4123_s26 + $0x3d8] sm:$0xff] %v396_v59  ;;  %399 = vst [vmem:[%s4123_s26 + $0x3e0] sm:$0xff] %v398_v60  ;;  %v406_v0 = vld [vmem:[%s4115_s25 + $0x4000] sm:$0xff]  ;;  %v408_v1 = vld [vmem:[%s4115_s25 + $0x4008] sm:$0xff] }
  0x51   : > { %401 = vst [vmem:[%s4123_s26 + $0x3e8] sm:$0xff] %v400_v61  ;;  %403 = vst [vmem:[%s4123_s26 + $0x3f0] sm:$0xff] %v402_v62  ;;  %v410_v2 = vld [vmem:[%s4115_s25 + $0x4010] sm:$0xff]  ;;  %v412_v3 = vld [vmem:[%s4115_s25 + $0x4018] sm:$0xff] }
  0x52   : > { %405 = vst [vmem:[%s4123_s26 + $0x3f8] sm:$0xff] %v404_v63  ;;  %407 = vst [vmem:[%s4123_s26 + $0x400] sm:$0xff] %v406_v0  ;;  %v414_v4 = vld [vmem:[%s4115_s25 + $0x4020] sm:$0xff]  ;;  %v416_v5 = vld [vmem:[%s4115_s25 + $0x4028] sm:$0xff] }
  0x53   : > { %409 = vst [vmem:[%s4123_s26 + $0x408] sm:$0xff] %v408_v1  ;;  %411 = vst [vmem:[%s4123_s26 + $0x410] sm:$0xff] %v410_v2  ;;  %v418_v6 = vld [vmem:[%s4115_s25 + $0x4030] sm:$0xff]  ;;  %v420_v7 = vld [vmem:[%s4115_s25 + $0x4038] sm:$0xff] }
  0x54   : > { %413 = vst [vmem:[%s4123_s26 + $0x418] sm:$0xff] %v412_v3  ;;  %415 = vst [vmem:[%s4123_s26 + $0x420] sm:$0xff] %v414_v4  ;;  %v422_v8 = vld [vmem:[%s4115_s25 + $0x4040] sm:$0xff]  ;;  %v424_v9 = vld [vmem:[%s4115_s25 + $0x4048] sm:$0xff] }
  0x55   : > { %417 = vst [vmem:[%s4123_s26 + $0x428] sm:$0xff] %v416_v5  ;;  %419 = vst [vmem:[%s4123_s26 + $0x430] sm:$0xff] %v418_v6  ;;  %v426_v10 = vld [vmem:[%s4115_s25 + $0x4050] sm:$0xff]  ;;  %v428_v11 = vld [vmem:[%s4115_s25 + $0x4058] sm:$0xff] }
  0x56   : > { %421 = vst [vmem:[%s4123_s26 + $0x438] sm:$0xff] %v420_v7  ;;  %423 = vst [vmem:[%s4123_s26 + $0x440] sm:$0xff] %v422_v8  ;;  %v430_v12 = vld [vmem:[%s4115_s25 + $0x4060] sm:$0xff]  ;;  %v432_v13 = vld [vmem:[%s4115_s25 + $0x4068] sm:$0xff] }
  0x57   : > { %425 = vst [vmem:[%s4123_s26 + $0x448] sm:$0xff] %v424_v9  ;;  %427 = vst [vmem:[%s4123_s26 + $0x450] sm:$0xff] %v426_v10  ;;  %v434_v14 = vld [vmem:[%s4115_s25 + $0x4070] sm:$0xff]  ;;  %v436_v15 = vld [vmem:[%s4115_s25 + $0x4078] sm:$0xff] }
  0x58   : > { %429 = vst [vmem:[%s4123_s26 + $0x458] sm:$0xff] %v428_v11  ;;  %431 = vst [vmem:[%s4123_s26 + $0x460] sm:$0xff] %v430_v12  ;;  %v438_v16 = vld [vmem:[%s4115_s25 + $0x4080] sm:$0xff]  ;;  %v440_v17 = vld [vmem:[%s4115_s25 + $0x4088] sm:$0xff] }
  0x59   : > { %433 = vst [vmem:[%s4123_s26 + $0x468] sm:$0xff] %v432_v13  ;;  %435 = vst [vmem:[%s4123_s26 + $0x470] sm:$0xff] %v434_v14  ;;  %v442_v18 = vld [vmem:[%s4115_s25 + $0x4090] sm:$0xff]  ;;  %v444_v19 = vld [vmem:[%s4115_s25 + $0x4098] sm:$0xff] }
  0x5a   : > { %437 = vst [vmem:[%s4123_s26 + $0x478] sm:$0xff] %v436_v15  ;;  %439 = vst [vmem:[%s4123_s26 + $0x480] sm:$0xff] %v438_v16  ;;  %v446_v20 = vld [vmem:[%s4115_s25 + $0x40a0] sm:$0xff]  ;;  %v448_v21 = vld [vmem:[%s4115_s25 + $0x40a8] sm:$0xff] }
  0x5b   : > { %441 = vst [vmem:[%s4123_s26 + $0x488] sm:$0xff] %v440_v17  ;;  %443 = vst [vmem:[%s4123_s26 + $0x490] sm:$0xff] %v442_v18  ;;  %v450_v22 = vld [vmem:[%s4115_s25 + $0x40b0] sm:$0xff]  ;;  %v452_v23 = vld [vmem:[%s4115_s25 + $0x40b8] sm:$0xff] }
  0x5c   : > { %445 = vst [vmem:[%s4123_s26 + $0x498] sm:$0xff] %v444_v19  ;;  %447 = vst [vmem:[%s4123_s26 + $0x4a0] sm:$0xff] %v446_v20  ;;  %v454_v24 = vld [vmem:[%s4115_s25 + $0x40c0] sm:$0xff]  ;;  %v456_v25 = vld [vmem:[%s4115_s25 + $0x40c8] sm:$0xff] }
  0x5d   : > { %449 = vst [vmem:[%s4123_s26 + $0x4a8] sm:$0xff] %v448_v21  ;;  %451 = vst [vmem:[%s4123_s26 + $0x4b0] sm:$0xff] %v450_v22  ;;  %v458_v26 = vld [vmem:[%s4115_s25 + $0x40d0] sm:$0xff]  ;;  %v460_v27 = vld [vmem:[%s4115_s25 + $0x40d8] sm:$0xff] }
  0x5e   : > { %453 = vst [vmem:[%s4123_s26 + $0x4b8] sm:$0xff] %v452_v23  ;;  %455 = vst [vmem:[%s4123_s26 + $0x4c0] sm:$0xff] %v454_v24  ;;  %v462_v28 = vld [vmem:[%s4115_s25 + $0x40e0] sm:$0xff]  ;;  %v464_v29 = vld [vmem:[%s4115_s25 + $0x40e8] sm:$0xff] }
  0x5f   : > { %457 = vst [vmem:[%s4123_s26 + $0x4c8] sm:$0xff] %v456_v25  ;;  %459 = vst [vmem:[%s4123_s26 + $0x4d0] sm:$0xff] %v458_v26  ;;  %v466_v30 = vld [vmem:[%s4115_s25 + $0x40f0] sm:$0xff]  ;;  %v468_v31 = vld [vmem:[%s4115_s25 + $0x40f8] sm:$0xff] }
  0x60   : > { %461 = vst [vmem:[%s4123_s26 + $0x4d8] sm:$0xff] %v460_v27  ;;  %463 = vst [vmem:[%s4123_s26 + $0x4e0] sm:$0xff] %v462_v28  ;;  %v470_v32 = vld [vmem:[%s4115_s25 + $0x5000] sm:$0xff]  ;;  %v472_v33 = vld [vmem:[%s4115_s25 + $0x5008] sm:$0xff] }
  0x61   : > { %465 = vst [vmem:[%s4123_s26 + $0x4e8] sm:$0xff] %v464_v29  ;;  %467 = vst [vmem:[%s4123_s26 + $0x4f0] sm:$0xff] %v466_v30  ;;  %v474_v34 = vld [vmem:[%s4115_s25 + $0x5010] sm:$0xff]  ;;  %v476_v35 = vld [vmem:[%s4115_s25 + $0x5018] sm:$0xff] }
  0x62   : > { %469 = vst [vmem:[%s4123_s26 + $0x4f8] sm:$0xff] %v468_v31  ;;  %471 = vst [vmem:[%s4123_s26 + $0x500] sm:$0xff] %v470_v32  ;;  %v478_v36 = vld [vmem:[%s4115_s25 + $0x5020] sm:$0xff]  ;;  %v480_v37 = vld [vmem:[%s4115_s25 + $0x5028] sm:$0xff] }
  0x63   : > { %473 = vst [vmem:[%s4123_s26 + $0x508] sm:$0xff] %v472_v33  ;;  %475 = vst [vmem:[%s4123_s26 + $0x510] sm:$0xff] %v474_v34  ;;  %v482_v38 = vld [vmem:[%s4115_s25 + $0x5030] sm:$0xff]  ;;  %v484_v39 = vld [vmem:[%s4115_s25 + $0x5038] sm:$0xff] }
  0x64   : > { %477 = vst [vmem:[%s4123_s26 + $0x518] sm:$0xff] %v476_v35  ;;  %479 = vst [vmem:[%s4123_s26 + $0x520] sm:$0xff] %v478_v36  ;;  %v486_v40 = vld [vmem:[%s4115_s25 + $0x5040] sm:$0xff]  ;;  %v488_v41 = vld [vmem:[%s4115_s25 + $0x5048] sm:$0xff] }
  0x65   : > { %481 = vst [vmem:[%s4123_s26 + $0x528] sm:$0xff] %v480_v37  ;;  %483 = vst [vmem:[%s4123_s26 + $0x530] sm:$0xff] %v482_v38  ;;  %v490_v42 = vld [vmem:[%s4115_s25 + $0x5050] sm:$0xff]  ;;  %v492_v43 = vld [vmem:[%s4115_s25 + $0x5058] sm:$0xff] }
  0x66   : > { %485 = vst [vmem:[%s4123_s26 + $0x538] sm:$0xff] %v484_v39  ;;  %487 = vst [vmem:[%s4123_s26 + $0x540] sm:$0xff] %v486_v40  ;;  %v494_v44 = vld [vmem:[%s4115_s25 + $0x5060] sm:$0xff]  ;;  %v496_v45 = vld [vmem:[%s4115_s25 + $0x5068] sm:$0xff] }
  0x67   : > { %489 = vst [vmem:[%s4123_s26 + $0x548] sm:$0xff] %v488_v41  ;;  %491 = vst [vmem:[%s4123_s26 + $0x550] sm:$0xff] %v490_v42  ;;  %v498_v46 = vld [vmem:[%s4115_s25 + $0x5070] sm:$0xff]  ;;  %v500_v47 = vld [vmem:[%s4115_s25 + $0x5078] sm:$0xff] }
  0x68   : > { %493 = vst [vmem:[%s4123_s26 + $0x558] sm:$0xff] %v492_v43  ;;  %495 = vst [vmem:[%s4123_s26 + $0x560] sm:$0xff] %v494_v44  ;;  %v502_v48 = vld [vmem:[%s4115_s25 + $0x5080] sm:$0xff]  ;;  %v504_v49 = vld [vmem:[%s4115_s25 + $0x5088] sm:$0xff] }
  0x69   : > { %497 = vst [vmem:[%s4123_s26 + $0x568] sm:$0xff] %v496_v45  ;;  %499 = vst [vmem:[%s4123_s26 + $0x570] sm:$0xff] %v498_v46  ;;  %v506_v50 = vld [vmem:[%s4115_s25 + $0x5090] sm:$0xff]  ;;  %v508_v51 = vld [vmem:[%s4115_s25 + $0x5098] sm:$0xff] }
  0x6a   : > { %501 = vst [vmem:[%s4123_s26 + $0x578] sm:$0xff] %v500_v47  ;;  %503 = vst [vmem:[%s4123_s26 + $0x580] sm:$0xff] %v502_v48  ;;  %v510_v52 = vld [vmem:[%s4115_s25 + $0x50a0] sm:$0xff]  ;;  %v512_v53 = vld [vmem:[%s4115_s25 + $0x50a8] sm:$0xff] }
  0x6b   : > { %505 = vst [vmem:[%s4123_s26 + $0x588] sm:$0xff] %v504_v49  ;;  %507 = vst [vmem:[%s4123_s26 + $0x590] sm:$0xff] %v506_v50  ;;  %v514_v54 = vld [vmem:[%s4115_s25 + $0x50b0] sm:$0xff]  ;;  %v516_v55 = vld [vmem:[%s4115_s25 + $0x50b8] sm:$0xff] }
  0x6c   : > { %509 = vst [vmem:[%s4123_s26 + $0x598] sm:$0xff] %v508_v51  ;;  %511 = vst [vmem:[%s4123_s26 + $0x5a0] sm:$0xff] %v510_v52  ;;  %v518_v56 = vld [vmem:[%s4115_s25 + $0x50c0] sm:$0xff]  ;;  %v520_v57 = vld [vmem:[%s4115_s25 + $0x50c8] sm:$0xff] }
  0x6d   : > { %513 = vst [vmem:[%s4123_s26 + $0x5a8] sm:$0xff] %v512_v53  ;;  %515 = vst [vmem:[%s4123_s26 + $0x5b0] sm:$0xff] %v514_v54  ;;  %v522_v58 = vld [vmem:[%s4115_s25 + $0x50d0] sm:$0xff]  ;;  %v524_v59 = vld [vmem:[%s4115_s25 + $0x50d8] sm:$0xff] }
  0x6e   : > { %517 = vst [vmem:[%s4123_s26 + $0x5b8] sm:$0xff] %v516_v55  ;;  %519 = vst [vmem:[%s4123_s26 + $0x5c0] sm:$0xff] %v518_v56  ;;  %v526_v60 = vld [vmem:[%s4115_s25 + $0x50e0] sm:$0xff]  ;;  %v528_v61 = vld [vmem:[%s4115_s25 + $0x50e8] sm:$0xff] }
  0x6f   : > { %521 = vst [vmem:[%s4123_s26 + $0x5c8] sm:$0xff] %v520_v57  ;;  %523 = vst [vmem:[%s4123_s26 + $0x5d0] sm:$0xff] %v522_v58  ;;  %v530_v62 = vld [vmem:[%s4115_s25 + $0x50f0] sm:$0xff]  ;;  %v532_v63 = vld [vmem:[%s4115_s25 + $0x50f8] sm:$0xff] }
  0x70   : > { %525 = vst [vmem:[%s4123_s26 + $0x5d8] sm:$0xff] %v524_v59  ;;  %527 = vst [vmem:[%s4123_s26 + $0x5e0] sm:$0xff] %v526_v60 }
  0x71   : > { %529 = vst [vmem:[%s4123_s26 + $0x5e8] sm:$0xff] %v528_v61  ;;  %531 = vst [vmem:[%s4123_s26 + $0x5f0] sm:$0xff] %v530_v62 }
  0x72   : > { %533 = vst [vmem:[%s4123_s26 + $0x5f8] sm:$0xff] %v532_v63 }
  0x73 PF: > { %p3743_p5 = scmp.ge.s32.totalorder %s4057_s14, 1  ;;  %p538_p6 = scmp.lt.s32.totalorder %s4057_s14, 17 }
  0x75   : > { %p539_p7 = pnand %p3743_p5, %p538_p6 }
  0x76   : > { %s545_s27 = sand.u32 (!%p539_p7), 1, %s4049_s12   ;;  %v4059_v0 = vmov (!%p539_p7), 0   ;;  %v769_v1 = vld [vmem:[%s4945_s2] sm:$0xf] (!%p539_p7)  ;;  %vm1735_vm0 = vcmask (!%p539_p7), 392192   ;;  %s3744_s9 = sshll.u32 (!%p539_p7), %s3737_s15, 6 }
  0x77   : > { %542 = sbr.rel (%p539_p7) target bundleno = 545 (0x221), region = 51  ;;  %1771 = vmatprep.mubr.bf16.mxu0 (!%p539_p7), %v4059_v0  ;;  %1812 = vmatprep.mubr.bf16.mxu1 (!%p539_p7), %v4059_v0  ;;  %v4537_v36 = vld [vmem:[%s4943_s0] sm:$0x3] (!%p539_p7)  ;;  %p570_p8 = scmp.lt.s32.totalorder (!%p539_p7), %s3744_s9, 1023 }
  0x78   : > { %s4006_s28 = smul.u32 (!%p539_p7), 1536, %s545_s27  ;;  %4033 = vset.pattern.permute.xlu0 (!%p539_p7), %v4059_v0 }
  0x79   : > { %772 = vperm.xlu0 (!%p539_p7), %4033, %v769_v1  }
  0x7a   : > { %s4512_s4 = scalar_lea.vmem (!%p539_p7), [#allocation2], %s4006_s28 }
  0x7b   : > { %v577_v2 = vld [vmem:[%s4512_s4] sm:$0xff] (!%p539_p7)  ;;  %v578_v4 = vld [vmem:[%s4512_s4 + $0x8] sm:$0xff] (!%p539_p7)  ;;  %v579_v24 = vld [vmem:[%s4512_s4 + $0x10] sm:$0xff] (!%p539_p7) }
  0x7c   : > { %v609_v3 = vld [vmem:[%s4512_s4 + $0x100] sm:$0xff] (!%p539_p7)  ;;  %v610_v6 = vld [vmem:[%s4512_s4 + $0x108] sm:$0xff] (!%p539_p7)  ;;  %v611_v25 = vld [vmem:[%s4512_s4 + $0x110] sm:$0xff] (!%p539_p7) }
  0x7d   : > { %v3747_v5 = vcombine.high (!%p539_p7), %v577_v2, %v609_v3  ;;  %v3746_v7 = vcombine.low (!%p539_p7), %v577_v2, %v609_v3  ;;  %v641_v8 = vld [vmem:[%s4512_s4 + $0x200] sm:$0xff] (!%p539_p7)  ;;  %v3749_v10 = vcombine.high (!%p539_p7), %v578_v4, %v610_v6  ;;  %v3748_v11 = vcombine.low (!%p539_p7), %v578_v4, %v610_v6  ;;  %v642_v13 = vld [vmem:[%s4512_s4 + $0x208] sm:$0xff] (!%p539_p7)  ;;  %v580_v26 = vld [vmem:[%s4512_s4 + $0x18] sm:$0xff] (!%p539_p7) }
  0x7e   : > { %v673_v9 = vld [vmem:[%s4512_s4 + $0x300] sm:$0xff]  ;;  %v674_v14 = vld [vmem:[%s4512_s4 + $0x308] sm:$0xff]  ;;  %v612_v27 = vld [vmem:[%s4512_s4 + $0x118] sm:$0xff]  ;;  %v3751_v30 = vcombine.high %v579_v24, %v611_v25  ;;  %v3750_v37 = vcombine.low %v579_v24, %v611_v25  ;;  %s4951_s9 = smov (!%p570_p8, %s3744_s9), 1023 }
  0x7f   : > { %v3811_v12 = vcombine.high %v641_v8, %v673_v9  ;;  %v705_v15 = vld [vmem:[%s4512_s4 + $0x400] sm:$0xff]  ;;  %1739 = vmatprep.subr.bf16.mxu0 %v3747_v5  ;;  %v3813_v16 = vcombine.high %v642_v13, %v674_v14  ;;  %v706_v18 = vld [vmem:[%s4512_s4 + $0x408] sm:$0xff]  ;;  %1780 = vmatprep.subr.bf16.mxu1 %v3749_v10  ;;  %v3810_v20 = vcombine.low %v641_v8, %v673_v9  ;;  %v643_v32 = vld [vmem:[%s4512_s4 + $0x210] sm:$0xff]  ;;  %s3745_s10 = sshll.u32 %s4951_s9, 1 }
  0x80   : > { %v737_v17 = vld [vmem:[%s4512_s4 + $0x500] sm:$0xff]  ;;  %v738_v19 = vld [vmem:[%s4512_s4 + $0x508] sm:$0xff]  ;;  %1740 = vmatpush1.bf16.msra.mxu0 %v3746_v7  ;;  %1781 = vmatpush1.bf16.msra.mxu1 %v3748_v11  ;;  %v3812_v21 = vcombine.low %v642_v13, %v674_v14  ;;  %v3753_v31 = vcombine.high %v580_v26, %v612_v27  ;;  %v675_v33 = vld [vmem:[%s4512_s4 + $0x310] sm:$0xff]  ;;  %v3752_v38 = vcombine.low %v580_v26, %v612_v27  ;;  %s4825_s14 = scalar_lea.vmem %s4946_s3, %s3745_s10 }
  0x81   : > { %1741 = vmatprep.subr.bf16.mxu0 %v3811_v12  ;;  %v3875_v22 = vcombine.high %v705_v15, %v737_v17  ;;  %1782 = vmatprep.subr.bf16.mxu1 %v3813_v16  ;;  %v3877_v23 = vcombine.high %v706_v18, %v738_v19  ;;  %v3874_v28 = vcombine.low %v705_v15, %v737_v17  ;;  %v644_v34 = vld [vmem:[%s4512_s4 + $0x218] sm:$0xff]  ;;  %v707_v41 = vld [vmem:[%s4512_s4 + $0x410] sm:$0xff]  ;;  %v581_v49 = vld [vmem:[%s4512_s4 + $0x20] sm:$0xff] }
  0x82   : > { %v3876_v29 = vcombine.low %v706_v18, %v738_v19  ;;  %v676_v35 = vld [vmem:[%s4512_s4 + $0x318] sm:$0xff]  ;;  %v3815_v39 = vcombine.high %v643_v32, %v675_v33  ;;  %v739_v42 = vld [vmem:[%s4512_s4 + $0x510] sm:$0xff]  ;;  %v3814_v45 = vcombine.low %v643_v32, %v675_v33  ;;  %v613_v50 = vld [vmem:[%s4512_s4 + $0x120] sm:$0xff] }
  0x83   : > { %v3817_v40 = vcombine.high %v644_v34, %v676_v35  ;;  %v708_v43 = vld [vmem:[%s4512_s4 + $0x418] sm:$0xff]  ;;  %v3816_v46 = vcombine.low %v644_v34, %v676_v35  ;;  %v3879_v47 = vcombine.high %v707_v41, %v739_v42  ;;  %v582_v51 = vld [vmem:[%s4512_s4 + $0x28] sm:$0xff]  ;;  %v3878_v53 = vcombine.low %v707_v41, %v739_v42  ;;  %v645_v57 = vld [vmem:[%s4512_s4 + $0x220] sm:$0xff] }
  0x84   : > { %1742 = vmatpush1.bf16.msra.mxu0 %v3810_v20  ;;  %1783 = vmatpush1.bf16.msra.mxu1 %v3812_v21  ;;  %v740_v44 = vld [vmem:[%s4512_s4 + $0x518] sm:$0xff]  ;;  %v614_v52 = vld [vmem:[%s4512_s4 + $0x128] sm:$0xff]  ;;  %v3755_v55 = vcombine.high %v581_v49, %v613_v50  ;;  %v677_v58 = vld [vmem:[%s4512_s4 + $0x320] sm:$0xff]  ;;  %v3754_v61 = vcombine.low %v581_v49, %v613_v50 }
  0x85   : > { %1743 = vmatprep.subr.bf16.mxu0 %v3875_v22  ;;  %1784 = vmatprep.subr.bf16.mxu1 %v3877_v23  ;;  %v3881_v48 = vcombine.high %v708_v43, %v740_v44  ;;  %v3880_v54 = vcombine.low %v708_v43, %v740_v44  ;;  %v3757_v56 = vcombine.high %v582_v51, %v614_v52  ;;  %v646_v59 = vld [vmem:[%s4512_s4 + $0x228] sm:$0xff]  ;;  %v709_v2 = vld [vmem:[%s4512_s4 + $0x420] sm:$0xff]  ;;  %v583_v10 = vld [vmem:[%s4512_s4 + $0x30] sm:$0xff] }
  0x86   : > { %v678_v60 = vld [vmem:[%s4512_s4 + $0x328] sm:$0xff]  ;;  %v3756_v62 = vcombine.low %v582_v51, %v614_v52  ;;  %v3819_v63 = vcombine.high %v645_v57, %v677_v58  ;;  %v741_v3 = vld [vmem:[%s4512_s4 + $0x520] sm:$0xff]  ;;  %v3818_v6 = vcombine.low %v645_v57, %v677_v58  ;;  %v615_v11 = vld [vmem:[%s4512_s4 + $0x130] sm:$0xff] }
  0x87   : > { %v3821_v1 = vcombine.high %v646_v59, %v678_v60  ;;  %v710_v4 = vld [vmem:[%s4512_s4 + $0x428] sm:$0xff]  ;;  %v3820_v7 = vcombine.low %v646_v59, %v678_v60  ;;  %v3883_v8 = vcombine.high %v709_v2, %v741_v3  ;;  %v584_v12 = vld [vmem:[%s4512_s4 + $0x38] sm:$0xff]  ;;  %v3882_v14 = vcombine.low %v709_v2, %v741_v3  ;;  %v647_v18 = vld [vmem:[%s4512_s4 + $0x230] sm:$0xff] }
  0x88   : > { %1744 = vmatpush1.bf16.msra.mxu0 %v3874_v28  ;;  %1785 = vmatpush1.bf16.msra.mxu1 %v3876_v29  ;;  %v742_v5 = vld [vmem:[%s4512_s4 + $0x528] sm:$0xff]  ;;  %v616_v13 = vld [vmem:[%s4512_s4 + $0x138] sm:$0xff]  ;;  %v3759_v16 = vcombine.high %v583_v10, %v615_v11  ;;  %v679_v19 = vld [vmem:[%s4512_s4 + $0x330] sm:$0xff]  ;;  %v3758_v22 = vcombine.low %v583_v10, %v615_v11 }
  0x89   : > { %1821 = vmatprep.subr.bf16.mxu0 %v3751_v30  ;;  %1862 = vmatprep.subr.bf16.mxu1 %v3753_v31  ;;  %v3885_v9 = vcombine.high %v710_v4, %v742_v5  ;;  %v3884_v15 = vcombine.low %v710_v4, %v742_v5  ;;  %v3761_v17 = vcombine.high %v584_v12, %v616_v13  ;;  %v648_v20 = vld [vmem:[%s4512_s4 + $0x238] sm:$0xff]  ;;  %v711_v26 = vld [vmem:[%s4512_s4 + $0x430] sm:$0xff]  ;;  %v585_v34 = vld [vmem:[%s4512_s4 + $0x40] sm:$0xff] }
  0x8a   : > { %v680_v21 = vld [vmem:[%s4512_s4 + $0x338] sm:$0xff]  ;;  %v3760_v23 = vcombine.low %v584_v12, %v616_v13  ;;  %v3823_v24 = vcombine.high %v647_v18, %v679_v19  ;;  %v743_v27 = vld [vmem:[%s4512_s4 + $0x530] sm:$0xff]  ;;  %v3822_v30 = vcombine.low %v647_v18, %v679_v19  ;;  %v617_v35 = vld [vmem:[%s4512_s4 + $0x140] sm:$0xff] }
  0x8b   : > { %3938 = vmatmul.mubr.msk.bf16.vlgmr.msra.gmra.mrb[0].mxu0 %vm1735_vm0, %v4537_v36  ;;  %3939 = vmatmul.mubr.msk.bf16.vlgmr.msra.gmra.mrb[0].mxu1 %vm1735_vm0, %v4537_v36  ;;  %v3825_v25 = vcombine.high %v648_v20, %v680_v21  ;;  %v712_v28 = vld [vmem:[%s4512_s4 + $0x438] sm:$0xff]  ;;  %v3824_v31 = vcombine.low %v648_v20, %v680_v21  ;;  %v3887_v32 = vcombine.high %v711_v26, %v743_v27  ;;  %v649_v43 = vld [vmem:[%s4512_s4 + $0x240] sm:$0xff]  ;;  %v587_v59 = vld [vmem:[%s4512_s4 + $0x50] sm:$0xff] }
  0x8c   : > { %1822 = vmatpush1.bf16.msra.mxu0 %v3750_v37  ;;  %1863 = vmatpush1.bf16.msra.mxu1 %v3752_v38  ;;  %v744_v29 = vld [vmem:[%s4512_s4 + $0x538] sm:$0xff]  ;;  %v586_v37 = vld [vmem:[%s4512_s4 + $0x48] sm:$0xff]  ;;  %v3763_v41 = vcombine.high %v585_v34, %v617_v35  ;;  %v681_v44 = vld [vmem:[%s4512_s4 + $0x340] sm:$0xff] }
  0x8d   : > { %1823 = vmatprep.subr.bf16.mxu0 %v3815_v39  ;;  %1864 = vmatprep.subr.bf16.mxu1 %v3817_v40  ;;  %v3889_v33 = vcombine.high %v712_v28, %v744_v29  ;;  %v618_v38 = vld [vmem:[%s4512_s4 + $0x148] sm:$0xff]  ;;  %v3886_v39 = vcombine.low %v711_v26, %v743_v27  ;;  %v3888_v40 = vcombine.low %v712_v28, %v744_v29  ;;  %v713_v51 = vld [vmem:[%s4512_s4 + $0x440] sm:$0xff]  ;;  %v619_v60 = vld [vmem:[%s4512_s4 + $0x150] sm:$0xff] }
  0x8e   : > { %1853 = vmatprep.mubr.bf16.mxu0 %v4059_v0  ;;  %1894 = vmatprep.mubr.bf16.mxu1 %v4059_v0  ;;  %v3765_v42 = vcombine.high %v586_v37, %v618_v38  ;;  %v3827_v49 = vcombine.high %v649_v43, %v681_v44  ;;  %v745_v52 = vld [vmem:[%s4512_s4 + $0x540] sm:$0xff]  ;;  %v3767_v2 = vcombine.high %v587_v59, %v619_v60  ;;  %v651_v4 = vld [vmem:[%s4512_s4 + $0x250] sm:$0xff] }
  0x8f   : > { %v3891_v57 = vcombine.high %v713_v51, %v745_v52  ;;  %v683_v5 = vld [vmem:[%s4512_s4 + $0x350] sm:$0xff]  ;;  %v589_v20 = vld [vmem:[%s4512_s4 + $0x60] sm:$0xff] }
  0x90   : > { %1824 = vmatpush1.bf16.msra.mxu0 %v3814_v45  ;;  %1865 = vmatpush1.bf16.msra.mxu1 %v3816_v46  ;;  %v650_v45 = vld [vmem:[%s4512_s4 + $0x248] sm:$0xff]  ;;  %v3831_v10 = vcombine.high %v651_v4, %v683_v5  ;;  %v715_v12 = vld [vmem:[%s4512_s4 + $0x450] sm:$0xff]  ;;  %v621_v21 = vld [vmem:[%s4512_s4 + $0x160] sm:$0xff] }
  0x91   : > { %1825 = vmatprep.subr.bf16.mxu0 %v3879_v47  ;;  %1866 = vmatprep.subr.bf16.mxu1 %v3881_v48  ;;  %v682_v46 = vld [vmem:[%s4512_s4 + $0x348] sm:$0xff]  ;;  %v3762_v47 = vcombine.low %v585_v34, %v617_v35  ;;  %v3764_v48 = vcombine.low %v586_v37, %v618_v38  ;;  %v747_v13 = vld [vmem:[%s4512_s4 + $0x550] sm:$0xff]  ;;  %v3771_v26 = vcombine.high %v589_v20, %v621_v21  ;;  %v653_v28 = vld [vmem:[%s4512_s4 + $0x260] sm:$0xff] }
  0x92   : > { %v3829_v50 = vcombine.high %v650_v45, %v682_v46  ;;  %v3895_v18 = vcombine.high %v715_v12, %v747_v13  ;;  %v685_v29 = vld [vmem:[%s4512_s4 + $0x360] sm:$0xff] }
  0x93   : > { %v3835_v34 = vcombine.high %v653_v28, %v685_v29  ;;  %v717_v37 = vld [vmem:[%s4512_s4 + $0x460] sm:$0xff] }
  0x94   : > { %1826 = vmatpush1.bf16.msra.mxu0 %v3878_v53  ;;  %1867 = vmatpush1.bf16.msra.mxu1 %v3880_v54  ;;  %v714_v53 = vld [vmem:[%s4512_s4 + $0x448] sm:$0xff]  ;;  %v749_v38 = vld [vmem:[%s4512_s4 + $0x560] sm:$0xff] }
  0x95   : > { %1903 = vmatprep.subr.bf16.mxu0 %v3755_v55  ;;  %1944 = vmatprep.subr.bf16.mxu1 %v3757_v56  ;;  %v746_v54 = vld [vmem:[%s4512_s4 + $0x548] sm:$0xff]  ;;  %v3826_v55 = vcombine.low %v649_v43, %v681_v44  ;;  %v3828_v56 = vcombine.low %v650_v45, %v682_v46  ;;  %v3899_v43 = vcombine.high %v717_v37, %v749_v38  ;;  %v591_v45 = vld [vmem:[%s4512_s4 + $0x70] sm:$0xff] }
  0x96   : > { %v3893_v58 = vcombine.high %v714_v53, %v746_v54  ;;  %v623_v46 = vld [vmem:[%s4512_s4 + $0x170] sm:$0xff] }
  0x97   : > { %3940 = vmatmul.mubr.msk.bf16.vlgmr.msra.gmra.mrb[4].mxu0 %vm1735_vm0, %v4537_v36  ;;  %3941 = vmatmul.mubr.msk.bf16.vlgmr.msra.gmra.mrb[4].mxu1 %vm1735_vm0, %v4537_v36 }
  0x98   : > { %1904 = vmatpush1.bf16.msra.mxu0 %v3754_v61  ;;  %1945 = vmatpush1.bf16.msra.mxu1 %v3756_v62  ;;  %v588_v61 = vld [vmem:[%s4512_s4 + $0x58] sm:$0xff] }
  0x99   : > { %1905 = vmatprep.subr.bf16.mxu0 %v3819_v63  ;;  %1946 = vmatprep.subr.bf16.mxu1 %v3821_v1  ;;  %v620_v62 = vld [vmem:[%s4512_s4 + $0x158] sm:$0xff]  ;;  %v3890_v63 = vcombine.low %v713_v51, %v745_v52  ;;  %v3892_v1 = vcombine.low %v714_v53, %v746_v54  ;;  %v3775_v51 = vcombine.high %v591_v45, %v623_v46  ;;  %v655_v53 = vld [vmem:[%s4512_s4 + $0x270] sm:$0xff] }
  0x9a   : > { %1935 = vmatprep.mubr.bf16.mxu0 %v4059_v0  ;;  %1976 = vmatprep.mubr.bf16.mxu1 %v4059_v0  ;;  %v3769_v3 = vcombine.high %v588_v61, %v620_v62  ;;  %v687_v54 = vld [vmem:[%s4512_s4 + $0x370] sm:$0xff] }
  0x9c   : > { %1906 = vmatpush1.bf16.msra.mxu0 %v3818_v6  ;;  %1947 = vmatpush1.bf16.msra.mxu1 %v3820_v7  ;;  %v652_v6 = vld [vmem:[%s4512_s4 + $0x258] sm:$0xff] }
  0x9d   : > { %1907 = vmatprep.subr.bf16.mxu0 %v3883_v8  ;;  %1948 = vmatprep.subr.bf16.mxu1 %v3885_v9  ;;  %v684_v7 = vld [vmem:[%s4512_s4 + $0x358] sm:$0xff]  ;;  %v3766_v8 = vcombine.low %v587_v59, %v619_v60  ;;  %v3768_v9 = vcombine.low %v588_v61, %v620_v62  ;;  %v3839_v59 = vcombine.high %v655_v53, %v687_v54  ;;  %v719_v61 = vld [vmem:[%s4512_s4 + $0x470] sm:$0xff] }
  0x9e   : > { %v3833_v11 = vcombine.high %v652_v6, %v684_v7  ;;  %v751_v62 = vld [vmem:[%s4512_s4 + $0x570] sm:$0xff] }
  0xa0   : > { %1908 = vmatpush1.bf16.msra.mxu0 %v3882_v14  ;;  %1949 = vmatpush1.bf16.msra.mxu1 %v3884_v15  ;;  %v716_v14 = vld [vmem:[%s4512_s4 + $0x458] sm:$0xff] }
  0xa1   : > { %1985 = vmatprep.subr.bf16.mxu0 %v3759_v16  ;;  %2026 = vmatprep.subr.bf16.mxu1 %v3761_v17  ;;  %v748_v15 = vld [vmem:[%s4512_s4 + $0x558] sm:$0xff]  ;;  %v3830_v16 = vcombine.low %v651_v4, %v683_v5  ;;  %v3832_v17 = vcombine.low %v652_v6, %v684_v7  ;;  %v3903_v4 = vcombine.high %v719_v61, %v751_v62  ;;  %v593_v6 = vld [vmem:[%s4512_s4 + $0x80] sm:$0xff] }
  0xa2   : > { %v3897_v19 = vcombine.high %v716_v14, %v748_v15  ;;  %v625_v7 = vld [vmem:[%s4512_s4 + $0x180] sm:$0xff] }
  0xa3   : > { %3942 = vmatmul.mubr.msk.bf16.vlgmr.msra.gmra.mrb[8].mxu0 %vm1735_vm0, %v4537_v36  ;;  %3943 = vmatmul.mubr.msk.bf16.vlgmr.msra.gmra.mrb[8].mxu1 %vm1735_vm0, %v4537_v36 }
  0xa4   : > { %1986 = vmatpush1.bf16.msra.mxu0 %v3758_v22  ;;  %2027 = vmatpush1.bf16.msra.mxu1 %v3760_v23  ;;  %v590_v22 = vld [vmem:[%s4512_s4 + $0x68] sm:$0xff] }
  0xa5   : > { %1987 = vmatprep.subr.bf16.mxu0 %v3823_v24  ;;  %2028 = vmatprep.subr.bf16.mxu1 %v3825_v25  ;;  %v622_v23 = vld [vmem:[%s4512_s4 + $0x168] sm:$0xff]  ;;  %v3894_v24 = vcombine.low %v715_v12, %v747_v13  ;;  %v3896_v25 = vcombine.low %v716_v14, %v748_v15  ;;  %v3779_v12 = vcombine.high %v593_v6, %v625_v7  ;;  %v657_v14 = vld [vmem:[%s4512_s4 + $0x280] sm:$0xff] }
  0xa6   : > { %2017 = vmatprep.mubr.bf16.mxu0 %v4059_v0  ;;  %2058 = vmatprep.mubr.bf16.mxu1 %v4059_v0  ;;  %v3773_v27 = vcombine.high %v590_v22, %v622_v23  ;;  %v689_v15 = vld [vmem:[%s4512_s4 + $0x380] sm:$0xff] }
  0xa8   : > { %1988 = vmatpush1.bf16.msra.mxu0 %v3822_v30  ;;  %2029 = vmatpush1.bf16.msra.mxu1 %v3824_v31  ;;  %v654_v30 = vld [vmem:[%s4512_s4 + $0x268] sm:$0xff] }
  0xa9   : > { %1989 = vmatprep.subr.bf16.mxu0 %v3887_v32  ;;  %2030 = vmatprep.subr.bf16.mxu1 %v3889_v33  ;;  %v686_v31 = vld [vmem:[%s4512_s4 + $0x368] sm:$0xff]  ;;  %v3770_v32 = vcombine.low %v589_v20, %v621_v21  ;;  %v3772_v33 = vcombine.low %v590_v22, %v622_v23  ;;  %v3843_v20 = vcombine.high %v657_v14, %v689_v15  ;;  %v721_v22 = vld [vmem:[%s4512_s4 + $0x480] sm:$0xff] }
  0xaa   : > { %v3837_v35 = vcombine.high %v654_v30, %v686_v31  ;;  %v753_v23 = vld [vmem:[%s4512_s4 + $0x580] sm:$0xff] }
  0xac   : > { %1990 = vmatpush1.bf16.msra.mxu0 %v3886_v39  ;;  %2031 = vmatpush1.bf16.msra.mxu1 %v3888_v40  ;;  %v718_v39 = vld [vmem:[%s4512_s4 + $0x468] sm:$0xff] }
  0xad   : > { %2067 = vmatprep.subr.bf16.mxu0 %v3763_v41  ;;  %2108 = vmatprep.subr.bf16.mxu1 %v3765_v42  ;;  %v750_v40 = vld [vmem:[%s4512_s4 + $0x568] sm:$0xff]  ;;  %v3834_v41 = vcombine.low %v653_v28, %v685_v29  ;;  %v3836_v42 = vcombine.low %v654_v30, %v686_v31  ;;  %v3907_v28 = vcombine.high %v721_v22, %v753_v23  ;;  %v595_v30 = vld [vmem:[%s4512_s4 + $0x90] sm:$0xff] }
  0xae   : > { %v3901_v44 = vcombine.high %v718_v39, %v750_v40  ;;  %v627_v31 = vld [vmem:[%s4512_s4 + $0x190] sm:$0xff] }
  0xaf   : > { %3944 = vmatmul.mubr.msk.bf16.vlgmr.msra.gmra.mrb[12].mxu0 %vm1735_vm0, %v4537_v36  ;;  %3945 = vmatmul.mubr.msk.bf16.vlgmr.msra.gmra.mrb[12].mxu1 %vm1735_vm0, %v4537_v36 }
  0xb0   : > { %2068 = vmatpush1.bf16.msra.mxu0 %v3762_v47  ;;  %2109 = vmatpush1.bf16.msra.mxu1 %v3764_v48  ;;  %v592_v47 = vld [vmem:[%s4512_s4 + $0x78] sm:$0xff] }
  0xb1   : > { %2069 = vmatprep.subr.bf16.mxu0 %v3827_v49  ;;  %2110 = vmatprep.subr.bf16.mxu1 %v3829_v50  ;;  %v624_v48 = vld [vmem:[%s4512_s4 + $0x178] sm:$0xff]  ;;  %v3898_v49 = vcombine.low %v717_v37, %v749_v38  ;;  %v3900_v50 = vcombine.low %v718_v39, %v750_v40  ;;  %v3783_v37 = vcombine.high %v595_v30, %v627_v31  ;;  %v659_v39 = vld [vmem:[%s4512_s4 + $0x290] sm:$0xff] }
  0xb2   : > { %2099 = vmatprep.mubr.bf16.mxu0 %v4059_v0  ;;  %2140 = vmatprep.mubr.bf16.mxu1 %v4059_v0  ;;  %v3777_v52 = vcombine.high %v592_v47, %v624_v48  ;;  %v691_v40 = vld [vmem:[%s4512_s4 + $0x390] sm:$0xff] }
  0xb4   : > { %2070 = vmatpush1.bf16.msra.mxu0 %v3826_v55  ;;  %2111 = vmatpush1.bf16.msra.mxu1 %v3828_v56  ;;  %v656_v55 = vld [vmem:[%s4512_s4 + $0x278] sm:$0xff] }
  0xb5   : > { %2071 = vmatprep.subr.bf16.mxu0 %v3891_v57  ;;  %2112 = vmatprep.subr.bf16.mxu1 %v3893_v58  ;;  %v688_v56 = vld [vmem:[%s4512_s4 + $0x378] sm:$0xff]  ;;  %v3774_v57 = vcombine.low %v591_v45, %v623_v46  ;;  %v3776_v58 = vcombine.low %v592_v47, %v624_v48  ;;  %v3847_v45 = vcombine.high %v659_v39, %v691_v40  ;;  %v723_v47 = vld [vmem:[%s4512_s4 + $0x490] sm:$0xff] }
  0xb6   : > { %v3841_v60 = vcombine.high %v656_v55, %v688_v56  ;;  %v755_v48 = vld [vmem:[%s4512_s4 + $0x590] sm:$0xff] }
  0xb8   : > { %2072 = vmatpush1.bf16.msra.mxu0 %v3890_v63  ;;  %2113 = vmatpush1.bf16.msra.mxu1 %v3892_v1  ;;  %v720_v63 = vld [vmem:[%s4512_s4 + $0x478] sm:$0xff] }
  0xb9   : > { %2149 = vmatprep.subr.bf16.mxu0 %v3767_v2  ;;  %2190 = vmatprep.subr.bf16.mxu1 %v3769_v3  ;;  %v752_v1 = vld [vmem:[%s4512_s4 + $0x578] sm:$0xff]  ;;  %v3838_v2 = vcombine.low %v655_v53, %v687_v54  ;;  %v3840_v3 = vcombine.low %v656_v55, %v688_v56  ;;  %v3911_v53 = vcombine.high %v723_v47, %v755_v48  ;;  %v597_v55 = vld [vmem:[%s4512_s4 + $0xa0] sm:$0xff] }
  0xba   : > { %v3905_v5 = vcombine.high %v720_v63, %v752_v1  ;;  %v629_v56 = vld [vmem:[%s4512_s4 + $0x1a0] sm:$0xff] }
  0xbb   : > { %3946 = vmatmul.mubr.msk.bf16.vlgmr.msra.gmra.mrb[16].mxu0 %vm1735_vm0, %v4537_v36  ;;  %3947 = vmatmul.mubr.msk.bf16.vlgmr.msra.gmra.mrb[16].mxu1 %vm1735_vm0, %v4537_v36 }
  0xbc   : > { %2150 = vmatpush1.bf16.msra.mxu0 %v3766_v8  ;;  %2191 = vmatpush1.bf16.msra.mxu1 %v3768_v9  ;;  %v594_v8 = vld [vmem:[%s4512_s4 + $0x88] sm:$0xff] }
  0xbd   : > { %2151 = vmatprep.subr.bf16.mxu0 %v3831_v10  ;;  %2192 = vmatprep.subr.bf16.mxu1 %v3833_v11  ;;  %v626_v9 = vld [vmem:[%s4512_s4 + $0x188] sm:$0xff]  ;;  %v3902_v10 = vcombine.low %v719_v61, %v751_v62  ;;  %v3904_v11 = vcombine.low %v720_v63, %v752_v1  ;;  %v3787_v61 = vcombine.high %v597_v55, %v629_v56  ;;  %v661_v63 = vld [vmem:[%s4512_s4 + $0x2a0] sm:$0xff] }
  0xbe   : > { %2181 = vmatprep.mubr.bf16.mxu0 %v4059_v0  ;;  %2222 = vmatprep.mubr.bf16.mxu1 %v4059_v0  ;;  %v3781_v13 = vcombine.high %v594_v8, %v626_v9  ;;  %v693_v1 = vld [vmem:[%s4512_s4 + $0x3a0] sm:$0xff] }
  0xc0   : > { %2152 = vmatpush1.bf16.msra.mxu0 %v3830_v16  ;;  %2193 = vmatpush1.bf16.msra.mxu1 %v3832_v17  ;;  %v658_v16 = vld [vmem:[%s4512_s4 + $0x288] sm:$0xff] }
  0xc1   : > { %2153 = vmatprep.subr.bf16.mxu0 %v3895_v18  ;;  %2194 = vmatprep.subr.bf16.mxu1 %v3897_v19  ;;  %v690_v17 = vld [vmem:[%s4512_s4 + $0x388] sm:$0xff]  ;;  %v3778_v18 = vcombine.low %v593_v6, %v625_v7  ;;  %v3780_v19 = vcombine.low %v594_v8, %v626_v9  ;;  %v3851_v6 = vcombine.high %v661_v63, %v693_v1  ;;  %v725_v8 = vld [vmem:[%s4512_s4 + $0x4a0] sm:$0xff] }
  0xc2   : > { %v3845_v21 = vcombine.high %v658_v16, %v690_v17  ;;  %v757_v9 = vld [vmem:[%s4512_s4 + $0x5a0] sm:$0xff] }
  0xc4   : > { %2154 = vmatpush1.bf16.msra.mxu0 %v3894_v24  ;;  %2195 = vmatpush1.bf16.msra.mxu1 %v3896_v25  ;;  %v722_v24 = vld [vmem:[%s4512_s4 + $0x488] sm:$0xff] }
  0xc5   : > { %2231 = vmatprep.subr.bf16.mxu0 %v3771_v26  ;;  %2272 = vmatprep.subr.bf16.mxu1 %v3773_v27  ;;  %v754_v25 = vld [vmem:[%s4512_s4 + $0x588] sm:$0xff]  ;;  %v3842_v26 = vcombine.low %v657_v14, %v689_v15  ;;  %v3844_v27 = vcombine.low %v658_v16, %v690_v17  ;;  %v3915_v14 = vcombine.high %v725_v8, %v757_v9  ;;  %v599_v16 = vld [vmem:[%s4512_s4 + $0xb0] sm:$0xff] }
  0xc6   : > { %v3909_v29 = vcombine.high %v722_v24, %v754_v25  ;;  %v631_v17 = vld [vmem:[%s4512_s4 + $0x1b0] sm:$0xff] }
  0xc7   : > { %3948 = vmatmul.mubr.msk.bf16.vlgmr.msra.gmra.mrb[20].mxu0 %vm1735_vm0, %v4537_v36  ;;  %3949 = vmatmul.mubr.msk.bf16.vlgmr.msra.gmra.mrb[20].mxu1 %vm1735_vm0, %v4537_v36 }
  0xc8   : > { %2232 = vmatpush1.bf16.msra.mxu0 %v3770_v32  ;;  %2273 = vmatpush1.bf16.msra.mxu1 %v3772_v33  ;;  %v596_v32 = vld [vmem:[%s4512_s4 + $0x98] sm:$0xff] }
  0xc9   : > { %2233 = vmatprep.subr.bf16.mxu0 %v3835_v34  ;;  %2274 = vmatprep.subr.bf16.mxu1 %v3837_v35  ;;  %v628_v33 = vld [vmem:[%s4512_s4 + $0x198] sm:$0xff]  ;;  %v3906_v34 = vcombine.low %v721_v22, %v753_v23  ;;  %v3908_v35 = vcombine.low %v722_v24, %v754_v25  ;;  %v3791_v22 = vcombine.high %v599_v16, %v631_v17  ;;  %v663_v24 = vld [vmem:[%s4512_s4 + $0x2b0] sm:$0xff] }
  0xca   : > { %2263 = vmatprep.mubr.bf16.mxu0 %v4059_v0  ;;  %2304 = vmatprep.mubr.bf16.mxu1 %v4059_v0  ;;  %v3785_v38 = vcombine.high %v596_v32, %v628_v33  ;;  %v695_v25 = vld [vmem:[%s4512_s4 + $0x3b0] sm:$0xff] }
  0xcc   : > { %2234 = vmatpush1.bf16.msra.mxu0 %v3834_v41  ;;  %2275 = vmatpush1.bf16.msra.mxu1 %v3836_v42  ;;  %v660_v41 = vld [vmem:[%s4512_s4 + $0x298] sm:$0xff] }
  0xcd   : > { %2235 = vmatprep.subr.bf16.mxu0 %v3899_v43  ;;  %2276 = vmatprep.subr.bf16.mxu1 %v3901_v44  ;;  %v692_v42 = vld [vmem:[%s4512_s4 + $0x398] sm:$0xff]  ;;  %v3782_v43 = vcombine.low %v595_v30, %v627_v31  ;;  %v3784_v44 = vcombine.low %v596_v32, %v628_v33  ;;  %v3855_v30 = vcombine.high %v663_v24, %v695_v25  ;;  %v727_v32 = vld [vmem:[%s4512_s4 + $0x4b0] sm:$0xff] }
  0xce   : > { %v3849_v46 = vcombine.high %v660_v41, %v692_v42  ;;  %v759_v33 = vld [vmem:[%s4512_s4 + $0x5b0] sm:$0xff] }
  0xd0   : > { %2236 = vmatpush1.bf16.msra.mxu0 %v3898_v49  ;;  %2277 = vmatpush1.bf16.msra.mxu1 %v3900_v50  ;;  %v724_v49 = vld [vmem:[%s4512_s4 + $0x498] sm:$0xff] }
  0xd1   : > { %2313 = vmatprep.subr.bf16.mxu0 %v3775_v51  ;;  %2354 = vmatprep.subr.bf16.mxu1 %v3777_v52  ;;  %v756_v50 = vld [vmem:[%s4512_s4 + $0x598] sm:$0xff]  ;;  %v3846_v51 = vcombine.low %v659_v39, %v691_v40  ;;  %v3848_v52 = vcombine.low %v660_v41, %v692_v42  ;;  %v3919_v39 = vcombine.high %v727_v32, %v759_v33  ;;  %v601_v41 = vld [vmem:[%s4512_s4 + $0xc0] sm:$0xff] }
  0xd2   : > { %v3913_v54 = vcombine.high %v724_v49, %v756_v50  ;;  %v633_v42 = vld [vmem:[%s4512_s4 + $0x1c0] sm:$0xff] }
  0xd3   : > { %3950 = vmatmul.mubr.msk.bf16.vlgmr.msra.gmra.mrb[24].mxu0 %vm1735_vm0, %v4537_v36  ;;  %3951 = vmatmul.mubr.msk.bf16.vlgmr.msra.gmra.mrb[24].mxu1 %vm1735_vm0, %v4537_v36 }
  0xd4   : > { %2314 = vmatpush1.bf16.msra.mxu0 %v3774_v57  ;;  %2355 = vmatpush1.bf16.msra.mxu1 %v3776_v58  ;;  %v598_v57 = vld [vmem:[%s4512_s4 + $0xa8] sm:$0xff] }
  0xd5   : > { %2315 = vmatprep.subr.bf16.mxu0 %v3839_v59  ;;  %2356 = vmatprep.subr.bf16.mxu1 %v3841_v60  ;;  %v630_v58 = vld [vmem:[%s4512_s4 + $0x1a8] sm:$0xff]  ;;  %v3910_v59 = vcombine.low %v723_v47, %v755_v48  ;;  %v3912_v60 = vcombine.low %v724_v49, %v756_v50  ;;  %v3795_v47 = vcombine.high %v601_v41, %v633_v42  ;;  %v665_v49 = vld [vmem:[%s4512_s4 + $0x2c0] sm:$0xff] }
  0xd6   : > { %2345 = vmatprep.mubr.bf16.mxu0 %v4059_v0  ;;  %2386 = vmatprep.mubr.bf16.mxu1 %v4059_v0  ;;  %v3789_v62 = vcombine.high %v598_v57, %v630_v58  ;;  %v697_v50 = vld [vmem:[%s4512_s4 + $0x3c0] sm:$0xff] }
  0xd8   : > { %2316 = vmatpush1.bf16.msra.mxu0 %v3838_v2  ;;  %2357 = vmatpush1.bf16.msra.mxu1 %v3840_v3  ;;  %v662_v2 = vld [vmem:[%s4512_s4 + $0x2a8] sm:$0xff] }
  0xd9   : > { %2317 = vmatprep.subr.bf16.mxu0 %v3903_v4  ;;  %2358 = vmatprep.subr.bf16.mxu1 %v3905_v5  ;;  %v694_v3 = vld [vmem:[%s4512_s4 + $0x3a8] sm:$0xff]  ;;  %v3786_v4 = vcombine.low %v597_v55, %v629_v56  ;;  %v3788_v5 = vcombine.low %v598_v57, %v630_v58  ;;  %v3859_v55 = vcombine.high %v665_v49, %v697_v50  ;;  %v729_v57 = vld [vmem:[%s4512_s4 + $0x4c0] sm:$0xff] }
  0xda   : > { %v3853_v7 = vcombine.high %v662_v2, %v694_v3  ;;  %v761_v58 = vld [vmem:[%s4512_s4 + $0x5c0] sm:$0xff] }
  0xdc   : > { %2318 = vmatpush1.bf16.msra.mxu0 %v3902_v10  ;;  %2359 = vmatpush1.bf16.msra.mxu1 %v3904_v11  ;;  %v726_v10 = vld [vmem:[%s4512_s4 + $0x4a8] sm:$0xff] }
  0xdd   : > { %2395 = vmatprep.subr.bf16.mxu0 %v3779_v12  ;;  %2436 = vmatprep.subr.bf16.mxu1 %v3781_v13  ;;  %v758_v11 = vld [vmem:[%s4512_s4 + $0x5a8] sm:$0xff]  ;;  %v3850_v12 = vcombine.low %v661_v63, %v693_v1  ;;  %v3852_v13 = vcombine.low %v662_v2, %v694_v3  ;;  %v3923_v63 = vcombine.high %v729_v57, %v761_v58  ;;  %v603_v2 = vld [vmem:[%s4512_s4 + $0xd0] sm:$0xff] }
  0xde   : > { %v3917_v15 = vcombine.high %v726_v10, %v758_v11  ;;  %v635_v3 = vld [vmem:[%s4512_s4 + $0x1d0] sm:$0xff] }
  0xdf   : > { %3952 = vmatmul.mubr.msk.bf16.vlgmr.msra.gmra.mrb[28].mxu0 %vm1735_vm0, %v4537_v36  ;;  %3953 = vmatmul.mubr.msk.bf16.vlgmr.msra.gmra.mrb[28].mxu1 %vm1735_vm0, %v4537_v36 }
  0xe0   : > { %2396 = vmatpush1.bf16.msra.mxu0 %v3778_v18  ;;  %2437 = vmatpush1.bf16.msra.mxu1 %v3780_v19  ;;  %v600_v18 = vld [vmem:[%s4512_s4 + $0xb8] sm:$0xff] }
  0xe1   : > { %2397 = vmatprep.subr.bf16.mxu0 %v3843_v20  ;;  %2438 = vmatprep.subr.bf16.mxu1 %v3845_v21  ;;  %v632_v19 = vld [vmem:[%s4512_s4 + $0x1b8] sm:$0xff]  ;;  %v3914_v20 = vcombine.low %v725_v8, %v757_v9  ;;  %v3916_v21 = vcombine.low %v726_v10, %v758_v11  ;;  %v3799_v8 = vcombine.high %v603_v2, %v635_v3  ;;  %v667_v10 = vld [vmem:[%s4512_s4 + $0x2d0] sm:$0xff] }
  0xe2   : > { %2427 = vmatprep.mubr.bf16.mxu0 %v4059_v0  ;;  %2468 = vmatprep.mubr.bf16.mxu1 %v4059_v0  ;;  %v3793_v23 = vcombine.high %v600_v18, %v632_v19  ;;  %v699_v11 = vld [vmem:[%s4512_s4 + $0x3d0] sm:$0xff] }
  0xe4   : > { %2398 = vmatpush1.bf16.msra.mxu0 %v3842_v26  ;;  %2439 = vmatpush1.bf16.msra.mxu1 %v3844_v27  ;;  %v664_v26 = vld [vmem:[%s4512_s4 + $0x2b8] sm:$0xff] }
  0xe5   : > { %2399 = vmatprep.subr.bf16.mxu0 %v3907_v28  ;;  %2440 = vmatprep.subr.bf16.mxu1 %v3909_v29  ;;  %v696_v27 = vld [vmem:[%s4512_s4 + $0x3b8] sm:$0xff]  ;;  %v3790_v28 = vcombine.low %v599_v16, %v631_v17  ;;  %v3792_v29 = vcombine.low %v600_v18, %v632_v19  ;;  %v3863_v16 = vcombine.high %v667_v10, %v699_v11  ;;  %v731_v18 = vld [vmem:[%s4512_s4 + $0x4d0] sm:$0xff] }
  0xe6   : > { %v3857_v31 = vcombine.high %v664_v26, %v696_v27  ;;  %v763_v19 = vld [vmem:[%s4512_s4 + $0x5d0] sm:$0xff] }
  0xe8   : > { %2400 = vmatpush1.bf16.msra.mxu0 %v3906_v34  ;;  %2441 = vmatpush1.bf16.msra.mxu1 %v3908_v35  ;;  %v728_v34 = vld [vmem:[%s4512_s4 + $0x4b8] sm:$0xff] }
  0xe9   : > { %2477 = vmatprep.subr.bf16.mxu0 %v3783_v37  ;;  %2518 = vmatprep.subr.bf16.mxu1 %v3785_v38  ;;  %v760_v35 = vld [vmem:[%s4512_s4 + $0x5b8] sm:$0xff]  ;;  %v3854_v37 = vcombine.low %v663_v24, %v695_v25  ;;  %v3856_v38 = vcombine.low %v664_v26, %v696_v27  ;;  %v3927_v24 = vcombine.high %v731_v18, %v763_v19  ;;  %v605_v26 = vld [vmem:[%s4512_s4 + $0xe0] sm:$0xff] }
  0xea   : > { %v3921_v40 = vcombine.high %v728_v34, %v760_v35  ;;  %v637_v27 = vld [vmem:[%s4512_s4 + $0x1e0] sm:$0xff] }
  0xeb   : > { %3954 = vmatmul.mubr.msk.bf16.vlgmr.msra.gmra.mrb[32].mxu0 %vm1735_vm0, %v4537_v36  ;;  %3955 = vmatmul.mubr.msk.bf16.vlgmr.msra.gmra.mrb[32].mxu1 %vm1735_vm0, %v4537_v36 }
  0xec   : > { %2478 = vmatpush1.bf16.msra.mxu0 %v3782_v43  ;;  %2519 = vmatpush1.bf16.msra.mxu1 %v3784_v44  ;;  %v602_v43 = vld [vmem:[%s4512_s4 + $0xc8] sm:$0xff] }
  0xed   : > { %2479 = vmatprep.subr.bf16.mxu0 %v3847_v45  ;;  %2520 = vmatprep.subr.bf16.mxu1 %v3849_v46  ;;  %v634_v44 = vld [vmem:[%s4512_s4 + $0x1c8] sm:$0xff]  ;;  %v3918_v45 = vcombine.low %v727_v32, %v759_v33  ;;  %v3920_v46 = vcombine.low %v728_v34, %v760_v35  ;;  %v669_v33 = vld [vmem:[%s4512_s4 + $0x2e0] sm:$0xff] }
  0xee   : > { %2509 = vmatprep.mubr.bf16.mxu0 %v4059_v0  ;;  %2550 = vmatprep.mubr.bf16.mxu1 %v4059_v0  ;;  %v3797_v48 = vcombine.high %v602_v43, %v634_v44  ;;  %v701_v34 = vld [vmem:[%s4512_s4 + $0x3e0] sm:$0xff]  ;;  %v670_v35 = vld [vmem:[%s4512_s4 + $0x2e8] sm:$0xff] }
  0xf0   : > { %2480 = vmatpush1.bf16.msra.mxu0 %v3846_v51  ;;  %2521 = vmatpush1.bf16.msra.mxu1 %v3848_v52  ;;  %v666_v51 = vld [vmem:[%s4512_s4 + $0x2c8] sm:$0xff] }
  0xf1   : > { %2481 = vmatprep.subr.bf16.mxu0 %v3911_v53  ;;  %2522 = vmatprep.subr.bf16.mxu1 %v3913_v54  ;;  %v698_v52 = vld [vmem:[%s4512_s4 + $0x3c8] sm:$0xff]  ;;  %v3794_v53 = vcombine.low %v601_v41, %v633_v42  ;;  %v3796_v54 = vcombine.low %v602_v43, %v634_v44  ;;  %v733_v42 = vld [vmem:[%s4512_s4 + $0x4e0] sm:$0xff] }
  0xf2   : > { %v3861_v56 = vcombine.high %v666_v51, %v698_v52  ;;  %v765_v43 = vld [vmem:[%s4512_s4 + $0x5e0] sm:$0xff] }
  0xf3   : > { %v4778_v44 = vld [vmem:[%s4943_s0] sm:$0x3] }
  0xf4   : > { %2482 = vmatpush1.bf16.msra.mxu0 %v3910_v59  ;;  %2523 = vmatpush1.bf16.msra.mxu1 %v3912_v60  ;;  %v730_v59 = vld [vmem:[%s4512_s4 + $0x4c8] sm:$0xff] }
  0xf5   : > { %2559 = vmatprep.subr.bf16.mxu0 %v3787_v61  ;;  %2600 = vmatprep.subr.bf16.mxu1 %v3789_v62  ;;  %v762_v60 = vld [vmem:[%s4512_s4 + $0x5c8] sm:$0xff]  ;;  %v3858_v61 = vcombine.low %v665_v49, %v697_v50  ;;  %v3860_v62 = vcombine.low %v666_v51, %v698_v52  ;;  %v3931_v49 = vcombine.high %v733_v42, %v765_v43  ;;  %v607_v51 = vld [vmem:[%s4512_s4 + $0xf0] sm:$0xff] }
  0xf6   : > { %v3925_v1 = vcombine.high %v730_v59, %v762_v60  ;;  %v639_v52 = vld [vmem:[%s4512_s4 + $0x1f0] sm:$0xff] }
  0xf7   : > { %3956 = vmatmul.mubr.msk.bf16.vlgmr.msra.gmra.mrb[36].mxu0 %vm1735_vm0, %v4537_v36  ;;  %3957 = vmatmul.mubr.msk.bf16.vlgmr.msra.gmra.mrb[36].mxu1 %vm1735_vm0, %v4537_v36 }
  0xf8   : > { %2560 = vmatpush1.bf16.msra.mxu0 %v3786_v4  ;;  %2601 = vmatpush1.bf16.msra.mxu1 %v3788_v5  ;;  %v604_v4 = vld [vmem:[%s4512_s4 + $0xd8] sm:$0xff] }
  0xf9   : > { %2561 = vmatprep.subr.bf16.mxu0 %v3851_v6  ;;  %2602 = vmatprep.subr.bf16.mxu1 %v3853_v7  ;;  %v636_v5 = vld [vmem:[%s4512_s4 + $0x1d8] sm:$0xff]  ;;  %v3922_v6 = vcombine.low %v729_v57, %v761_v58  ;;  %v3924_v7 = vcombine.low %v730_v59, %v762_v60  ;;  %v3807_v57 = vcombine.high %v607_v51, %v639_v52  ;;  %v671_v59 = vld [vmem:[%s4512_s4 + $0x2f0] sm:$0xff] }
  0xfa   : > { %2591 = vmatprep.mubr.bf16.mxu0 %v4059_v0  ;;  %2632 = vmatprep.mubr.bf16.mxu1 %v4059_v0  ;;  %v3801_v9 = vcombine.high %v604_v4, %v636_v5  ;;  %v703_v60 = vld [vmem:[%s4512_s4 + $0x3f0] sm:$0xff] }
  0xfc   : > { %2562 = vmatpush1.bf16.msra.mxu0 %v3850_v12  ;;  %2603 = vmatpush1.bf16.msra.mxu1 %v3852_v13  ;;  %v668_v12 = vld [vmem:[%s4512_s4 + $0x2d8] sm:$0xff] }
  0xfd   : > { %2563 = vmatprep.subr.bf16.mxu0 %v3915_v14  ;;  %2604 = vmatprep.subr.bf16.mxu1 %v3917_v15  ;;  %v700_v13 = vld [vmem:[%s4512_s4 + $0x3d8] sm:$0xff]  ;;  %v3798_v14 = vcombine.low %v603_v2, %v635_v3  ;;  %v3800_v15 = vcombine.low %v604_v4, %v636_v5  ;;  %v3871_v2 = vcombine.high %v671_v59, %v703_v60  ;;  %v735_v4 = vld [vmem:[%s4512_s4 + $0x4f0] sm:$0xff] }
  0xfe   : > { %v3865_v17 = vcombine.high %v668_v12, %v700_v13  ;;  %v767_v5 = vld [vmem:[%s4512_s4 + $0x5f0] sm:$0xff] }
 0x100   : > { %2564 = vmatpush1.bf16.msra.mxu0 %v3914_v20  ;;  %2605 = vmatpush1.bf16.msra.mxu1 %v3916_v21  ;;  %v732_v20 = vld [vmem:[%s4512_s4 + $0x4d8] sm:$0xff] }
 0x101   : > { %2641 = vmatprep.subr.bf16.mxu0 %v3791_v22  ;;  %2682 = vmatprep.subr.bf16.mxu1 %v3793_v23  ;;  %v764_v21 = vld [vmem:[%s4512_s4 + $0x5d8] sm:$0xff]  ;;  %v3862_v22 = vcombine.low %v667_v10, %v699_v11  ;;  %v3864_v23 = vcombine.low %v668_v12, %v700_v13  ;;  %v3935_v10 = vcombine.high %v735_v4, %v767_v5 }
 0x102   : > { %v3929_v25 = vcombine.high %v732_v20, %v764_v21  ;;  %v3934_v12 = vcombine.low %v735_v4, %v767_v5 }
 0x103   : > { %3958 = vmatmul.mubr.msk.bf16.vlgmr.msra.gmra.mrb[40].mxu0 %vm1735_vm0, %v4537_v36  ;;  %3959 = vmatmul.mubr.msk.bf16.vlgmr.msra.gmra.mrb[40].mxu1 %vm1735_vm0, %v4537_v36 }
 0x104   : > { %2642 = vmatpush1.bf16.msra.mxu0 %v3790_v28  ;;  %2683 = vmatpush1.bf16.msra.mxu1 %v3792_v29  ;;  %v606_v28 = vld [vmem:[%s4512_s4 + $0xe8] sm:$0xff]  ;;  %v3926_v29 = vcombine.low %v731_v18, %v763_v19 }
 0x105   : > { %2643 = vmatprep.subr.bf16.mxu0 %v3855_v30  ;;  %2684 = vmatprep.subr.bf16.mxu1 %v3857_v31  ;;  %v3928_v30 = vcombine.low %v732_v20, %v764_v21  ;;  %v3803_v31 = vcombine.high %v605_v26, %v637_v27 }
 0x106   : > { %2673 = vmatprep.mubr.bf16.mxu0 %v4059_v0  ;;  %2714 = vmatprep.mubr.bf16.mxu1 %v4059_v0 }
 0x108   : > { %2644 = vmatpush1.bf16.msra.mxu0 %v3854_v37  ;;  %2685 = vmatpush1.bf16.msra.mxu1 %v3856_v38  ;;  %v702_v37 = vld [vmem:[%s4512_s4 + $0x3e8] sm:$0xff]  ;;  %v3802_v38 = vcombine.low %v605_v26, %v637_v27 }
 0x109   : > { %2645 = vmatprep.subr.bf16.mxu0 %v3919_v39  ;;  %2686 = vmatprep.subr.bf16.mxu1 %v3921_v40  ;;  %v3867_v40 = vcombine.high %v669_v33, %v701_v34  ;;  %v3869_v41 = vcombine.high %v670_v35, %v702_v37 }
 0x10c   : > { %2646 = vmatpush1.bf16.msra.mxu0 %v3918_v45  ;;  %2687 = vmatpush1.bf16.msra.mxu1 %v3920_v46  ;;  %v734_v45 = vld [vmem:[%s4512_s4 + $0x4e8] sm:$0xff] }
 0x10d   : > { %2723 = vmatprep.subr.bf16.mxu0 %v3795_v47  ;;  %2764 = vmatprep.subr.bf16.mxu1 %v3797_v48  ;;  %v766_v46 = vld [vmem:[%s4512_s4 + $0x5e8] sm:$0xff]  ;;  %v3866_v47 = vcombine.low %v669_v33, %v701_v34  ;;  %v3868_v48 = vcombine.low %v670_v35, %v702_v37 }
 0x10e   : > { %v3933_v50 = vcombine.high %v734_v45, %v766_v46 }
 0x10f   : > { %3960 = vmatmul.mubr.msk.bf16.vlgmr.msra.gmra.mrb[44].mxu0 %vm1735_vm0, %v4537_v36  ;;  %3961 = vmatmul.mubr.msk.bf16.vlgmr.msra.gmra.mrb[44].mxu1 %vm1735_vm0, %v4537_v36 }
 0x110   : > { %2724 = vmatpush1.bf16.msra.mxu0 %v3794_v53  ;;  %2765 = vmatpush1.bf16.msra.mxu1 %v3796_v54  ;;  %v608_v53 = vld [vmem:[%s4512_s4 + $0xf8] sm:$0xff] }
 0x111   : > { %2725 = vmatprep.subr.bf16.mxu0 %v3859_v55  ;;  %2766 = vmatprep.subr.bf16.mxu1 %v3861_v56  ;;  %v640_v54 = vld [vmem:[%s4512_s4 + $0x1f8] sm:$0xff]  ;;  %v3930_v55 = vcombine.low %v733_v42, %v765_v43  ;;  %v3932_v56 = vcombine.low %v734_v45, %v766_v46 }
 0x112   : > { %2755 = vmatprep.mubr.bf16.mxu0 %v4059_v0  ;;  %2796 = vmatprep.mubr.bf16.mxu1 %v4059_v0  ;;  %v3809_v58 = vcombine.high %v608_v53, %v640_v54 }
 0x114   : > { %2726 = vmatpush1.bf16.msra.mxu0 %v3858_v61  ;;  %2767 = vmatpush1.bf16.msra.mxu1 %v3860_v62  ;;  %v672_v61 = vld [vmem:[%s4512_s4 + $0x2f8] sm:$0xff] }
 0x115   : > { %2727 = vmatprep.subr.bf16.mxu0 %v3923_v63  ;;  %2768 = vmatprep.subr.bf16.mxu1 %v3925_v1  ;;  %v704_v62 = vld [vmem:[%s4512_s4 + $0x3f8] sm:$0xff]  ;;  %v3806_v63 = vcombine.low %v607_v51, %v639_v52  ;;  %v3808_v1 = vcombine.low %v608_v53, %v640_v54 }
 0x116   : > { %v3873_v3 = vcombine.high %v672_v61, %v704_v62 }
 0x118   : > { %2728 = vmatpush1.bf16.msra.mxu0 %v3922_v6  ;;  %2769 = vmatpush1.bf16.msra.mxu1 %v3924_v7  ;;  %v736_v6 = vld [vmem:[%s4512_s4 + $0x4f8] sm:$0xff] }
 0x119   : > { %2805 = vmatprep.subr.bf16.mxu0 %v3799_v8  ;;  %2846 = vmatprep.subr.bf16.mxu1 %v3801_v9  ;;  %v768_v7 = vld [vmem:[%s4512_s4 + $0x5f8] sm:$0xff]  ;;  %v3870_v8 = vcombine.low %v671_v59, %v703_v60  ;;  %v3872_v9 = vcombine.low %v672_v61, %v704_v62 }
 0x11a   : > { %v3937_v11 = vcombine.high %v736_v6, %v768_v7  ;;  %v3936_v13 = vcombine.low %v736_v6, %v768_v7 }
 0x11b   : > { %3962 = vmatmul.mubr.msk.bf16.vlgmr.msra.gmra.mrb[48].mxu0 %vm1735_vm0, %v4537_v36  ;;  %3963 = vmatmul.mubr.msk.bf16.vlgmr.msra.gmra.mrb[48].mxu1 %vm1735_vm0, %v4537_v36  ;;  %v638_v36 = vld [vmem:[%s4512_s4 + $0x1e8] sm:$0xff] }
 0x11c   : > { %2806 = vmatpush1.bf16.msra.mxu0 %v3798_v14  ;;  %2847 = vmatpush1.bf16.msra.mxu1 %v3800_v15  ;;  %v3805_v32 = vcombine.high %v606_v28, %v638_v36  ;;  %v3804_v39 = vcombine.low %v606_v28, %v638_v36  ;;  %v4060_v14 = vmov 1983009808  }
 0x11d   : > { %2807 = vmatprep.subr.bf16.mxu0 %v3863_v16  ;;  %2848 = vmatprep.subr.bf16.mxu1 %v3865_v17  ;;  %v3374_v15 = vunpack.c.l.s4 %v4060_v14  ;;  %v3376_v16 = vlaneseq }
 0x11e   : > { %2837 = vmatprep.mubr.bf16.mxu0 %v4059_v0  ;;  %2878 = vmatprep.mubr.bf16.mxu1 %v4059_v0 }
 0x11f   : > { %v3375_v21 = vunpack.c.0.s8 %v3374_v15 }
 0x120   : > { %2808 = vmatpush1.bf16.msra.mxu0 %v3862_v22  ;;  %2849 = vmatpush1.bf16.msra.mxu1 %v3864_v23  ;;  %v3377_v22 = vshrl.u32 %v3376_v16, 7 }
 0x121   : > { %2809 = vmatprep.subr.bf16.mxu0 %v3927_v24  ;;  %2850 = vmatprep.subr.bf16.mxu1 %v3929_v25 }
 0x122   : > { %v4818_v33 = vsub.s32 %v3375_v21, %v3377_v22 }
 0x124   : > { %2810 = vmatpush1.bf16.msra.mxu0 %v3926_v29  ;;  %2851 = vmatpush1.bf16.msra.mxu1 %v3928_v30 }
 0x125   : > { %2887 = vmatprep.subr.bf16.mxu0 %v3803_v31  ;;  %2928 = vmatprep.subr.bf16.mxu1 %v3805_v32 }
 0x127   : > { %3964 = vmatmul.mubr.msk.bf16.vlgmr.msra.gmra.mrb[52].mxu0 %vm1735_vm0, %v4778_v44  ;;  %3965 = vmatmul.mubr.msk.bf16.vlgmr.msra.gmra.mrb[52].mxu1 %vm1735_vm0, %v4778_v44 }
 0x128   : > { %2888 = vmatpush1.bf16.msra.mxu0 %v3802_v38  ;;  %2929 = vmatpush1.bf16.msra.mxu1 %v3804_v39 }
 0x129   : > { %2889 = vmatprep.subr.bf16.mxu0 %v3867_v40  ;;  %2930 = vmatprep.subr.bf16.mxu1 %v3869_v41 }
 0x12a   : > { %2919 = vmatprep.mubr.bf16.mxu0 %v4059_v0  ;;  %2960 = vmatprep.mubr.bf16.mxu1 %v4059_v0 }
 0x12c   : > { %2890 = vmatpush1.bf16.msra.mxu0 %v3866_v47  ;;  %2931 = vmatpush1.bf16.msra.mxu1 %v3868_v48 }
 0x12d   : > { %2891 = vmatprep.subr.bf16.mxu0 %v3931_v49  ;;  %2932 = vmatprep.subr.bf16.mxu1 %v3933_v50 }
 0x130   : > { %2892 = vmatpush1.bf16.msra.mxu0 %v3930_v55  ;;  %2933 = vmatpush1.bf16.msra.mxu1 %v3932_v56 }
 0x131   : > { %2969 = vmatprep.subr.bf16.mxu0 %v3807_v57  ;;  %3010 = vmatprep.subr.bf16.mxu1 %v3809_v58 }
 0x133   : > { %3966 = vmatmul.mubr.msk.bf16.vlgmr.msra.gmra.mrb[56].mxu0 %vm1735_vm0, %v4778_v44  ;;  %3967 = vmatmul.mubr.msk.bf16.vlgmr.msra.gmra.mrb[56].mxu1 %vm1735_vm0, %v4778_v44 }
 0x134   : > { %2970 = vmatpush1.bf16.msra.mxu0 %v3806_v63  ;;  %3011 = vmatpush1.bf16.msra.mxu1 %v3808_v1 }
 0x135   : > { %2971 = vmatprep.subr.bf16.mxu0 %v3871_v2  ;;  %3012 = vmatprep.subr.bf16.mxu1 %v3873_v3 }
 0x136   : > { %3001 = vmatprep.mubr.bf16.mxu0 %v4059_v0  ;;  %3042 = vmatprep.mubr.bf16.mxu1 %v4059_v0  ;;  %v4812_v0 = vpop.permute.xlu0 %772 }
 0x138   : > { %2972 = vmatpush1.bf16.msra.mxu0 %v3870_v8  ;;  %3013 = vmatpush1.bf16.msra.mxu1 %v3872_v9 }
 0x139   : > { %2973 = vmatprep.subr.bf16.mxu0 %v3935_v10  ;;  %3014 = vmatprep.subr.bf16.mxu1 %v3937_v11 }
 0x13c   : > { %2974 = vmatpush1.bf16.msra.mxu0 %v3934_v12  ;;  %3015 = vmatpush1.bf16.msra.mxu1 %v3936_v13 }
 0x13f   : > { %3968 = vmatmul.mubr.msk.bf16.vlgmr.msra.gmra.mrb[60].mxu0 %vm1735_vm0, %v4778_v44  ;;  %3969 = vmatmul.mubr.msk.bf16.vlgmr.msra.gmra.mrb[60].mxu1 %vm1735_vm0, %v4778_v44 }
 0x15e   : > { %v1773_v17 = vpop.f32.mrb[0].mxu0  ;;  %v1814_v19 = vpop.f32.mrb[0].mxu1 }
 0x15f   : > { %v1774_v18 = vadd.f32 %v1773_v17, %v4812_v0  ;;  %v1775_v20 = vpop.f32.mrb[1].mxu0  ;;  %v1815_v23 = vadd.f32 %v1814_v19, %v4812_v0  ;;  %v1816_v25 = vpop.f32.mrb[1].mxu1 }
 0x160   : > { %v1776_v24 = vadd.f32 %v1775_v20, %v4812_v0  ;;  %v1777_v26 = vpop.f32.mrb[2].mxu0  ;;  %v1817_v28 = vadd.f32 %v1816_v25, %v4812_v0  ;;  %v1818_v36 = vpop.f32.mrb[2].mxu1 }
 0x161   : > { %vm3051_vm1 = vcmp.gt.f32.partialorder %v1774_v18, 0.0  ;;  %v3115_v27 = vmul.f32 0.2, %v1774_v18  ;;  %v1778_v29 = vpop.f32.mrb[3].mxu0  ;;  %vm3053_vm2 = vcmp.gt.f32.partialorder %v1815_v23, 0.0  ;;  %v1819_v35 = vpop.f32.mrb[3].mxu1 }
 0x162   : > { %v3117_v30 = vmul.f32 0.2, %v1815_v23  ;;  %vm3052_vm3 = vcmp.gt.f32.partialorder %v1776_v24, 0.0  ;;  %v3116_v31 = vmul.f32 0.2, %v1776_v24  ;;  %vm3054_vm4 = vcmp.gt.f32.partialorder %v1817_v28, 0.0 }
 0x163   : > { %v3179_v32 = vsel %vm3051_vm1, %v1774_v18, %v3115_v27  ;;  %v3118_v34 = vmul.f32 0.2, %v1817_v28 }
 0x164   : > { %v3181_v37 = vsel %vm3053_vm2, %v1815_v23, %v3117_v30  ;;  %v3180_v38 = vsel %vm3052_vm3, %v1776_v24, %v3116_v31 }
 0x165   : > { %v3970_v39 = vpack.c.bf16 %v3180_v38, %v3179_v32  ;;  %v3182_v40 = vsel %vm3054_vm4, %v1817_v28, %v3118_v34 }
 0x166   : > { %v3971_v41 = vpack.c.bf16 %v3182_v40, %v3181_v37 }
 0x167   : > { %v3379_v42 = vrot.slane %v3970_v39, %v4818_v33 }
 0x168   : > { %v3386_v43 = vrot.slane %v3971_v41, %v4818_v33 }
 0x16a   : > { %v3387_v44 = vcombine.low %v3379_v42, %v3386_v43  ;;  %v1855_v45 = vpop.f32.mrb[4].mxu0  ;;  %v1896_v47 = vpop.f32.mrb[4].mxu1 }
 0x16b   : > { %v1856_v46 = vadd.f32 %v1855_v45, %v4812_v0  ;;  %v1857_v48 = vpop.f32.mrb[5].mxu0  ;;  %v1897_v49 = vadd.f32 %v1896_v47, %v4812_v0  ;;  %v1898_v51 = vpop.f32.mrb[5].mxu1 }
 0x16c   : > { %3659 = vst [vmem:[%s4825_s14] sm:$0xff] %v3387_v44  ;;  %v1858_v50 = vadd.f32 %v1857_v48, %v4812_v0  ;;  %v1859_v52 = vpop.f32.mrb[6].mxu0  ;;  %v1899_v54 = vadd.f32 %v1898_v51, %v4812_v0  ;;  %v1900_v55 = vpop.f32.mrb[6].mxu1 }
 0x16d   : > { %vm3055_vm5 = vcmp.gt.f32.partialorder %v1856_v46, 0.0  ;;  %v3119_v53 = vmul.f32 0.2, %v1856_v46  ;;  %v1860_v56 = vpop.f32.mrb[7].mxu0  ;;  %vm3057_vm6 = vcmp.gt.f32.partialorder %v1897_v49, 0.0  ;;  %v1901_v61 = vpop.f32.mrb[7].mxu1 }
 0x16e   : > { %v3121_v57 = vmul.f32 0.2, %v1897_v49  ;;  %vm3056_vm7 = vcmp.gt.f32.partialorder %v1858_v50, 0.0  ;;  %v3120_v58 = vmul.f32 0.2, %v1858_v50  ;;  %vm3058_vm8 = vcmp.gt.f32.partialorder %v1899_v54, 0.0 }
 0x16f   : > { %v3183_v59 = vsel %vm3055_vm5, %v1856_v46, %v3119_v53  ;;  %v3122_v60 = vmul.f32 0.2, %v1899_v54 }
 0x170   : > { %v3185_v62 = vsel %vm3057_vm6, %v1897_v49, %v3121_v57  ;;  %v3184_v63 = vsel %vm3056_vm7, %v1858_v50, %v3120_v58 }
 0x171   : > { %v3972_v1 = vpack.c.bf16 %v3184_v63, %v3183_v59  ;;  %v3186_v2 = vsel %vm3058_vm8, %v1899_v54, %v3122_v60 }
 0x172   : > { %v3973_v3 = vpack.c.bf16 %v3186_v2, %v3185_v62 }
 0x173   : > { %v3396_v4 = vrot.slane %v3972_v1, %v4818_v33 }
 0x174   : > { %v3403_v5 = vrot.slane %v3973_v3, %v4818_v33 }
 0x176   : > { %v3404_v6 = vcombine.low %v3396_v4, %v3403_v5  ;;  %v1937_v7 = vpop.f32.mrb[8].mxu0  ;;  %v1978_v9 = vpop.f32.mrb[8].mxu1 }
 0x177   : > { %v1938_v8 = vadd.f32 %v1937_v7, %v4812_v0  ;;  %v1939_v10 = vpop.f32.mrb[9].mxu0  ;;  %v1979_v11 = vadd.f32 %v1978_v9, %v4812_v0  ;;  %v1980_v13 = vpop.f32.mrb[9].mxu1 }
 0x178   : > { %3660 = vst [vmem:[%s4825_s14 + $0x8] sm:$0xff] %v3404_v6  ;;  %v1940_v12 = vadd.f32 %v1939_v10, %v4812_v0  ;;  %v1941_v14 = vpop.f32.mrb[10].mxu0  ;;  %v1981_v16 = vadd.f32 %v1980_v13, %v4812_v0  ;;  %v1982_v17 = vpop.f32.mrb[10].mxu1 }
 0x179   : > { %vm3059_vm9 = vcmp.gt.f32.partialorder %v1938_v8, 0.0  ;;  %v3123_v15 = vmul.f32 0.2, %v1938_v8  ;;  %v1942_v18 = vpop.f32.mrb[11].mxu0  ;;  %vm3061_vm10 = vcmp.gt.f32.partialorder %v1979_v11, 0.0  ;;  %v1983_v23 = vpop.f32.mrb[11].mxu1 }
 0x17a   : > { %v3125_v19 = vmul.f32 0.2, %v1979_v11  ;;  %vm3060_vm11 = vcmp.gt.f32.partialorder %v1940_v12, 0.0  ;;  %v3124_v20 = vmul.f32 0.2, %v1940_v12  ;;  %vm3062_vm12 = vcmp.gt.f32.partialorder %v1981_v16, 0.0 }
 0x17b   : > { %v3187_v21 = vsel %vm3059_vm9, %v1938_v8, %v3123_v15  ;;  %v3126_v22 = vmul.f32 0.2, %v1981_v16 }
 0x17c   : > { %v3189_v24 = vsel %vm3061_vm10, %v1979_v11, %v3125_v19  ;;  %v3188_v25 = vsel %vm3060_vm11, %v1940_v12, %v3124_v20 }
 0x17d   : > { %v3974_v26 = vpack.c.bf16 %v3188_v25, %v3187_v21  ;;  %v3190_v27 = vsel %vm3062_vm12, %v1981_v16, %v3126_v22 }
 0x17e   : > { %v3975_v28 = vpack.c.bf16 %v3190_v27, %v3189_v24 }
 0x17f   : > { %v3413_v36 = vrot.slane %v3974_v26, %v4818_v33 }
 0x180   : > { %v3420_v29 = vrot.slane %v3975_v28, %v4818_v33 }
 0x182   : > { %v3421_v30 = vcombine.low %v3413_v36, %v3420_v29  ;;  %v2019_v31 = vpop.f32.mrb[12].mxu0  ;;  %v2060_v34 = vpop.f32.mrb[12].mxu1 }
 0x183   : > { %v2020_v32 = vadd.f32 %v2019_v31, %v4812_v0  ;;  %v2021_v35 = vpop.f32.mrb[13].mxu0  ;;  %v2061_v37 = vadd.f32 %v2060_v34, %v4812_v0  ;;  %v2062_v39 = vpop.f32.mrb[13].mxu1 }
 0x184   : > { %3661 = vst [vmem:[%s4825_s14 + $0x10] sm:$0xff] %v3421_v30  ;;  %v2022_v38 = vadd.f32 %v2021_v35, %v4812_v0  ;;  %v2023_v40 = vpop.f32.mrb[14].mxu0  ;;  %v2063_v42 = vadd.f32 %v2062_v39, %v4812_v0  ;;  %v2064_v43 = vpop.f32.mrb[14].mxu1 }
 0x185   : > { %vm3063_vm13 = vcmp.gt.f32.partialorder %v2020_v32, 0.0  ;;  %v3127_v41 = vmul.f32 0.2, %v2020_v32  ;;  %v2024_v44 = vpop.f32.mrb[15].mxu0  ;;  %vm3065_vm14 = vcmp.gt.f32.partialorder %v2061_v37, 0.0  ;;  %v2065_v49 = vpop.f32.mrb[15].mxu1 }
 0x186   : > { %v3129_v45 = vmul.f32 0.2, %v2061_v37  ;;  %vm3064_vm15 = vcmp.gt.f32.partialorder %v2022_v38, 0.0  ;;  %v3128_v46 = vmul.f32 0.2, %v2022_v38  ;;  %vm3066_vm0 = vcmp.gt.f32.partialorder %v2063_v42, 0.0 }
 0x187   : > { %v3191_v47 = vsel %vm3063_vm13, %v2020_v32, %v3127_v41  ;;  %v3130_v48 = vmul.f32 0.2, %v2063_v42 }
 0x188   : > { %v3193_v50 = vsel %vm3065_vm14, %v2061_v37, %v3129_v45  ;;  %v3192_v51 = vsel %vm3064_vm15, %v2022_v38, %v3128_v46 }
 0x189   : > { %v3976_v52 = vpack.c.bf16 %v3192_v51, %v3191_v47  ;;  %v3194_v53 = vsel %vm3066_vm0, %v2063_v42, %v3130_v48 }
 0x18a   : > { %v3977_v54 = vpack.c.bf16 %v3194_v53, %v3193_v50 }
 0x18b   : > { %v3430_v55 = vrot.slane %v3976_v52, %v4818_v33 }
 0x18c   : > { %v3437_v56 = vrot.slane %v3977_v54, %v4818_v33 }
 0x18e   : > { %v3438_v57 = vcombine.low %v3430_v55, %v3437_v56  ;;  %v2101_v58 = vpop.f32.mrb[16].mxu0  ;;  %v2142_v60 = vpop.f32.mrb[16].mxu1 }
 0x18f   : > { %v2102_v59 = vadd.f32 %v2101_v58, %v4812_v0  ;;  %v2103_v61 = vpop.f32.mrb[17].mxu0  ;;  %v2143_v62 = vadd.f32 %v2142_v60, %v4812_v0  ;;  %v2144_v1 = vpop.f32.mrb[17].mxu1 }
 0x190   : > { %3662 = vst [vmem:[%s4825_s14 + $0x18] sm:$0xff] %v3438_v57  ;;  %v2104_v63 = vadd.f32 %v2103_v61, %v4812_v0  ;;  %v2105_v2 = vpop.f32.mrb[18].mxu0  ;;  %v2145_v4 = vadd.f32 %v2144_v1, %v4812_v0  ;;  %v2146_v5 = vpop.f32.mrb[18].mxu1 }
 0x191   : > { %vm3067_vm1 = vcmp.gt.f32.partialorder %v2102_v59, 0.0  ;;  %v3131_v3 = vmul.f32 0.2, %v2102_v59  ;;  %v2106_v6 = vpop.f32.mrb[19].mxu0  ;;  %vm3069_vm2 = vcmp.gt.f32.partialorder %v2143_v62, 0.0  ;;  %v2147_v11 = vpop.f32.mrb[19].mxu1 }
 0x192   : > { %v3133_v7 = vmul.f32 0.2, %v2143_v62  ;;  %vm3068_vm3 = vcmp.gt.f32.partialorder %v2104_v63, 0.0  ;;  %v3132_v8 = vmul.f32 0.2, %v2104_v63  ;;  %vm3070_vm4 = vcmp.gt.f32.partialorder %v2145_v4, 0.0 }
 0x193   : > { %v3195_v9 = vsel %vm3067_vm1, %v2102_v59, %v3131_v3  ;;  %v3134_v10 = vmul.f32 0.2, %v2145_v4 }
 0x194   : > { %v3197_v12 = vsel %vm3069_vm2, %v2143_v62, %v3133_v7  ;;  %v3196_v13 = vsel %vm3068_vm3, %v2104_v63, %v3132_v8 }
 0x195   : > { %v3978_v14 = vpack.c.bf16 %v3196_v13, %v3195_v9  ;;  %v3198_v15 = vsel %vm3070_vm4, %v2145_v4, %v3134_v10 }
 0x196   : > { %v3979_v16 = vpack.c.bf16 %v3198_v15, %v3197_v12 }
 0x197   : > { %v3447_v17 = vrot.slane %v3978_v14, %v4818_v33 }
 0x198   : > { %v3454_v18 = vrot.slane %v3979_v16, %v4818_v33 }
 0x19a   : > { %v3455_v19 = vcombine.low %v3447_v17, %v3454_v18  ;;  %v2183_v20 = vpop.f32.mrb[20].mxu0  ;;  %v2224_v22 = vpop.f32.mrb[20].mxu1 }
 0x19b   : > { %v2184_v21 = vadd.f32 %v2183_v20, %v4812_v0  ;;  %v2185_v23 = vpop.f32.mrb[21].mxu0  ;;  %v2225_v24 = vadd.f32 %v2224_v22, %v4812_v0  ;;  %v2226_v26 = vpop.f32.mrb[21].mxu1 }
 0x19c   : > { %3663 = vst [vmem:[%s4825_s14 + $0x20] sm:$0xff] %v3455_v19  ;;  %v2186_v25 = vadd.f32 %v2185_v23, %v4812_v0  ;;  %v2187_v27 = vpop.f32.mrb[22].mxu0  ;;  %v2227_v36 = vadd.f32 %v2226_v26, %v4812_v0  ;;  %v2228_v29 = vpop.f32.mrb[22].mxu1 }
 0x19d   : > { %vm3071_vm5 = vcmp.gt.f32.partialorder %v2184_v21, 0.0  ;;  %v3135_v28 = vmul.f32 0.2, %v2184_v21  ;;  %v2188_v30 = vpop.f32.mrb[23].mxu0  ;;  %vm3073_vm6 = vcmp.gt.f32.partialorder %v2225_v24, 0.0  ;;  %v2229_v37 = vpop.f32.mrb[23].mxu1 }
 0x19e   : > { %v3137_v31 = vmul.f32 0.2, %v2225_v24  ;;  %vm3072_vm7 = vcmp.gt.f32.partialorder %v2186_v25, 0.0  ;;  %v3136_v32 = vmul.f32 0.2, %v2186_v25  ;;  %vm3074_vm8 = vcmp.gt.f32.partialorder %v2227_v36, 0.0 }
 0x19f   : > { %v3199_v34 = vsel %vm3071_vm5, %v2184_v21, %v3135_v28  ;;  %v3138_v35 = vmul.f32 0.2, %v2227_v36 }
 0x1a0   : > { %v3201_v38 = vsel %vm3073_vm6, %v2225_v24, %v3137_v31  ;;  %v3200_v39 = vsel %vm3072_vm7, %v2186_v25, %v3136_v32 }
 0x1a1   : > { %v3980_v40 = vpack.c.bf16 %v3200_v39, %v3199_v34  ;;  %v3202_v41 = vsel %vm3074_vm8, %v2227_v36, %v3138_v35 }
 0x1a2   : > { %v3981_v42 = vpack.c.bf16 %v3202_v41, %v3201_v38 }
 0x1a3   : > { %v3464_v43 = vrot.slane %v3980_v40, %v4818_v33 }
 0x1a4   : > { %v3471_v44 = vrot.slane %v3981_v42, %v4818_v33 }
 0x1a6   : > { %v3472_v45 = vcombine.low %v3464_v43, %v3471_v44  ;;  %v2265_v46 = vpop.f32.mrb[24].mxu0  ;;  %v2306_v48 = vpop.f32.mrb[24].mxu1 }
 0x1a7   : > { %v2266_v47 = vadd.f32 %v2265_v46, %v4812_v0  ;;  %v2267_v49 = vpop.f32.mrb[25].mxu0  ;;  %v2307_v50 = vadd.f32 %v2306_v48, %v4812_v0  ;;  %v2308_v52 = vpop.f32.mrb[25].mxu1 }
 0x1a8   : > { %3664 = vst [vmem:[%s4825_s14 + $0x28] sm:$0xff] %v3472_v45  ;;  %v2268_v51 = vadd.f32 %v2267_v49, %v4812_v0  ;;  %v2269_v53 = vpop.f32.mrb[26].mxu0  ;;  %v2309_v55 = vadd.f32 %v2308_v52, %v4812_v0  ;;  %v2310_v56 = vpop.f32.mrb[26].mxu1 }
 0x1a9   : > { %vm3075_vm9 = vcmp.gt.f32.partialorder %v2266_v47, 0.0  ;;  %v3139_v54 = vmul.f32 0.2, %v2266_v47  ;;  %v2270_v57 = vpop.f32.mrb[27].mxu0  ;;  %vm3077_vm10 = vcmp.gt.f32.partialorder %v2307_v50, 0.0  ;;  %v2311_v62 = vpop.f32.mrb[27].mxu1 }
 0x1aa   : > { %v3141_v58 = vmul.f32 0.2, %v2307_v50  ;;  %vm3076_vm11 = vcmp.gt.f32.partialorder %v2268_v51, 0.0  ;;  %v3140_v59 = vmul.f32 0.2, %v2268_v51  ;;  %vm3078_vm12 = vcmp.gt.f32.partialorder %v2309_v55, 0.0 }
 0x1ab   : > { %v3203_v60 = vsel %vm3075_vm9, %v2266_v47, %v3139_v54  ;;  %v3142_v61 = vmul.f32 0.2, %v2309_v55 }
 0x1ac   : > { %v3205_v63 = vsel %vm3077_vm10, %v2307_v50, %v3141_v58  ;;  %v3204_v1 = vsel %vm3076_vm11, %v2268_v51, %v3140_v59 }
 0x1ad   : > { %v3982_v2 = vpack.c.bf16 %v3204_v1, %v3203_v60  ;;  %v3206_v3 = vsel %vm3078_vm12, %v2309_v55, %v3142_v61 }
 0x1ae   : > { %v3983_v4 = vpack.c.bf16 %v3206_v3, %v3205_v63 }
 0x1af   : > { %v3481_v5 = vrot.slane %v3982_v2, %v4818_v33 }
 0x1b0   : > { %v3488_v6 = vrot.slane %v3983_v4, %v4818_v33 }
 0x1b2   : > { %v3489_v7 = vcombine.low %v3481_v5, %v3488_v6  ;;  %v2347_v8 = vpop.f32.mrb[28].mxu0  ;;  %v2388_v10 = vpop.f32.mrb[28].mxu1 }
 0x1b3   : > { %v2348_v9 = vadd.f32 %v2347_v8, %v4812_v0  ;;  %v2349_v11 = vpop.f32.mrb[29].mxu0  ;;  %v2389_v12 = vadd.f32 %v2388_v10, %v4812_v0  ;;  %v2390_v14 = vpop.f32.mrb[29].mxu1 }
 0x1b4   : > { %3665 = vst [vmem:[%s4825_s14 + $0x30] sm:$0xff] %v3489_v7  ;;  %v2350_v13 = vadd.f32 %v2349_v11, %v4812_v0  ;;  %v2351_v15 = vpop.f32.mrb[30].mxu0  ;;  %v2391_v17 = vadd.f32 %v2390_v14, %v4812_v0  ;;  %v2392_v18 = vpop.f32.mrb[30].mxu1 }
 0x1b5   : > { %vm3079_vm13 = vcmp.gt.f32.partialorder %v2348_v9, 0.0  ;;  %v3143_v16 = vmul.f32 0.2, %v2348_v9  ;;  %v2352_v19 = vpop.f32.mrb[31].mxu0  ;;  %vm3081_vm14 = vcmp.gt.f32.partialorder %v2389_v12, 0.0  ;;  %v2393_v24 = vpop.f32.mrb[31].mxu1 }
 0x1b6   : > { %v3145_v20 = vmul.f32 0.2, %v2389_v12  ;;  %vm3080_vm15 = vcmp.gt.f32.partialorder %v2350_v13, 0.0  ;;  %v3144_v21 = vmul.f32 0.2, %v2350_v13  ;;  %vm3082_vm0 = vcmp.gt.f32.partialorder %v2391_v17, 0.0 }
 0x1b7   : > { %v3207_v22 = vsel %vm3079_vm13, %v2348_v9, %v3143_v16  ;;  %v3146_v23 = vmul.f32 0.2, %v2391_v17 }
 0x1b8   : > { %v3209_v25 = vsel %vm3081_vm14, %v2389_v12, %v3145_v20  ;;  %v3208_v26 = vsel %vm3080_vm15, %v2350_v13, %v3144_v21 }
 0x1b9   : > { %v3984_v27 = vpack.c.bf16 %v3208_v26, %v3207_v22  ;;  %v3210_v28 = vsel %vm3082_vm0, %v2391_v17, %v3146_v23 }
 0x1ba   : > { %v3985_v36 = vpack.c.bf16 %v3210_v28, %v3209_v25 }
 0x1bb   : > { %v3498_v29 = vrot.slane %v3984_v27, %v4818_v33 }
 0x1bc   : > { %v3505_v30 = vrot.slane %v3985_v36, %v4818_v33 }
 0x1be   : > { %v3506_v31 = vcombine.low %v3498_v29, %v3505_v30  ;;  %v2429_v32 = vpop.f32.mrb[32].mxu0  ;;  %v2470_v35 = vpop.f32.mrb[32].mxu1 }
 0x1bf   : > { %v2430_v34 = vadd.f32 %v2429_v32, %v4812_v0  ;;  %v2431_v37 = vpop.f32.mrb[33].mxu0  ;;  %v2471_v38 = vadd.f32 %v2470_v35, %v4812_v0  ;;  %v2472_v40 = vpop.f32.mrb[33].mxu1 }
 0x1c0   : > { %3666 = vst [vmem:[%s4825_s14 + $0x38] sm:$0xff] %v3506_v31  ;;  %v2432_v39 = vadd.f32 %v2431_v37, %v4812_v0  ;;  %v2433_v41 = vpop.f32.mrb[34].mxu0  ;;  %v2473_v43 = vadd.f32 %v2472_v40, %v4812_v0  ;;  %v2474_v44 = vpop.f32.mrb[34].mxu1 }
 0x1c1   : > { %vm3083_vm1 = vcmp.gt.f32.partialorder %v2430_v34, 0.0  ;;  %v3147_v42 = vmul.f32 0.2, %v2430_v34  ;;  %v2434_v45 = vpop.f32.mrb[35].mxu0  ;;  %vm3085_vm2 = vcmp.gt.f32.partialorder %v2471_v38, 0.0  ;;  %v2475_v50 = vpop.f32.mrb[35].mxu1 }
 0x1c2   : > { %v3149_v46 = vmul.f32 0.2, %v2471_v38  ;;  %vm3084_vm3 = vcmp.gt.f32.partialorder %v2432_v39, 0.0  ;;  %v3148_v47 = vmul.f32 0.2, %v2432_v39  ;;  %vm3086_vm4 = vcmp.gt.f32.partialorder %v2473_v43, 0.0 }
 0x1c3   : > { %v3211_v48 = vsel %vm3083_vm1, %v2430_v34, %v3147_v42  ;;  %v3150_v49 = vmul.f32 0.2, %v2473_v43 }
 0x1c4   : > { %v3213_v51 = vsel %vm3085_vm2, %v2471_v38, %v3149_v46  ;;  %v3212_v52 = vsel %vm3084_vm3, %v2432_v39, %v3148_v47 }
 0x1c5   : > { %v3986_v53 = vpack.c.bf16 %v3212_v52, %v3211_v48  ;;  %v3214_v54 = vsel %vm3086_vm4, %v2473_v43, %v3150_v49 }
 0x1c6   : > { %v3987_v55 = vpack.c.bf16 %v3214_v54, %v3213_v51 }
 0x1c7   : > { %v3515_v56 = vrot.slane %v3986_v53, %v4818_v33 }
 0x1c8   : > { %v3522_v57 = vrot.slane %v3987_v55, %v4818_v33 }
 0x1ca   : > { %v3523_v58 = vcombine.low %v3515_v56, %v3522_v57  ;;  %v2511_v59 = vpop.f32.mrb[36].mxu0  ;;  %v2552_v61 = vpop.f32.mrb[36].mxu1 }
 0x1cb   : > { %v2512_v60 = vadd.f32 %v2511_v59, %v4812_v0  ;;  %v2513_v62 = vpop.f32.mrb[37].mxu0  ;;  %v2553_v63 = vadd.f32 %v2552_v61, %v4812_v0  ;;  %v2554_v2 = vpop.f32.mrb[37].mxu1 }
 0x1cc   : > { %3667 = vst [vmem:[%s4825_s14 + $0x40] sm:$0xff] %v3523_v58  ;;  %v2514_v1 = vadd.f32 %v2513_v62, %v4812_v0  ;;  %v2515_v3 = vpop.f32.mrb[38].mxu0  ;;  %v2555_v5 = vadd.f32 %v2554_v2, %v4812_v0  ;;  %v2556_v6 = vpop.f32.mrb[38].mxu1 }
 0x1cd   : > { %vm3087_vm5 = vcmp.gt.f32.partialorder %v2512_v60, 0.0  ;;  %v3151_v4 = vmul.f32 0.2, %v2512_v60  ;;  %v2516_v7 = vpop.f32.mrb[39].mxu0  ;;  %vm3089_vm6 = vcmp.gt.f32.partialorder %v2553_v63, 0.0  ;;  %v2557_v12 = vpop.f32.mrb[39].mxu1 }
 0x1ce   : > { %v3153_v8 = vmul.f32 0.2, %v2553_v63  ;;  %vm3088_vm7 = vcmp.gt.f32.partialorder %v2514_v1, 0.0  ;;  %v3152_v9 = vmul.f32 0.2, %v2514_v1  ;;  %vm3090_vm8 = vcmp.gt.f32.partialorder %v2555_v5, 0.0 }
 0x1cf   : > { %v3215_v10 = vsel %vm3087_vm5, %v2512_v60, %v3151_v4  ;;  %v3154_v11 = vmul.f32 0.2, %v2555_v5 }
 0x1d0   : > { %v3217_v13 = vsel %vm3089_vm6, %v2553_v63, %v3153_v8  ;;  %v3216_v14 = vsel %vm3088_vm7, %v2514_v1, %v3152_v9 }
 0x1d1   : > { %v3988_v15 = vpack.c.bf16 %v3216_v14, %v3215_v10  ;;  %v3218_v16 = vsel %vm3090_vm8, %v2555_v5, %v3154_v11 }
 0x1d2   : > { %v3989_v17 = vpack.c.bf16 %v3218_v16, %v3217_v13 }
 0x1d3   : > { %v3532_v18 = vrot.slane %v3988_v15, %v4818_v33 }
 0x1d4   : > { %v3539_v19 = vrot.slane %v3989_v17, %v4818_v33 }
 0x1d6   : > { %v3540_v20 = vcombine.low %v3532_v18, %v3539_v19  ;;  %v2593_v21 = vpop.f32.mrb[40].mxu0  ;;  %v2634_v23 = vpop.f32.mrb[40].mxu1 }
 0x1d7   : > { %v2594_v22 = vadd.f32 %v2593_v21, %v4812_v0  ;;  %v2595_v24 = vpop.f32.mrb[41].mxu0  ;;  %v2635_v25 = vadd.f32 %v2634_v23, %v4812_v0  ;;  %v2636_v27 = vpop.f32.mrb[41].mxu1 }
 0x1d8   : > { %3668 = vst [vmem:[%s4825_s14 + $0x48] sm:$0xff] %v3540_v20  ;;  %v2596_v26 = vadd.f32 %v2595_v24, %v4812_v0  ;;  %v2597_v28 = vpop.f32.mrb[42].mxu0  ;;  %v2637_v29 = vadd.f32 %v2636_v27, %v4812_v0  ;;  %v2638_v30 = vpop.f32.mrb[42].mxu1 }
 0x1d9   : > { %vm3091_vm9 = vcmp.gt.f32.partialorder %v2594_v22, 0.0  ;;  %v3155_v36 = vmul.f32 0.2, %v2594_v22  ;;  %v2598_v31 = vpop.f32.mrb[43].mxu0  ;;  %vm3093_vm10 = vcmp.gt.f32.partialorder %v2635_v25, 0.0  ;;  %v2639_v38 = vpop.f32.mrb[43].mxu1 }
 0x1da   : > { %v3157_v32 = vmul.f32 0.2, %v2635_v25  ;;  %vm3092_vm11 = vcmp.gt.f32.partialorder %v2596_v26, 0.0  ;;  %v3156_v34 = vmul.f32 0.2, %v2596_v26  ;;  %vm3094_vm12 = vcmp.gt.f32.partialorder %v2637_v29, 0.0 }
 0x1db   : > { %v3219_v35 = vsel %vm3091_vm9, %v2594_v22, %v3155_v36  ;;  %v3158_v37 = vmul.f32 0.2, %v2637_v29 }
 0x1dc   : > { %v3221_v39 = vsel %vm3093_vm10, %v2635_v25, %v3157_v32  ;;  %v3220_v40 = vsel %vm3092_vm11, %v2596_v26, %v3156_v34 }
 0x1dd   : > { %v3990_v41 = vpack.c.bf16 %v3220_v40, %v3219_v35  ;;  %v3222_v42 = vsel %vm3094_vm12, %v2637_v29, %v3158_v37 }
 0x1de   : > { %v3991_v43 = vpack.c.bf16 %v3222_v42, %v3221_v39 }
 0x1df   : > { %v3549_v44 = vrot.slane %v3990_v41, %v4818_v33 }
 0x1e0   : > { %v3556_v45 = vrot.slane %v3991_v43, %v4818_v33 }
 0x1e2   : > { %v3557_v46 = vcombine.low %v3549_v44, %v3556_v45  ;;  %v2675_v47 = vpop.f32.mrb[44].mxu0  ;;  %v2716_v49 = vpop.f32.mrb[44].mxu1 }
 0x1e3   : > { %v2676_v48 = vadd.f32 %v2675_v47, %v4812_v0  ;;  %v2677_v50 = vpop.f32.mrb[45].mxu0  ;;  %v2717_v51 = vadd.f32 %v2716_v49, %v4812_v0  ;;  %v2718_v53 = vpop.f32.mrb[45].mxu1 }
 0x1e4   : > { %3669 = vst [vmem:[%s4825_s14 + $0x50] sm:$0xff] %v3557_v46  ;;  %v2678_v52 = vadd.f32 %v2677_v50, %v4812_v0  ;;  %v2679_v54 = vpop.f32.mrb[46].mxu0  ;;  %v2719_v56 = vadd.f32 %v2718_v53, %v4812_v0  ;;  %v2720_v57 = vpop.f32.mrb[46].mxu1 }
 0x1e5   : > { %vm3095_vm13 = vcmp.gt.f32.partialorder %v2676_v48, 0.0  ;;  %v3159_v55 = vmul.f32 0.2, %v2676_v48  ;;  %v2680_v58 = vpop.f32.mrb[47].mxu0  ;;  %vm3097_vm14 = vcmp.gt.f32.partialorder %v2717_v51, 0.0  ;;  %v2721_v63 = vpop.f32.mrb[47].mxu1 }
 0x1e6   : > { %v3161_v59 = vmul.f32 0.2, %v2717_v51  ;;  %vm3096_vm15 = vcmp.gt.f32.partialorder %v2678_v52, 0.0  ;;  %v3160_v60 = vmul.f32 0.2, %v2678_v52  ;;  %vm3098_vm0 = vcmp.gt.f32.partialorder %v2719_v56, 0.0 }
 0x1e7   : > { %v3223_v61 = vsel %vm3095_vm13, %v2676_v48, %v3159_v55  ;;  %v3162_v62 = vmul.f32 0.2, %v2719_v56 }
 0x1e8   : > { %v3225_v1 = vsel %vm3097_vm14, %v2717_v51, %v3161_v59  ;;  %v3224_v2 = vsel %vm3096_vm15, %v2678_v52, %v3160_v60 }
 0x1e9   : > { %v3992_v3 = vpack.c.bf16 %v3224_v2, %v3223_v61  ;;  %v3226_v4 = vsel %vm3098_vm0, %v2719_v56, %v3162_v62 }
 0x1ea   : > { %v3993_v5 = vpack.c.bf16 %v3226_v4, %v3225_v1 }
 0x1eb   : > { %v3566_v6 = vrot.slane %v3992_v3, %v4818_v33 }
 0x1ec   : > { %v3573_v7 = vrot.slane %v3993_v5, %v4818_v33 }
 0x1ee   : > { %v3574_v8 = vcombine.low %v3566_v6, %v3573_v7  ;;  %v2757_v9 = vpop.f32.mrb[48].mxu0  ;;  %v2798_v11 = vpop.f32.mrb[48].mxu1 }
 0x1ef   : > { %v2758_v10 = vadd.f32 %v2757_v9, %v4812_v0  ;;  %v2759_v12 = vpop.f32.mrb[49].mxu0  ;;  %v2799_v13 = vadd.f32 %v2798_v11, %v4812_v0  ;;  %v2800_v15 = vpop.f32.mrb[49].mxu1 }
 0x1f0   : > { %3670 = vst [vmem:[%s4825_s14 + $0x58] sm:$0xff] %v3574_v8  ;;  %v2760_v14 = vadd.f32 %v2759_v12, %v4812_v0  ;;  %v2761_v16 = vpop.f32.mrb[50].mxu0  ;;  %v2801_v18 = vadd.f32 %v2800_v15, %v4812_v0  ;;  %v2802_v19 = vpop.f32.mrb[50].mxu1 }
 0x1f1   : > { %vm3099_vm1 = vcmp.gt.f32.partialorder %v2758_v10, 0.0  ;;  %v3163_v17 = vmul.f32 0.2, %v2758_v10  ;;  %v2762_v20 = vpop.f32.mrb[51].mxu0  ;;  %vm3101_vm2 = vcmp.gt.f32.partialorder %v2799_v13, 0.0  ;;  %v2803_v25 = vpop.f32.mrb[51].mxu1 }
 0x1f2   : > { %v3165_v21 = vmul.f32 0.2, %v2799_v13  ;;  %vm3100_vm3 = vcmp.gt.f32.partialorder %v2760_v14, 0.0  ;;  %v3164_v22 = vmul.f32 0.2, %v2760_v14  ;;  %vm3102_vm4 = vcmp.gt.f32.partialorder %v2801_v18, 0.0 }
 0x1f3   : > { %v3227_v23 = vsel %vm3099_vm1, %v2758_v10, %v3163_v17  ;;  %v3166_v24 = vmul.f32 0.2, %v2801_v18 }
 0x1f4   : > { %v3229_v26 = vsel %vm3101_vm2, %v2799_v13, %v3165_v21  ;;  %v3228_v27 = vsel %vm3100_vm3, %v2760_v14, %v3164_v22 }
 0x1f5   : > { %v3994_v28 = vpack.c.bf16 %v3228_v27, %v3227_v23  ;;  %v3230_v36 = vsel %vm3102_vm4, %v2801_v18, %v3166_v24 }
 0x1f6   : > { %v3995_v29 = vpack.c.bf16 %v3230_v36, %v3229_v26 }
 0x1f7   : > { %v3583_v30 = vrot.slane %v3994_v28, %v4818_v33 }
 0x1f8   : > { %v3590_v31 = vrot.slane %v3995_v29, %v4818_v33 }
 0x1fa   : > { %v3591_v32 = vcombine.low %v3583_v30, %v3590_v31  ;;  %v2839_v34 = vpop.f32.mrb[52].mxu0  ;;  %v2880_v37 = vpop.f32.mrb[52].mxu1 }
 0x1fb   : > { %v2840_v35 = vadd.f32 %v2839_v34, %v4812_v0  ;;  %v2841_v38 = vpop.f32.mrb[53].mxu0  ;;  %v2881_v39 = vadd.f32 %v2880_v37, %v4812_v0  ;;  %v2882_v41 = vpop.f32.mrb[53].mxu1 }
 0x1fc   : > { %3671 = vst [vmem:[%s4825_s14 + $0x60] sm:$0xff] %v3591_v32  ;;  %v2842_v40 = vadd.f32 %v2841_v38, %v4812_v0  ;;  %v2843_v42 = vpop.f32.mrb[54].mxu0  ;;  %v2883_v44 = vadd.f32 %v2882_v41, %v4812_v0  ;;  %v2884_v45 = vpop.f32.mrb[54].mxu1 }
 0x1fd   : > { %vm3103_vm5 = vcmp.gt.f32.partialorder %v2840_v35, 0.0  ;;  %v3167_v43 = vmul.f32 0.2, %v2840_v35  ;;  %v2844_v46 = vpop.f32.mrb[55].mxu0  ;;  %vm3105_vm6 = vcmp.gt.f32.partialorder %v2881_v39, 0.0  ;;  %v2885_v51 = vpop.f32.mrb[55].mxu1 }
 0x1fe   : > { %v3169_v47 = vmul.f32 0.2, %v2881_v39  ;;  %vm3104_vm7 = vcmp.gt.f32.partialorder %v2842_v40, 0.0  ;;  %v3168_v48 = vmul.f32 0.2, %v2842_v40  ;;  %vm3106_vm8 = vcmp.gt.f32.partialorder %v2883_v44, 0.0 }
 0x1ff   : > { %v3231_v49 = vsel %vm3103_vm5, %v2840_v35, %v3167_v43  ;;  %v3170_v50 = vmul.f32 0.2, %v2883_v44 }
 0x200   : > { %v3233_v52 = vsel %vm3105_vm6, %v2881_v39, %v3169_v47  ;;  %v3232_v53 = vsel %vm3104_vm7, %v2842_v40, %v3168_v48 }
 0x201   : > { %v3996_v54 = vpack.c.bf16 %v3232_v53, %v3231_v49  ;;  %v3234_v55 = vsel %vm3106_vm8, %v2883_v44, %v3170_v50 }
 0x202   : > { %v3997_v56 = vpack.c.bf16 %v3234_v55, %v3233_v52 }
 0x203   : > { %v3600_v57 = vrot.slane %v3996_v54, %v4818_v33 }
 0x204   : > { %v3607_v58 = vrot.slane %v3997_v56, %v4818_v33 }
 0x206   : > { %v3608_v59 = vcombine.low %v3600_v57, %v3607_v58  ;;  %v2921_v60 = vpop.f32.mrb[56].mxu0  ;;  %v2962_v62 = vpop.f32.mrb[56].mxu1 }
 0x207   : > { %v2922_v61 = vadd.f32 %v2921_v60, %v4812_v0  ;;  %v2923_v63 = vpop.f32.mrb[57].mxu0  ;;  %v2963_v1 = vadd.f32 %v2962_v62, %v4812_v0  ;;  %v2964_v3 = vpop.f32.mrb[57].mxu1 }
 0x208   : > { %3672 = vst [vmem:[%s4825_s14 + $0x68] sm:$0xff] %v3608_v59  ;;  %v2924_v2 = vadd.f32 %v2923_v63, %v4812_v0  ;;  %v2925_v4 = vpop.f32.mrb[58].mxu0  ;;  %v2965_v6 = vadd.f32 %v2964_v3, %v4812_v0  ;;  %v2966_v7 = vpop.f32.mrb[58].mxu1 }
 0x209   : > { %vm3107_vm9 = vcmp.gt.f32.partialorder %v2922_v61, 0.0  ;;  %v3171_v5 = vmul.f32 0.2, %v2922_v61  ;;  %v2926_v8 = vpop.f32.mrb[59].mxu0  ;;  %vm3109_vm10 = vcmp.gt.f32.partialorder %v2963_v1, 0.0  ;;  %v2967_v13 = vpop.f32.mrb[59].mxu1 }
 0x20a   : > { %v3173_v9 = vmul.f32 0.2, %v2963_v1  ;;  %vm3108_vm11 = vcmp.gt.f32.partialorder %v2924_v2, 0.0  ;;  %v3172_v10 = vmul.f32 0.2, %v2924_v2  ;;  %vm3110_vm12 = vcmp.gt.f32.partialorder %v2965_v6, 0.0 }
 0x20b   : > { %v3235_v11 = vsel %vm3107_vm9, %v2922_v61, %v3171_v5  ;;  %v3174_v12 = vmul.f32 0.2, %v2965_v6 }
 0x20c   : > { %v3237_v14 = vsel %vm3109_vm10, %v2963_v1, %v3173_v9  ;;  %v3236_v15 = vsel %vm3108_vm11, %v2924_v2, %v3172_v10 }
 0x20d   : > { %v3998_v16 = vpack.c.bf16 %v3236_v15, %v3235_v11  ;;  %v3238_v17 = vsel %vm3110_vm12, %v2965_v6, %v3174_v12 }
 0x20e   : > { %v3999_v18 = vpack.c.bf16 %v3238_v17, %v3237_v14 }
 0x20f   : > { %v3617_v19 = vrot.slane %v3998_v16, %v4818_v33 }
 0x210   : > { %v3624_v20 = vrot.slane %v3999_v18, %v4818_v33 }
 0x212   : > { %v3625_v21 = vcombine.low %v3617_v19, %v3624_v20  ;;  %v3003_v22 = vpop.f32.mrb[60].mxu0  ;;  %v3044_v24 = vpop.f32.mrb[60].mxu1 }
 0x213   : > { %v3004_v23 = vadd.f32 %v3003_v22, %v4812_v0  ;;  %v3005_v25 = vpop.f32.mrb[61].mxu0  ;;  %v3045_v26 = vadd.f32 %v3044_v24, %v4812_v0  ;;  %v3046_v28 = vpop.f32.mrb[61].mxu1 }
 0x214   : > { %3673 = vst [vmem:[%s4825_s14 + $0x70] sm:$0xff] %v3625_v21  ;;  %v3006_v27 = vadd.f32 %v3005_v25, %v4812_v0  ;;  %v3007_v36 = vpop.f32.mrb[62].mxu0  ;;  %v3047_v30 = vadd.f32 %v3046_v28, %v4812_v0  ;;  %v3048_v31 = vpop.f32.mrb[62].mxu1 }
 0x215   : > { %vm3111_vm13 = vcmp.gt.f32.partialorder %v3004_v23, 0.0  ;;  %v3175_v29 = vmul.f32 0.2, %v3004_v23  ;;  %v3008_v32 = vpop.f32.mrb[63].mxu0  ;;  %vm3113_vm14 = vcmp.gt.f32.partialorder %v3045_v26, 0.0  ;;  %v3049_v39 = vpop.f32.mrb[63].mxu1 }
 0x216   : > { %v3177_v34 = vmul.f32 0.2, %v3045_v26  ;;  %vm3112_vm15 = vcmp.gt.f32.partialorder %v3006_v27, 0.0  ;;  %v3176_v35 = vmul.f32 0.2, %v3006_v27  ;;  %vm3114_vm0 = vcmp.gt.f32.partialorder %v3047_v30, 0.0 }
 0x217   : > { %v3239_v37 = vsel %vm3111_vm13, %v3004_v23, %v3175_v29  ;;  %v3178_v38 = vmul.f32 0.2, %v3047_v30 }
 0x218   : > { %v3241_v40 = vsel %vm3113_vm14, %v3045_v26, %v3177_v34  ;;  %v3240_v41 = vsel %vm3112_vm15, %v3006_v27, %v3176_v35 }
 0x219   : > { %v4000_v42 = vpack.c.bf16 %v3240_v41, %v3239_v37  ;;  %v3242_v43 = vsel %vm3114_vm0, %v3047_v30, %v3178_v38 }
 0x21a   : > { %v4001_v44 = vpack.c.bf16 %v3242_v43, %v3241_v40 }
 0x21b   : > { %v3634_v45 = vrot.slane %v4000_v42, %v4818_v33 }
 0x21c   : > { %v3641_v0 = vrot.slane %v4001_v44, %v4818_v33 }
 0x21e   : > { %v3642_v46 = vcombine.low %v3634_v45, %v3641_v0 }
 0x220   : > { %3674 = vst [vmem:[%s4825_s14 + $0x78] sm:$0xff] %v3642_v46 }
 0x221 PF: > { %p10_p9 = scmp.ge.s32.totalorder %s4098_s16, 18   ;;  %s4947_s12 = smov %s4053_s13 }
 0x222   : > { %s4948_s13 = smov %s4107_s19  ;;  %s4949_s14 = smov %s4098_s16 }
 0x223   :  { %12 = sbr.rel (!%p10_p9) target bundleno = 2 (0x2), region = 90 }

// kernel: _lambda_.9
= control target key start
LH: loop header
LB: loop body
LE: loop exit
PB: predicated region body
PF: predicated region fallthrough
CT: control target
= control target key end

     0   :  { %s4657_s12 = smov 0   ;;  %s4659_s13 = smov 0   ;;  %s5748_s0 = inlined_call_operand.vmem [shape: bf16[4,64], index: 0, kind: input, shape index: {}]   ;;  %s5749_s1 = inlined_call_operand.vmem [shape: bf16[64,32768], index: 1, kind: input, shape index: {}]   ;;  %s5750_s2 = inlined_call_operand.vmem [shape: f32[4,1], index: 2, kind: input, shape index: {}]   ;;  %s5751_s3 = inlined_call_operand.vmem [shape: bf16[4,32768], index: 3, kind: output, shape index: {}]  }
   0x1   :  { %s4661_s14 = smov 0  }
   0x2 LB: > { %s4249_s15 = sadd.s32 4294967295, %s4633_s14   ;;  %s4674_s16 = sadd.s32 1, %s4633_s14   ;;  %s4633_s14 = sphi %s4661_s14, %s5754_s14   ;;  %s4629_s13 = sphi %s4659_s13, %s5753_s13   ;;  %s4625_s12 = sphi %s4657_s12, %s5752_s12  }
   0x3   : > { %s38_s17 = ssub.s32 %s4633_s14, %s4674_s16  ;;  %s41_s18 = sadd.s32 1, %s4629_s13 }
   0x4   : > { %p39_p0 = scmp.eq.s32.totalorder %s38_s17, 0  ;;  %p48_p1 = scmp.ne.s32.totalorder %s4629_s13, %s4625_s12 }
   0x5   : > { %p49_p2 = scmp.eq.s32.totalorder %s4633_s14, 0  ;;  %p4252_p4 = scmp.ge.s32.totalorder %s4633_s14, 4 }
   0x6   : > { %s4683_s19 = scalar_select %p39_p0, %s4629_s13, %s41_s18  }
   0x7   : > { %p50_p3 = por %p49_p2, %p48_p1  ;;  %127 = sbr.rel (%p4252_p4) target bundleno = 146 (0x92), region = 24 }
   0xe   : > { %130 = sbr.rel (!%p50_p3) target bundleno = 146 (0x92), region = 28  ;;  %s132_s20 = sand.u32 (%p50_p3), 1, %s4629_s13  }
   0xf   : > { %s4582_s21 = sshll.u32 (%p50_p3), %s4633_s14, 8  ;;  %s4253_s22 = sshll.u32 (%p50_p3), %s132_s20, 11 }
  0x10   : > { %s4691_s25 = scalar_lea.vmem (%p50_p3), %s5749_s1, %s4582_s21  ;;  %s4696_s26 = scalar_lea.vmem (%p50_p3), [#allocation2], %s4253_s22 }
  0x11   : > { %v150_v0 = vld [vmem:[%s4691_s25] sm:$0xff] (%p50_p3)  ;;  %v152_v1 = vld [vmem:[%s4691_s25 + $0x8] sm:$0xff] (%p50_p3)  ;;  %v154_v2 = vld [vmem:[%s4691_s25 + $0x10] sm:$0xff] (%p50_p3) }
  0x12   : > { %151 = vst [vmem:[%s4696_s26] sm:$0xff] (%p50_p3), %v150_v0  ;;  %153 = vst [vmem:[%s4696_s26 + $0x8] sm:$0xff] (%p50_p3), %v152_v1  ;;  %v156_v3 = vld [vmem:[%s4691_s25 + $0x18] sm:$0xff] (%p50_p3)  ;;  %v158_v4 = vld [vmem:[%s4691_s25 + $0x20] sm:$0xff] (%p50_p3) }
  0x13   : > { %155 = vst [vmem:[%s4696_s26 + $0x10] sm:$0xff] (%p50_p3), %v154_v2  ;;  %v160_v5 = vld [vmem:[%s4691_s25 + $0x28] sm:$0xff] (%p50_p3)  ;;  %157 = vst [vmem:[%s4696_s26 + $0x18] sm:$0xff] (%p50_p3), %v156_v3  ;;  %v162_v6 = vld [vmem:[%s4691_s25 + $0x30] sm:$0xff] (%p50_p3) }
  0x14   : > { %159 = vst [vmem:[%s4696_s26 + $0x20] sm:$0xff] (%p50_p3), %v158_v4  ;;  %161 = vst [vmem:[%s4696_s26 + $0x28] sm:$0xff] (%p50_p3), %v160_v5  ;;  %v164_v7 = vld [vmem:[%s4691_s25 + $0x38] sm:$0xff] (%p50_p3)  ;;  %v166_v8 = vld [vmem:[%s4691_s25 + $0x40] sm:$0xff] (%p50_p3) }
  0x15   : > { %163 = vst [vmem:[%s4696_s26 + $0x30] sm:$0xff] %v162_v6  ;;  %165 = vst [vmem:[%s4696_s26 + $0x38] sm:$0xff] %v164_v7  ;;  %v168_v9 = vld [vmem:[%s4691_s25 + $0x48] sm:$0xff]  ;;  %v170_v10 = vld [vmem:[%s4691_s25 + $0x50] sm:$0xff] }
  0x16   : > { %167 = vst [vmem:[%s4696_s26 + $0x40] sm:$0xff] %v166_v8  ;;  %v172_v11 = vld [vmem:[%s4691_s25 + $0x58] sm:$0xff]  ;;  %169 = vst [vmem:[%s4696_s26 + $0x48] sm:$0xff] %v168_v9  ;;  %v174_v12 = vld [vmem:[%s4691_s25 + $0x60] sm:$0xff] }
  0x17   : > { %171 = vst [vmem:[%s4696_s26 + $0x50] sm:$0xff] %v170_v10  ;;  %173 = vst [vmem:[%s4696_s26 + $0x58] sm:$0xff] %v172_v11  ;;  %v176_v13 = vld [vmem:[%s4691_s25 + $0x68] sm:$0xff]  ;;  %v178_v14 = vld [vmem:[%s4691_s25 + $0x70] sm:$0xff] }
  0x18   : > { %175 = vst [vmem:[%s4696_s26 + $0x60] sm:$0xff] %v174_v12  ;;  %177 = vst [vmem:[%s4696_s26 + $0x68] sm:$0xff] %v176_v13  ;;  %v180_v15 = vld [vmem:[%s4691_s25 + $0x78] sm:$0xff]  ;;  %v182_v16 = vld [vmem:[%s4691_s25 + $0x80] sm:$0xff] }
  0x19   : > { %179 = vst [vmem:[%s4696_s26 + $0x70] sm:$0xff] %v178_v14  ;;  %v184_v17 = vld [vmem:[%s4691_s25 + $0x88] sm:$0xff]  ;;  %181 = vst [vmem:[%s4696_s26 + $0x78] sm:$0xff] %v180_v15  ;;  %v186_v18 = vld [vmem:[%s4691_s25 + $0x90] sm:$0xff] }
  0x1a   : > { %183 = vst [vmem:[%s4696_s26 + $0x80] sm:$0xff] %v182_v16  ;;  %185 = vst [vmem:[%s4696_s26 + $0x88] sm:$0xff] %v184_v17  ;;  %v188_v19 = vld [vmem:[%s4691_s25 + $0x98] sm:$0xff]  ;;  %v190_v20 = vld [vmem:[%s4691_s25 + $0xa0] sm:$0xff] }
  0x1b   : > { %187 = vst [vmem:[%s4696_s26 + $0x90] sm:$0xff] %v186_v18  ;;  %189 = vst [vmem:[%s4696_s26 + $0x98] sm:$0xff] %v188_v19  ;;  %v192_v21 = vld [vmem:[%s4691_s25 + $0xa8] sm:$0xff]  ;;  %v194_v22 = vld [vmem:[%s4691_s25 + $0xb0] sm:$0xff] }
  0x1c   : > { %191 = vst [vmem:[%s4696_s26 + $0xa0] sm:$0xff] %v190_v20  ;;  %v196_v23 = vld [vmem:[%s4691_s25 + $0xb8] sm:$0xff]  ;;  %193 = vst [vmem:[%s4696_s26 + $0xa8] sm:$0xff] %v192_v21  ;;  %v198_v24 = vld [vmem:[%s4691_s25 + $0xc0] sm:$0xff] }
  0x1d   : > { %195 = vst [vmem:[%s4696_s26 + $0xb0] sm:$0xff] %v194_v22  ;;  %197 = vst [vmem:[%s4696_s26 + $0xb8] sm:$0xff] %v196_v23  ;;  %v200_v25 = vld [vmem:[%s4691_s25 + $0xc8] sm:$0xff]  ;;  %v202_v26 = vld [vmem:[%s4691_s25 + $0xd0] sm:$0xff] }
  0x1e   : > { %199 = vst [vmem:[%s4696_s26 + $0xc0] sm:$0xff] %v198_v24  ;;  %201 = vst [vmem:[%s4696_s26 + $0xc8] sm:$0xff] %v200_v25  ;;  %v204_v27 = vld [vmem:[%s4691_s25 + $0xd8] sm:$0xff]  ;;  %v206_v28 = vld [vmem:[%s4691_s25 + $0xe0] sm:$0xff] }
  0x1f   : > { %203 = vst [vmem:[%s4696_s26 + $0xd0] sm:$0xff] %v202_v26  ;;  %v208_v29 = vld [vmem:[%s4691_s25 + $0xe8] sm:$0xff]  ;;  %205 = vst [vmem:[%s4696_s26 + $0xd8] sm:$0xff] %v204_v27  ;;  %v210_v30 = vld [vmem:[%s4691_s25 + $0xf0] sm:$0xff] }
  0x20   : > { %207 = vst [vmem:[%s4696_s26 + $0xe0] sm:$0xff] %v206_v28  ;;  %209 = vst [vmem:[%s4696_s26 + $0xe8] sm:$0xff] %v208_v29  ;;  %v212_v31 = vld [vmem:[%s4691_s25 + $0xf8] sm:$0xff]  ;;  %v214_v32 = vld [vmem:[%s4691_s25 + $0x400] sm:$0xff] }
  0x21   : > { %211 = vst [vmem:[%s4696_s26 + $0xf0] sm:$0xff] %v210_v30  ;;  %213 = vst [vmem:[%s4696_s26 + $0xf8] sm:$0xff] %v212_v31  ;;  %v216_v33 = vld [vmem:[%s4691_s25 + $0x408] sm:$0xff]  ;;  %v218_v34 = vld [vmem:[%s4691_s25 + $0x410] sm:$0xff] }
  0x22   : > { %215 = vst [vmem:[%s4696_s26 + $0x100] sm:$0xff] %v214_v32  ;;  %v220_v35 = vld [vmem:[%s4691_s25 + $0x418] sm:$0xff]  ;;  %217 = vst [vmem:[%s4696_s26 + $0x108] sm:$0xff] %v216_v33  ;;  %v222_v36 = vld [vmem:[%s4691_s25 + $0x420] sm:$0xff] }
  0x23   : > { %219 = vst [vmem:[%s4696_s26 + $0x110] sm:$0xff] %v218_v34  ;;  %221 = vst [vmem:[%s4696_s26 + $0x118] sm:$0xff] %v220_v35  ;;  %v224_v37 = vld [vmem:[%s4691_s25 + $0x428] sm:$0xff]  ;;  %v226_v38 = vld [vmem:[%s4691_s25 + $0x430] sm:$0xff] }
  0x24   : > { %223 = vst [vmem:[%s4696_s26 + $0x120] sm:$0xff] %v222_v36  ;;  %225 = vst [vmem:[%s4696_s26 + $0x128] sm:$0xff] %v224_v37  ;;  %v228_v39 = vld [vmem:[%s4691_s25 + $0x438] sm:$0xff]  ;;  %v230_v40 = vld [vmem:[%s4691_s25 + $0x440] sm:$0xff] }
  0x25   : > { %227 = vst [vmem:[%s4696_s26 + $0x130] sm:$0xff] %v226_v38  ;;  %v232_v41 = vld [vmem:[%s4691_s25 + $0x448] sm:$0xff]  ;;  %229 = vst [vmem:[%s4696_s26 + $0x138] sm:$0xff] %v228_v39  ;;  %v234_v42 = vld [vmem:[%s4691_s25 + $0x450] sm:$0xff] }
  0x26   : > { %231 = vst [vmem:[%s4696_s26 + $0x140] sm:$0xff] %v230_v40  ;;  %233 = vst [vmem:[%s4696_s26 + $0x148] sm:$0xff] %v232_v41  ;;  %v236_v43 = vld [vmem:[%s4691_s25 + $0x458] sm:$0xff]  ;;  %v238_v44 = vld [vmem:[%s4691_s25 + $0x460] sm:$0xff] }
  0x27   : > { %235 = vst [vmem:[%s4696_s26 + $0x150] sm:$0xff] %v234_v42  ;;  %237 = vst [vmem:[%s4696_s26 + $0x158] sm:$0xff] %v236_v43  ;;  %v240_v45 = vld [vmem:[%s4691_s25 + $0x468] sm:$0xff]  ;;  %v242_v46 = vld [vmem:[%s4691_s25 + $0x470] sm:$0xff] }
  0x28   : > { %239 = vst [vmem:[%s4696_s26 + $0x160] sm:$0xff] %v238_v44  ;;  %v244_v47 = vld [vmem:[%s4691_s25 + $0x478] sm:$0xff]  ;;  %241 = vst [vmem:[%s4696_s26 + $0x168] sm:$0xff] %v240_v45  ;;  %v246_v48 = vld [vmem:[%s4691_s25 + $0x480] sm:$0xff] }
  0x29   : > { %243 = vst [vmem:[%s4696_s26 + $0x170] sm:$0xff] %v242_v46  ;;  %245 = vst [vmem:[%s4696_s26 + $0x178] sm:$0xff] %v244_v47  ;;  %v248_v49 = vld [vmem:[%s4691_s25 + $0x488] sm:$0xff]  ;;  %v250_v50 = vld [vmem:[%s4691_s25 + $0x490] sm:$0xff] }
  0x2a   : > { %247 = vst [vmem:[%s4696_s26 + $0x180] sm:$0xff] %v246_v48  ;;  %249 = vst [vmem:[%s4696_s26 + $0x188] sm:$0xff] %v248_v49  ;;  %v252_v51 = vld [vmem:[%s4691_s25 + $0x498] sm:$0xff]  ;;  %v254_v52 = vld [vmem:[%s4691_s25 + $0x4a0] sm:$0xff] }
  0x2b   : > { %251 = vst [vmem:[%s4696_s26 + $0x190] sm:$0xff] %v250_v50  ;;  %v256_v53 = vld [vmem:[%s4691_s25 + $0x4a8] sm:$0xff]  ;;  %253 = vst [vmem:[%s4696_s26 + $0x198] sm:$0xff] %v252_v51  ;;  %v258_v54 = vld [vmem:[%s4691_s25 + $0x4b0] sm:$0xff] }
  0x2c   : > { %255 = vst [vmem:[%s4696_s26 + $0x1a0] sm:$0xff] %v254_v52  ;;  %257 = vst [vmem:[%s4696_s26 + $0x1a8] sm:$0xff] %v256_v53  ;;  %v260_v55 = vld [vmem:[%s4691_s25 + $0x4b8] sm:$0xff]  ;;  %v262_v56 = vld [vmem:[%s4691_s25 + $0x4c0] sm:$0xff] }
  0x2d   : > { %259 = vst [vmem:[%s4696_s26 + $0x1b0] sm:$0xff] %v258_v54  ;;  %261 = vst [vmem:[%s4696_s26 + $0x1b8] sm:$0xff] %v260_v55  ;;  %v264_v57 = vld [vmem:[%s4691_s25 + $0x4c8] sm:$0xff]  ;;  %v266_v58 = vld [vmem:[%s4691_s25 + $0x4d0] sm:$0xff] }
  0x2e   : > { %263 = vst [vmem:[%s4696_s26 + $0x1c0] sm:$0xff] %v262_v56  ;;  %v268_v59 = vld [vmem:[%s4691_s25 + $0x4d8] sm:$0xff]  ;;  %265 = vst [vmem:[%s4696_s26 + $0x1c8] sm:$0xff] %v264_v57  ;;  %v270_v60 = vld [vmem:[%s4691_s25 + $0x4e0] sm:$0xff] }
  0x2f   : > { %267 = vst [vmem:[%s4696_s26 + $0x1d0] sm:$0xff] %v266_v58  ;;  %269 = vst [vmem:[%s4696_s26 + $0x1d8] sm:$0xff] %v268_v59  ;;  %v272_v61 = vld [vmem:[%s4691_s25 + $0x4e8] sm:$0xff]  ;;  %v274_v62 = vld [vmem:[%s4691_s25 + $0x4f0] sm:$0xff] }
  0x30   : > { %271 = vst [vmem:[%s4696_s26 + $0x1e0] sm:$0xff] %v270_v60  ;;  %273 = vst [vmem:[%s4696_s26 + $0x1e8] sm:$0xff] %v272_v61  ;;  %v276_v63 = vld [vmem:[%s4691_s25 + $0x4f8] sm:$0xff]  ;;  %v278_v0 = vld [vmem:[%s4691_s25 + $0x800] sm:$0xff] }
  0x31   : > { %275 = vst [vmem:[%s4696_s26 + $0x1f0] sm:$0xff] %v274_v62  ;;  %v280_v1 = vld [vmem:[%s4691_s25 + $0x808] sm:$0xff]  ;;  %277 = vst [vmem:[%s4696_s26 + $0x1f8] sm:$0xff] %v276_v63  ;;  %v282_v2 = vld [vmem:[%s4691_s25 + $0x810] sm:$0xff] }
  0x32   : > { %279 = vst [vmem:[%s4696_s26 + $0x200] sm:$0xff] %v278_v0  ;;  %281 = vst [vmem:[%s4696_s26 + $0x208] sm:$0xff] %v280_v1  ;;  %v284_v3 = vld [vmem:[%s4691_s25 + $0x818] sm:$0xff]  ;;  %v286_v4 = vld [vmem:[%s4691_s25 + $0x820] sm:$0xff] }
  0x33   : > { %283 = vst [vmem:[%s4696_s26 + $0x210] sm:$0xff] %v282_v2  ;;  %285 = vst [vmem:[%s4696_s26 + $0x218] sm:$0xff] %v284_v3  ;;  %v288_v5 = vld [vmem:[%s4691_s25 + $0x828] sm:$0xff]  ;;  %v290_v6 = vld [vmem:[%s4691_s25 + $0x830] sm:$0xff] }
  0x34   : > { %287 = vst [vmem:[%s4696_s26 + $0x220] sm:$0xff] %v286_v4  ;;  %v292_v7 = vld [vmem:[%s4691_s25 + $0x838] sm:$0xff]  ;;  %289 = vst [vmem:[%s4696_s26 + $0x228] sm:$0xff] %v288_v5  ;;  %v294_v8 = vld [vmem:[%s4691_s25 + $0x840] sm:$0xff] }
  0x35   : > { %291 = vst [vmem:[%s4696_s26 + $0x230] sm:$0xff] %v290_v6  ;;  %293 = vst [vmem:[%s4696_s26 + $0x238] sm:$0xff] %v292_v7  ;;  %v296_v9 = vld [vmem:[%s4691_s25 + $0x848] sm:$0xff]  ;;  %v298_v10 = vld [vmem:[%s4691_s25 + $0x850] sm:$0xff] }
  0x36   : > { %295 = vst [vmem:[%s4696_s26 + $0x240] sm:$0xff] %v294_v8  ;;  %297 = vst [vmem:[%s4696_s26 + $0x248] sm:$0xff] %v296_v9  ;;  %v300_v11 = vld [vmem:[%s4691_s25 + $0x858] sm:$0xff]  ;;  %v302_v12 = vld [vmem:[%s4691_s25 + $0x860] sm:$0xff] }
  0x37   : > { %299 = vst [vmem:[%s4696_s26 + $0x250] sm:$0xff] %v298_v10  ;;  %v304_v13 = vld [vmem:[%s4691_s25 + $0x868] sm:$0xff]  ;;  %301 = vst [vmem:[%s4696_s26 + $0x258] sm:$0xff] %v300_v11  ;;  %v306_v14 = vld [vmem:[%s4691_s25 + $0x870] sm:$0xff] }
  0x38   : > { %303 = vst [vmem:[%s4696_s26 + $0x260] sm:$0xff] %v302_v12  ;;  %305 = vst [vmem:[%s4696_s26 + $0x268] sm:$0xff] %v304_v13  ;;  %v308_v15 = vld [vmem:[%s4691_s25 + $0x878] sm:$0xff]  ;;  %v310_v16 = vld [vmem:[%s4691_s25 + $0x880] sm:$0xff] }
  0x39   : > { %307 = vst [vmem:[%s4696_s26 + $0x270] sm:$0xff] %v306_v14  ;;  %309 = vst [vmem:[%s4696_s26 + $0x278] sm:$0xff] %v308_v15  ;;  %v312_v17 = vld [vmem:[%s4691_s25 + $0x888] sm:$0xff]  ;;  %v314_v18 = vld [vmem:[%s4691_s25 + $0x890] sm:$0xff] }
  0x3a   : > { %311 = vst [vmem:[%s4696_s26 + $0x280] sm:$0xff] %v310_v16  ;;  %v316_v19 = vld [vmem:[%s4691_s25 + $0x898] sm:$0xff]  ;;  %313 = vst [vmem:[%s4696_s26 + $0x288] sm:$0xff] %v312_v17  ;;  %v318_v20 = vld [vmem:[%s4691_s25 + $0x8a0] sm:$0xff] }
  0x3b   : > { %315 = vst [vmem:[%s4696_s26 + $0x290] sm:$0xff] %v314_v18  ;;  %317 = vst [vmem:[%s4696_s26 + $0x298] sm:$0xff] %v316_v19  ;;  %v320_v21 = vld [vmem:[%s4691_s25 + $0x8a8] sm:$0xff]  ;;  %v322_v22 = vld [vmem:[%s4691_s25 + $0x8b0] sm:$0xff] }
  0x3c   : > { %319 = vst [vmem:[%s4696_s26 + $0x2a0] sm:$0xff] %v318_v20  ;;  %321 = vst [vmem:[%s4696_s26 + $0x2a8] sm:$0xff] %v320_v21  ;;  %v324_v23 = vld [vmem:[%s4691_s25 + $0x8b8] sm:$0xff]  ;;  %v326_v24 = vld [vmem:[%s4691_s25 + $0x8c0] sm:$0xff] }
  0x3d   : > { %323 = vst [vmem:[%s4696_s26 + $0x2b0] sm:$0xff] %v322_v22  ;;  %v328_v25 = vld [vmem:[%s4691_s25 + $0x8c8] sm:$0xff]  ;;  %325 = vst [vmem:[%s4696_s26 + $0x2b8] sm:$0xff] %v324_v23  ;;  %v330_v26 = vld [vmem:[%s4691_s25 + $0x8d0] sm:$0xff] }
  0x3e   : > { %327 = vst [vmem:[%s4696_s26 + $0x2c0] sm:$0xff] %v326_v24  ;;  %329 = vst [vmem:[%s4696_s26 + $0x2c8] sm:$0xff] %v328_v25  ;;  %v332_v27 = vld [vmem:[%s4691_s25 + $0x8d8] sm:$0xff]  ;;  %v334_v28 = vld [vmem:[%s4691_s25 + $0x8e0] sm:$0xff] }
  0x3f   : > { %331 = vst [vmem:[%s4696_s26 + $0x2d0] sm:$0xff] %v330_v26  ;;  %333 = vst [vmem:[%s4696_s26 + $0x2d8] sm:$0xff] %v332_v27  ;;  %v336_v29 = vld [vmem:[%s4691_s25 + $0x8e8] sm:$0xff]  ;;  %v338_v30 = vld [vmem:[%s4691_s25 + $0x8f0] sm:$0xff] }
  0x40   : > { %335 = vst [vmem:[%s4696_s26 + $0x2e0] sm:$0xff] %v334_v28  ;;  %v340_v31 = vld [vmem:[%s4691_s25 + $0x8f8] sm:$0xff]  ;;  %337 = vst [vmem:[%s4696_s26 + $0x2e8] sm:$0xff] %v336_v29  ;;  %v342_v32 = vld [vmem:[%s4691_s25 + $0xc00] sm:$0xff] }
  0x41   : > { %339 = vst [vmem:[%s4696_s26 + $0x2f0] sm:$0xff] %v338_v30  ;;  %341 = vst [vmem:[%s4696_s26 + $0x2f8] sm:$0xff] %v340_v31  ;;  %v344_v33 = vld [vmem:[%s4691_s25 + $0xc08] sm:$0xff]  ;;  %v346_v34 = vld [vmem:[%s4691_s25 + $0xc10] sm:$0xff] }
  0x42   : > { %343 = vst [vmem:[%s4696_s26 + $0x300] sm:$0xff] %v342_v32  ;;  %345 = vst [vmem:[%s4696_s26 + $0x308] sm:$0xff] %v344_v33  ;;  %v348_v35 = vld [vmem:[%s4691_s25 + $0xc18] sm:$0xff]  ;;  %v350_v36 = vld [vmem:[%s4691_s25 + $0xc20] sm:$0xff] }
  0x43   : > { %347 = vst [vmem:[%s4696_s26 + $0x310] sm:$0xff] %v346_v34  ;;  %v352_v37 = vld [vmem:[%s4691_s25 + $0xc28] sm:$0xff]  ;;  %349 = vst [vmem:[%s4696_s26 + $0x318] sm:$0xff] %v348_v35  ;;  %v354_v38 = vld [vmem:[%s4691_s25 + $0xc30] sm:$0xff] }
  0x44   : > { %351 = vst [vmem:[%s4696_s26 + $0x320] sm:$0xff] %v350_v36  ;;  %353 = vst [vmem:[%s4696_s26 + $0x328] sm:$0xff] %v352_v37  ;;  %v356_v39 = vld [vmem:[%s4691_s25 + $0xc38] sm:$0xff]  ;;  %v358_v40 = vld [vmem:[%s4691_s25 + $0xc40] sm:$0xff] }
  0x45   : > { %355 = vst [vmem:[%s4696_s26 + $0x330] sm:$0xff] %v354_v38  ;;  %357 = vst [vmem:[%s4696_s26 + $0x338] sm:$0xff] %v356_v39  ;;  %v360_v41 = vld [vmem:[%s4691_s25 + $0xc48] sm:$0xff]  ;;  %v362_v42 = vld [vmem:[%s4691_s25 + $0xc50] sm:$0xff] }
  0x46   : > { %359 = vst [vmem:[%s4696_s26 + $0x340] sm:$0xff] %v358_v40  ;;  %v364_v43 = vld [vmem:[%s4691_s25 + $0xc58] sm:$0xff]  ;;  %361 = vst [vmem:[%s4696_s26 + $0x348] sm:$0xff] %v360_v41  ;;  %v366_v44 = vld [vmem:[%s4691_s25 + $0xc60] sm:$0xff] }
  0x47   : > { %363 = vst [vmem:[%s4696_s26 + $0x350] sm:$0xff] %v362_v42  ;;  %365 = vst [vmem:[%s4696_s26 + $0x358] sm:$0xff] %v364_v43  ;;  %v368_v45 = vld [vmem:[%s4691_s25 + $0xc68] sm:$0xff]  ;;  %v370_v46 = vld [vmem:[%s4691_s25 + $0xc70] sm:$0xff] }
  0x48   : > { %367 = vst [vmem:[%s4696_s26 + $0x360] sm:$0xff] %v366_v44  ;;  %369 = vst [vmem:[%s4696_s26 + $0x368] sm:$0xff] %v368_v45  ;;  %v372_v47 = vld [vmem:[%s4691_s25 + $0xc78] sm:$0xff]  ;;  %v374_v48 = vld [vmem:[%s4691_s25 + $0xc80] sm:$0xff] }
  0x49   : > { %371 = vst [vmem:[%s4696_s26 + $0x370] sm:$0xff] %v370_v46  ;;  %v376_v49 = vld [vmem:[%s4691_s25 + $0xc88] sm:$0xff]  ;;  %373 = vst [vmem:[%s4696_s26 + $0x378] sm:$0xff] %v372_v47  ;;  %v378_v50 = vld [vmem:[%s4691_s25 + $0xc90] sm:$0xff] }
  0x4a   : > { %375 = vst [vmem:[%s4696_s26 + $0x380] sm:$0xff] %v374_v48  ;;  %377 = vst [vmem:[%s4696_s26 + $0x388] sm:$0xff] %v376_v49  ;;  %v380_v51 = vld [vmem:[%s4691_s25 + $0xc98] sm:$0xff]  ;;  %v382_v52 = vld [vmem:[%s4691_s25 + $0xca0] sm:$0xff] }
  0x4b   : > { %379 = vst [vmem:[%s4696_s26 + $0x390] sm:$0xff] %v378_v50  ;;  %381 = vst [vmem:[%s4696_s26 + $0x398] sm:$0xff] %v380_v51  ;;  %v384_v53 = vld [vmem:[%s4691_s25 + $0xca8] sm:$0xff]  ;;  %v386_v54 = vld [vmem:[%s4691_s25 + $0xcb0] sm:$0xff] }
  0x4c   : > { %383 = vst [vmem:[%s4696_s26 + $0x3a0] sm:$0xff] %v382_v52  ;;  %v388_v55 = vld [vmem:[%s4691_s25 + $0xcb8] sm:$0xff]  ;;  %385 = vst [vmem:[%s4696_s26 + $0x3a8] sm:$0xff] %v384_v53  ;;  %v390_v56 = vld [vmem:[%s4691_s25 + $0xcc0] sm:$0xff] }
  0x4d   : > { %387 = vst [vmem:[%s4696_s26 + $0x3b0] sm:$0xff] %v386_v54  ;;  %389 = vst [vmem:[%s4696_s26 + $0x3b8] sm:$0xff] %v388_v55  ;;  %v392_v57 = vld [vmem:[%s4691_s25 + $0xcc8] sm:$0xff]  ;;  %v394_v58 = vld [vmem:[%s4691_s25 + $0xcd0] sm:$0xff] }
  0x4e   : > { %391 = vst [vmem:[%s4696_s26 + $0x3c0] sm:$0xff] %v390_v56  ;;  %393 = vst [vmem:[%s4696_s26 + $0x3c8] sm:$0xff] %v392_v57  ;;  %v396_v59 = vld [vmem:[%s4691_s25 + $0xcd8] sm:$0xff]  ;;  %v398_v60 = vld [vmem:[%s4691_s25 + $0xce0] sm:$0xff] }
  0x4f   : > { %395 = vst [vmem:[%s4696_s26 + $0x3d0] sm:$0xff] %v394_v58  ;;  %v400_v61 = vld [vmem:[%s4691_s25 + $0xce8] sm:$0xff]  ;;  %397 = vst [vmem:[%s4696_s26 + $0x3d8] sm:$0xff] %v396_v59  ;;  %v402_v62 = vld [vmem:[%s4691_s25 + $0xcf0] sm:$0xff] }
  0x50   : > { %399 = vst [vmem:[%s4696_s26 + $0x3e0] sm:$0xff] %v398_v60  ;;  %401 = vst [vmem:[%s4696_s26 + $0x3e8] sm:$0xff] %v400_v61  ;;  %v404_v63 = vld [vmem:[%s4691_s25 + $0xcf8] sm:$0xff]  ;;  %v406_v0 = vld [vmem:[%s4691_s25 + $0x1000] sm:$0xff] }
  0x51   : > { %403 = vst [vmem:[%s4696_s26 + $0x3f0] sm:$0xff] %v402_v62  ;;  %405 = vst [vmem:[%s4696_s26 + $0x3f8] sm:$0xff] %v404_v63  ;;  %v408_v1 = vld [vmem:[%s4691_s25 + $0x1008] sm:$0xff]  ;;  %v410_v2 = vld [vmem:[%s4691_s25 + $0x1010] sm:$0xff] }
  0x52   : > { %407 = vst [vmem:[%s4696_s26 + $0x400] sm:$0xff] %v406_v0  ;;  %v412_v3 = vld [vmem:[%s4691_s25 + $0x1018] sm:$0xff]  ;;  %409 = vst [vmem:[%s4696_s26 + $0x408] sm:$0xff] %v408_v1  ;;  %v414_v4 = vld [vmem:[%s4691_s25 + $0x1020] sm:$0xff] }
  0x53   : > { %411 = vst [vmem:[%s4696_s26 + $0x410] sm:$0xff] %v410_v2  ;;  %413 = vst [vmem:[%s4696_s26 + $0x418] sm:$0xff] %v412_v3  ;;  %v416_v5 = vld [vmem:[%s4691_s25 + $0x1028] sm:$0xff]  ;;  %v418_v6 = vld [vmem:[%s4691_s25 + $0x1030] sm:$0xff] }
  0x54   : > { %415 = vst [vmem:[%s4696_s26 + $0x420] sm:$0xff] %v414_v4  ;;  %417 = vst [vmem:[%s4696_s26 + $0x428] sm:$0xff] %v416_v5  ;;  %v420_v7 = vld [vmem:[%s4691_s25 + $0x1038] sm:$0xff]  ;;  %v422_v8 = vld [vmem:[%s4691_s25 + $0x1040] sm:$0xff] }
  0x55   : > { %419 = vst [vmem:[%s4696_s26 + $0x430] sm:$0xff] %v418_v6  ;;  %v424_v9 = vld [vmem:[%s4691_s25 + $0x1048] sm:$0xff]  ;;  %421 = vst [vmem:[%s4696_s26 + $0x438] sm:$0xff] %v420_v7  ;;  %v426_v10 = vld [vmem:[%s4691_s25 + $0x1050] sm:$0xff] }
  0x56   : > { %423 = vst [vmem:[%s4696_s26 + $0x440] sm:$0xff] %v422_v8  ;;  %425 = vst [vmem:[%s4696_s26 + $0x448] sm:$0xff] %v424_v9  ;;  %v428_v11 = vld [vmem:[%s4691_s25 + $0x1058] sm:$0xff]  ;;  %v430_v12 = vld [vmem:[%s4691_s25 + $0x1060] sm:$0xff] }
  0x57   : > { %427 = vst [vmem:[%s4696_s26 + $0x450] sm:$0xff] %v426_v10  ;;  %429 = vst [vmem:[%s4696_s26 + $0x458] sm:$0xff] %v428_v11  ;;  %v432_v13 = vld [vmem:[%s4691_s25 + $0x1068] sm:$0xff]  ;;  %v434_v14 = vld [vmem:[%s4691_s25 + $0x1070] sm:$0xff] }
  0x58   : > { %431 = vst [vmem:[%s4696_s26 + $0x460] sm:$0xff] %v430_v12  ;;  %v436_v15 = vld [vmem:[%s4691_s25 + $0x1078] sm:$0xff]  ;;  %433 = vst [vmem:[%s4696_s26 + $0x468] sm:$0xff] %v432_v13  ;;  %v438_v16 = vld [vmem:[%s4691_s25 + $0x1080] sm:$0xff] }
  0x59   : > { %435 = vst [vmem:[%s4696_s26 + $0x470] sm:$0xff] %v434_v14  ;;  %437 = vst [vmem:[%s4696_s26 + $0x478] sm:$0xff] %v436_v15  ;;  %v440_v17 = vld [vmem:[%s4691_s25 + $0x1088] sm:$0xff]  ;;  %v442_v18 = vld [vmem:[%s4691_s25 + $0x1090] sm:$0xff] }
  0x5a   : > { %439 = vst [vmem:[%s4696_s26 + $0x480] sm:$0xff] %v438_v16  ;;  %441 = vst [vmem:[%s4696_s26 + $0x488] sm:$0xff] %v440_v17  ;;  %v444_v19 = vld [vmem:[%s4691_s25 + $0x1098] sm:$0xff]  ;;  %v446_v20 = vld [vmem:[%s4691_s25 + $0x10a0] sm:$0xff] }
  0x5b   : > { %443 = vst [vmem:[%s4696_s26 + $0x490] sm:$0xff] %v442_v18  ;;  %v448_v21 = vld [vmem:[%s4691_s25 + $0x10a8] sm:$0xff]  ;;  %445 = vst [vmem:[%s4696_s26 + $0x498] sm:$0xff] %v444_v19  ;;  %v450_v22 = vld [vmem:[%s4691_s25 + $0x10b0] sm:$0xff] }
  0x5c   : > { %447 = vst [vmem:[%s4696_s26 + $0x4a0] sm:$0xff] %v446_v20  ;;  %449 = vst [vmem:[%s4696_s26 + $0x4a8] sm:$0xff] %v448_v21  ;;  %v452_v23 = vld [vmem:[%s4691_s25 + $0x10b8] sm:$0xff]  ;;  %v454_v24 = vld [vmem:[%s4691_s25 + $0x10c0] sm:$0xff] }
  0x5d   : > { %451 = vst [vmem:[%s4696_s26 + $0x4b0] sm:$0xff] %v450_v22  ;;  %453 = vst [vmem:[%s4696_s26 + $0x4b8] sm:$0xff] %v452_v23  ;;  %v456_v25 = vld [vmem:[%s4691_s25 + $0x10c8] sm:$0xff]  ;;  %v458_v26 = vld [vmem:[%s4691_s25 + $0x10d0] sm:$0xff] }
  0x5e   : > { %455 = vst [vmem:[%s4696_s26 + $0x4c0] sm:$0xff] %v454_v24  ;;  %v460_v27 = vld [vmem:[%s4691_s25 + $0x10d8] sm:$0xff]  ;;  %457 = vst [vmem:[%s4696_s26 + $0x4c8] sm:$0xff] %v456_v25  ;;  %v462_v28 = vld [vmem:[%s4691_s25 + $0x10e0] sm:$0xff] }
  0x5f   : > { %459 = vst [vmem:[%s4696_s26 + $0x4d0] sm:$0xff] %v458_v26  ;;  %461 = vst [vmem:[%s4696_s26 + $0x4d8] sm:$0xff] %v460_v27  ;;  %v464_v29 = vld [vmem:[%s4691_s25 + $0x10e8] sm:$0xff]  ;;  %v466_v30 = vld [vmem:[%s4691_s25 + $0x10f0] sm:$0xff] }
  0x60   : > { %463 = vst [vmem:[%s4696_s26 + $0x4e0] sm:$0xff] %v462_v28  ;;  %465 = vst [vmem:[%s4696_s26 + $0x4e8] sm:$0xff] %v464_v29  ;;  %v468_v31 = vld [vmem:[%s4691_s25 + $0x10f8] sm:$0xff]  ;;  %v470_v32 = vld [vmem:[%s4691_s25 + $0x1400] sm:$0xff] }
  0x61   : > { %467 = vst [vmem:[%s4696_s26 + $0x4f0] sm:$0xff] %v466_v30  ;;  %v472_v33 = vld [vmem:[%s4691_s25 + $0x1408] sm:$0xff]  ;;  %469 = vst [vmem:[%s4696_s26 + $0x4f8] sm:$0xff] %v468_v31  ;;  %v474_v34 = vld [vmem:[%s4691_s25 + $0x1410] sm:$0xff] }
  0x62   : > { %471 = vst [vmem:[%s4696_s26 + $0x500] sm:$0xff] %v470_v32  ;;  %473 = vst [vmem:[%s4696_s26 + $0x508] sm:$0xff] %v472_v33  ;;  %v476_v35 = vld [vmem:[%s4691_s25 + $0x1418] sm:$0xff]  ;;  %v478_v36 = vld [vmem:[%s4691_s25 + $0x1420] sm:$0xff] }
  0x63   : > { %475 = vst [vmem:[%s4696_s26 + $0x510] sm:$0xff] %v474_v34  ;;  %477 = vst [vmem:[%s4696_s26 + $0x518] sm:$0xff] %v476_v35  ;;  %v480_v37 = vld [vmem:[%s4691_s25 + $0x1428] sm:$0xff]  ;;  %v482_v38 = vld [vmem:[%s4691_s25 + $0x1430] sm:$0xff] }
  0x64   : > { %479 = vst [vmem:[%s4696_s26 + $0x520] sm:$0xff] %v478_v36  ;;  %v484_v39 = vld [vmem:[%s4691_s25 + $0x1438] sm:$0xff]  ;;  %481 = vst [vmem:[%s4696_s26 + $0x528] sm:$0xff] %v480_v37  ;;  %v486_v40 = vld [vmem:[%s4691_s25 + $0x1440] sm:$0xff] }
  0x65   : > { %483 = vst [vmem:[%s4696_s26 + $0x530] sm:$0xff] %v482_v38  ;;  %485 = vst [vmem:[%s4696_s26 + $0x538] sm:$0xff] %v484_v39  ;;  %v488_v41 = vld [vmem:[%s4691_s25 + $0x1448] sm:$0xff]  ;;  %v490_v42 = vld [vmem:[%s4691_s25 + $0x1450] sm:$0xff] }
  0x66   : > { %487 = vst [vmem:[%s4696_s26 + $0x540] sm:$0xff] %v486_v40  ;;  %489 = vst [vmem:[%s4696_s26 + $0x548] sm:$0xff] %v488_v41  ;;  %v492_v43 = vld [vmem:[%s4691_s25 + $0x1458] sm:$0xff]  ;;  %v494_v44 = vld [vmem:[%s4691_s25 + $0x1460] sm:$0xff] }
  0x67   : > { %491 = vst [vmem:[%s4696_s26 + $0x550] sm:$0xff] %v490_v42  ;;  %v496_v45 = vld [vmem:[%s4691_s25 + $0x1468] sm:$0xff]  ;;  %493 = vst [vmem:[%s4696_s26 + $0x558] sm:$0xff] %v492_v43  ;;  %v498_v46 = vld [vmem:[%s4691_s25 + $0x1470] sm:$0xff] }
  0x68   : > { %495 = vst [vmem:[%s4696_s26 + $0x560] sm:$0xff] %v494_v44  ;;  %497 = vst [vmem:[%s4696_s26 + $0x568] sm:$0xff] %v496_v45  ;;  %v500_v47 = vld [vmem:[%s4691_s25 + $0x1478] sm:$0xff]  ;;  %v502_v48 = vld [vmem:[%s4691_s25 + $0x1480] sm:$0xff] }
  0x69   : > { %499 = vst [vmem:[%s4696_s26 + $0x570] sm:$0xff] %v498_v46  ;;  %501 = vst [vmem:[%s4696_s26 + $0x578] sm:$0xff] %v500_v47  ;;  %v504_v49 = vld [vmem:[%s4691_s25 + $0x1488] sm:$0xff]  ;;  %v506_v50 = vld [vmem:[%s4691_s25 + $0x1490] sm:$0xff] }
  0x6a   : > { %503 = vst [vmem:[%s4696_s26 + $0x580] sm:$0xff] %v502_v48  ;;  %v508_v51 = vld [vmem:[%s4691_s25 + $0x1498] sm:$0xff]  ;;  %505 = vst [vmem:[%s4696_s26 + $0x588] sm:$0xff] %v504_v49  ;;  %v510_v52 = vld [vmem:[%s4691_s25 + $0x14a0] sm:$0xff] }
  0x6b   : > { %507 = vst [vmem:[%s4696_s26 + $0x590] sm:$0xff] %v506_v50  ;;  %509 = vst [vmem:[%s4696_s26 + $0x598] sm:$0xff] %v508_v51  ;;  %v512_v53 = vld [vmem:[%s4691_s25 + $0x14a8] sm:$0xff]  ;;  %v514_v54 = vld [vmem:[%s4691_s25 + $0x14b0] sm:$0xff] }
  0x6c   : > { %511 = vst [vmem:[%s4696_s26 + $0x5a0] sm:$0xff] %v510_v52  ;;  %513 = vst [vmem:[%s4696_s26 + $0x5a8] sm:$0xff] %v512_v53  ;;  %v516_v55 = vld [vmem:[%s4691_s25 + $0x14b8] sm:$0xff]  ;;  %v518_v56 = vld [vmem:[%s4691_s25 + $0x14c0] sm:$0xff] }
  0x6d   : > { %515 = vst [vmem:[%s4696_s26 + $0x5b0] sm:$0xff] %v514_v54  ;;  %v520_v57 = vld [vmem:[%s4691_s25 + $0x14c8] sm:$0xff]  ;;  %517 = vst [vmem:[%s4696_s26 + $0x5b8] sm:$0xff] %v516_v55  ;;  %v522_v58 = vld [vmem:[%s4691_s25 + $0x14d0] sm:$0xff] }
  0x6e   : > { %519 = vst [vmem:[%s4696_s26 + $0x5c0] sm:$0xff] %v518_v56  ;;  %521 = vst [vmem:[%s4696_s26 + $0x5c8] sm:$0xff] %v520_v57  ;;  %v524_v59 = vld [vmem:[%s4691_s25 + $0x14d8] sm:$0xff]  ;;  %v526_v60 = vld [vmem:[%s4691_s25 + $0x14e0] sm:$0xff] }
  0x6f   : > { %523 = vst [vmem:[%s4696_s26 + $0x5d0] sm:$0xff] %v522_v58  ;;  %525 = vst [vmem:[%s4696_s26 + $0x5d8] sm:$0xff] %v524_v59  ;;  %v528_v61 = vld [vmem:[%s4691_s25 + $0x14e8] sm:$0xff]  ;;  %v530_v62 = vld [vmem:[%s4691_s25 + $0x14f0] sm:$0xff] }
  0x70   : > { %527 = vst [vmem:[%s4696_s26 + $0x5e0] sm:$0xff] %v526_v60  ;;  %v532_v63 = vld [vmem:[%s4691_s25 + $0x14f8] sm:$0xff]  ;;  %529 = vst [vmem:[%s4696_s26 + $0x5e8] sm:$0xff] %v528_v61  ;;  %v534_v0 = vld [vmem:[%s4691_s25 + $0x1800] sm:$0xff] }
  0x71   : > { %531 = vst [vmem:[%s4696_s26 + $0x5f0] sm:$0xff] %v530_v62  ;;  %533 = vst [vmem:[%s4696_s26 + $0x5f8] sm:$0xff] %v532_v63  ;;  %v536_v1 = vld [vmem:[%s4691_s25 + $0x1808] sm:$0xff]  ;;  %v538_v2 = vld [vmem:[%s4691_s25 + $0x1810] sm:$0xff] }
  0x72   : > { %535 = vst [vmem:[%s4696_s26 + $0x600] sm:$0xff] %v534_v0  ;;  %537 = vst [vmem:[%s4696_s26 + $0x608] sm:$0xff] %v536_v1  ;;  %v540_v3 = vld [vmem:[%s4691_s25 + $0x1818] sm:$0xff]  ;;  %v542_v4 = vld [vmem:[%s4691_s25 + $0x1820] sm:$0xff] }
  0x73   : > { %539 = vst [vmem:[%s4696_s26 + $0x610] sm:$0xff] %v538_v2  ;;  %v544_v5 = vld [vmem:[%s4691_s25 + $0x1828] sm:$0xff]  ;;  %541 = vst [vmem:[%s4696_s26 + $0x618] sm:$0xff] %v540_v3  ;;  %v546_v6 = vld [vmem:[%s4691_s25 + $0x1830] sm:$0xff] }
  0x74   : > { %543 = vst [vmem:[%s4696_s26 + $0x620] sm:$0xff] %v542_v4  ;;  %545 = vst [vmem:[%s4696_s26 + $0x628] sm:$0xff] %v544_v5  ;;  %v548_v7 = vld [vmem:[%s4691_s25 + $0x1838] sm:$0xff]  ;;  %v550_v8 = vld [vmem:[%s4691_s25 + $0x1840] sm:$0xff] }
  0x75   : > { %547 = vst [vmem:[%s4696_s26 + $0x630] sm:$0xff] %v546_v6  ;;  %549 = vst [vmem:[%s4696_s26 + $0x638] sm:$0xff] %v548_v7  ;;  %v552_v9 = vld [vmem:[%s4691_s25 + $0x1848] sm:$0xff]  ;;  %v554_v10 = vld [vmem:[%s4691_s25 + $0x1850] sm:$0xff] }
  0x76   : > { %551 = vst [vmem:[%s4696_s26 + $0x640] sm:$0xff] %v550_v8  ;;  %v556_v11 = vld [vmem:[%s4691_s25 + $0x1858] sm:$0xff]  ;;  %553 = vst [vmem:[%s4696_s26 + $0x648] sm:$0xff] %v552_v9  ;;  %v558_v12 = vld [vmem:[%s4691_s25 + $0x1860] sm:$0xff] }
  0x77   : > { %555 = vst [vmem:[%s4696_s26 + $0x650] sm:$0xff] %v554_v10  ;;  %557 = vst [vmem:[%s4696_s26 + $0x658] sm:$0xff] %v556_v11  ;;  %v560_v13 = vld [vmem:[%s4691_s25 + $0x1868] sm:$0xff]  ;;  %v562_v14 = vld [vmem:[%s4691_s25 + $0x1870] sm:$0xff] }
  0x78   : > { %559 = vst [vmem:[%s4696_s26 + $0x660] sm:$0xff] %v558_v12  ;;  %561 = vst [vmem:[%s4696_s26 + $0x668] sm:$0xff] %v560_v13  ;;  %v564_v15 = vld [vmem:[%s4691_s25 + $0x1878] sm:$0xff]  ;;  %v566_v16 = vld [vmem:[%s4691_s25 + $0x1880] sm:$0xff] }
  0x79   : > { %563 = vst [vmem:[%s4696_s26 + $0x670] sm:$0xff] %v562_v14  ;;  %v568_v17 = vld [vmem:[%s4691_s25 + $0x1888] sm:$0xff]  ;;  %565 = vst [vmem:[%s4696_s26 + $0x678] sm:$0xff] %v564_v15  ;;  %v570_v18 = vld [vmem:[%s4691_s25 + $0x1890] sm:$0xff] }
  0x7a   : > { %567 = vst [vmem:[%s4696_s26 + $0x680] sm:$0xff] %v566_v16  ;;  %569 = vst [vmem:[%s4696_s26 + $0x688] sm:$0xff] %v568_v17  ;;  %v572_v19 = vld [vmem:[%s4691_s25 + $0x1898] sm:$0xff]  ;;  %v574_v20 = vld [vmem:[%s4691_s25 + $0x18a0] sm:$0xff] }
  0x7b   : > { %571 = vst [vmem:[%s4696_s26 + $0x690] sm:$0xff] %v570_v18  ;;  %573 = vst [vmem:[%s4696_s26 + $0x698] sm:$0xff] %v572_v19  ;;  %v576_v21 = vld [vmem:[%s4691_s25 + $0x18a8] sm:$0xff]  ;;  %v578_v22 = vld [vmem:[%s4691_s25 + $0x18b0] sm:$0xff] }
  0x7c   : > { %575 = vst [vmem:[%s4696_s26 + $0x6a0] sm:$0xff] %v574_v20  ;;  %v580_v23 = vld [vmem:[%s4691_s25 + $0x18b8] sm:$0xff]  ;;  %577 = vst [vmem:[%s4696_s26 + $0x6a8] sm:$0xff] %v576_v21  ;;  %v582_v24 = vld [vmem:[%s4691_s25 + $0x18c0] sm:$0xff] }
  0x7d   : > { %579 = vst [vmem:[%s4696_s26 + $0x6b0] sm:$0xff] %v578_v22  ;;  %581 = vst [vmem:[%s4696_s26 + $0x6b8] sm:$0xff] %v580_v23  ;;  %v584_v25 = vld [vmem:[%s4691_s25 + $0x18c8] sm:$0xff]  ;;  %v586_v26 = vld [vmem:[%s4691_s25 + $0x18d0] sm:$0xff] }
  0x7e   : > { %583 = vst [vmem:[%s4696_s26 + $0x6c0] sm:$0xff] %v582_v24  ;;  %585 = vst [vmem:[%s4696_s26 + $0x6c8] sm:$0xff] %v584_v25  ;;  %v588_v27 = vld [vmem:[%s4691_s25 + $0x18d8] sm:$0xff]  ;;  %v590_v28 = vld [vmem:[%s4691_s25 + $0x18e0] sm:$0xff] }
  0x7f   : > { %587 = vst [vmem:[%s4696_s26 + $0x6d0] sm:$0xff] %v586_v26  ;;  %v592_v29 = vld [vmem:[%s4691_s25 + $0x18e8] sm:$0xff]  ;;  %589 = vst [vmem:[%s4696_s26 + $0x6d8] sm:$0xff] %v588_v27  ;;  %v594_v30 = vld [vmem:[%s4691_s25 + $0x18f0] sm:$0xff] }
  0x80   : > { %591 = vst [vmem:[%s4696_s26 + $0x6e0] sm:$0xff] %v590_v28  ;;  %593 = vst [vmem:[%s4696_s26 + $0x6e8] sm:$0xff] %v592_v29  ;;  %v596_v31 = vld [vmem:[%s4691_s25 + $0x18f8] sm:$0xff]  ;;  %v598_v32 = vld [vmem:[%s4691_s25 + $0x1c00] sm:$0xff] }
  0x81   : > { %595 = vst [vmem:[%s4696_s26 + $0x6f0] sm:$0xff] %v594_v30  ;;  %597 = vst [vmem:[%s4696_s26 + $0x6f8] sm:$0xff] %v596_v31  ;;  %v600_v33 = vld [vmem:[%s4691_s25 + $0x1c08] sm:$0xff]  ;;  %v602_v34 = vld [vmem:[%s4691_s25 + $0x1c10] sm:$0xff] }
  0x82   : > { %599 = vst [vmem:[%s4696_s26 + $0x700] sm:$0xff] %v598_v32  ;;  %v604_v35 = vld [vmem:[%s4691_s25 + $0x1c18] sm:$0xff]  ;;  %601 = vst [vmem:[%s4696_s26 + $0x708] sm:$0xff] %v600_v33  ;;  %v606_v36 = vld [vmem:[%s4691_s25 + $0x1c20] sm:$0xff] }
  0x83   : > { %603 = vst [vmem:[%s4696_s26 + $0x710] sm:$0xff] %v602_v34  ;;  %605 = vst [vmem:[%s4696_s26 + $0x718] sm:$0xff] %v604_v35  ;;  %v608_v37 = vld [vmem:[%s4691_s25 + $0x1c28] sm:$0xff]  ;;  %v610_v38 = vld [vmem:[%s4691_s25 + $0x1c30] sm:$0xff] }
  0x84   : > { %607 = vst [vmem:[%s4696_s26 + $0x720] sm:$0xff] %v606_v36  ;;  %609 = vst [vmem:[%s4696_s26 + $0x728] sm:$0xff] %v608_v37  ;;  %v612_v39 = vld [vmem:[%s4691_s25 + $0x1c38] sm:$0xff]  ;;  %v614_v40 = vld [vmem:[%s4691_s25 + $0x1c40] sm:$0xff] }
  0x85   : > { %611 = vst [vmem:[%s4696_s26 + $0x730] sm:$0xff] %v610_v38  ;;  %v616_v41 = vld [vmem:[%s4691_s25 + $0x1c48] sm:$0xff]  ;;  %613 = vst [vmem:[%s4696_s26 + $0x738] sm:$0xff] %v612_v39  ;;  %v618_v42 = vld [vmem:[%s4691_s25 + $0x1c50] sm:$0xff] }
  0x86   : > { %615 = vst [vmem:[%s4696_s26 + $0x740] sm:$0xff] %v614_v40  ;;  %617 = vst [vmem:[%s4696_s26 + $0x748] sm:$0xff] %v616_v41  ;;  %v620_v43 = vld [vmem:[%s4691_s25 + $0x1c58] sm:$0xff]  ;;  %v622_v44 = vld [vmem:[%s4691_s25 + $0x1c60] sm:$0xff] }
  0x87   : > { %619 = vst [vmem:[%s4696_s26 + $0x750] sm:$0xff] %v618_v42  ;;  %621 = vst [vmem:[%s4696_s26 + $0x758] sm:$0xff] %v620_v43  ;;  %v624_v45 = vld [vmem:[%s4691_s25 + $0x1c68] sm:$0xff]  ;;  %v626_v46 = vld [vmem:[%s4691_s25 + $0x1c70] sm:$0xff] }
  0x88   : > { %623 = vst [vmem:[%s4696_s26 + $0x760] sm:$0xff] %v622_v44  ;;  %v628_v47 = vld [vmem:[%s4691_s25 + $0x1c78] sm:$0xff]  ;;  %625 = vst [vmem:[%s4696_s26 + $0x768] sm:$0xff] %v624_v45  ;;  %v630_v48 = vld [vmem:[%s4691_s25 + $0x1c80] sm:$0xff] }
  0x89   : > { %627 = vst [vmem:[%s4696_s26 + $0x770] sm:$0xff] %v626_v46  ;;  %629 = vst [vmem:[%s4696_s26 + $0x778] sm:$0xff] %v628_v47  ;;  %v632_v49 = vld [vmem:[%s4691_s25 + $0x1c88] sm:$0xff]  ;;  %v634_v50 = vld [vmem:[%s4691_s25 + $0x1c90] sm:$0xff] }
  0x8a   : > { %631 = vst [vmem:[%s4696_s26 + $0x780] sm:$0xff] %v630_v48  ;;  %633 = vst [vmem:[%s4696_s26 + $0x788] sm:$0xff] %v632_v49  ;;  %v636_v51 = vld [vmem:[%s4691_s25 + $0x1c98] sm:$0xff]  ;;  %v638_v52 = vld [vmem:[%s4691_s25 + $0x1ca0] sm:$0xff] }
  0x8b   : > { %635 = vst [vmem:[%s4696_s26 + $0x790] sm:$0xff] %v634_v50  ;;  %v640_v53 = vld [vmem:[%s4691_s25 + $0x1ca8] sm:$0xff]  ;;  %637 = vst [vmem:[%s4696_s26 + $0x798] sm:$0xff] %v636_v51  ;;  %v642_v54 = vld [vmem:[%s4691_s25 + $0x1cb0] sm:$0xff] }
  0x8c   : > { %639 = vst [vmem:[%s4696_s26 + $0x7a0] sm:$0xff] %v638_v52  ;;  %641 = vst [vmem:[%s4696_s26 + $0x7a8] sm:$0xff] %v640_v53  ;;  %v644_v55 = vld [vmem:[%s4691_s25 + $0x1cb8] sm:$0xff]  ;;  %v646_v56 = vld [vmem:[%s4691_s25 + $0x1cc0] sm:$0xff] }
  0x8d   : > { %643 = vst [vmem:[%s4696_s26 + $0x7b0] sm:$0xff] %v642_v54  ;;  %645 = vst [vmem:[%s4696_s26 + $0x7b8] sm:$0xff] %v644_v55  ;;  %v648_v57 = vld [vmem:[%s4691_s25 + $0x1cc8] sm:$0xff]  ;;  %v650_v58 = vld [vmem:[%s4691_s25 + $0x1cd0] sm:$0xff] }
  0x8e   : > { %647 = vst [vmem:[%s4696_s26 + $0x7c0] sm:$0xff] %v646_v56  ;;  %v652_v59 = vld [vmem:[%s4691_s25 + $0x1cd8] sm:$0xff]  ;;  %649 = vst [vmem:[%s4696_s26 + $0x7c8] sm:$0xff] %v648_v57  ;;  %v654_v60 = vld [vmem:[%s4691_s25 + $0x1ce0] sm:$0xff] }
  0x8f   : > { %651 = vst [vmem:[%s4696_s26 + $0x7d0] sm:$0xff] %v650_v58  ;;  %653 = vst [vmem:[%s4696_s26 + $0x7d8] sm:$0xff] %v652_v59  ;;  %v656_v61 = vld [vmem:[%s4691_s25 + $0x1ce8] sm:$0xff]  ;;  %v658_v62 = vld [vmem:[%s4691_s25 + $0x1cf0] sm:$0xff] }
  0x90   : > { %655 = vst [vmem:[%s4696_s26 + $0x7e0] sm:$0xff] %v654_v60  ;;  %657 = vst [vmem:[%s4696_s26 + $0x7e8] sm:$0xff] %v656_v61  ;;  %v660_v63 = vld [vmem:[%s4691_s25 + $0x1cf8] sm:$0xff] }
  0x91   : > { %659 = vst [vmem:[%s4696_s26 + $0x7f0] sm:$0xff] %v658_v62  ;;  %661 = vst [vmem:[%s4696_s26 + $0x7f8] sm:$0xff] %v660_v63 }
  0x92 PF: > { %p4256_p5 = scmp.ge.s32.totalorder %s4633_s14, 1  ;;  %p666_p6 = scmp.lt.s32.totalorder %s4633_s14, 5 }
  0x94   : > { %p667_p7 = pnand %p4256_p5, %p666_p6 }
  0x95   : > { %s673_s27 = sand.u32 (!%p667_p7), 1, %s4625_s12   ;;  %v4635_v0 = vmov (!%p667_p7), 0   ;;  %v961_v1 = vld [vmem:[%s5750_s2] sm:$0xf] (!%p667_p7)  ;;  %vm2247_vm0 = vcmask (!%p667_p7), 523264   ;;  %s5540_s9 = sshll.u32 (!%p667_p7), %s4249_s15, 6 }
  0x96   : > { %670 = sbr.rel (%p667_p7) target bundleno = 638 (0x27e), region = 51  ;;  %s4257_s28 = sshll.u32 (!%p667_p7), %s673_s27, 11  ;;  %2283 = vmatprep.mubr.bf16.mxu0 (!%p667_p7), %v4635_v0  ;;  %2324 = vmatprep.mubr.bf16.mxu1 (!%p667_p7), %v4635_v0  ;;  %v5245_v44 = vld [vmem:[%s5748_s0] sm:$0x3] (!%p667_p7) }
  0x97   : > { %4609 = vset.pattern.permute.xlu0 (!%p667_p7), %v4635_v0  ;;  %s5216_s4 = scalar_lea.vmem (!%p667_p7), [#allocation2], %s4257_s28  ;;  %p698_p8 = scmp.lt.s32.totalorder (!%p667_p7), %s5540_s9, 255 }
  0x98   : > { %v705_v2 = vld [vmem:[%s5216_s4] sm:$0xff] (!%p667_p7)  ;;  %v706_v4 = vld [vmem:[%s5216_s4 + $0x8] sm:$0xff] (!%p667_p7)  ;;  %964 = vperm.xlu0 (!%p667_p7), %4609, %v961_v1   ;;  %v707_v32 = vld [vmem:[%s5216_s4 + $0x10] sm:$0xff] (!%p667_p7) }
  0x99   : > { %v737_v3 = vld [vmem:[%s5216_s4 + $0x100] sm:$0xff] (!%p667_p7)  ;;  %v738_v6 = vld [vmem:[%s5216_s4 + $0x108] sm:$0xff] (!%p667_p7)  ;;  %v739_v33 = vld [vmem:[%s5216_s4 + $0x110] sm:$0xff] (!%p667_p7) }
  0x9a   : > { %v4261_v5 = vcombine.high (!%p667_p7), %v705_v2, %v737_v3  ;;  %v4260_v7 = vcombine.low (!%p667_p7), %v705_v2, %v737_v3  ;;  %v769_v8 = vld [vmem:[%s5216_s4 + $0x200] sm:$0xff] (!%p667_p7)  ;;  %v4263_v10 = vcombine.high (!%p667_p7), %v706_v4, %v738_v6  ;;  %v4262_v11 = vcombine.low (!%p667_p7), %v706_v4, %v738_v6  ;;  %v770_v13 = vld [vmem:[%s5216_s4 + $0x208] sm:$0xff] (!%p667_p7)  ;;  %v708_v34 = vld [vmem:[%s5216_s4 + $0x18] sm:$0xff] (!%p667_p7) }
  0x9b   : > { %v801_v9 = vld [vmem:[%s5216_s4 + $0x300] sm:$0xff] (!%p667_p7)  ;;  %v802_v14 = vld [vmem:[%s5216_s4 + $0x308] sm:$0xff] (!%p667_p7)  ;;  %v740_v35 = vld [vmem:[%s5216_s4 + $0x118] sm:$0xff] (!%p667_p7)  ;;  %v4265_v38 = vcombine.high (!%p667_p7), %v707_v32, %v739_v33  ;;  %v4264_v45 = vcombine.low (!%p667_p7), %v707_v32, %v739_v33 }
  0x9c   : > { %v4325_v12 = vcombine.high (!%p667_p7), %v769_v8, %v801_v9  ;;  %v833_v15 = vld [vmem:[%s5216_s4 + $0x400] sm:$0xff] (!%p667_p7)  ;;  %2251 = vmatprep.subr.bf16.mxu0 (!%p667_p7), %v4261_v5  ;;  %v4327_v16 = vcombine.high (!%p667_p7), %v770_v13, %v802_v14  ;;  %v834_v18 = vld [vmem:[%s5216_s4 + $0x408] sm:$0xff] (!%p667_p7)  ;;  %2292 = vmatprep.subr.bf16.mxu1 (!%p667_p7), %v4263_v10  ;;  %v4324_v20 = vcombine.low (!%p667_p7), %v769_v8, %v801_v9  ;;  %v771_v40 = vld [vmem:[%s5216_s4 + $0x210] sm:$0xff] (!%p667_p7) }
  0x9d   : > { %v865_v17 = vld [vmem:[%s5216_s4 + $0x500] sm:$0xff]  ;;  %v866_v19 = vld [vmem:[%s5216_s4 + $0x508] sm:$0xff]  ;;  %2252 = vmatpush1.bf16.msra.mxu0 %v4260_v7  ;;  %2293 = vmatpush1.bf16.msra.mxu1 %v4262_v11  ;;  %v4326_v21 = vcombine.low %v770_v13, %v802_v14  ;;  %v4267_v39 = vcombine.high %v708_v34, %v740_v35  ;;  %v803_v41 = vld [vmem:[%s5216_s4 + $0x310] sm:$0xff]  ;;  %v4266_v46 = vcombine.low %v708_v34, %v740_v35  ;;  %s5756_s9 = smov (!%p698_p8, %s5540_s9), 255 }
  0x9e   : > { %2253 = vmatprep.subr.bf16.mxu0 %v4325_v12  ;;  %v4389_v22 = vcombine.high %v833_v15, %v865_v17  ;;  %2294 = vmatprep.subr.bf16.mxu1 %v4327_v16  ;;  %v4391_v23 = vcombine.high %v834_v18, %v866_v19  ;;  %v897_v24 = vld [vmem:[%s5216_s4 + $0x600] sm:$0xff]  ;;  %v898_v26 = vld [vmem:[%s5216_s4 + $0x608] sm:$0xff]  ;;  %v4388_v28 = vcombine.low %v833_v15, %v865_v17  ;;  %v772_v42 = vld [vmem:[%s5216_s4 + $0x218] sm:$0xff]  ;;  %s4259_s10 = sshll.u32 %s5756_s9, 1 }
  0x9f   : > { %v929_v25 = vld [vmem:[%s5216_s4 + $0x700] sm:$0xff]  ;;  %v930_v27 = vld [vmem:[%s5216_s4 + $0x708] sm:$0xff]  ;;  %v4390_v29 = vcombine.low %v834_v18, %v866_v19  ;;  %v804_v43 = vld [vmem:[%s5216_s4 + $0x318] sm:$0xff]  ;;  %v4329_v47 = vcombine.high %v771_v40, %v803_v41  ;;  %v4328_v53 = vcombine.low %v771_v40, %v803_v41  ;;  %s5612_s14 = scalar_lea.vmem %s5751_s3, %s4259_s10 }
  0xa0   : > { %v4453_v30 = vcombine.high %v897_v24, %v929_v25  ;;  %v4455_v31 = vcombine.high %v898_v26, %v930_v27  ;;  %v4452_v36 = vcombine.low %v897_v24, %v929_v25  ;;  %v4454_v37 = vcombine.low %v898_v26, %v930_v27  ;;  %v835_v49 = vld [vmem:[%s5216_s4 + $0x410] sm:$0xff]  ;;  %v836_v51 = vld [vmem:[%s5216_s4 + $0x418] sm:$0xff]  ;;  %v709_v2 = vld [vmem:[%s5216_s4 + $0x20] sm:$0xff] }
  0xa1   : > { %2254 = vmatpush1.bf16.msra.mxu0 %v4324_v20  ;;  %2295 = vmatpush1.bf16.msra.mxu1 %v4326_v21  ;;  %v4331_v48 = vcombine.high %v772_v42, %v804_v43  ;;  %v867_v50 = vld [vmem:[%s5216_s4 + $0x510] sm:$0xff]  ;;  %v868_v52 = vld [vmem:[%s5216_s4 + $0x518] sm:$0xff]  ;;  %v4330_v54 = vcombine.low %v772_v42, %v804_v43  ;;  %v741_v3 = vld [vmem:[%s5216_s4 + $0x120] sm:$0xff] }
  0xa2   : > { %2255 = vmatprep.subr.bf16.mxu0 %v4389_v22  ;;  %2296 = vmatprep.subr.bf16.mxu1 %v4391_v23  ;;  %v4393_v55 = vcombine.high %v835_v49, %v867_v50  ;;  %v4395_v56 = vcombine.high %v836_v51, %v868_v52  ;;  %v899_v57 = vld [vmem:[%s5216_s4 + $0x610] sm:$0xff]  ;;  %v900_v59 = vld [vmem:[%s5216_s4 + $0x618] sm:$0xff]  ;;  %v4392_v61 = vcombine.low %v835_v49, %v867_v50  ;;  %v710_v4 = vld [vmem:[%s5216_s4 + $0x28] sm:$0xff] }
  0xa3   : > { %v931_v58 = vld [vmem:[%s5216_s4 + $0x710] sm:$0xff]  ;;  %v932_v60 = vld [vmem:[%s5216_s4 + $0x718] sm:$0xff]  ;;  %v4394_v62 = vcombine.low %v836_v51, %v868_v52  ;;  %v742_v5 = vld [vmem:[%s5216_s4 + $0x128] sm:$0xff]  ;;  %v4269_v8 = vcombine.high %v709_v2, %v741_v3  ;;  %v4268_v14 = vcombine.low %v709_v2, %v741_v3 }
  0xa4   : > { %v4457_v63 = vcombine.high %v899_v57, %v931_v58  ;;  %v4459_v1 = vcombine.high %v900_v59, %v932_v60  ;;  %v4456_v6 = vcombine.low %v899_v57, %v931_v58  ;;  %v4458_v7 = vcombine.low %v900_v59, %v932_v60  ;;  %v773_v10 = vld [vmem:[%s5216_s4 + $0x220] sm:$0xff]  ;;  %v774_v12 = vld [vmem:[%s5216_s4 + $0x228] sm:$0xff]  ;;  %v711_v34 = vld [vmem:[%s5216_s4 + $0x30] sm:$0xff] }
  0xa5   : > { %2256 = vmatpush1.bf16.msra.mxu0 %v4388_v28  ;;  %2297 = vmatpush1.bf16.msra.mxu1 %v4390_v29  ;;  %v4271_v9 = vcombine.high %v710_v4, %v742_v5  ;;  %v805_v11 = vld [vmem:[%s5216_s4 + $0x320] sm:$0xff]  ;;  %v806_v13 = vld [vmem:[%s5216_s4 + $0x328] sm:$0xff]  ;;  %v4270_v15 = vcombine.low %v710_v4, %v742_v5  ;;  %v743_v35 = vld [vmem:[%s5216_s4 + $0x130] sm:$0xff] }
  0xa6   : > { %2257 = vmatprep.subr.bf16.mxu0 %v4453_v30  ;;  %2298 = vmatprep.subr.bf16.mxu1 %v4455_v31  ;;  %v4333_v16 = vcombine.high %v773_v10, %v805_v11  ;;  %v4335_v17 = vcombine.high %v774_v12, %v806_v13  ;;  %v837_v18 = vld [vmem:[%s5216_s4 + $0x420] sm:$0xff]  ;;  %v838_v20 = vld [vmem:[%s5216_s4 + $0x428] sm:$0xff]  ;;  %v4332_v22 = vcombine.low %v773_v10, %v805_v11  ;;  %v775_v42 = vld [vmem:[%s5216_s4 + $0x230] sm:$0xff] }
  0xa7   : > { %v869_v19 = vld [vmem:[%s5216_s4 + $0x520] sm:$0xff]  ;;  %v870_v21 = vld [vmem:[%s5216_s4 + $0x528] sm:$0xff]  ;;  %v4334_v23 = vcombine.low %v774_v12, %v806_v13  ;;  %v4273_v40 = vcombine.high %v711_v34, %v743_v35  ;;  %v807_v43 = vld [vmem:[%s5216_s4 + $0x330] sm:$0xff] }
  0xa8   : > { %v4397_v24 = vcombine.high %v837_v18, %v869_v19  ;;  %v4399_v25 = vcombine.high %v838_v20, %v870_v21  ;;  %v901_v26 = vld [vmem:[%s5216_s4 + $0x620] sm:$0xff]  ;;  %v902_v28 = vld [vmem:[%s5216_s4 + $0x628] sm:$0xff]  ;;  %v4396_v30 = vcombine.low %v837_v18, %v869_v19  ;;  %v4398_v31 = vcombine.low %v838_v20, %v870_v21  ;;  %v839_v51 = vld [vmem:[%s5216_s4 + $0x430] sm:$0xff] }
  0xa9   : > { %2258 = vmatpush1.bf16.msra.mxu0 %v4452_v36  ;;  %2299 = vmatpush1.bf16.msra.mxu1 %v4454_v37  ;;  %v933_v27 = vld [vmem:[%s5216_s4 + $0x720] sm:$0xff]  ;;  %v934_v29 = vld [vmem:[%s5216_s4 + $0x728] sm:$0xff]  ;;  %v712_v36 = vld [vmem:[%s5216_s4 + $0x38] sm:$0xff]  ;;  %v4337_v49 = vcombine.high %v775_v42, %v807_v43 }
  0xaa   : > { %2333 = vmatprep.subr.bf16.mxu0 %v4265_v38  ;;  %2374 = vmatprep.subr.bf16.mxu1 %v4267_v39  ;;  %v4461_v32 = vcombine.high %v901_v26, %v933_v27  ;;  %v4463_v33 = vcombine.high %v902_v28, %v934_v29  ;;  %v744_v37 = vld [vmem:[%s5216_s4 + $0x138] sm:$0xff]  ;;  %v4460_v38 = vcombine.low %v901_v26, %v933_v27  ;;  %v871_v52 = vld [vmem:[%s5216_s4 + $0x530] sm:$0xff]  ;;  %v713_v4 = vld [vmem:[%s5216_s4 + $0x40] sm:$0xff] }
  0xab   : > { %v4462_v39 = vcombine.low %v902_v28, %v934_v29  ;;  %v4275_v41 = vcombine.high %v712_v36, %v744_v37  ;;  %v4401_v57 = vcombine.high %v839_v51, %v871_v52  ;;  %v903_v59 = vld [vmem:[%s5216_s4 + $0x630] sm:$0xff]  ;;  %v745_v5 = vld [vmem:[%s5216_s4 + $0x140] sm:$0xff] }
  0xac   : > { %4516 = vmatmul.mubr.msk.bf16.vlgmr.msra.gmra.mrb[0].mxu0 %vm2247_vm0, %v5245_v44  ;;  %4517 = vmatmul.mubr.msk.bf16.vlgmr.msra.gmra.mrb[0].mxu1 %vm2247_vm0, %v5245_v44  ;;  %v935_v60 = vld [vmem:[%s5216_s4 + $0x730] sm:$0xff]  ;;  %v4277_v10 = vcombine.high %v713_v4, %v745_v5  ;;  %v777_v12 = vld [vmem:[%s5216_s4 + $0x240] sm:$0xff] }
  0xad   : > { %2334 = vmatpush1.bf16.msra.mxu0 %v4264_v45  ;;  %2375 = vmatpush1.bf16.msra.mxu1 %v4266_v46  ;;  %v776_v45 = vld [vmem:[%s5216_s4 + $0x238] sm:$0xff]  ;;  %v4465_v2 = vcombine.high %v903_v59, %v935_v60  ;;  %v809_v13 = vld [vmem:[%s5216_s4 + $0x340] sm:$0xff] }
  0xae   : > { %2335 = vmatprep.subr.bf16.mxu0 %v4329_v47  ;;  %2376 = vmatprep.subr.bf16.mxu1 %v4331_v48  ;;  %v808_v46 = vld [vmem:[%s5216_s4 + $0x338] sm:$0xff]  ;;  %v4272_v47 = vcombine.low %v711_v34, %v743_v35  ;;  %v4274_v48 = vcombine.low %v712_v36, %v744_v37  ;;  %v4341_v18 = vcombine.high %v777_v12, %v809_v13  ;;  %v841_v20 = vld [vmem:[%s5216_s4 + $0x440] sm:$0xff]  ;;  %v715_v36 = vld [vmem:[%s5216_s4 + $0x50] sm:$0xff] }
  0xaf   : > { %2365 = vmatprep.mubr.bf16.mxu0 %v4635_v0  ;;  %2406 = vmatprep.mubr.bf16.mxu1 %v4635_v0  ;;  %v4339_v50 = vcombine.high %v776_v45, %v808_v46  ;;  %v873_v21 = vld [vmem:[%s5216_s4 + $0x540] sm:$0xff]  ;;  %v747_v37 = vld [vmem:[%s5216_s4 + $0x150] sm:$0xff] }
  0xb0   : > { %v4405_v26 = vcombine.high %v841_v20, %v873_v21  ;;  %v905_v28 = vld [vmem:[%s5216_s4 + $0x640] sm:$0xff] }
  0xb1   : > { %2336 = vmatpush1.bf16.msra.mxu0 %v4328_v53  ;;  %2377 = vmatpush1.bf16.msra.mxu1 %v4330_v54  ;;  %v840_v53 = vld [vmem:[%s5216_s4 + $0x438] sm:$0xff]  ;;  %v937_v29 = vld [vmem:[%s5216_s4 + $0x740] sm:$0xff] }
  0xb2   : > { %2337 = vmatprep.subr.bf16.mxu0 %v4393_v55  ;;  %2378 = vmatprep.subr.bf16.mxu1 %v4395_v56  ;;  %v872_v54 = vld [vmem:[%s5216_s4 + $0x538] sm:$0xff]  ;;  %v4336_v55 = vcombine.low %v775_v42, %v807_v43  ;;  %v4338_v56 = vcombine.low %v776_v45, %v808_v46  ;;  %v4469_v34 = vcombine.high %v905_v28, %v937_v29  ;;  %v779_v45 = vld [vmem:[%s5216_s4 + $0x250] sm:$0xff] }
  0xb3   : > { %v4403_v58 = vcombine.high %v840_v53, %v872_v54  ;;  %v4281_v42 = vcombine.high %v715_v36, %v747_v37  ;;  %v811_v46 = vld [vmem:[%s5216_s4 + $0x350] sm:$0xff] }
  0xb5   : > { %2338 = vmatpush1.bf16.msra.mxu0 %v4392_v61  ;;  %2379 = vmatpush1.bf16.msra.mxu1 %v4394_v62  ;;  %v904_v61 = vld [vmem:[%s5216_s4 + $0x638] sm:$0xff] }
  0xb6   : > { %2339 = vmatprep.subr.bf16.mxu0 %v4457_v63  ;;  %2380 = vmatprep.subr.bf16.mxu1 %v4459_v1  ;;  %v936_v62 = vld [vmem:[%s5216_s4 + $0x738] sm:$0xff]  ;;  %v4400_v63 = vcombine.low %v839_v51, %v871_v52  ;;  %v4402_v1 = vcombine.low %v840_v53, %v872_v54  ;;  %v4345_v51 = vcombine.high %v779_v45, %v811_v46  ;;  %v843_v53 = vld [vmem:[%s5216_s4 + $0x450] sm:$0xff] }
  0xb7   : > { %v4467_v3 = vcombine.high %v904_v61, %v936_v62  ;;  %v875_v54 = vld [vmem:[%s5216_s4 + $0x550] sm:$0xff] }
  0xb9   : > { %2340 = vmatpush1.bf16.msra.mxu0 %v4456_v6  ;;  %2381 = vmatpush1.bf16.msra.mxu1 %v4458_v7  ;;  %v714_v6 = vld [vmem:[%s5216_s4 + $0x48] sm:$0xff] }
  0xba   : > { %2415 = vmatprep.subr.bf16.mxu0 %v4269_v8  ;;  %2456 = vmatprep.subr.bf16.mxu1 %v4271_v9  ;;  %v746_v7 = vld [vmem:[%s5216_s4 + $0x148] sm:$0xff]  ;;  %v4464_v8 = vcombine.low %v903_v59, %v935_v60  ;;  %v4466_v9 = vcombine.low %v904_v61, %v936_v62  ;;  %v4409_v59 = vcombine.high %v843_v53, %v875_v54  ;;  %v907_v61 = vld [vmem:[%s5216_s4 + $0x650] sm:$0xff] }
  0xbb   : > { %v4279_v11 = vcombine.high %v714_v6, %v746_v7  ;;  %v939_v62 = vld [vmem:[%s5216_s4 + $0x750] sm:$0xff] }
  0xbc   : > { %4518 = vmatmul.mubr.msk.bf16.vlgmr.msra.gmra.mrb[4].mxu0 %vm2247_vm0, %v5245_v44  ;;  %4519 = vmatmul.mubr.msk.bf16.vlgmr.msra.gmra.mrb[4].mxu1 %vm2247_vm0, %v5245_v44 }
  0xbd   : > { %2416 = vmatpush1.bf16.msra.mxu0 %v4268_v14  ;;  %2457 = vmatpush1.bf16.msra.mxu1 %v4270_v15  ;;  %v778_v14 = vld [vmem:[%s5216_s4 + $0x248] sm:$0xff] }
  0xbe   : > { %2417 = vmatprep.subr.bf16.mxu0 %v4333_v16  ;;  %2458 = vmatprep.subr.bf16.mxu1 %v4335_v17  ;;  %v810_v15 = vld [vmem:[%s5216_s4 + $0x348] sm:$0xff]  ;;  %v4276_v16 = vcombine.low %v713_v4, %v745_v5  ;;  %v4278_v17 = vcombine.low %v714_v6, %v746_v7  ;;  %v4473_v4 = vcombine.high %v907_v61, %v939_v62  ;;  %v717_v6 = vld [vmem:[%s5216_s4 + $0x60] sm:$0xff] }
  0xbf   : > { %2447 = vmatprep.mubr.bf16.mxu0 %v4635_v0  ;;  %2488 = vmatprep.mubr.bf16.mxu1 %v4635_v0  ;;  %v4343_v19 = vcombine.high %v778_v14, %v810_v15  ;;  %v749_v7 = vld [vmem:[%s5216_s4 + $0x160] sm:$0xff] }
  0xc1   : > { %2418 = vmatpush1.bf16.msra.mxu0 %v4332_v22  ;;  %2459 = vmatpush1.bf16.msra.mxu1 %v4334_v23  ;;  %v842_v22 = vld [vmem:[%s5216_s4 + $0x448] sm:$0xff] }
  0xc2   : > { %2419 = vmatprep.subr.bf16.mxu0 %v4397_v24  ;;  %2460 = vmatprep.subr.bf16.mxu1 %v4399_v25  ;;  %v874_v23 = vld [vmem:[%s5216_s4 + $0x548] sm:$0xff]  ;;  %v4340_v24 = vcombine.low %v777_v12, %v809_v13  ;;  %v4342_v25 = vcombine.low %v778_v14, %v810_v15  ;;  %v4285_v12 = vcombine.high %v717_v6, %v749_v7  ;;  %v781_v14 = vld [vmem:[%s5216_s4 + $0x260] sm:$0xff] }
  0xc3   : > { %v4407_v27 = vcombine.high %v842_v22, %v874_v23  ;;  %v813_v15 = vld [vmem:[%s5216_s4 + $0x360] sm:$0xff] }
  0xc5   : > { %2420 = vmatpush1.bf16.msra.mxu0 %v4396_v30  ;;  %2461 = vmatpush1.bf16.msra.mxu1 %v4398_v31  ;;  %v906_v30 = vld [vmem:[%s5216_s4 + $0x648] sm:$0xff] }
  0xc6   : > { %2421 = vmatprep.subr.bf16.mxu0 %v4461_v32  ;;  %2462 = vmatprep.subr.bf16.mxu1 %v4463_v33  ;;  %v938_v31 = vld [vmem:[%s5216_s4 + $0x748] sm:$0xff]  ;;  %v4404_v32 = vcombine.low %v841_v20, %v873_v21  ;;  %v4406_v33 = vcombine.low %v842_v22, %v874_v23  ;;  %v4349_v20 = vcombine.high %v781_v14, %v813_v15  ;;  %v845_v22 = vld [vmem:[%s5216_s4 + $0x460] sm:$0xff] }
  0xc7   : > { %v4471_v35 = vcombine.high %v906_v30, %v938_v31  ;;  %v877_v23 = vld [vmem:[%s5216_s4 + $0x560] sm:$0xff] }
  0xc9   : > { %2422 = vmatpush1.bf16.msra.mxu0 %v4460_v38  ;;  %2463 = vmatpush1.bf16.msra.mxu1 %v4462_v39  ;;  %v716_v38 = vld [vmem:[%s5216_s4 + $0x58] sm:$0xff] }
  0xca   : > { %2497 = vmatprep.subr.bf16.mxu0 %v4273_v40  ;;  %2538 = vmatprep.subr.bf16.mxu1 %v4275_v41  ;;  %v748_v39 = vld [vmem:[%s5216_s4 + $0x158] sm:$0xff]  ;;  %v4468_v40 = vcombine.low %v905_v28, %v937_v29  ;;  %v4470_v41 = vcombine.low %v906_v30, %v938_v31  ;;  %v4413_v28 = vcombine.high %v845_v22, %v877_v23  ;;  %v909_v30 = vld [vmem:[%s5216_s4 + $0x660] sm:$0xff] }
  0xcb   : > { %v4283_v43 = vcombine.high %v716_v38, %v748_v39  ;;  %v941_v31 = vld [vmem:[%s5216_s4 + $0x760] sm:$0xff] }
  0xcc   : > { %4520 = vmatmul.mubr.msk.bf16.vlgmr.msra.gmra.mrb[8].mxu0 %vm2247_vm0, %v5245_v44  ;;  %4521 = vmatmul.mubr.msk.bf16.vlgmr.msra.gmra.mrb[8].mxu1 %vm2247_vm0, %v5245_v44 }
  0xcd   : > { %2498 = vmatpush1.bf16.msra.mxu0 %v4272_v47  ;;  %2539 = vmatpush1.bf16.msra.mxu1 %v4274_v48  ;;  %v780_v47 = vld [vmem:[%s5216_s4 + $0x258] sm:$0xff] }
  0xce   : > { %2499 = vmatprep.subr.bf16.mxu0 %v4337_v49  ;;  %2540 = vmatprep.subr.bf16.mxu1 %v4339_v50  ;;  %v812_v48 = vld [vmem:[%s5216_s4 + $0x358] sm:$0xff]  ;;  %v4280_v49 = vcombine.low %v715_v36, %v747_v37  ;;  %v4282_v50 = vcombine.low %v716_v38, %v748_v39  ;;  %v4477_v36 = vcombine.high %v909_v30, %v941_v31  ;;  %v719_v38 = vld [vmem:[%s5216_s4 + $0x70] sm:$0xff] }
  0xcf   : > { %2529 = vmatprep.mubr.bf16.mxu0 %v4635_v0  ;;  %2570 = vmatprep.mubr.bf16.mxu1 %v4635_v0  ;;  %v4347_v52 = vcombine.high %v780_v47, %v812_v48  ;;  %v751_v39 = vld [vmem:[%s5216_s4 + $0x170] sm:$0xff] }
  0xd1   : > { %2500 = vmatpush1.bf16.msra.mxu0 %v4336_v55  ;;  %2541 = vmatpush1.bf16.msra.mxu1 %v4338_v56  ;;  %v844_v55 = vld [vmem:[%s5216_s4 + $0x458] sm:$0xff] }
  0xd2   : > { %2501 = vmatprep.subr.bf16.mxu0 %v4401_v57  ;;  %2542 = vmatprep.subr.bf16.mxu1 %v4403_v58  ;;  %v876_v56 = vld [vmem:[%s5216_s4 + $0x558] sm:$0xff]  ;;  %v4344_v57 = vcombine.low %v779_v45, %v811_v46  ;;  %v4346_v58 = vcombine.low %v780_v47, %v812_v48  ;;  %v4289_v45 = vcombine.high %v719_v38, %v751_v39  ;;  %v783_v47 = vld [vmem:[%s5216_s4 + $0x270] sm:$0xff] }
  0xd3   : > { %v4411_v60 = vcombine.high %v844_v55, %v876_v56  ;;  %v815_v48 = vld [vmem:[%s5216_s4 + $0x370] sm:$0xff] }
  0xd5   : > { %2502 = vmatpush1.bf16.msra.mxu0 %v4400_v63  ;;  %2543 = vmatpush1.bf16.msra.mxu1 %v4402_v1  ;;  %v908_v63 = vld [vmem:[%s5216_s4 + $0x658] sm:$0xff] }
  0xd6   : > { %2503 = vmatprep.subr.bf16.mxu0 %v4465_v2  ;;  %2544 = vmatprep.subr.bf16.mxu1 %v4467_v3  ;;  %v940_v1 = vld [vmem:[%s5216_s4 + $0x758] sm:$0xff]  ;;  %v4408_v2 = vcombine.low %v843_v53, %v875_v54  ;;  %v4410_v3 = vcombine.low %v844_v55, %v876_v56  ;;  %v4353_v53 = vcombine.high %v783_v47, %v815_v48  ;;  %v847_v55 = vld [vmem:[%s5216_s4 + $0x470] sm:$0xff] }
  0xd7   : > { %v4475_v5 = vcombine.high %v908_v63, %v940_v1  ;;  %v879_v56 = vld [vmem:[%s5216_s4 + $0x570] sm:$0xff] }
  0xd9   : > { %2504 = vmatpush1.bf16.msra.mxu0 %v4464_v8  ;;  %2545 = vmatpush1.bf16.msra.mxu1 %v4466_v9  ;;  %v718_v8 = vld [vmem:[%s5216_s4 + $0x68] sm:$0xff] }
  0xda   : > { %2579 = vmatprep.subr.bf16.mxu0 %v4277_v10  ;;  %2620 = vmatprep.subr.bf16.mxu1 %v4279_v11  ;;  %v750_v9 = vld [vmem:[%s5216_s4 + $0x168] sm:$0xff]  ;;  %v4472_v10 = vcombine.low %v907_v61, %v939_v62  ;;  %v4474_v11 = vcombine.low %v908_v63, %v940_v1  ;;  %v4417_v61 = vcombine.high %v847_v55, %v879_v56  ;;  %v911_v63 = vld [vmem:[%s5216_s4 + $0x670] sm:$0xff] }
  0xdb   : > { %v4287_v13 = vcombine.high %v718_v8, %v750_v9  ;;  %v943_v1 = vld [vmem:[%s5216_s4 + $0x770] sm:$0xff] }
  0xdc   : > { %4522 = vmatmul.mubr.msk.bf16.vlgmr.msra.gmra.mrb[12].mxu0 %vm2247_vm0, %v5245_v44  ;;  %4523 = vmatmul.mubr.msk.bf16.vlgmr.msra.gmra.mrb[12].mxu1 %vm2247_vm0, %v5245_v44 }
  0xdd   : > { %2580 = vmatpush1.bf16.msra.mxu0 %v4276_v16  ;;  %2621 = vmatpush1.bf16.msra.mxu1 %v4278_v17  ;;  %v782_v16 = vld [vmem:[%s5216_s4 + $0x268] sm:$0xff] }
  0xde   : > { %2581 = vmatprep.subr.bf16.mxu0 %v4341_v18  ;;  %2622 = vmatprep.subr.bf16.mxu1 %v4343_v19  ;;  %v814_v17 = vld [vmem:[%s5216_s4 + $0x368] sm:$0xff]  ;;  %v4284_v18 = vcombine.low %v717_v6, %v749_v7  ;;  %v4286_v19 = vcombine.low %v718_v8, %v750_v9  ;;  %v4481_v6 = vcombine.high %v911_v63, %v943_v1  ;;  %v721_v8 = vld [vmem:[%s5216_s4 + $0x80] sm:$0xff] }
  0xdf   : > { %2611 = vmatprep.mubr.bf16.mxu0 %v4635_v0  ;;  %2652 = vmatprep.mubr.bf16.mxu1 %v4635_v0  ;;  %v4351_v21 = vcombine.high %v782_v16, %v814_v17  ;;  %v753_v9 = vld [vmem:[%s5216_s4 + $0x180] sm:$0xff] }
  0xe1   : > { %2582 = vmatpush1.bf16.msra.mxu0 %v4340_v24  ;;  %2623 = vmatpush1.bf16.msra.mxu1 %v4342_v25  ;;  %v846_v24 = vld [vmem:[%s5216_s4 + $0x468] sm:$0xff] }
  0xe2   : > { %2583 = vmatprep.subr.bf16.mxu0 %v4405_v26  ;;  %2624 = vmatprep.subr.bf16.mxu1 %v4407_v27  ;;  %v878_v25 = vld [vmem:[%s5216_s4 + $0x568] sm:$0xff]  ;;  %v4348_v26 = vcombine.low %v781_v14, %v813_v15  ;;  %v4350_v27 = vcombine.low %v782_v16, %v814_v17  ;;  %v4293_v14 = vcombine.high %v721_v8, %v753_v9  ;;  %v785_v16 = vld [vmem:[%s5216_s4 + $0x280] sm:$0xff] }
  0xe3   : > { %v4415_v29 = vcombine.high %v846_v24, %v878_v25  ;;  %v817_v17 = vld [vmem:[%s5216_s4 + $0x380] sm:$0xff] }
  0xe5   : > { %2584 = vmatpush1.bf16.msra.mxu0 %v4404_v32  ;;  %2625 = vmatpush1.bf16.msra.mxu1 %v4406_v33  ;;  %v910_v32 = vld [vmem:[%s5216_s4 + $0x668] sm:$0xff] }
  0xe6   : > { %2585 = vmatprep.subr.bf16.mxu0 %v4469_v34  ;;  %2626 = vmatprep.subr.bf16.mxu1 %v4471_v35  ;;  %v942_v33 = vld [vmem:[%s5216_s4 + $0x768] sm:$0xff]  ;;  %v4412_v34 = vcombine.low %v845_v22, %v877_v23  ;;  %v4414_v35 = vcombine.low %v846_v24, %v878_v25  ;;  %v4357_v22 = vcombine.high %v785_v16, %v817_v17  ;;  %v849_v24 = vld [vmem:[%s5216_s4 + $0x480] sm:$0xff] }
  0xe7   : > { %v4479_v37 = vcombine.high %v910_v32, %v942_v33  ;;  %v881_v25 = vld [vmem:[%s5216_s4 + $0x580] sm:$0xff] }
  0xe9   : > { %2586 = vmatpush1.bf16.msra.mxu0 %v4468_v40  ;;  %2627 = vmatpush1.bf16.msra.mxu1 %v4470_v41  ;;  %v720_v40 = vld [vmem:[%s5216_s4 + $0x78] sm:$0xff] }
  0xea   : > { %2661 = vmatprep.subr.bf16.mxu0 %v4281_v42  ;;  %2702 = vmatprep.subr.bf16.mxu1 %v4283_v43  ;;  %v752_v41 = vld [vmem:[%s5216_s4 + $0x178] sm:$0xff]  ;;  %v4476_v42 = vcombine.low %v909_v30, %v941_v31  ;;  %v4478_v43 = vcombine.low %v910_v32, %v942_v33  ;;  %v4421_v30 = vcombine.high %v849_v24, %v881_v25  ;;  %v913_v32 = vld [vmem:[%s5216_s4 + $0x680] sm:$0xff] }
  0xeb   : > { %v4291_v46 = vcombine.high %v720_v40, %v752_v41  ;;  %v945_v33 = vld [vmem:[%s5216_s4 + $0x780] sm:$0xff] }
  0xec   : > { %4524 = vmatmul.mubr.msk.bf16.vlgmr.msra.gmra.mrb[16].mxu0 %vm2247_vm0, %v5245_v44  ;;  %4525 = vmatmul.mubr.msk.bf16.vlgmr.msra.gmra.mrb[16].mxu1 %vm2247_vm0, %v5245_v44 }
  0xed   : > { %2662 = vmatpush1.bf16.msra.mxu0 %v4280_v49  ;;  %2703 = vmatpush1.bf16.msra.mxu1 %v4282_v50  ;;  %v784_v49 = vld [vmem:[%s5216_s4 + $0x278] sm:$0xff] }
  0xee   : > { %2663 = vmatprep.subr.bf16.mxu0 %v4345_v51  ;;  %2704 = vmatprep.subr.bf16.mxu1 %v4347_v52  ;;  %v816_v50 = vld [vmem:[%s5216_s4 + $0x378] sm:$0xff]  ;;  %v4288_v51 = vcombine.low %v719_v38, %v751_v39  ;;  %v4290_v52 = vcombine.low %v720_v40, %v752_v41  ;;  %v4485_v38 = vcombine.high %v913_v32, %v945_v33  ;;  %v723_v40 = vld [vmem:[%s5216_s4 + $0x90] sm:$0xff] }
  0xef   : > { %2693 = vmatprep.mubr.bf16.mxu0 %v4635_v0  ;;  %2734 = vmatprep.mubr.bf16.mxu1 %v4635_v0  ;;  %v4355_v54 = vcombine.high %v784_v49, %v816_v50  ;;  %v755_v41 = vld [vmem:[%s5216_s4 + $0x190] sm:$0xff] }
  0xf1   : > { %2664 = vmatpush1.bf16.msra.mxu0 %v4344_v57  ;;  %2705 = vmatpush1.bf16.msra.mxu1 %v4346_v58  ;;  %v848_v57 = vld [vmem:[%s5216_s4 + $0x478] sm:$0xff] }
  0xf2   : > { %2665 = vmatprep.subr.bf16.mxu0 %v4409_v59  ;;  %2706 = vmatprep.subr.bf16.mxu1 %v4411_v60  ;;  %v880_v58 = vld [vmem:[%s5216_s4 + $0x578] sm:$0xff]  ;;  %v4352_v59 = vcombine.low %v783_v47, %v815_v48  ;;  %v4354_v60 = vcombine.low %v784_v49, %v816_v50  ;;  %v4297_v47 = vcombine.high %v723_v40, %v755_v41  ;;  %v787_v49 = vld [vmem:[%s5216_s4 + $0x290] sm:$0xff] }
  0xf3   : > { %v4419_v62 = vcombine.high %v848_v57, %v880_v58  ;;  %v819_v50 = vld [vmem:[%s5216_s4 + $0x390] sm:$0xff] }
  0xf5   : > { %2666 = vmatpush1.bf16.msra.mxu0 %v4408_v2  ;;  %2707 = vmatpush1.bf16.msra.mxu1 %v4410_v3  ;;  %v912_v2 = vld [vmem:[%s5216_s4 + $0x678] sm:$0xff] }
  0xf6   : > { %2667 = vmatprep.subr.bf16.mxu0 %v4473_v4  ;;  %2708 = vmatprep.subr.bf16.mxu1 %v4475_v5  ;;  %v944_v3 = vld [vmem:[%s5216_s4 + $0x778] sm:$0xff]  ;;  %v4416_v4 = vcombine.low %v847_v55, %v879_v56  ;;  %v4418_v5 = vcombine.low %v848_v57, %v880_v58  ;;  %v4361_v55 = vcombine.high %v787_v49, %v819_v50  ;;  %v851_v57 = vld [vmem:[%s5216_s4 + $0x490] sm:$0xff] }
  0xf7   : > { %v4483_v7 = vcombine.high %v912_v2, %v944_v3  ;;  %v883_v58 = vld [vmem:[%s5216_s4 + $0x590] sm:$0xff] }
  0xf9   : > { %2668 = vmatpush1.bf16.msra.mxu0 %v4472_v10  ;;  %2709 = vmatpush1.bf16.msra.mxu1 %v4474_v11  ;;  %v722_v10 = vld [vmem:[%s5216_s4 + $0x88] sm:$0xff] }
  0xfa   : > { %2743 = vmatprep.subr.bf16.mxu0 %v4285_v12  ;;  %2784 = vmatprep.subr.bf16.mxu1 %v4287_v13  ;;  %v754_v11 = vld [vmem:[%s5216_s4 + $0x188] sm:$0xff]  ;;  %v4480_v12 = vcombine.low %v911_v63, %v943_v1  ;;  %v4482_v13 = vcombine.low %v912_v2, %v944_v3  ;;  %v4425_v63 = vcombine.high %v851_v57, %v883_v58  ;;  %v915_v2 = vld [vmem:[%s5216_s4 + $0x690] sm:$0xff] }
  0xfb   : > { %v4295_v15 = vcombine.high %v722_v10, %v754_v11  ;;  %v947_v3 = vld [vmem:[%s5216_s4 + $0x790] sm:$0xff] }
  0xfc   : > { %4526 = vmatmul.mubr.msk.bf16.vlgmr.msra.gmra.mrb[20].mxu0 %vm2247_vm0, %v5245_v44  ;;  %4527 = vmatmul.mubr.msk.bf16.vlgmr.msra.gmra.mrb[20].mxu1 %vm2247_vm0, %v5245_v44 }
  0xfd   : > { %2744 = vmatpush1.bf16.msra.mxu0 %v4284_v18  ;;  %2785 = vmatpush1.bf16.msra.mxu1 %v4286_v19  ;;  %v786_v18 = vld [vmem:[%s5216_s4 + $0x288] sm:$0xff] }
  0xfe   : > { %2745 = vmatprep.subr.bf16.mxu0 %v4349_v20  ;;  %2786 = vmatprep.subr.bf16.mxu1 %v4351_v21  ;;  %v818_v19 = vld [vmem:[%s5216_s4 + $0x388] sm:$0xff]  ;;  %v4292_v20 = vcombine.low %v721_v8, %v753_v9  ;;  %v4294_v21 = vcombine.low %v722_v10, %v754_v11  ;;  %v4489_v8 = vcombine.high %v915_v2, %v947_v3  ;;  %v725_v10 = vld [vmem:[%s5216_s4 + $0xa0] sm:$0xff] }
  0xff   : > { %2775 = vmatprep.mubr.bf16.mxu0 %v4635_v0  ;;  %2816 = vmatprep.mubr.bf16.mxu1 %v4635_v0  ;;  %v4359_v23 = vcombine.high %v786_v18, %v818_v19  ;;  %v757_v11 = vld [vmem:[%s5216_s4 + $0x1a0] sm:$0xff] }
 0x101   : > { %2746 = vmatpush1.bf16.msra.mxu0 %v4348_v26  ;;  %2787 = vmatpush1.bf16.msra.mxu1 %v4350_v27  ;;  %v850_v26 = vld [vmem:[%s5216_s4 + $0x488] sm:$0xff] }
 0x102   : > { %2747 = vmatprep.subr.bf16.mxu0 %v4413_v28  ;;  %2788 = vmatprep.subr.bf16.mxu1 %v4415_v29  ;;  %v882_v27 = vld [vmem:[%s5216_s4 + $0x588] sm:$0xff]  ;;  %v4356_v28 = vcombine.low %v785_v16, %v817_v17  ;;  %v4358_v29 = vcombine.low %v786_v18, %v818_v19  ;;  %v4301_v16 = vcombine.high %v725_v10, %v757_v11  ;;  %v789_v18 = vld [vmem:[%s5216_s4 + $0x2a0] sm:$0xff] }
 0x103   : > { %v4423_v31 = vcombine.high %v850_v26, %v882_v27  ;;  %v821_v19 = vld [vmem:[%s5216_s4 + $0x3a0] sm:$0xff] }
 0x105   : > { %2748 = vmatpush1.bf16.msra.mxu0 %v4412_v34  ;;  %2789 = vmatpush1.bf16.msra.mxu1 %v4414_v35  ;;  %v914_v34 = vld [vmem:[%s5216_s4 + $0x688] sm:$0xff] }
 0x106   : > { %2749 = vmatprep.subr.bf16.mxu0 %v4477_v36  ;;  %2790 = vmatprep.subr.bf16.mxu1 %v4479_v37  ;;  %v946_v35 = vld [vmem:[%s5216_s4 + $0x788] sm:$0xff]  ;;  %v4420_v36 = vcombine.low %v849_v24, %v881_v25  ;;  %v4422_v37 = vcombine.low %v850_v26, %v882_v27  ;;  %v4365_v24 = vcombine.high %v789_v18, %v821_v19  ;;  %v853_v26 = vld [vmem:[%s5216_s4 + $0x4a0] sm:$0xff] }
 0x107   : > { %v4487_v39 = vcombine.high %v914_v34, %v946_v35  ;;  %v885_v27 = vld [vmem:[%s5216_s4 + $0x5a0] sm:$0xff] }
 0x109   : > { %2750 = vmatpush1.bf16.msra.mxu0 %v4476_v42  ;;  %2791 = vmatpush1.bf16.msra.mxu1 %v4478_v43  ;;  %v724_v42 = vld [vmem:[%s5216_s4 + $0x98] sm:$0xff] }
 0x10a   : > { %2825 = vmatprep.subr.bf16.mxu0 %v4289_v45  ;;  %2866 = vmatprep.subr.bf16.mxu1 %v4291_v46  ;;  %v756_v43 = vld [vmem:[%s5216_s4 + $0x198] sm:$0xff]  ;;  %v4484_v45 = vcombine.low %v913_v32, %v945_v33  ;;  %v4486_v46 = vcombine.low %v914_v34, %v946_v35  ;;  %v4429_v32 = vcombine.high %v853_v26, %v885_v27  ;;  %v917_v34 = vld [vmem:[%s5216_s4 + $0x6a0] sm:$0xff] }
 0x10b   : > { %v4299_v48 = vcombine.high %v724_v42, %v756_v43  ;;  %v949_v35 = vld [vmem:[%s5216_s4 + $0x7a0] sm:$0xff] }
 0x10c   : > { %4528 = vmatmul.mubr.msk.bf16.vlgmr.msra.gmra.mrb[24].mxu0 %vm2247_vm0, %v5245_v44  ;;  %4529 = vmatmul.mubr.msk.bf16.vlgmr.msra.gmra.mrb[24].mxu1 %vm2247_vm0, %v5245_v44 }
 0x10d   : > { %2826 = vmatpush1.bf16.msra.mxu0 %v4288_v51  ;;  %2867 = vmatpush1.bf16.msra.mxu1 %v4290_v52  ;;  %v788_v51 = vld [vmem:[%s5216_s4 + $0x298] sm:$0xff] }
 0x10e   : > { %2827 = vmatprep.subr.bf16.mxu0 %v4353_v53  ;;  %2868 = vmatprep.subr.bf16.mxu1 %v4355_v54  ;;  %v820_v52 = vld [vmem:[%s5216_s4 + $0x398] sm:$0xff]  ;;  %v4296_v53 = vcombine.low %v723_v40, %v755_v41  ;;  %v4298_v54 = vcombine.low %v724_v42, %v756_v43  ;;  %v727_v41 = vld [vmem:[%s5216_s4 + $0xb0] sm:$0xff] }
 0x10f   : > { %2857 = vmatprep.mubr.bf16.mxu0 %v4635_v0  ;;  %2898 = vmatprep.mubr.bf16.mxu1 %v4635_v0  ;;  %v4363_v56 = vcombine.high %v788_v51, %v820_v52  ;;  %v759_v42 = vld [vmem:[%s5216_s4 + $0x1b0] sm:$0xff]  ;;  %v728_v43 = vld [vmem:[%s5216_s4 + $0xb8] sm:$0xff] }
 0x111   : > { %2828 = vmatpush1.bf16.msra.mxu0 %v4352_v59  ;;  %2869 = vmatpush1.bf16.msra.mxu1 %v4354_v60  ;;  %v852_v59 = vld [vmem:[%s5216_s4 + $0x498] sm:$0xff] }
 0x112   : > { %2829 = vmatprep.subr.bf16.mxu0 %v4417_v61  ;;  %2870 = vmatprep.subr.bf16.mxu1 %v4419_v62  ;;  %v884_v60 = vld [vmem:[%s5216_s4 + $0x598] sm:$0xff]  ;;  %v4360_v61 = vcombine.low %v787_v49, %v819_v50  ;;  %v4362_v62 = vcombine.low %v788_v51, %v820_v52  ;;  %v791_v50 = vld [vmem:[%s5216_s4 + $0x2b0] sm:$0xff] }
 0x113   : > { %v4427_v1 = vcombine.high %v852_v59, %v884_v60  ;;  %v823_v51 = vld [vmem:[%s5216_s4 + $0x3b0] sm:$0xff]  ;;  %v792_v52 = vld [vmem:[%s5216_s4 + $0x2b8] sm:$0xff] }
 0x115   : > { %2830 = vmatpush1.bf16.msra.mxu0 %v4416_v4  ;;  %2871 = vmatpush1.bf16.msra.mxu1 %v4418_v5  ;;  %v916_v4 = vld [vmem:[%s5216_s4 + $0x698] sm:$0xff] }
 0x116   : > { %2831 = vmatprep.subr.bf16.mxu0 %v4481_v6  ;;  %2872 = vmatprep.subr.bf16.mxu1 %v4483_v7  ;;  %v948_v5 = vld [vmem:[%s5216_s4 + $0x798] sm:$0xff]  ;;  %v4424_v6 = vcombine.low %v851_v57, %v883_v58  ;;  %v4426_v7 = vcombine.low %v852_v59, %v884_v60  ;;  %v855_v58 = vld [vmem:[%s5216_s4 + $0x4b0] sm:$0xff]  ;;  %v5472_v60 = vld [vmem:[%s5748_s0] sm:$0x3] }
 0x117   : > { %v4491_v9 = vcombine.high %v916_v4, %v948_v5  ;;  %v887_v59 = vld [vmem:[%s5216_s4 + $0x5b0] sm:$0xff] }
 0x119   : > { %2832 = vmatpush1.bf16.msra.mxu0 %v4480_v12  ;;  %2873 = vmatpush1.bf16.msra.mxu1 %v4482_v13  ;;  %v726_v12 = vld [vmem:[%s5216_s4 + $0xa8] sm:$0xff] }
 0x11a   : > { %2907 = vmatprep.subr.bf16.mxu0 %v4293_v14  ;;  %2948 = vmatprep.subr.bf16.mxu1 %v4295_v15  ;;  %v758_v13 = vld [vmem:[%s5216_s4 + $0x1a8] sm:$0xff]  ;;  %v4488_v14 = vcombine.low %v915_v2, %v947_v3  ;;  %v4490_v15 = vcombine.low %v916_v4, %v948_v5  ;;  %v4433_v2 = vcombine.high %v855_v58, %v887_v59  ;;  %v919_v4 = vld [vmem:[%s5216_s4 + $0x6b0] sm:$0xff] }
 0x11b   : > { %v4303_v17 = vcombine.high %v726_v12, %v758_v13  ;;  %v951_v5 = vld [vmem:[%s5216_s4 + $0x7b0] sm:$0xff] }
 0x11c   : > { %4530 = vmatmul.mubr.msk.bf16.vlgmr.msra.gmra.mrb[28].mxu0 %vm2247_vm0, %v5245_v44  ;;  %4531 = vmatmul.mubr.msk.bf16.vlgmr.msra.gmra.mrb[28].mxu1 %vm2247_vm0, %v5245_v44 }
 0x11d   : > { %2908 = vmatpush1.bf16.msra.mxu0 %v4292_v20  ;;  %2949 = vmatpush1.bf16.msra.mxu1 %v4294_v21  ;;  %v790_v20 = vld [vmem:[%s5216_s4 + $0x2a8] sm:$0xff] }
 0x11e   : > { %2909 = vmatprep.subr.bf16.mxu0 %v4357_v22  ;;  %2950 = vmatprep.subr.bf16.mxu1 %v4359_v23  ;;  %v822_v21 = vld [vmem:[%s5216_s4 + $0x3a8] sm:$0xff]  ;;  %v4300_v22 = vcombine.low %v725_v10, %v757_v11  ;;  %v4302_v23 = vcombine.low %v726_v12, %v758_v13  ;;  %v4497_v10 = vcombine.high %v919_v4, %v951_v5  ;;  %v729_v12 = vld [vmem:[%s5216_s4 + $0xc0] sm:$0xff] }
 0x11f   : > { %2939 = vmatprep.mubr.bf16.mxu0 %v4635_v0  ;;  %2980 = vmatprep.mubr.bf16.mxu1 %v4635_v0  ;;  %v4367_v25 = vcombine.high %v790_v20, %v822_v21  ;;  %v761_v13 = vld [vmem:[%s5216_s4 + $0x1c0] sm:$0xff] }
 0x121   : > { %2910 = vmatpush1.bf16.msra.mxu0 %v4356_v28  ;;  %2951 = vmatpush1.bf16.msra.mxu1 %v4358_v29  ;;  %v854_v28 = vld [vmem:[%s5216_s4 + $0x4a8] sm:$0xff] }
 0x122   : > { %2911 = vmatprep.subr.bf16.mxu0 %v4421_v30  ;;  %2952 = vmatprep.subr.bf16.mxu1 %v4423_v31  ;;  %v886_v29 = vld [vmem:[%s5216_s4 + $0x5a8] sm:$0xff]  ;;  %v4364_v30 = vcombine.low %v789_v18, %v821_v19  ;;  %v4366_v31 = vcombine.low %v790_v20, %v822_v21  ;;  %v4309_v18 = vcombine.high %v729_v12, %v761_v13  ;;  %v793_v20 = vld [vmem:[%s5216_s4 + $0x2c0] sm:$0xff] }
 0x123   : > { %v4431_v33 = vcombine.high %v854_v28, %v886_v29  ;;  %v825_v21 = vld [vmem:[%s5216_s4 + $0x3c0] sm:$0xff] }
 0x125   : > { %2912 = vmatpush1.bf16.msra.mxu0 %v4420_v36  ;;  %2953 = vmatpush1.bf16.msra.mxu1 %v4422_v37  ;;  %v918_v36 = vld [vmem:[%s5216_s4 + $0x6a8] sm:$0xff] }
 0x126   : > { %2913 = vmatprep.subr.bf16.mxu0 %v4485_v38  ;;  %2954 = vmatprep.subr.bf16.mxu1 %v4487_v39  ;;  %v950_v37 = vld [vmem:[%s5216_s4 + $0x7a8] sm:$0xff]  ;;  %v4430_v38 = vcombine.low %v854_v28, %v886_v29  ;;  %v4493_v39 = vcombine.high %v917_v34, %v949_v35  ;;  %v857_v28 = vld [vmem:[%s5216_s4 + $0x4c0] sm:$0xff] }
 0x127   : > { %v4495_v40 = vcombine.high %v918_v36, %v950_v37  ;;  %v889_v29 = vld [vmem:[%s5216_s4 + $0x5c0] sm:$0xff] }
 0x129   : > { %2914 = vmatpush1.bf16.msra.mxu0 %v4484_v45  ;;  %2955 = vmatpush1.bf16.msra.mxu1 %v4486_v46  ;;  %v760_v45 = vld [vmem:[%s5216_s4 + $0x1b8] sm:$0xff]  ;;  %v4492_v46 = vcombine.low %v917_v34, %v949_v35  ;;  %v4437_v34 = vcombine.high %v857_v28, %v889_v29 }
 0x12a   : > { %2989 = vmatprep.subr.bf16.mxu0 %v4297_v47  ;;  %3030 = vmatprep.subr.bf16.mxu1 %v4299_v48  ;;  %v4494_v47 = vcombine.low %v918_v36, %v950_v37  ;;  %v4305_v48 = vcombine.high %v727_v41, %v759_v42  ;;  %v4307_v49 = vcombine.high %v728_v43, %v760_v45  ;;  %v921_v36 = vld [vmem:[%s5216_s4 + $0x6c0] sm:$0xff] }
 0x12b   : > { %v953_v37 = vld [vmem:[%s5216_s4 + $0x7c0] sm:$0xff] }
 0x12c   : > { %4532 = vmatmul.mubr.msk.bf16.vlgmr.msra.gmra.mrb[32].mxu0 %vm2247_vm0, %v5245_v44  ;;  %4533 = vmatmul.mubr.msk.bf16.vlgmr.msra.gmra.mrb[32].mxu1 %vm2247_vm0, %v5245_v44 }
 0x12d   : > { %2990 = vmatpush1.bf16.msra.mxu0 %v4296_v53  ;;  %3031 = vmatpush1.bf16.msra.mxu1 %v4298_v54  ;;  %v824_v53 = vld [vmem:[%s5216_s4 + $0x3b8] sm:$0xff]  ;;  %v4304_v54 = vcombine.low %v727_v41, %v759_v42  ;;  %v4501_v41 = vcombine.high %v921_v36, %v953_v37 }
 0x12e   : > { %2991 = vmatprep.subr.bf16.mxu0 %v4361_v55  ;;  %3032 = vmatprep.subr.bf16.mxu1 %v4363_v56  ;;  %v4306_v55 = vcombine.low %v728_v43, %v760_v45  ;;  %v4369_v56 = vcombine.high %v791_v50, %v823_v51  ;;  %v4371_v57 = vcombine.high %v792_v52, %v824_v53  ;;  %v731_v43 = vld [vmem:[%s5216_s4 + $0xd0] sm:$0xff] }
 0x12f   : > { %3021 = vmatprep.mubr.bf16.mxu0 %v4635_v0  ;;  %3062 = vmatprep.mubr.bf16.mxu1 %v4635_v0  ;;  %v763_v45 = vld [vmem:[%s5216_s4 + $0x1d0] sm:$0xff] }
 0x131   : > { %2992 = vmatpush1.bf16.msra.mxu0 %v4360_v61  ;;  %3033 = vmatpush1.bf16.msra.mxu1 %v4362_v62  ;;  %v856_v61 = vld [vmem:[%s5216_s4 + $0x4b8] sm:$0xff] }
 0x132   : > { %2993 = vmatprep.subr.bf16.mxu0 %v4425_v63  ;;  %3034 = vmatprep.subr.bf16.mxu1 %v4427_v1  ;;  %v888_v62 = vld [vmem:[%s5216_s4 + $0x5b8] sm:$0xff]  ;;  %v4368_v63 = vcombine.low %v791_v50, %v823_v51  ;;  %v4370_v1 = vcombine.low %v792_v52, %v824_v53  ;;  %v4313_v50 = vcombine.high %v731_v43, %v763_v45  ;;  %v795_v52 = vld [vmem:[%s5216_s4 + $0x2d0] sm:$0xff] }
 0x133   : > { %v4435_v3 = vcombine.high %v856_v61, %v888_v62  ;;  %v827_v53 = vld [vmem:[%s5216_s4 + $0x3d0] sm:$0xff] }
 0x135   : > { %2994 = vmatpush1.bf16.msra.mxu0 %v4424_v6  ;;  %3035 = vmatpush1.bf16.msra.mxu1 %v4426_v7  ;;  %v920_v6 = vld [vmem:[%s5216_s4 + $0x6b8] sm:$0xff] }
 0x136   : > { %2995 = vmatprep.subr.bf16.mxu0 %v4489_v8  ;;  %3036 = vmatprep.subr.bf16.mxu1 %v4491_v9  ;;  %v952_v7 = vld [vmem:[%s5216_s4 + $0x7b8] sm:$0xff]  ;;  %v4432_v8 = vcombine.low %v855_v58, %v887_v59  ;;  %v4434_v9 = vcombine.low %v856_v61, %v888_v62  ;;  %v4377_v58 = vcombine.high %v795_v52, %v827_v53  ;;  %v859_v61 = vld [vmem:[%s5216_s4 + $0x4d0] sm:$0xff] }
 0x137   : > { %v4499_v11 = vcombine.high %v920_v6, %v952_v7  ;;  %v891_v62 = vld [vmem:[%s5216_s4 + $0x5d0] sm:$0xff] }
 0x139   : > { %2996 = vmatpush1.bf16.msra.mxu0 %v4488_v14  ;;  %3037 = vmatpush1.bf16.msra.mxu1 %v4490_v15  ;;  %v730_v14 = vld [vmem:[%s5216_s4 + $0xc8] sm:$0xff] }
 0x13a   : > { %3071 = vmatprep.subr.bf16.mxu0 %v4301_v16  ;;  %3112 = vmatprep.subr.bf16.mxu1 %v4303_v17  ;;  %v762_v15 = vld [vmem:[%s5216_s4 + $0x1c8] sm:$0xff]  ;;  %v4496_v16 = vcombine.low %v919_v4, %v951_v5  ;;  %v4498_v17 = vcombine.low %v920_v6, %v952_v7  ;;  %v4441_v4 = vcombine.high %v859_v61, %v891_v62  ;;  %v923_v6 = vld [vmem:[%s5216_s4 + $0x6d0] sm:$0xff] }
 0x13b   : > { %v4311_v19 = vcombine.high %v730_v14, %v762_v15  ;;  %v955_v7 = vld [vmem:[%s5216_s4 + $0x7d0] sm:$0xff] }
 0x13c   : > { %4534 = vmatmul.mubr.msk.bf16.vlgmr.msra.gmra.mrb[36].mxu0 %vm2247_vm0, %v5245_v44  ;;  %4535 = vmatmul.mubr.msk.bf16.vlgmr.msra.gmra.mrb[36].mxu1 %vm2247_vm0, %v5245_v44  ;;  %v4428_v44 = vcombine.low %v853_v26, %v885_v27  ;;  %v4373_v26 = vcombine.high %v793_v20, %v825_v21 }
 0x13d   : > { %3072 = vmatpush1.bf16.msra.mxu0 %v4300_v22  ;;  %3113 = vmatpush1.bf16.msra.mxu1 %v4302_v23  ;;  %v794_v22 = vld [vmem:[%s5216_s4 + $0x2c8] sm:$0xff] }
 0x13e   : > { %3073 = vmatprep.subr.bf16.mxu0 %v4365_v24  ;;  %3114 = vmatprep.subr.bf16.mxu1 %v4367_v25  ;;  %v826_v23 = vld [vmem:[%s5216_s4 + $0x3c8] sm:$0xff]  ;;  %v4308_v24 = vcombine.low %v729_v12, %v761_v13  ;;  %v4310_v25 = vcombine.low %v730_v14, %v762_v15  ;;  %v4505_v12 = vcombine.high %v923_v6, %v955_v7  ;;  %v733_v14 = vld [vmem:[%s5216_s4 + $0xe0] sm:$0xff] }
 0x13f   : > { %3103 = vmatprep.mubr.bf16.mxu0 %v4635_v0  ;;  %3144 = vmatprep.mubr.bf16.mxu1 %v4635_v0  ;;  %v4375_v27 = vcombine.high %v794_v22, %v826_v23  ;;  %v765_v15 = vld [vmem:[%s5216_s4 + $0x1e0] sm:$0xff] }
 0x141   : > { %3074 = vmatpush1.bf16.msra.mxu0 %v4364_v30  ;;  %3115 = vmatpush1.bf16.msra.mxu1 %v4366_v31  ;;  %v858_v30 = vld [vmem:[%s5216_s4 + $0x4c8] sm:$0xff] }
 0x142   : > { %3075 = vmatprep.subr.bf16.mxu0 %v4429_v32  ;;  %3116 = vmatprep.subr.bf16.mxu1 %v4431_v33  ;;  %v890_v31 = vld [vmem:[%s5216_s4 + $0x5c8] sm:$0xff]  ;;  %v4372_v32 = vcombine.low %v793_v20, %v825_v21  ;;  %v4374_v33 = vcombine.low %v794_v22, %v826_v23  ;;  %v4317_v20 = vcombine.high %v733_v14, %v765_v15  ;;  %v797_v22 = vld [vmem:[%s5216_s4 + $0x2e0] sm:$0xff] }
 0x143   : > { %v4439_v35 = vcombine.high %v858_v30, %v890_v31  ;;  %v829_v23 = vld [vmem:[%s5216_s4 + $0x3e0] sm:$0xff] }
 0x145   : > { %3076 = vmatpush1.bf16.msra.mxu0 %v4428_v44  ;;  %3117 = vmatpush1.bf16.msra.mxu1 %v4430_v38  ;;  %v922_v44 = vld [vmem:[%s5216_s4 + $0x6c8] sm:$0xff] }
 0x146   : > { %3077 = vmatprep.subr.bf16.mxu0 %v4493_v39  ;;  %3118 = vmatprep.subr.bf16.mxu1 %v4495_v40  ;;  %v954_v38 = vld [vmem:[%s5216_s4 + $0x7c8] sm:$0xff]  ;;  %v4436_v39 = vcombine.low %v857_v28, %v889_v29  ;;  %v4438_v40 = vcombine.low %v858_v30, %v890_v31  ;;  %v4381_v28 = vcombine.high %v797_v22, %v829_v23  ;;  %v5543_v30 = vld [vmem:[%s5216_s4 + $0x4e0] sm:$0xff] }
 0x147   : > { %v4503_v42 = vcombine.high %v922_v44, %v954_v38  ;;  %v5546_v31 = vld [vmem:[%s5216_s4 + $0x5e0] sm:$0xff] }
 0x149   : > { %3078 = vmatpush1.bf16.msra.mxu0 %v4492_v46  ;;  %3119 = vmatpush1.bf16.msra.mxu1 %v4494_v47  ;;  %v732_v46 = vld [vmem:[%s5216_s4 + $0xd8] sm:$0xff] }
 0x14a   : > { %3153 = vmatprep.subr.bf16.mxu0 %v4305_v48  ;;  %3194 = vmatprep.subr.bf16.mxu1 %v4307_v49  ;;  %v764_v47 = vld [vmem:[%s5216_s4 + $0x1d8] sm:$0xff]  ;;  %v4500_v48 = vcombine.low %v921_v36, %v953_v37  ;;  %v4502_v49 = vcombine.low %v922_v44, %v954_v38  ;;  %v5554_v36 = vld [vmem:[%s5216_s4 + $0x5e8] sm:$0xff]  ;;  %v5558_v37 = vpop.permute.xlu0 %964  ;;  %v4380_v44 = vcombine.low %v797_v22, %v829_v23  ;;  %v831_v22 = vld [vmem:[%s5216_s4 + $0x3f0] sm:$0xff] }
 0x14b   : > { %v4315_v51 = vcombine.high %v732_v46, %v764_v47 }
 0x14c   : > { %4536 = vmatmul.mubr.msk.bf16.vlgmr.msra.gmra.mrb[40].mxu0 %vm2247_vm0, %v5472_v60  ;;  %4537 = vmatmul.mubr.msk.bf16.vlgmr.msra.gmra.mrb[40].mxu1 %vm2247_vm0, %v5472_v60 }
 0x14d   : > { %3154 = vmatpush1.bf16.msra.mxu0 %v4304_v54  ;;  %3195 = vmatpush1.bf16.msra.mxu1 %v4306_v55  ;;  %v796_v54 = vld [vmem:[%s5216_s4 + $0x2d8] sm:$0xff] }
 0x14e   : > { %3155 = vmatprep.subr.bf16.mxu0 %v4369_v56  ;;  %3196 = vmatprep.subr.bf16.mxu1 %v4371_v57  ;;  %v828_v55 = vld [vmem:[%s5216_s4 + $0x3d8] sm:$0xff]  ;;  %v4312_v56 = vcombine.low %v731_v43, %v763_v45  ;;  %v4314_v57 = vcombine.low %v732_v46, %v764_v47  ;;  %v5572_v45 = vld [vmem:[%s5216_s4 + $0x6e8] sm:$0xff] }
 0x14f   : > { %3185 = vmatprep.mubr.bf16.mxu0 %v4635_v0  ;;  %3226 = vmatprep.mubr.bf16.mxu1 %v4635_v0  ;;  %v4379_v59 = vcombine.high %v796_v54, %v828_v55  ;;  %v958_v46 = vld [vmem:[%s5216_s4 + $0x7e8] sm:$0xff] }
 0x151   : > { %3156 = vmatpush1.bf16.msra.mxu0 %v4368_v63  ;;  %3197 = vmatpush1.bf16.msra.mxu1 %v4370_v1  ;;  %v860_v63 = vld [vmem:[%s5216_s4 + $0x4d8] sm:$0xff] }
 0x152   : > { %3157 = vmatprep.subr.bf16.mxu0 %v4433_v2  ;;  %3198 = vmatprep.subr.bf16.mxu1 %v4435_v3  ;;  %v892_v1 = vld [vmem:[%s5216_s4 + $0x5d8] sm:$0xff]  ;;  %v4376_v2 = vcombine.low %v795_v52, %v827_v53  ;;  %v4378_v3 = vcombine.low %v796_v54, %v828_v55  ;;  %v4444_v52 = vcombine.low %v5543_v30, %v5546_v31 }
 0x153   : > { %v4443_v5 = vcombine.high %v860_v63, %v892_v1 }
 0x155   : > { %3158 = vmatpush1.bf16.msra.mxu0 %v4432_v8  ;;  %3199 = vmatpush1.bf16.msra.mxu1 %v4434_v9  ;;  %v924_v8 = vld [vmem:[%s5216_s4 + $0x6d8] sm:$0xff] }
 0x156   : > { %3159 = vmatprep.subr.bf16.mxu0 %v4497_v10  ;;  %3200 = vmatprep.subr.bf16.mxu1 %v4499_v11  ;;  %v956_v9 = vld [vmem:[%s5216_s4 + $0x7d8] sm:$0xff]  ;;  %v4440_v10 = vcombine.low %v859_v61, %v891_v62  ;;  %v4442_v11 = vcombine.low %v860_v63, %v892_v1 }
 0x157   : > { %v4507_v13 = vcombine.high %v924_v8, %v956_v9 }
 0x159   : > { %3160 = vmatpush1.bf16.msra.mxu0 %v4496_v16  ;;  %3201 = vmatpush1.bf16.msra.mxu1 %v4498_v17  ;;  %v734_v16 = vld [vmem:[%s5216_s4 + $0xe8] sm:$0xff] }
 0x15a   : > { %3235 = vmatprep.subr.bf16.mxu0 %v4309_v18  ;;  %3276 = vmatprep.subr.bf16.mxu1 %v4311_v19  ;;  %v766_v17 = vld [vmem:[%s5216_s4 + $0x1e8] sm:$0xff]  ;;  %v4504_v18 = vcombine.low %v923_v6, %v955_v7  ;;  %v4506_v19 = vcombine.low %v924_v8, %v956_v9 }
 0x15b   : > { %v4319_v21 = vcombine.high %v734_v16, %v766_v17 }
 0x15c   : > { %4538 = vmatmul.mubr.msk.bf16.vlgmr.msra.gmra.mrb[44].mxu0 %vm2247_vm0, %v5472_v60  ;;  %4539 = vmatmul.mubr.msk.bf16.vlgmr.msra.gmra.mrb[44].mxu1 %vm2247_vm0, %v5472_v60 }
 0x15d   : > { %3236 = vmatpush1.bf16.msra.mxu0 %v4308_v24  ;;  %3277 = vmatpush1.bf16.msra.mxu1 %v4310_v25  ;;  %v798_v24 = vld [vmem:[%s5216_s4 + $0x2e8] sm:$0xff] }
 0x15e   : > { %3237 = vmatprep.subr.bf16.mxu0 %v4373_v26  ;;  %3278 = vmatprep.subr.bf16.mxu1 %v4375_v27  ;;  %v830_v25 = vld [vmem:[%s5216_s4 + $0x3e8] sm:$0xff]  ;;  %v4316_v26 = vcombine.low %v733_v14, %v765_v15  ;;  %v4318_v27 = vcombine.low %v734_v16, %v766_v17  ;;  %v4510_v15 = vcombine.low %v5572_v45, %v958_v46 }
 0x15f   : > { %3267 = vmatprep.mubr.bf16.mxu0 %v4635_v0  ;;  %3308 = vmatprep.mubr.bf16.mxu1 %v4635_v0  ;;  %v4383_v29 = vcombine.high %v798_v24, %v830_v25  ;;  %v4382_v38 = vcombine.low %v798_v24, %v830_v25  ;;  %v800_v24 = vld [vmem:[%s5216_s4 + $0x2f8] sm:$0xff] }
 0x160   : > { %v832_v25 = vld [vmem:[%s5216_s4 + $0x3f8] sm:$0xff] }
 0x161   : > { %3238 = vmatpush1.bf16.msra.mxu0 %v4372_v32  ;;  %3279 = vmatpush1.bf16.msra.mxu1 %v4374_v33  ;;  %v4636_v32 = vmov 1983009808  }
 0x162   : > { %3239 = vmatprep.subr.bf16.mxu0 %v4437_v34  ;;  %3280 = vmatprep.subr.bf16.mxu1 %v4439_v35  ;;  %v3886_v33 = vunpack.c.l.s4 %v4636_v32  ;;  %v3888_v34 = vlaneseq  ;;  %v5551_v35 = vld [vmem:[%s5216_s4 + $0x4e8] sm:$0xff]  ;;  %v863_v32 = vld [vmem:[%s5216_s4 + $0x4f0] sm:$0xff] }
 0x163   : > { %v4447_v43 = vcombine.high %v5551_v35, %v5554_v36 }
 0x165   : > { %3240 = vmatpush1.bf16.msra.mxu0 %v4436_v39  ;;  %3281 = vmatpush1.bf16.msra.mxu1 %v4438_v40  ;;  %v4445_v39 = vcombine.high %v5543_v30, %v5546_v31  ;;  %v5564_v40 = vld [vmem:[%s5216_s4 + $0x6e0] sm:$0xff]  ;;  %v4387_v31 = vcombine.high %v800_v24, %v832_v25 }
 0x166   : > { %3241 = vmatprep.subr.bf16.mxu0 %v4501_v41  ;;  %3282 = vmatprep.subr.bf16.mxu1 %v4503_v42  ;;  %v5567_v41 = vld [vmem:[%s5216_s4 + $0x7e0] sm:$0xff] }
 0x167   : > { %v4508_v14 = vcombine.low %v5564_v40, %v5567_v41 }
 0x169   : > { %3242 = vmatpush1.bf16.msra.mxu0 %v4500_v48  ;;  %3283 = vmatpush1.bf16.msra.mxu1 %v4502_v49 }
 0x16a   : > { %3317 = vmatprep.subr.bf16.mxu0 %v4313_v50  ;;  %3358 = vmatprep.subr.bf16.mxu1 %v4315_v51  ;;  %v3887_v50 = vunpack.c.0.s8 %v3886_v33  ;;  %v3889_v51 = vshrl.u32 %v3888_v34, 7  ;;  %v895_v33 = vld [vmem:[%s5216_s4 + $0x5f0] sm:$0xff]  ;;  %v864_v34 = vld [vmem:[%s5216_s4 + $0x4f8] sm:$0xff] }
 0x16c   : > { %4540 = vmatmul.mubr.msk.bf16.vlgmr.msra.gmra.mrb[48].mxu0 %vm2247_vm0, %v5472_v60  ;;  %4541 = vmatmul.mubr.msk.bf16.vlgmr.msra.gmra.mrb[48].mxu1 %vm2247_vm0, %v5472_v60  ;;  %v5595_v7 = vsub.s32 %v3887_v50, %v3889_v51 }
 0x16d   : > { %3318 = vmatpush1.bf16.msra.mxu0 %v4312_v56  ;;  %3359 = vmatpush1.bf16.msra.mxu1 %v4314_v57  ;;  %v4446_v57 = vcombine.low %v5551_v35, %v5554_v36  ;;  %v896_v35 = vld [vmem:[%s5216_s4 + $0x5f8] sm:$0xff] }
 0x16e   : > { %3319 = vmatprep.subr.bf16.mxu0 %v4377_v58  ;;  %3360 = vmatprep.subr.bf16.mxu1 %v4379_v59  ;;  %v4509_v58 = vcombine.high %v5564_v40, %v5567_v41  ;;  %v735_v59 = vld [vmem:[%s5216_s4 + $0xf0] sm:$0xff] }
 0x16f   : > { %3349 = vmatprep.mubr.bf16.mxu0 %v4635_v0  ;;  %3390 = vmatprep.mubr.bf16.mxu1 %v4635_v0  ;;  %v959_v40 = vld [vmem:[%s5216_s4 + $0x7f0] sm:$0xff] }
 0x171   : > { %3320 = vmatpush1.bf16.msra.mxu0 %v4376_v2  ;;  %3361 = vmatpush1.bf16.msra.mxu1 %v4378_v3  ;;  %v4511_v2 = vcombine.high %v5572_v45, %v958_v46  ;;  %v767_v3 = vld [vmem:[%s5216_s4 + $0x1f0] sm:$0xff]  ;;  %v960_v45 = vld [vmem:[%s5216_s4 + $0x7f8] sm:$0xff] }
 0x172   : > { %3321 = vmatprep.subr.bf16.mxu0 %v4441_v4  ;;  %3362 = vmatprep.subr.bf16.mxu1 %v4443_v5 }
 0x175   : > { %3322 = vmatpush1.bf16.msra.mxu0 %v4440_v10  ;;  %3363 = vmatpush1.bf16.msra.mxu1 %v4442_v11  ;;  %v736_v10 = vld [vmem:[%s5216_s4 + $0xf8] sm:$0xff] }
 0x176   : > { %3323 = vmatprep.subr.bf16.mxu0 %v4505_v12  ;;  %3364 = vmatprep.subr.bf16.mxu1 %v4507_v13  ;;  %v768_v11 = vld [vmem:[%s5216_s4 + $0x1f8] sm:$0xff] }
 0x179   : > { %3324 = vmatpush1.bf16.msra.mxu0 %v4504_v18  ;;  %3365 = vmatpush1.bf16.msra.mxu1 %v4506_v19  ;;  %v4321_v18 = vcombine.high %v735_v59, %v767_v3 }
 0x17a   : > { %3399 = vmatprep.subr.bf16.mxu0 %v4317_v20  ;;  %3440 = vmatprep.subr.bf16.mxu1 %v4319_v21  ;;  %v4323_v20 = vcombine.high %v736_v10, %v768_v11  ;;  %v799_v21 = vld [vmem:[%s5216_s4 + $0x2f0] sm:$0xff] }
 0x17b   : > { %v4384_v36 = vcombine.low %v799_v21, %v831_v22 }
 0x17c   : > { %4542 = vmatmul.mubr.msk.bf16.vlgmr.msra.gmra.mrb[52].mxu0 %vm2247_vm0, %v5472_v60  ;;  %4543 = vmatmul.mubr.msk.bf16.vlgmr.msra.gmra.mrb[52].mxu1 %vm2247_vm0, %v5472_v60 }
 0x17d   : > { %3400 = vmatpush1.bf16.msra.mxu0 %v4316_v26  ;;  %3441 = vmatpush1.bf16.msra.mxu1 %v4318_v27  ;;  %v4320_v27 = vcombine.low %v735_v59, %v767_v3 }
 0x17e   : > { %3401 = vmatprep.subr.bf16.mxu0 %v4381_v28  ;;  %3442 = vmatprep.subr.bf16.mxu1 %v4383_v29  ;;  %v4322_v28 = vcombine.low %v736_v10, %v768_v11  ;;  %v4385_v29 = vcombine.high %v799_v21, %v831_v22 }
 0x17f   : > { %v2285_v42 = vpop.f32.mrb[0].mxu0  ;;  %3431 = vmatprep.mubr.bf16.mxu0 %v4635_v0  ;;  %v2326_v48 = vpop.f32.mrb[0].mxu1  ;;  %3472 = vmatprep.mubr.bf16.mxu1 %v4635_v0 }
 0x180   : > { %v2286_v47 = vadd.f32 %v2285_v42, %v5558_v37  ;;  %v2287_v49 = vpop.f32.mrb[1].mxu0  ;;  %v2327_v53 = vadd.f32 %v2326_v48, %v5558_v37  ;;  %v2328_v55 = vpop.f32.mrb[1].mxu1  ;;  %v4451_v42 = vcombine.high %v864_v34, %v896_v35 }
 0x181   : > { %v2288_v54 = vadd.f32 %v2287_v49, %v5558_v37  ;;  %v2289_v56 = vpop.f32.mrb[2].mxu0  ;;  %3402 = vmatpush1.bf16.msra.mxu0 %v4380_v44  ;;  %v2329_v62 = vadd.f32 %v2328_v55, %v5558_v37  ;;  %v2330_v63 = vpop.f32.mrb[2].mxu1  ;;  %3443 = vmatpush1.bf16.msra.mxu1 %v4382_v38  ;;  %v4386_v44 = vcombine.low %v800_v24, %v832_v25 }
 0x182   : > { %vm3563_vm1 = vcmp.gt.f32.partialorder %v2286_v47, 0.0  ;;  %v3627_v61 = vmul.f32 0.2, %v2286_v47  ;;  %v2290_v1 = vpop.f32.mrb[3].mxu0  ;;  %3403 = vmatprep.subr.bf16.mxu0 %v4445_v39  ;;  %vm3565_vm2 = vcmp.gt.f32.partialorder %v2327_v53, 0.0  ;;  %3444 = vmatprep.subr.bf16.mxu1 %v4447_v43  ;;  %v2331_v9 = vpop.f32.mrb[3].mxu1  ;;  %v4449_v38 = vcombine.high %v863_v32, %v895_v33 }
 0x183   : > { %v3629_v4 = vmul.f32 0.2, %v2327_v53  ;;  %vm3564_vm3 = vcmp.gt.f32.partialorder %v2288_v54, 0.0  ;;  %v3628_v5 = vmul.f32 0.2, %v2288_v54  ;;  %vm3566_vm4 = vcmp.gt.f32.partialorder %v2329_v62, 0.0 }
 0x184   : > { %v3691_v6 = vsel %vm3563_vm1, %v2286_v47, %v3627_v61  ;;  %v3630_v8 = vmul.f32 0.2, %v2329_v62  ;;  %v927_v39 = vld [vmem:[%s5216_s4 + $0x6f0] sm:$0xff]  ;;  %v928_v43 = vld [vmem:[%s5216_s4 + $0x6f8] sm:$0xff]  ;;  %v4448_v49 = vcombine.low %v863_v32, %v895_v33 }
 0x185   : > { %v3693_v12 = vsel %vm3565_vm2, %v2327_v53, %v3629_v4  ;;  %v3692_v13 = vsel %vm3564_vm3, %v2288_v54, %v3628_v5  ;;  %3404 = vmatpush1.bf16.msra.mxu0 %v4444_v52  ;;  %3445 = vmatpush1.bf16.msra.mxu1 %v4446_v57  ;;  %v4450_v54 = vcombine.low %v864_v34, %v896_v35 }
 0x186   : > { %v4548_v16 = vpack.c.bf16 %v3692_v13, %v3691_v6  ;;  %v3694_v17 = vsel %vm3566_vm4, %v2329_v62, %v3630_v8  ;;  %3405 = vmatprep.subr.bf16.mxu0 %v4509_v58  ;;  %3446 = vmatprep.subr.bf16.mxu1 %v4511_v2  ;;  %v4513_v55 = vcombine.high %v927_v39, %v959_v40 }
 0x187   : > { %v4549_v19 = vpack.c.bf16 %v3694_v17, %v3693_v12  ;;  %v4515_v61 = vcombine.high %v928_v43, %v960_v45  ;;  %v4512_v5 = vcombine.low %v927_v39, %v959_v40  ;;  %v4514_v9 = vcombine.low %v928_v43, %v960_v45 }
 0x188   : > { %v3891_v23 = vrot.slane %v4548_v16, %v5595_v7 }
 0x189   : > { %v3898_v26 = vrot.slane %v4549_v19, %v5595_v7  ;;  %3406 = vmatpush1.bf16.msra.mxu0 %v4508_v14  ;;  %3447 = vmatpush1.bf16.msra.mxu1 %v4510_v15 }
 0x18a   : > { %3481 = vmatprep.subr.bf16.mxu0 %v4321_v18  ;;  %3522 = vmatprep.subr.bf16.mxu1 %v4323_v20 }
 0x18b   : > { %v3899_v30 = vcombine.low %v3891_v23, %v3898_v26 }
 0x18c   : > { %4544 = vmatmul.mubr.msk.bf16.vlgmr.msra.gmra.mrb[56].mxu0 %vm2247_vm0, %v5472_v60  ;;  %4545 = vmatmul.mubr.msk.bf16.vlgmr.msra.gmra.mrb[56].mxu1 %vm2247_vm0, %v5472_v60 }
 0x18d   : > { %4171 = vst [vmem:[%s5612_s14] sm:$0xff] %v3899_v30  ;;  %3482 = vmatpush1.bf16.msra.mxu0 %v4320_v27  ;;  %3523 = vmatpush1.bf16.msra.mxu1 %v4322_v28 }
 0x18e   : > { %3483 = vmatprep.subr.bf16.mxu0 %v4385_v29  ;;  %3524 = vmatprep.subr.bf16.mxu1 %v4387_v31 }
 0x18f   : > { %v2367_v41 = vpop.f32.mrb[4].mxu0  ;;  %3513 = vmatprep.mubr.bf16.mxu0 %v4635_v0  ;;  %v2408_v47 = vpop.f32.mrb[4].mxu1  ;;  %3554 = vmatprep.mubr.bf16.mxu1 %v4635_v0 }
 0x190   : > { %v2368_v46 = vadd.f32 %v2367_v41, %v5558_v37  ;;  %v2369_v48 = vpop.f32.mrb[5].mxu0  ;;  %v2409_v50 = vadd.f32 %v2408_v47, %v5558_v37  ;;  %v2410_v52 = vpop.f32.mrb[5].mxu1 }
 0x191   : > { %v2370_v51 = vadd.f32 %v2369_v48, %v5558_v37  ;;  %v2371_v53 = vpop.f32.mrb[6].mxu0  ;;  %3484 = vmatpush1.bf16.msra.mxu0 %v4384_v36  ;;  %v2411_v57 = vadd.f32 %v2410_v52, %v5558_v37  ;;  %v2412_v58 = vpop.f32.mrb[6].mxu1  ;;  %3525 = vmatpush1.bf16.msra.mxu1 %v4386_v44 }
 0x192   : > { %vm3567_vm5 = vcmp.gt.f32.partialorder %v2368_v46, 0.0  ;;  %v3631_v56 = vmul.f32 0.2, %v2368_v46  ;;  %v2372_v59 = vpop.f32.mrb[7].mxu0  ;;  %3485 = vmatprep.subr.bf16.mxu0 %v4449_v38  ;;  %vm3569_vm6 = vcmp.gt.f32.partialorder %v2409_v50, 0.0  ;;  %3526 = vmatprep.subr.bf16.mxu1 %v4451_v42  ;;  %v2413_v2 = vpop.f32.mrb[7].mxu1 }
 0x193   : > { %v3633_v0 = vmul.f32 0.2, %v2409_v50  ;;  %vm3568_vm7 = vcmp.gt.f32.partialorder %v2370_v51, 0.0  ;;  %v3632_v62 = vmul.f32 0.2, %v2370_v51  ;;  %vm3570_vm8 = vcmp.gt.f32.partialorder %v2411_v57, 0.0 }
 0x194   : > { %v3695_v63 = vsel %vm3567_vm5, %v2368_v46, %v3631_v56  ;;  %v3634_v1 = vmul.f32 0.2, %v2411_v57 }
 0x195   : > { %v3697_v3 = vsel %vm3569_vm6, %v2409_v50, %v3633_v0  ;;  %v3696_v4 = vsel %vm3568_vm7, %v2370_v51, %v3632_v62  ;;  %3486 = vmatpush1.bf16.msra.mxu0 %v4448_v49  ;;  %3527 = vmatpush1.bf16.msra.mxu1 %v4450_v54 }
 0x196   : > { %v4550_v6 = vpack.c.bf16 %v3696_v4, %v3695_v63  ;;  %v3698_v8 = vsel %vm3570_vm8, %v2411_v57, %v3634_v1  ;;  %3487 = vmatprep.subr.bf16.mxu0 %v4513_v55  ;;  %3528 = vmatprep.subr.bf16.mxu1 %v4515_v61 }
 0x197   : > { %v4551_v10 = vpack.c.bf16 %v3698_v8, %v3697_v3 }
 0x198   : > { %v3908_v11 = vrot.slane %v4550_v6, %v5595_v7 }
 0x199   : > { %v3915_v12 = vrot.slane %v4551_v10, %v5595_v7  ;;  %3488 = vmatpush1.bf16.msra.mxu0 %v4512_v5  ;;  %3529 = vmatpush1.bf16.msra.mxu1 %v4514_v9 }
 0x19b   : > { %v3916_v13 = vcombine.low %v3908_v11, %v3915_v12 }
 0x19c   : > { %4546 = vmatmul.mubr.msk.bf16.vlgmr.msra.gmra.mrb[60].mxu0 %vm2247_vm0, %v5472_v60  ;;  %4547 = vmatmul.mubr.msk.bf16.vlgmr.msra.gmra.mrb[60].mxu1 %vm2247_vm0, %v5472_v60 }
 0x19d   : > { %4172 = vst [vmem:[%s5612_s14 + $0x8] sm:$0xff] %v3916_v13 }
 0x19f   : > { %v2449_v14 = vpop.f32.mrb[8].mxu0  ;;  %v2490_v16 = vpop.f32.mrb[8].mxu1 }
 0x1a0   : > { %v2450_v15 = vadd.f32 %v2449_v14, %v5558_v37  ;;  %v2451_v17 = vpop.f32.mrb[9].mxu0  ;;  %v2491_v18 = vadd.f32 %v2490_v16, %v5558_v37  ;;  %v2492_v20 = vpop.f32.mrb[9].mxu1 }
 0x1a1   : > { %v2452_v19 = vadd.f32 %v2451_v17, %v5558_v37  ;;  %v2453_v21 = vpop.f32.mrb[10].mxu0  ;;  %v2493_v23 = vadd.f32 %v2492_v20, %v5558_v37  ;;  %v2494_v24 = vpop.f32.mrb[10].mxu1 }
 0x1a2   : > { %vm3571_vm9 = vcmp.gt.f32.partialorder %v2450_v15, 0.0  ;;  %v3635_v22 = vmul.f32 0.2, %v2450_v15  ;;  %v2454_v25 = vpop.f32.mrb[11].mxu0  ;;  %vm3573_vm10 = vcmp.gt.f32.partialorder %v2491_v18, 0.0  ;;  %v2495_v29 = vpop.f32.mrb[11].mxu1 }
 0x1a3   : > { %v3637_v60 = vmul.f32 0.2, %v2491_v18  ;;  %vm3572_vm11 = vcmp.gt.f32.partialorder %v2452_v19, 0.0  ;;  %v3636_v26 = vmul.f32 0.2, %v2452_v19  ;;  %vm3574_vm12 = vcmp.gt.f32.partialorder %v2493_v23, 0.0 }
 0x1a4   : > { %v3699_v27 = vsel %vm3571_vm9, %v2450_v15, %v3635_v22  ;;  %v3638_v28 = vmul.f32 0.2, %v2493_v23 }
 0x1a5   : > { %v3701_v30 = vsel %vm3573_vm10, %v2491_v18, %v3637_v60  ;;  %v3700_v31 = vsel %vm3572_vm11, %v2452_v19, %v3636_v26 }
 0x1a6   : > { %v4552_v32 = vpack.c.bf16 %v3700_v31, %v3699_v27  ;;  %v3702_v33 = vsel %vm3574_vm12, %v2493_v23, %v3638_v28 }
 0x1a7   : > { %v4553_v34 = vpack.c.bf16 %v3702_v33, %v3701_v30 }
 0x1a8   : > { %v3925_v35 = vrot.slane %v4552_v32, %v5595_v7 }
 0x1a9   : > { %v3932_v36 = vrot.slane %v4553_v34, %v5595_v7 }
 0x1ab   : > { %v3933_v44 = vcombine.low %v3925_v35, %v3932_v36 }
 0x1ad   : > { %4173 = vst [vmem:[%s5612_s14 + $0x10] sm:$0xff] %v3933_v44 }
 0x1af   : > { %v2531_v38 = vpop.f32.mrb[12].mxu0  ;;  %v2572_v40 = vpop.f32.mrb[12].mxu1 }
 0x1b0   : > { %v2532_v39 = vadd.f32 %v2531_v38, %v5558_v37  ;;  %v2533_v41 = vpop.f32.mrb[13].mxu0  ;;  %v2573_v42 = vadd.f32 %v2572_v40, %v5558_v37  ;;  %v2574_v45 = vpop.f32.mrb[13].mxu1 }
 0x1b1   : > { %v2534_v43 = vadd.f32 %v2533_v41, %v5558_v37  ;;  %v2535_v46 = vpop.f32.mrb[14].mxu0  ;;  %v2575_v48 = vadd.f32 %v2574_v45, %v5558_v37  ;;  %v2576_v49 = vpop.f32.mrb[14].mxu1 }
 0x1b2   : > { %vm3575_vm13 = vcmp.gt.f32.partialorder %v2532_v39, 0.0  ;;  %v3639_v47 = vmul.f32 0.2, %v2532_v39  ;;  %v2536_v50 = vpop.f32.mrb[15].mxu0  ;;  %vm3577_vm14 = vcmp.gt.f32.partialorder %v2573_v42, 0.0  ;;  %v2577_v55 = vpop.f32.mrb[15].mxu1 }
 0x1b3   : > { %v3641_v51 = vmul.f32 0.2, %v2573_v42  ;;  %vm3576_vm15 = vcmp.gt.f32.partialorder %v2534_v43, 0.0  ;;  %v3640_v52 = vmul.f32 0.2, %v2534_v43  ;;  %vm3578_vm0 = vcmp.gt.f32.partialorder %v2575_v48, 0.0 }
 0x1b4   : > { %v3703_v53 = vsel %vm3575_vm13, %v2532_v39, %v3639_v47  ;;  %v3642_v54 = vmul.f32 0.2, %v2575_v48 }
 0x1b5   : > { %v3705_v56 = vsel %vm3577_vm14, %v2573_v42, %v3641_v51  ;;  %v3704_v57 = vsel %vm3576_vm15, %v2534_v43, %v3640_v52 }
 0x1b6   : > { %v4554_v58 = vpack.c.bf16 %v3704_v57, %v3703_v53  ;;  %v3706_v59 = vsel %vm3578_vm0, %v2575_v48, %v3642_v54 }
 0x1b7   : > { %v4555_v61 = vpack.c.bf16 %v3706_v59, %v3705_v56 }
 0x1b8   : > { %v3942_v0 = vrot.slane %v4554_v58, %v5595_v7 }
 0x1b9   : > { %v3949_v62 = vrot.slane %v4555_v61, %v5595_v7 }
 0x1bb   : > { %v3950_v63 = vcombine.low %v3942_v0, %v3949_v62 }
 0x1bd   : > { %4174 = vst [vmem:[%s5612_s14 + $0x18] sm:$0xff] %v3950_v63 }
 0x1bf   : > { %v2613_v1 = vpop.f32.mrb[16].mxu0  ;;  %v2654_v3 = vpop.f32.mrb[16].mxu1 }
 0x1c0   : > { %v2614_v2 = vadd.f32 %v2613_v1, %v5558_v37  ;;  %v2615_v4 = vpop.f32.mrb[17].mxu0  ;;  %v2655_v5 = vadd.f32 %v2654_v3, %v5558_v37  ;;  %v2656_v8 = vpop.f32.mrb[17].mxu1 }
 0x1c1   : > { %v2616_v6 = vadd.f32 %v2615_v4, %v5558_v37  ;;  %v2617_v9 = vpop.f32.mrb[18].mxu0  ;;  %v2657_v11 = vadd.f32 %v2656_v8, %v5558_v37  ;;  %v2658_v12 = vpop.f32.mrb[18].mxu1 }
 0x1c2   : > { %vm3579_vm1 = vcmp.gt.f32.partialorder %v2614_v2, 0.0  ;;  %v3643_v10 = vmul.f32 0.2, %v2614_v2  ;;  %v2618_v13 = vpop.f32.mrb[19].mxu0  ;;  %vm3581_vm2 = vcmp.gt.f32.partialorder %v2655_v5, 0.0  ;;  %v2659_v18 = vpop.f32.mrb[19].mxu1 }
 0x1c3   : > { %v3645_v14 = vmul.f32 0.2, %v2655_v5  ;;  %vm3580_vm3 = vcmp.gt.f32.partialorder %v2616_v6, 0.0  ;;  %v3644_v15 = vmul.f32 0.2, %v2616_v6  ;;  %vm3582_vm4 = vcmp.gt.f32.partialorder %v2657_v11, 0.0 }
 0x1c4   : > { %v3707_v16 = vsel %vm3579_vm1, %v2614_v2, %v3643_v10  ;;  %v3646_v17 = vmul.f32 0.2, %v2657_v11 }
 0x1c5   : > { %v3709_v19 = vsel %vm3581_vm2, %v2655_v5, %v3645_v14  ;;  %v3708_v20 = vsel %vm3580_vm3, %v2616_v6, %v3644_v15 }
 0x1c6   : > { %v4556_v21 = vpack.c.bf16 %v3708_v20, %v3707_v16  ;;  %v3710_v22 = vsel %vm3582_vm4, %v2657_v11, %v3646_v17 }
 0x1c7   : > { %v4557_v23 = vpack.c.bf16 %v3710_v22, %v3709_v19 }
 0x1c8   : > { %v3959_v24 = vrot.slane %v4556_v21, %v5595_v7 }
 0x1c9   : > { %v3966_v25 = vrot.slane %v4557_v23, %v5595_v7 }
 0x1cb   : > { %v3967_v60 = vcombine.low %v3959_v24, %v3966_v25 }
 0x1cd   : > { %4175 = vst [vmem:[%s5612_s14 + $0x20] sm:$0xff] %v3967_v60 }
 0x1cf   : > { %v2695_v26 = vpop.f32.mrb[20].mxu0  ;;  %v2736_v28 = vpop.f32.mrb[20].mxu1 }
 0x1d0   : > { %v2696_v27 = vadd.f32 %v2695_v26, %v5558_v37  ;;  %v2697_v29 = vpop.f32.mrb[21].mxu0  ;;  %v2737_v30 = vadd.f32 %v2736_v28, %v5558_v37  ;;  %v2738_v32 = vpop.f32.mrb[21].mxu1 }
 0x1d1   : > { %v2698_v31 = vadd.f32 %v2697_v29, %v5558_v37  ;;  %v2699_v33 = vpop.f32.mrb[22].mxu0  ;;  %v2739_v35 = vadd.f32 %v2738_v32, %v5558_v37  ;;  %v2740_v36 = vpop.f32.mrb[22].mxu1 }
 0x1d2   : > { %vm3583_vm5 = vcmp.gt.f32.partialorder %v2696_v27, 0.0  ;;  %v3647_v34 = vmul.f32 0.2, %v2696_v27  ;;  %v2700_v44 = vpop.f32.mrb[23].mxu0  ;;  %vm3585_vm6 = vcmp.gt.f32.partialorder %v2737_v30, 0.0  ;;  %v2741_v42 = vpop.f32.mrb[23].mxu1 }
 0x1d3   : > { %v3649_v38 = vmul.f32 0.2, %v2737_v30  ;;  %vm3584_vm7 = vcmp.gt.f32.partialorder %v2698_v31, 0.0  ;;  %v3648_v39 = vmul.f32 0.2, %v2698_v31  ;;  %vm3586_vm8 = vcmp.gt.f32.partialorder %v2739_v35, 0.0 }
 0x1d4   : > { %v3711_v40 = vsel %vm3583_vm5, %v2696_v27, %v3647_v34  ;;  %v3650_v41 = vmul.f32 0.2, %v2739_v35 }
 0x1d5   : > { %v3713_v43 = vsel %vm3585_vm6, %v2737_v30, %v3649_v38  ;;  %v3712_v45 = vsel %vm3584_vm7, %v2698_v31, %v3648_v39 }
 0x1d6   : > { %v4558_v46 = vpack.c.bf16 %v3712_v45, %v3711_v40  ;;  %v3714_v47 = vsel %vm3586_vm8, %v2739_v35, %v3650_v41 }
 0x1d7   : > { %v4559_v48 = vpack.c.bf16 %v3714_v47, %v3713_v43 }
 0x1d8   : > { %v3976_v49 = vrot.slane %v4558_v46, %v5595_v7 }
 0x1d9   : > { %v3983_v50 = vrot.slane %v4559_v48, %v5595_v7 }
 0x1db   : > { %v3984_v51 = vcombine.low %v3976_v49, %v3983_v50 }
 0x1dd   : > { %4176 = vst [vmem:[%s5612_s14 + $0x28] sm:$0xff] %v3984_v51 }
 0x1df   : > { %v2777_v52 = vpop.f32.mrb[24].mxu0  ;;  %v2818_v54 = vpop.f32.mrb[24].mxu1 }
 0x1e0   : > { %v2778_v53 = vadd.f32 %v2777_v52, %v5558_v37  ;;  %v2779_v55 = vpop.f32.mrb[25].mxu0  ;;  %v2819_v56 = vadd.f32 %v2818_v54, %v5558_v37  ;;  %v2820_v58 = vpop.f32.mrb[25].mxu1 }
 0x1e1   : > { %v2780_v57 = vadd.f32 %v2779_v55, %v5558_v37  ;;  %v2781_v59 = vpop.f32.mrb[26].mxu0  ;;  %v2821_v0 = vadd.f32 %v2820_v58, %v5558_v37  ;;  %v2822_v62 = vpop.f32.mrb[26].mxu1 }
 0x1e2   : > { %vm3587_vm9 = vcmp.gt.f32.partialorder %v2778_v53, 0.0  ;;  %v3651_v61 = vmul.f32 0.2, %v2778_v53  ;;  %v2782_v63 = vpop.f32.mrb[27].mxu0  ;;  %vm3589_vm10 = vcmp.gt.f32.partialorder %v2819_v56, 0.0  ;;  %v2823_v5 = vpop.f32.mrb[27].mxu1 }
 0x1e3   : > { %v3653_v1 = vmul.f32 0.2, %v2819_v56  ;;  %vm3588_vm11 = vcmp.gt.f32.partialorder %v2780_v57, 0.0  ;;  %v3652_v2 = vmul.f32 0.2, %v2780_v57  ;;  %vm3590_vm12 = vcmp.gt.f32.partialorder %v2821_v0, 0.0 }
 0x1e4   : > { %v3715_v3 = vsel %vm3587_vm9, %v2778_v53, %v3651_v61  ;;  %v3654_v4 = vmul.f32 0.2, %v2821_v0 }
 0x1e5   : > { %v3717_v6 = vsel %vm3589_vm10, %v2819_v56, %v3653_v1  ;;  %v3716_v8 = vsel %vm3588_vm11, %v2780_v57, %v3652_v2 }
 0x1e6   : > { %v4560_v9 = vpack.c.bf16 %v3716_v8, %v3715_v3  ;;  %v3718_v10 = vsel %vm3590_vm12, %v2821_v0, %v3654_v4 }
 0x1e7   : > { %v4561_v11 = vpack.c.bf16 %v3718_v10, %v3717_v6 }
 0x1e8   : > { %v3993_v12 = vrot.slane %v4560_v9, %v5595_v7 }
 0x1e9   : > { %v4000_v13 = vrot.slane %v4561_v11, %v5595_v7 }
 0x1eb   : > { %v4001_v14 = vcombine.low %v3993_v12, %v4000_v13 }
 0x1ed   : > { %4177 = vst [vmem:[%s5612_s14 + $0x30] sm:$0xff] %v4001_v14 }
 0x1ef   : > { %v2859_v15 = vpop.f32.mrb[28].mxu0  ;;  %v2900_v17 = vpop.f32.mrb[28].mxu1 }
 0x1f0   : > { %v2860_v16 = vadd.f32 %v2859_v15, %v5558_v37  ;;  %v2861_v18 = vpop.f32.mrb[29].mxu0  ;;  %v2901_v19 = vadd.f32 %v2900_v17, %v5558_v37  ;;  %v2902_v21 = vpop.f32.mrb[29].mxu1 }
 0x1f1   : > { %v2862_v20 = vadd.f32 %v2861_v18, %v5558_v37  ;;  %v2863_v22 = vpop.f32.mrb[30].mxu0  ;;  %v2903_v24 = vadd.f32 %v2902_v21, %v5558_v37  ;;  %v2904_v25 = vpop.f32.mrb[30].mxu1 }
 0x1f2   : > { %vm3591_vm13 = vcmp.gt.f32.partialorder %v2860_v16, 0.0  ;;  %v3655_v23 = vmul.f32 0.2, %v2860_v16  ;;  %v2864_v60 = vpop.f32.mrb[31].mxu0  ;;  %vm3593_vm14 = vcmp.gt.f32.partialorder %v2901_v19, 0.0  ;;  %v2905_v30 = vpop.f32.mrb[31].mxu1 }
 0x1f3   : > { %v3657_v26 = vmul.f32 0.2, %v2901_v19  ;;  %vm3592_vm15 = vcmp.gt.f32.partialorder %v2862_v20, 0.0  ;;  %v3656_v27 = vmul.f32 0.2, %v2862_v20  ;;  %vm3594_vm0 = vcmp.gt.f32.partialorder %v2903_v24, 0.0 }
 0x1f4   : > { %v3719_v28 = vsel %vm3591_vm13, %v2860_v16, %v3655_v23  ;;  %v3658_v29 = vmul.f32 0.2, %v2903_v24 }
 0x1f5   : > { %v3721_v31 = vsel %vm3593_vm14, %v2901_v19, %v3657_v26  ;;  %v3720_v32 = vsel %vm3592_vm15, %v2862_v20, %v3656_v27 }
 0x1f6   : > { %v4562_v33 = vpack.c.bf16 %v3720_v32, %v3719_v28  ;;  %v3722_v34 = vsel %vm3594_vm0, %v2903_v24, %v3658_v29 }
 0x1f7   : > { %v4563_v35 = vpack.c.bf16 %v3722_v34, %v3721_v31 }
 0x1f8   : > { %v4010_v36 = vrot.slane %v4562_v33, %v5595_v7 }
 0x1f9   : > { %v4017_v44 = vrot.slane %v4563_v35, %v5595_v7 }
 0x1fb   : > { %v4018_v38 = vcombine.low %v4010_v36, %v4017_v44 }
 0x1fd   : > { %4178 = vst [vmem:[%s5612_s14 + $0x38] sm:$0xff] %v4018_v38 }
 0x1ff   : > { %v2941_v39 = vpop.f32.mrb[32].mxu0  ;;  %v2982_v41 = vpop.f32.mrb[32].mxu1 }
 0x200   : > { %v2942_v40 = vadd.f32 %v2941_v39, %v5558_v37  ;;  %v2943_v42 = vpop.f32.mrb[33].mxu0  ;;  %v2983_v43 = vadd.f32 %v2982_v41, %v5558_v37  ;;  %v2984_v46 = vpop.f32.mrb[33].mxu1 }
 0x201   : > { %v2944_v45 = vadd.f32 %v2943_v42, %v5558_v37  ;;  %v2945_v47 = vpop.f32.mrb[34].mxu0  ;;  %v2985_v49 = vadd.f32 %v2984_v46, %v5558_v37  ;;  %v2986_v50 = vpop.f32.mrb[34].mxu1 }
 0x202   : > { %vm3595_vm1 = vcmp.gt.f32.partialorder %v2942_v40, 0.0  ;;  %v3659_v48 = vmul.f32 0.2, %v2942_v40  ;;  %v2946_v51 = vpop.f32.mrb[35].mxu0  ;;  %vm3597_vm2 = vcmp.gt.f32.partialorder %v2983_v43, 0.0  ;;  %v2987_v56 = vpop.f32.mrb[35].mxu1 }
 0x203   : > { %v3661_v52 = vmul.f32 0.2, %v2983_v43  ;;  %vm3596_vm3 = vcmp.gt.f32.partialorder %v2944_v45, 0.0  ;;  %v3660_v53 = vmul.f32 0.2, %v2944_v45  ;;  %vm3598_vm4 = vcmp.gt.f32.partialorder %v2985_v49, 0.0 }
 0x204   : > { %v3723_v54 = vsel %vm3595_vm1, %v2942_v40, %v3659_v48  ;;  %v3662_v55 = vmul.f32 0.2, %v2985_v49 }
 0x205   : > { %v3725_v57 = vsel %vm3597_vm2, %v2983_v43, %v3661_v52  ;;  %v3724_v58 = vsel %vm3596_vm3, %v2944_v45, %v3660_v53 }
 0x206   : > { %v4564_v59 = vpack.c.bf16 %v3724_v58, %v3723_v54  ;;  %v3726_v61 = vsel %vm3598_vm4, %v2985_v49, %v3662_v55 }
 0x207   : > { %v4565_v0 = vpack.c.bf16 %v3726_v61, %v3725_v57 }
 0x208   : > { %v4027_v62 = vrot.slane %v4564_v59, %v5595_v7 }
 0x209   : > { %v4034_v63 = vrot.slane %v4565_v0, %v5595_v7 }
 0x20b   : > { %v4035_v1 = vcombine.low %v4027_v62, %v4034_v63 }
 0x20d   : > { %4179 = vst [vmem:[%s5612_s14 + $0x40] sm:$0xff] %v4035_v1 }
 0x20f   : > { %v3023_v2 = vpop.f32.mrb[36].mxu0  ;;  %v3064_v4 = vpop.f32.mrb[36].mxu1 }
 0x210   : > { %v3024_v3 = vadd.f32 %v3023_v2, %v5558_v37  ;;  %v3025_v5 = vpop.f32.mrb[37].mxu0  ;;  %v3065_v6 = vadd.f32 %v3064_v4, %v5558_v37  ;;  %v3066_v9 = vpop.f32.mrb[37].mxu1 }
 0x211   : > { %v3026_v8 = vadd.f32 %v3025_v5, %v5558_v37  ;;  %v3027_v10 = vpop.f32.mrb[38].mxu0  ;;  %v3067_v12 = vadd.f32 %v3066_v9, %v5558_v37  ;;  %v3068_v13 = vpop.f32.mrb[38].mxu1 }
 0x212   : > { %vm3599_vm5 = vcmp.gt.f32.partialorder %v3024_v3, 0.0  ;;  %v3663_v11 = vmul.f32 0.2, %v3024_v3  ;;  %v3028_v14 = vpop.f32.mrb[39].mxu0  ;;  %vm3601_vm6 = vcmp.gt.f32.partialorder %v3065_v6, 0.0  ;;  %v3069_v19 = vpop.f32.mrb[39].mxu1 }
 0x213   : > { %v3665_v15 = vmul.f32 0.2, %v3065_v6  ;;  %vm3600_vm7 = vcmp.gt.f32.partialorder %v3026_v8, 0.0  ;;  %v3664_v16 = vmul.f32 0.2, %v3026_v8  ;;  %vm3602_vm8 = vcmp.gt.f32.partialorder %v3067_v12, 0.0 }
 0x214   : > { %v3727_v17 = vsel %vm3599_vm5, %v3024_v3, %v3663_v11  ;;  %v3666_v18 = vmul.f32 0.2, %v3067_v12 }
 0x215   : > { %v3729_v20 = vsel %vm3601_vm6, %v3065_v6, %v3665_v15  ;;  %v3728_v21 = vsel %vm3600_vm7, %v3026_v8, %v3664_v16 }
 0x216   : > { %v4566_v22 = vpack.c.bf16 %v3728_v21, %v3727_v17  ;;  %v3730_v23 = vsel %vm3602_vm8, %v3067_v12, %v3666_v18 }
 0x217   : > { %v4567_v24 = vpack.c.bf16 %v3730_v23, %v3729_v20 }
 0x218   : > { %v4044_v25 = vrot.slane %v4566_v22, %v5595_v7 }
 0x219   : > { %v4051_v60 = vrot.slane %v4567_v24, %v5595_v7 }
 0x21b   : > { %v4052_v26 = vcombine.low %v4044_v25, %v4051_v60 }
 0x21d   : > { %4180 = vst [vmem:[%s5612_s14 + $0x48] sm:$0xff] %v4052_v26 }
 0x21f   : > { %v3105_v27 = vpop.f32.mrb[40].mxu0  ;;  %v3146_v29 = vpop.f32.mrb[40].mxu1 }
 0x220   : > { %v3106_v28 = vadd.f32 %v3105_v27, %v5558_v37  ;;  %v3107_v30 = vpop.f32.mrb[41].mxu0  ;;  %v3147_v31 = vadd.f32 %v3146_v29, %v5558_v37  ;;  %v3148_v33 = vpop.f32.mrb[41].mxu1 }
 0x221   : > { %v3108_v32 = vadd.f32 %v3107_v30, %v5558_v37  ;;  %v3109_v34 = vpop.f32.mrb[42].mxu0  ;;  %v3149_v36 = vadd.f32 %v3148_v33, %v5558_v37  ;;  %v3150_v44 = vpop.f32.mrb[42].mxu1 }
 0x222   : > { %vm3603_vm9 = vcmp.gt.f32.partialorder %v3106_v28, 0.0  ;;  %v3667_v35 = vmul.f32 0.2, %v3106_v28  ;;  %v3110_v38 = vpop.f32.mrb[43].mxu0  ;;  %vm3605_vm10 = vcmp.gt.f32.partialorder %v3147_v31, 0.0  ;;  %v3151_v43 = vpop.f32.mrb[43].mxu1 }
 0x223   : > { %v3669_v39 = vmul.f32 0.2, %v3147_v31  ;;  %vm3604_vm11 = vcmp.gt.f32.partialorder %v3108_v32, 0.0  ;;  %v3668_v40 = vmul.f32 0.2, %v3108_v32  ;;  %vm3606_vm12 = vcmp.gt.f32.partialorder %v3149_v36, 0.0 }
 0x224   : > { %v3731_v41 = vsel %vm3603_vm9, %v3106_v28, %v3667_v35  ;;  %v3670_v42 = vmul.f32 0.2, %v3149_v36 }
 0x225   : > { %v3733_v45 = vsel %vm3605_vm10, %v3147_v31, %v3669_v39  ;;  %v3732_v46 = vsel %vm3604_vm11, %v3108_v32, %v3668_v40 }
 0x226   : > { %v4568_v47 = vpack.c.bf16 %v3732_v46, %v3731_v41  ;;  %v3734_v48 = vsel %vm3606_vm12, %v3149_v36, %v3670_v42 }
 0x227   : > { %v4569_v49 = vpack.c.bf16 %v3734_v48, %v3733_v45 }
 0x228   : > { %v4061_v50 = vrot.slane %v4568_v47, %v5595_v7 }
 0x229   : > { %v4068_v51 = vrot.slane %v4569_v49, %v5595_v7 }
 0x22b   : > { %v4069_v52 = vcombine.low %v4061_v50, %v4068_v51 }
 0x22d   : > { %4181 = vst [vmem:[%s5612_s14 + $0x50] sm:$0xff] %v4069_v52 }
 0x22f   : > { %v3187_v53 = vpop.f32.mrb[44].mxu0  ;;  %v3228_v55 = vpop.f32.mrb[44].mxu1 }
 0x230   : > { %v3188_v54 = vadd.f32 %v3187_v53, %v5558_v37  ;;  %v3189_v56 = vpop.f32.mrb[45].mxu0  ;;  %v3229_v57 = vadd.f32 %v3228_v55, %v5558_v37  ;;  %v3230_v59 = vpop.f32.mrb[45].mxu1 }
 0x231   : > { %v3190_v58 = vadd.f32 %v3189_v56, %v5558_v37  ;;  %v3191_v61 = vpop.f32.mrb[46].mxu0  ;;  %v3231_v62 = vadd.f32 %v3230_v59, %v5558_v37  ;;  %v3232_v63 = vpop.f32.mrb[46].mxu1 }
 0x232   : > { %vm3607_vm13 = vcmp.gt.f32.partialorder %v3188_v54, 0.0  ;;  %v3671_v0 = vmul.f32 0.2, %v3188_v54  ;;  %v3192_v1 = vpop.f32.mrb[47].mxu0  ;;  %vm3609_vm14 = vcmp.gt.f32.partialorder %v3229_v57, 0.0  ;;  %v3233_v6 = vpop.f32.mrb[47].mxu1 }
 0x233   : > { %v3673_v2 = vmul.f32 0.2, %v3229_v57  ;;  %vm3608_vm15 = vcmp.gt.f32.partialorder %v3190_v58, 0.0  ;;  %v3672_v3 = vmul.f32 0.2, %v3190_v58  ;;  %vm3610_vm0 = vcmp.gt.f32.partialorder %v3231_v62, 0.0 }
 0x234   : > { %v3735_v4 = vsel %vm3607_vm13, %v3188_v54, %v3671_v0  ;;  %v3674_v5 = vmul.f32 0.2, %v3231_v62 }
 0x235   : > { %v3737_v8 = vsel %vm3609_vm14, %v3229_v57, %v3673_v2  ;;  %v3736_v9 = vsel %vm3608_vm15, %v3190_v58, %v3672_v3 }
 0x236   : > { %v4570_v10 = vpack.c.bf16 %v3736_v9, %v3735_v4  ;;  %v3738_v11 = vsel %vm3610_vm0, %v3231_v62, %v3674_v5 }
 0x237   : > { %v4571_v12 = vpack.c.bf16 %v3738_v11, %v3737_v8 }
 0x238   : > { %v4078_v13 = vrot.slane %v4570_v10, %v5595_v7 }
 0x239   : > { %v4085_v14 = vrot.slane %v4571_v12, %v5595_v7 }
 0x23b   : > { %v4086_v15 = vcombine.low %v4078_v13, %v4085_v14 }
 0x23d   : > { %4182 = vst [vmem:[%s5612_s14 + $0x58] sm:$0xff] %v4086_v15 }
 0x23f   : > { %v3269_v16 = vpop.f32.mrb[48].mxu0  ;;  %v3310_v18 = vpop.f32.mrb[48].mxu1 }
 0x240   : > { %v3270_v17 = vadd.f32 %v3269_v16, %v5558_v37  ;;  %v3271_v19 = vpop.f32.mrb[49].mxu0  ;;  %v3311_v20 = vadd.f32 %v3310_v18, %v5558_v37  ;;  %v3312_v22 = vpop.f32.mrb[49].mxu1 }
 0x241   : > { %v3272_v21 = vadd.f32 %v3271_v19, %v5558_v37  ;;  %v3273_v23 = vpop.f32.mrb[50].mxu0  ;;  %v3313_v25 = vadd.f32 %v3312_v22, %v5558_v37  ;;  %v3314_v60 = vpop.f32.mrb[50].mxu1 }
 0x242   : > { %vm3611_vm1 = vcmp.gt.f32.partialorder %v3270_v17, 0.0  ;;  %v3675_v24 = vmul.f32 0.2, %v3270_v17  ;;  %v3274_v26 = vpop.f32.mrb[51].mxu0  ;;  %vm3613_vm2 = vcmp.gt.f32.partialorder %v3311_v20, 0.0  ;;  %v3315_v31 = vpop.f32.mrb[51].mxu1 }
 0x243   : > { %v3677_v27 = vmul.f32 0.2, %v3311_v20  ;;  %vm3612_vm3 = vcmp.gt.f32.partialorder %v3272_v21, 0.0  ;;  %v3676_v28 = vmul.f32 0.2, %v3272_v21  ;;  %vm3614_vm4 = vcmp.gt.f32.partialorder %v3313_v25, 0.0 }
 0x244   : > { %v3739_v29 = vsel %vm3611_vm1, %v3270_v17, %v3675_v24  ;;  %v3678_v30 = vmul.f32 0.2, %v3313_v25 }
 0x245   : > { %v3741_v32 = vsel %vm3613_vm2, %v3311_v20, %v3677_v27  ;;  %v3740_v33 = vsel %vm3612_vm3, %v3272_v21, %v3676_v28 }
 0x246   : > { %v4572_v34 = vpack.c.bf16 %v3740_v33, %v3739_v29  ;;  %v3742_v35 = vsel %vm3614_vm4, %v3313_v25, %v3678_v30 }
 0x247   : > { %v4573_v36 = vpack.c.bf16 %v3742_v35, %v3741_v32 }
 0x248   : > { %v4095_v44 = vrot.slane %v4572_v34, %v5595_v7 }
 0x249   : > { %v4102_v38 = vrot.slane %v4573_v36, %v5595_v7 }
 0x24b   : > { %v4103_v39 = vcombine.low %v4095_v44, %v4102_v38 }
 0x24d   : > { %4183 = vst [vmem:[%s5612_s14 + $0x60] sm:$0xff] %v4103_v39 }
 0x24f   : > { %v3351_v40 = vpop.f32.mrb[52].mxu0  ;;  %v3392_v42 = vpop.f32.mrb[52].mxu1 }
 0x250   : > { %v3352_v41 = vadd.f32 %v3351_v40, %v5558_v37  ;;  %v3353_v43 = vpop.f32.mrb[53].mxu0  ;;  %v3393_v45 = vadd.f32 %v3392_v42, %v5558_v37  ;;  %v3394_v47 = vpop.f32.mrb[53].mxu1 }
 0x251   : > { %v3354_v46 = vadd.f32 %v3353_v43, %v5558_v37  ;;  %v3355_v48 = vpop.f32.mrb[54].mxu0  ;;  %v3395_v50 = vadd.f32 %v3394_v47, %v5558_v37  ;;  %v3396_v51 = vpop.f32.mrb[54].mxu1 }
 0x252   : > { %vm3615_vm5 = vcmp.gt.f32.partialorder %v3352_v41, 0.0  ;;  %v3679_v49 = vmul.f32 0.2, %v3352_v41  ;;  %v3356_v52 = vpop.f32.mrb[55].mxu0  ;;  %vm3617_vm6 = vcmp.gt.f32.partialorder %v3393_v45, 0.0  ;;  %v3397_v57 = vpop.f32.mrb[55].mxu1 }
 0x253   : > { %v3681_v53 = vmul.f32 0.2, %v3393_v45  ;;  %vm3616_vm7 = vcmp.gt.f32.partialorder %v3354_v46, 0.0  ;;  %v3680_v54 = vmul.f32 0.2, %v3354_v46  ;;  %vm3618_vm8 = vcmp.gt.f32.partialorder %v3395_v50, 0.0 }
 0x254   : > { %v3743_v55 = vsel %vm3615_vm5, %v3352_v41, %v3679_v49  ;;  %v3682_v56 = vmul.f32 0.2, %v3395_v50 }
 0x255   : > { %v3745_v58 = vsel %vm3617_vm6, %v3393_v45, %v3681_v53  ;;  %v3744_v59 = vsel %vm3616_vm7, %v3354_v46, %v3680_v54 }
 0x256   : > { %v4574_v61 = vpack.c.bf16 %v3744_v59, %v3743_v55  ;;  %v3746_v0 = vsel %vm3618_vm8, %v3395_v50, %v3682_v56 }
 0x257   : > { %v4575_v62 = vpack.c.bf16 %v3746_v0, %v3745_v58 }
 0x258   : > { %v4112_v63 = vrot.slane %v4574_v61, %v5595_v7 }
 0x259   : > { %v4119_v1 = vrot.slane %v4575_v62, %v5595_v7 }
 0x25b   : > { %v4120_v2 = vcombine.low %v4112_v63, %v4119_v1 }
 0x25d   : > { %4184 = vst [vmem:[%s5612_s14 + $0x68] sm:$0xff] %v4120_v2 }
 0x25f   : > { %v3433_v3 = vpop.f32.mrb[56].mxu0  ;;  %v3474_v5 = vpop.f32.mrb[56].mxu1 }
 0x260   : > { %v3434_v4 = vadd.f32 %v3433_v3, %v5558_v37  ;;  %v3435_v6 = vpop.f32.mrb[57].mxu0  ;;  %v3475_v8 = vadd.f32 %v3474_v5, %v5558_v37  ;;  %v3476_v10 = vpop.f32.mrb[57].mxu1 }
 0x261   : > { %v3436_v9 = vadd.f32 %v3435_v6, %v5558_v37  ;;  %v3437_v11 = vpop.f32.mrb[58].mxu0  ;;  %v3477_v13 = vadd.f32 %v3476_v10, %v5558_v37  ;;  %v3478_v14 = vpop.f32.mrb[58].mxu1 }
 0x262   : > { %vm3619_vm9 = vcmp.gt.f32.partialorder %v3434_v4, 0.0  ;;  %v3683_v12 = vmul.f32 0.2, %v3434_v4  ;;  %v3438_v15 = vpop.f32.mrb[59].mxu0  ;;  %vm3621_vm10 = vcmp.gt.f32.partialorder %v3475_v8, 0.0  ;;  %v3479_v20 = vpop.f32.mrb[59].mxu1 }
 0x263   : > { %v3685_v16 = vmul.f32 0.2, %v3475_v8  ;;  %vm3620_vm11 = vcmp.gt.f32.partialorder %v3436_v9, 0.0  ;;  %v3684_v17 = vmul.f32 0.2, %v3436_v9  ;;  %vm3622_vm12 = vcmp.gt.f32.partialorder %v3477_v13, 0.0 }
 0x264   : > { %v3747_v18 = vsel %vm3619_vm9, %v3434_v4, %v3683_v12  ;;  %v3686_v19 = vmul.f32 0.2, %v3477_v13 }
 0x265   : > { %v3749_v21 = vsel %vm3621_vm10, %v3475_v8, %v3685_v16  ;;  %v3748_v22 = vsel %vm3620_vm11, %v3436_v9, %v3684_v17 }
 0x266   : > { %v4576_v23 = vpack.c.bf16 %v3748_v22, %v3747_v18  ;;  %v3750_v24 = vsel %vm3622_vm12, %v3477_v13, %v3686_v19 }
 0x267   : > { %v4577_v25 = vpack.c.bf16 %v3750_v24, %v3749_v21 }
 0x268   : > { %v4129_v60 = vrot.slane %v4576_v23, %v5595_v7 }
 0x269   : > { %v4136_v26 = vrot.slane %v4577_v25, %v5595_v7 }
 0x26b   : > { %v4137_v27 = vcombine.low %v4129_v60, %v4136_v26 }
 0x26d   : > { %4185 = vst [vmem:[%s5612_s14 + $0x70] sm:$0xff] %v4137_v27 }
 0x26f   : > { %v3515_v28 = vpop.f32.mrb[60].mxu0  ;;  %v3556_v30 = vpop.f32.mrb[60].mxu1 }
 0x270   : > { %v3516_v29 = vadd.f32 %v3515_v28, %v5558_v37  ;;  %v3517_v31 = vpop.f32.mrb[61].mxu0  ;;  %v3557_v32 = vadd.f32 %v3556_v30, %v5558_v37  ;;  %v3558_v34 = vpop.f32.mrb[61].mxu1 }
 0x271   : > { %v3518_v33 = vadd.f32 %v3517_v31, %v5558_v37  ;;  %v3519_v35 = vpop.f32.mrb[62].mxu0  ;;  %v3559_v44 = vadd.f32 %v3558_v34, %v5558_v37  ;;  %v3560_v38 = vpop.f32.mrb[62].mxu1 }
 0x272   : > { %vm3623_vm13 = vcmp.gt.f32.partialorder %v3516_v29, 0.0  ;;  %v3687_v36 = vmul.f32 0.2, %v3516_v29  ;;  %v3520_v39 = vpop.f32.mrb[63].mxu0  ;;  %vm3625_vm14 = vcmp.gt.f32.partialorder %v3557_v32, 0.0  ;;  %v3561_v45 = vpop.f32.mrb[63].mxu1 }
 0x273   : > { %v3689_v40 = vmul.f32 0.2, %v3557_v32  ;;  %vm3624_vm15 = vcmp.gt.f32.partialorder %v3518_v33, 0.0  ;;  %v3688_v41 = vmul.f32 0.2, %v3518_v33  ;;  %vm3626_vm0 = vcmp.gt.f32.partialorder %v3559_v44, 0.0 }
 0x274   : > { %v3751_v42 = vsel %vm3623_vm13, %v3516_v29, %v3687_v36  ;;  %v3690_v43 = vmul.f32 0.2, %v3559_v44 }
 0x275   : > { %v3753_v46 = vsel %vm3625_vm14, %v3557_v32, %v3689_v40  ;;  %v3752_v47 = vsel %vm3624_vm15, %v3518_v33, %v3688_v41 }
 0x276   : > { %v4578_v48 = vpack.c.bf16 %v3752_v47, %v3751_v42  ;;  %v3754_v49 = vsel %vm3626_vm0, %v3559_v44, %v3690_v43 }
 0x277   : > { %v4579_v50 = vpack.c.bf16 %v3754_v49, %v3753_v46 }
 0x278   : > { %v4146_v51 = vrot.slane %v4578_v48, %v5595_v7 }
 0x279   : > { %v4153_v37 = vrot.slane %v4579_v50, %v5595_v7 }
 0x27b   : > { %v4154_v52 = vcombine.low %v4146_v51, %v4153_v37 }
 0x27d   : > { %4186 = vst [vmem:[%s5612_s14 + $0x78] sm:$0xff] %v4154_v52 }
 0x27e PF: > { %p10_p9 = scmp.ge.s32.totalorder %s4674_s16, 6   ;;  %s5752_s12 = smov %s4629_s13 }
 0x27f   : > { %s5753_s13 = smov %s4683_s19  ;;  %s5754_s14 = smov %s4674_s16 }
 0x280   :  { %12 = sbr.rel (!%p10_p9) target bundleno = 2 (0x2), region = 90 }

// kernel: _lambda_.10
= control target key start
LH: loop header
LB: loop body
LE: loop exit
PB: predicated region body
PF: predicated region fallthrough
CT: control target
= control target key end

     0   :  { %s2504_s12 = smov 0   ;;  %s2506_s13 = smov 0   ;;  %s3065_s0 = inlined_call_operand.vmem [shape: bf16[4,64], index: 0, kind: input, shape index: {}]   ;;  %s3066_s1 = inlined_call_operand.vmem [shape: bf16[64,8192], index: 1, kind: input, shape index: {}]   ;;  %s3067_s2 = inlined_call_operand.vmem [shape: f32[4,1], index: 2, kind: input, shape index: {}]   ;;  %s3068_s3 = inlined_call_operand.vmem [shape: bf16[4,8192], index: 3, kind: output, shape index: {}]  }
   0x1   :  { %s2508_s14 = smov 0  }
   0x2 LB: > { %s2257_s15 = sadd.s32 4294967295, %s2480_s14   ;;  %s2521_s16 = sadd.s32 1, %s2480_s14   ;;  %s2480_s14 = sphi %s2508_s14, %s3071_s14   ;;  %s2476_s13 = sphi %s2506_s13, %s3070_s13   ;;  %s2472_s12 = sphi %s2504_s12, %s3069_s12  }
   0x3   : > { %s38_s17 = ssub.s32 %s2480_s14, %s2521_s16  ;;  %s41_s18 = sadd.s32 1, %s2476_s13 }
   0x4   : > { %p39_p0 = scmp.eq.s32.totalorder %s38_s17, 0  ;;  %p48_p1 = scmp.ne.s32.totalorder %s2476_s13, %s2472_s12 }
   0x5   : > { %p49_p2 = scmp.eq.s32.totalorder %s2480_s14, 0  ;;  %p2260_p4 = scmp.ge.s32.totalorder %s2480_s14, 2 }
   0x6   : > { %s2530_s19 = scalar_select %p39_p0, %s2476_s13, %s41_s18  }
   0x7   : > { %p50_p3 = por %p49_p2, %p48_p1  ;;  %127 = sbr.rel (%p2260_p4) target bundleno = 82 (0x52), region = 24 }
   0xe   : > { %130 = sbr.rel (!%p50_p3) target bundleno = 82 (0x52), region = 28  ;;  %s132_s20 = sand.u32 (%p50_p3), 1, %s2476_s13  }
   0xf   : > { %s2430_s21 = sshll.u32 (%p50_p3), %s2480_s14, 7  ;;  %s2261_s22 = sshll.u32 (%p50_p3), %s132_s20, 10 }
  0x10   : > { %s2538_s25 = scalar_lea.vmem (%p50_p3), %s3066_s1, %s2430_s21  ;;  %s2543_s26 = scalar_lea.vmem (%p50_p3), [#allocation2], %s2261_s22 }
  0x11   : > { %v150_v0 = vld [vmem:[%s2538_s25] sm:$0xff] (%p50_p3)  ;;  %v152_v1 = vld [vmem:[%s2538_s25 + $0x8] sm:$0xff] (%p50_p3)  ;;  %v154_v2 = vld [vmem:[%s2538_s25 + $0x10] sm:$0xff] (%p50_p3) }
  0x12   : > { %151 = vst [vmem:[%s2543_s26] sm:$0xff] (%p50_p3), %v150_v0  ;;  %153 = vst [vmem:[%s2543_s26 + $0x8] sm:$0xff] (%p50_p3), %v152_v1  ;;  %v156_v3 = vld [vmem:[%s2538_s25 + $0x18] sm:$0xff] (%p50_p3)  ;;  %v158_v4 = vld [vmem:[%s2538_s25 + $0x20] sm:$0xff] (%p50_p3) }
  0x13   : > { %155 = vst [vmem:[%s2543_s26 + $0x10] sm:$0xff] (%p50_p3), %v154_v2  ;;  %v160_v5 = vld [vmem:[%s2538_s25 + $0x28] sm:$0xff] (%p50_p3)  ;;  %157 = vst [vmem:[%s2543_s26 + $0x18] sm:$0xff] (%p50_p3), %v156_v3  ;;  %v162_v6 = vld [vmem:[%s2538_s25 + $0x30] sm:$0xff] (%p50_p3) }
  0x14   : > { %159 = vst [vmem:[%s2543_s26 + $0x20] sm:$0xff] (%p50_p3), %v158_v4  ;;  %161 = vst [vmem:[%s2543_s26 + $0x28] sm:$0xff] (%p50_p3), %v160_v5  ;;  %v164_v7 = vld [vmem:[%s2538_s25 + $0x38] sm:$0xff] (%p50_p3)  ;;  %v166_v8 = vld [vmem:[%s2538_s25 + $0x40] sm:$0xff] (%p50_p3) }
  0x15   : > { %163 = vst [vmem:[%s2543_s26 + $0x30] sm:$0xff] %v162_v6  ;;  %165 = vst [vmem:[%s2543_s26 + $0x38] sm:$0xff] %v164_v7  ;;  %v168_v9 = vld [vmem:[%s2538_s25 + $0x48] sm:$0xff]  ;;  %v170_v10 = vld [vmem:[%s2538_s25 + $0x50] sm:$0xff] }
  0x16   : > { %167 = vst [vmem:[%s2543_s26 + $0x40] sm:$0xff] %v166_v8  ;;  %v172_v11 = vld [vmem:[%s2538_s25 + $0x58] sm:$0xff]  ;;  %169 = vst [vmem:[%s2543_s26 + $0x48] sm:$0xff] %v168_v9  ;;  %v174_v12 = vld [vmem:[%s2538_s25 + $0x60] sm:$0xff] }
  0x17   : > { %171 = vst [vmem:[%s2543_s26 + $0x50] sm:$0xff] %v170_v10  ;;  %173 = vst [vmem:[%s2543_s26 + $0x58] sm:$0xff] %v172_v11  ;;  %v176_v13 = vld [vmem:[%s2538_s25 + $0x68] sm:$0xff]  ;;  %v178_v14 = vld [vmem:[%s2538_s25 + $0x70] sm:$0xff] }
  0x18   : > { %175 = vst [vmem:[%s2543_s26 + $0x60] sm:$0xff] %v174_v12  ;;  %177 = vst [vmem:[%s2543_s26 + $0x68] sm:$0xff] %v176_v13  ;;  %v180_v15 = vld [vmem:[%s2538_s25 + $0x78] sm:$0xff]  ;;  %v182_v16 = vld [vmem:[%s2538_s25 + $0x100] sm:$0xff] }
  0x19   : > { %179 = vst [vmem:[%s2543_s26 + $0x70] sm:$0xff] %v178_v14  ;;  %v184_v17 = vld [vmem:[%s2538_s25 + $0x108] sm:$0xff]  ;;  %181 = vst [vmem:[%s2543_s26 + $0x78] sm:$0xff] %v180_v15  ;;  %v186_v18 = vld [vmem:[%s2538_s25 + $0x110] sm:$0xff] }
  0x1a   : > { %183 = vst [vmem:[%s2543_s26 + $0x80] sm:$0xff] %v182_v16  ;;  %185 = vst [vmem:[%s2543_s26 + $0x88] sm:$0xff] %v184_v17  ;;  %v188_v19 = vld [vmem:[%s2538_s25 + $0x118] sm:$0xff]  ;;  %v190_v20 = vld [vmem:[%s2538_s25 + $0x120] sm:$0xff] }
  0x1b   : > { %187 = vst [vmem:[%s2543_s26 + $0x90] sm:$0xff] %v186_v18  ;;  %189 = vst [vmem:[%s2543_s26 + $0x98] sm:$0xff] %v188_v19  ;;  %v192_v21 = vld [vmem:[%s2538_s25 + $0x128] sm:$0xff]  ;;  %v194_v22 = vld [vmem:[%s2538_s25 + $0x130] sm:$0xff] }
  0x1c   : > { %191 = vst [vmem:[%s2543_s26 + $0xa0] sm:$0xff] %v190_v20  ;;  %v196_v23 = vld [vmem:[%s2538_s25 + $0x138] sm:$0xff]  ;;  %193 = vst [vmem:[%s2543_s26 + $0xa8] sm:$0xff] %v192_v21  ;;  %v198_v24 = vld [vmem:[%s2538_s25 + $0x140] sm:$0xff] }
  0x1d   : > { %195 = vst [vmem:[%s2543_s26 + $0xb0] sm:$0xff] %v194_v22  ;;  %197 = vst [vmem:[%s2543_s26 + $0xb8] sm:$0xff] %v196_v23  ;;  %v200_v25 = vld [vmem:[%s2538_s25 + $0x148] sm:$0xff]  ;;  %v202_v26 = vld [vmem:[%s2538_s25 + $0x150] sm:$0xff] }
  0x1e   : > { %199 = vst [vmem:[%s2543_s26 + $0xc0] sm:$0xff] %v198_v24  ;;  %201 = vst [vmem:[%s2543_s26 + $0xc8] sm:$0xff] %v200_v25  ;;  %v204_v27 = vld [vmem:[%s2538_s25 + $0x158] sm:$0xff]  ;;  %v206_v28 = vld [vmem:[%s2538_s25 + $0x160] sm:$0xff] }
  0x1f   : > { %203 = vst [vmem:[%s2543_s26 + $0xd0] sm:$0xff] %v202_v26  ;;  %v208_v29 = vld [vmem:[%s2538_s25 + $0x168] sm:$0xff]  ;;  %205 = vst [vmem:[%s2543_s26 + $0xd8] sm:$0xff] %v204_v27  ;;  %v210_v30 = vld [vmem:[%s2538_s25 + $0x170] sm:$0xff] }
  0x20   : > { %207 = vst [vmem:[%s2543_s26 + $0xe0] sm:$0xff] %v206_v28  ;;  %209 = vst [vmem:[%s2543_s26 + $0xe8] sm:$0xff] %v208_v29  ;;  %v212_v31 = vld [vmem:[%s2538_s25 + $0x178] sm:$0xff]  ;;  %v214_v32 = vld [vmem:[%s2538_s25 + $0x200] sm:$0xff] }
  0x21   : > { %211 = vst [vmem:[%s2543_s26 + $0xf0] sm:$0xff] %v210_v30  ;;  %213 = vst [vmem:[%s2543_s26 + $0xf8] sm:$0xff] %v212_v31  ;;  %v216_v33 = vld [vmem:[%s2538_s25 + $0x208] sm:$0xff]  ;;  %v218_v34 = vld [vmem:[%s2538_s25 + $0x210] sm:$0xff] }
  0x22   : > { %215 = vst [vmem:[%s2543_s26 + $0x100] sm:$0xff] %v214_v32  ;;  %v220_v35 = vld [vmem:[%s2538_s25 + $0x218] sm:$0xff]  ;;  %217 = vst [vmem:[%s2543_s26 + $0x108] sm:$0xff] %v216_v33  ;;  %v222_v36 = vld [vmem:[%s2538_s25 + $0x220] sm:$0xff] }
  0x23   : > { %219 = vst [vmem:[%s2543_s26 + $0x110] sm:$0xff] %v218_v34  ;;  %221 = vst [vmem:[%s2543_s26 + $0x118] sm:$0xff] %v220_v35  ;;  %v224_v37 = vld [vmem:[%s2538_s25 + $0x228] sm:$0xff]  ;;  %v226_v38 = vld [vmem:[%s2538_s25 + $0x230] sm:$0xff] }
  0x24   : > { %223 = vst [vmem:[%s2543_s26 + $0x120] sm:$0xff] %v222_v36  ;;  %225 = vst [vmem:[%s2543_s26 + $0x128] sm:$0xff] %v224_v37  ;;  %v228_v39 = vld [vmem:[%s2538_s25 + $0x238] sm:$0xff]  ;;  %v230_v40 = vld [vmem:[%s2538_s25 + $0x240] sm:$0xff] }
  0x25   : > { %227 = vst [vmem:[%s2543_s26 + $0x130] sm:$0xff] %v226_v38  ;;  %v232_v41 = vld [vmem:[%s2538_s25 + $0x248] sm:$0xff]  ;;  %229 = vst [vmem:[%s2543_s26 + $0x138] sm:$0xff] %v228_v39  ;;  %v234_v42 = vld [vmem:[%s2538_s25 + $0x250] sm:$0xff] }
  0x26   : > { %231 = vst [vmem:[%s2543_s26 + $0x140] sm:$0xff] %v230_v40  ;;  %233 = vst [vmem:[%s2543_s26 + $0x148] sm:$0xff] %v232_v41  ;;  %v236_v43 = vld [vmem:[%s2538_s25 + $0x258] sm:$0xff]  ;;  %v238_v44 = vld [vmem:[%s2538_s25 + $0x260] sm:$0xff] }
  0x27   : > { %235 = vst [vmem:[%s2543_s26 + $0x150] sm:$0xff] %v234_v42  ;;  %237 = vst [vmem:[%s2543_s26 + $0x158] sm:$0xff] %v236_v43  ;;  %v240_v45 = vld [vmem:[%s2538_s25 + $0x268] sm:$0xff]  ;;  %v242_v46 = vld [vmem:[%s2538_s25 + $0x270] sm:$0xff] }
  0x28   : > { %239 = vst [vmem:[%s2543_s26 + $0x160] sm:$0xff] %v238_v44  ;;  %v244_v47 = vld [vmem:[%s2538_s25 + $0x278] sm:$0xff]  ;;  %241 = vst [vmem:[%s2543_s26 + $0x168] sm:$0xff] %v240_v45  ;;  %v246_v48 = vld [vmem:[%s2538_s25 + $0x300] sm:$0xff] }
  0x29   : > { %243 = vst [vmem:[%s2543_s26 + $0x170] sm:$0xff] %v242_v46  ;;  %245 = vst [vmem:[%s2543_s26 + $0x178] sm:$0xff] %v244_v47  ;;  %v248_v49 = vld [vmem:[%s2538_s25 + $0x308] sm:$0xff]  ;;  %v250_v50 = vld [vmem:[%s2538_s25 + $0x310] sm:$0xff] }
  0x2a   : > { %247 = vst [vmem:[%s2543_s26 + $0x180] sm:$0xff] %v246_v48  ;;  %249 = vst [vmem:[%s2543_s26 + $0x188] sm:$0xff] %v248_v49  ;;  %v252_v51 = vld [vmem:[%s2538_s25 + $0x318] sm:$0xff]  ;;  %v254_v52 = vld [vmem:[%s2538_s25 + $0x320] sm:$0xff] }
  0x2b   : > { %251 = vst [vmem:[%s2543_s26 + $0x190] sm:$0xff] %v250_v50  ;;  %v256_v53 = vld [vmem:[%s2538_s25 + $0x328] sm:$0xff]  ;;  %253 = vst [vmem:[%s2543_s26 + $0x198] sm:$0xff] %v252_v51  ;;  %v258_v54 = vld [vmem:[%s2538_s25 + $0x330] sm:$0xff] }
  0x2c   : > { %255 = vst [vmem:[%s2543_s26 + $0x1a0] sm:$0xff] %v254_v52  ;;  %257 = vst [vmem:[%s2543_s26 + $0x1a8] sm:$0xff] %v256_v53  ;;  %v260_v55 = vld [vmem:[%s2538_s25 + $0x338] sm:$0xff]  ;;  %v262_v56 = vld [vmem:[%s2538_s25 + $0x340] sm:$0xff] }
  0x2d   : > { %259 = vst [vmem:[%s2543_s26 + $0x1b0] sm:$0xff] %v258_v54  ;;  %261 = vst [vmem:[%s2543_s26 + $0x1b8] sm:$0xff] %v260_v55  ;;  %v264_v57 = vld [vmem:[%s2538_s25 + $0x348] sm:$0xff]  ;;  %v266_v58 = vld [vmem:[%s2538_s25 + $0x350] sm:$0xff] }
  0x2e   : > { %263 = vst [vmem:[%s2543_s26 + $0x1c0] sm:$0xff] %v262_v56  ;;  %v268_v59 = vld [vmem:[%s2538_s25 + $0x358] sm:$0xff]  ;;  %265 = vst [vmem:[%s2543_s26 + $0x1c8] sm:$0xff] %v264_v57  ;;  %v270_v60 = vld [vmem:[%s2538_s25 + $0x360] sm:$0xff] }
  0x2f   : > { %267 = vst [vmem:[%s2543_s26 + $0x1d0] sm:$0xff] %v266_v58  ;;  %269 = vst [vmem:[%s2543_s26 + $0x1d8] sm:$0xff] %v268_v59  ;;  %v272_v61 = vld [vmem:[%s2538_s25 + $0x368] sm:$0xff]  ;;  %v274_v62 = vld [vmem:[%s2538_s25 + $0x370] sm:$0xff] }
  0x30   : > { %271 = vst [vmem:[%s2543_s26 + $0x1e0] sm:$0xff] %v270_v60  ;;  %273 = vst [vmem:[%s2543_s26 + $0x1e8] sm:$0xff] %v272_v61  ;;  %v276_v63 = vld [vmem:[%s2538_s25 + $0x378] sm:$0xff]  ;;  %v278_v0 = vld [vmem:[%s2538_s25 + $0x400] sm:$0xff] }
  0x31   : > { %275 = vst [vmem:[%s2543_s26 + $0x1f0] sm:$0xff] %v274_v62  ;;  %v280_v1 = vld [vmem:[%s2538_s25 + $0x408] sm:$0xff]  ;;  %277 = vst [vmem:[%s2543_s26 + $0x1f8] sm:$0xff] %v276_v63  ;;  %v282_v2 = vld [vmem:[%s2538_s25 + $0x410] sm:$0xff] }
  0x32   : > { %279 = vst [vmem:[%s2543_s26 + $0x200] sm:$0xff] %v278_v0  ;;  %281 = vst [vmem:[%s2543_s26 + $0x208] sm:$0xff] %v280_v1  ;;  %v284_v3 = vld [vmem:[%s2538_s25 + $0x418] sm:$0xff]  ;;  %v286_v4 = vld [vmem:[%s2538_s25 + $0x420] sm:$0xff] }
  0x33   : > { %283 = vst [vmem:[%s2543_s26 + $0x210] sm:$0xff] %v282_v2  ;;  %285 = vst [vmem:[%s2543_s26 + $0x218] sm:$0xff] %v284_v3  ;;  %v288_v5 = vld [vmem:[%s2538_s25 + $0x428] sm:$0xff]  ;;  %v290_v6 = vld [vmem:[%s2538_s25 + $0x430] sm:$0xff] }
  0x34   : > { %287 = vst [vmem:[%s2543_s26 + $0x220] sm:$0xff] %v286_v4  ;;  %v292_v7 = vld [vmem:[%s2538_s25 + $0x438] sm:$0xff]  ;;  %289 = vst [vmem:[%s2543_s26 + $0x228] sm:$0xff] %v288_v5  ;;  %v294_v8 = vld [vmem:[%s2538_s25 + $0x440] sm:$0xff] }
  0x35   : > { %291 = vst [vmem:[%s2543_s26 + $0x230] sm:$0xff] %v290_v6  ;;  %293 = vst [vmem:[%s2543_s26 + $0x238] sm:$0xff] %v292_v7  ;;  %v296_v9 = vld [vmem:[%s2538_s25 + $0x448] sm:$0xff]  ;;  %v298_v10 = vld [vmem:[%s2538_s25 + $0x450] sm:$0xff] }
  0x36   : > { %295 = vst [vmem:[%s2543_s26 + $0x240] sm:$0xff] %v294_v8  ;;  %297 = vst [vmem:[%s2543_s26 + $0x248] sm:$0xff] %v296_v9  ;;  %v300_v11 = vld [vmem:[%s2538_s25 + $0x458] sm:$0xff]  ;;  %v302_v12 = vld [vmem:[%s2538_s25 + $0x460] sm:$0xff] }
  0x37   : > { %299 = vst [vmem:[%s2543_s26 + $0x250] sm:$0xff] %v298_v10  ;;  %v304_v13 = vld [vmem:[%s2538_s25 + $0x468] sm:$0xff]  ;;  %301 = vst [vmem:[%s2543_s26 + $0x258] sm:$0xff] %v300_v11  ;;  %v306_v14 = vld [vmem:[%s2538_s25 + $0x470] sm:$0xff] }
  0x38   : > { %303 = vst [vmem:[%s2543_s26 + $0x260] sm:$0xff] %v302_v12  ;;  %305 = vst [vmem:[%s2543_s26 + $0x268] sm:$0xff] %v304_v13  ;;  %v308_v15 = vld [vmem:[%s2538_s25 + $0x478] sm:$0xff]  ;;  %v310_v16 = vld [vmem:[%s2538_s25 + $0x500] sm:$0xff] }
  0x39   : > { %307 = vst [vmem:[%s2543_s26 + $0x270] sm:$0xff] %v306_v14  ;;  %309 = vst [vmem:[%s2543_s26 + $0x278] sm:$0xff] %v308_v15  ;;  %v312_v17 = vld [vmem:[%s2538_s25 + $0x508] sm:$0xff]  ;;  %v314_v18 = vld [vmem:[%s2538_s25 + $0x510] sm:$0xff] }
  0x3a   : > { %311 = vst [vmem:[%s2543_s26 + $0x280] sm:$0xff] %v310_v16  ;;  %v316_v19 = vld [vmem:[%s2538_s25 + $0x518] sm:$0xff]  ;;  %313 = vst [vmem:[%s2543_s26 + $0x288] sm:$0xff] %v312_v17  ;;  %v318_v20 = vld [vmem:[%s2538_s25 + $0x520] sm:$0xff] }
  0x3b   : > { %315 = vst [vmem:[%s2543_s26 + $0x290] sm:$0xff] %v314_v18  ;;  %317 = vst [vmem:[%s2543_s26 + $0x298] sm:$0xff] %v316_v19  ;;  %v320_v21 = vld [vmem:[%s2538_s25 + $0x528] sm:$0xff]  ;;  %v322_v22 = vld [vmem:[%s2538_s25 + $0x530] sm:$0xff] }
  0x3c   : > { %319 = vst [vmem:[%s2543_s26 + $0x2a0] sm:$0xff] %v318_v20  ;;  %321 = vst [vmem:[%s2543_s26 + $0x2a8] sm:$0xff] %v320_v21  ;;  %v324_v23 = vld [vmem:[%s2538_s25 + $0x538] sm:$0xff]  ;;  %v326_v24 = vld [vmem:[%s2538_s25 + $0x540] sm:$0xff] }
  0x3d   : > { %323 = vst [vmem:[%s2543_s26 + $0x2b0] sm:$0xff] %v322_v22  ;;  %v328_v25 = vld [vmem:[%s2538_s25 + $0x548] sm:$0xff]  ;;  %325 = vst [vmem:[%s2543_s26 + $0x2b8] sm:$0xff] %v324_v23  ;;  %v330_v26 = vld [vmem:[%s2538_s25 + $0x550] sm:$0xff] }
  0x3e   : > { %327 = vst [vmem:[%s2543_s26 + $0x2c0] sm:$0xff] %v326_v24  ;;  %329 = vst [vmem:[%s2543_s26 + $0x2c8] sm:$0xff] %v328_v25  ;;  %v332_v27 = vld [vmem:[%s2538_s25 + $0x558] sm:$0xff]  ;;  %v334_v28 = vld [vmem:[%s2538_s25 + $0x560] sm:$0xff] }
  0x3f   : > { %331 = vst [vmem:[%s2543_s26 + $0x2d0] sm:$0xff] %v330_v26  ;;  %333 = vst [vmem:[%s2543_s26 + $0x2d8] sm:$0xff] %v332_v27  ;;  %v336_v29 = vld [vmem:[%s2538_s25 + $0x568] sm:$0xff]  ;;  %v338_v30 = vld [vmem:[%s2538_s25 + $0x570] sm:$0xff] }
  0x40   : > { %335 = vst [vmem:[%s2543_s26 + $0x2e0] sm:$0xff] %v334_v28  ;;  %v340_v31 = vld [vmem:[%s2538_s25 + $0x578] sm:$0xff]  ;;  %337 = vst [vmem:[%s2543_s26 + $0x2e8] sm:$0xff] %v336_v29  ;;  %v342_v32 = vld [vmem:[%s2538_s25 + $0x600] sm:$0xff] }
  0x41   : > { %339 = vst [vmem:[%s2543_s26 + $0x2f0] sm:$0xff] %v338_v30  ;;  %341 = vst [vmem:[%s2543_s26 + $0x2f8] sm:$0xff] %v340_v31  ;;  %v344_v33 = vld [vmem:[%s2538_s25 + $0x608] sm:$0xff]  ;;  %v346_v34 = vld [vmem:[%s2538_s25 + $0x610] sm:$0xff] }
  0x42   : > { %343 = vst [vmem:[%s2543_s26 + $0x300] sm:$0xff] %v342_v32  ;;  %345 = vst [vmem:[%s2543_s26 + $0x308] sm:$0xff] %v344_v33  ;;  %v348_v35 = vld [vmem:[%s2538_s25 + $0x618] sm:$0xff]  ;;  %v350_v36 = vld [vmem:[%s2538_s25 + $0x620] sm:$0xff] }
  0x43   : > { %347 = vst [vmem:[%s2543_s26 + $0x310] sm:$0xff] %v346_v34  ;;  %v352_v37 = vld [vmem:[%s2538_s25 + $0x628] sm:$0xff]  ;;  %349 = vst [vmem:[%s2543_s26 + $0x318] sm:$0xff] %v348_v35  ;;  %v354_v38 = vld [vmem:[%s2538_s25 + $0x630] sm:$0xff] }
  0x44   : > { %351 = vst [vmem:[%s2543_s26 + $0x320] sm:$0xff] %v350_v36  ;;  %353 = vst [vmem:[%s2543_s26 + $0x328] sm:$0xff] %v352_v37  ;;  %v356_v39 = vld [vmem:[%s2538_s25 + $0x638] sm:$0xff]  ;;  %v358_v40 = vld [vmem:[%s2538_s25 + $0x640] sm:$0xff] }
  0x45   : > { %355 = vst [vmem:[%s2543_s26 + $0x330] sm:$0xff] %v354_v38  ;;  %357 = vst [vmem:[%s2543_s26 + $0x338] sm:$0xff] %v356_v39  ;;  %v360_v41 = vld [vmem:[%s2538_s25 + $0x648] sm:$0xff]  ;;  %v362_v42 = vld [vmem:[%s2538_s25 + $0x650] sm:$0xff] }
  0x46   : > { %359 = vst [vmem:[%s2543_s26 + $0x340] sm:$0xff] %v358_v40  ;;  %v364_v43 = vld [vmem:[%s2538_s25 + $0x658] sm:$0xff]  ;;  %361 = vst [vmem:[%s2543_s26 + $0x348] sm:$0xff] %v360_v41  ;;  %v366_v44 = vld [vmem:[%s2538_s25 + $0x660] sm:$0xff] }
  0x47   : > { %363 = vst [vmem:[%s2543_s26 + $0x350] sm:$0xff] %v362_v42  ;;  %365 = vst [vmem:[%s2543_s26 + $0x358] sm:$0xff] %v364_v43  ;;  %v368_v45 = vld [vmem:[%s2538_s25 + $0x668] sm:$0xff]  ;;  %v370_v46 = vld [vmem:[%s2538_s25 + $0x670] sm:$0xff] }
  0x48   : > { %367 = vst [vmem:[%s2543_s26 + $0x360] sm:$0xff] %v366_v44  ;;  %369 = vst [vmem:[%s2543_s26 + $0x368] sm:$0xff] %v368_v45  ;;  %v372_v47 = vld [vmem:[%s2538_s25 + $0x678] sm:$0xff]  ;;  %v374_v48 = vld [vmem:[%s2538_s25 + $0x700] sm:$0xff] }
  0x49   : > { %371 = vst [vmem:[%s2543_s26 + $0x370] sm:$0xff] %v370_v46  ;;  %v376_v49 = vld [vmem:[%s2538_s25 + $0x708] sm:$0xff]  ;;  %373 = vst [vmem:[%s2543_s26 + $0x378] sm:$0xff] %v372_v47  ;;  %v378_v50 = vld [vmem:[%s2538_s25 + $0x710] sm:$0xff] }
  0x4a   : > { %375 = vst [vmem:[%s2543_s26 + $0x380] sm:$0xff] %v374_v48  ;;  %377 = vst [vmem:[%s2543_s26 + $0x388] sm:$0xff] %v376_v49  ;;  %v380_v51 = vld [vmem:[%s2538_s25 + $0x718] sm:$0xff]  ;;  %v382_v52 = vld [vmem:[%s2538_s25 + $0x720] sm:$0xff] }
  0x4b   : > { %379 = vst [vmem:[%s2543_s26 + $0x390] sm:$0xff] %v378_v50  ;;  %381 = vst [vmem:[%s2543_s26 + $0x398] sm:$0xff] %v380_v51  ;;  %v384_v53 = vld [vmem:[%s2538_s25 + $0x728] sm:$0xff]  ;;  %v386_v54 = vld [vmem:[%s2538_s25 + $0x730] sm:$0xff] }
  0x4c   : > { %383 = vst [vmem:[%s2543_s26 + $0x3a0] sm:$0xff] %v382_v52  ;;  %v388_v55 = vld [vmem:[%s2538_s25 + $0x738] sm:$0xff]  ;;  %385 = vst [vmem:[%s2543_s26 + $0x3a8] sm:$0xff] %v384_v53  ;;  %v390_v56 = vld [vmem:[%s2538_s25 + $0x740] sm:$0xff] }
  0x4d   : > { %387 = vst [vmem:[%s2543_s26 + $0x3b0] sm:$0xff] %v386_v54  ;;  %389 = vst [vmem:[%s2543_s26 + $0x3b8] sm:$0xff] %v388_v55  ;;  %v392_v57 = vld [vmem:[%s2538_s25 + $0x748] sm:$0xff]  ;;  %v394_v58 = vld [vmem:[%s2538_s25 + $0x750] sm:$0xff] }
  0x4e   : > { %391 = vst [vmem:[%s2543_s26 + $0x3c0] sm:$0xff] %v390_v56  ;;  %393 = vst [vmem:[%s2543_s26 + $0x3c8] sm:$0xff] %v392_v57  ;;  %v396_v59 = vld [vmem:[%s2538_s25 + $0x758] sm:$0xff]  ;;  %v398_v60 = vld [vmem:[%s2538_s25 + $0x760] sm:$0xff] }
  0x4f   : > { %395 = vst [vmem:[%s2543_s26 + $0x3d0] sm:$0xff] %v394_v58  ;;  %v400_v61 = vld [vmem:[%s2538_s25 + $0x768] sm:$0xff]  ;;  %397 = vst [vmem:[%s2543_s26 + $0x3d8] sm:$0xff] %v396_v59  ;;  %v402_v62 = vld [vmem:[%s2538_s25 + $0x770] sm:$0xff] }
  0x50   : > { %399 = vst [vmem:[%s2543_s26 + $0x3e0] sm:$0xff] %v398_v60  ;;  %401 = vst [vmem:[%s2543_s26 + $0x3e8] sm:$0xff] %v400_v61  ;;  %v404_v63 = vld [vmem:[%s2538_s25 + $0x778] sm:$0xff] }
  0x51   : > { %403 = vst [vmem:[%s2543_s26 + $0x3f0] sm:$0xff] %v402_v62  ;;  %405 = vst [vmem:[%s2543_s26 + $0x3f8] sm:$0xff] %v404_v63 }
  0x52 PF: > { %p2264_p5 = scmp.ge.s32.totalorder %s2480_s14, 1  ;;  %p410_p6 = scmp.lt.s32.totalorder %s2480_s14, 3 }
  0x54   : > { %p411_p7 = pnand %p2264_p5, %p410_p6 }
  0x55   : > { %s417_s27 = sand.u32 (!%p411_p7), 1, %s2472_s12   ;;  %v2482_v0 = vmov (!%p411_p7), 0   ;;  %v577_v1 = vld [vmem:[%s3067_s2] sm:$0xf] (!%p411_p7)  ;;  %vm1223_vm0 = vcmask (!%p411_p7), 523264   ;;  %s2266_s7 = sshll.u32 (!%p411_p7), %s2257_s15, 5 }
  0x56   : > { %414 = sbr.rel (%p411_p7) target bundleno = 446 (0x1be), region = 51  ;;  %s2265_s28 = sshll.u32 (!%p411_p7), %s417_s27, 10  ;;  %1259 = vmatprep.mubr.bf16.mxu0 (!%p411_p7), %v2482_v0  ;;  %1300 = vmatprep.mubr.bf16.mxu1 (!%p411_p7), %v2482_v0  ;;  %v2836_v44 = vld [vmem:[%s3065_s0] sm:$0x3] (!%p411_p7) }
  0x57   : > { %2457 = vset.pattern.permute.xlu0 (!%p411_p7), %v2482_v0  ;;  %s2807_s4 = scalar_lea.vmem (!%p411_p7), [#allocation2], %s2265_s28  ;;  %p442_p8 = scmp.lt.s32.totalorder (!%p411_p7), %s2266_s7, 63 }
  0x58   : > { %v449_v2 = vld [vmem:[%s2807_s4] sm:$0xff] (!%p411_p7)  ;;  %v450_v4 = vld [vmem:[%s2807_s4 + $0x8] sm:$0xff] (!%p411_p7)  ;;  %580 = vperm.xlu0 (!%p411_p7), %2457, %v577_v1   ;;  %v451_v32 = vld [vmem:[%s2807_s4 + $0x10] sm:$0xff] (!%p411_p7) }
  0x59   : > { %v465_v3 = vld [vmem:[%s2807_s4 + $0x80] sm:$0xff] (!%p411_p7)  ;;  %v466_v6 = vld [vmem:[%s2807_s4 + $0x88] sm:$0xff] (!%p411_p7)  ;;  %v467_v33 = vld [vmem:[%s2807_s4 + $0x90] sm:$0xff] (!%p411_p7) }
  0x5a   : > { %v2269_v5 = vcombine.high (!%p411_p7), %v449_v2, %v465_v3  ;;  %v2268_v7 = vcombine.low (!%p411_p7), %v449_v2, %v465_v3  ;;  %v481_v8 = vld [vmem:[%s2807_s4 + $0x100] sm:$0xff] (!%p411_p7)  ;;  %v2271_v10 = vcombine.high (!%p411_p7), %v450_v4, %v466_v6  ;;  %v2270_v11 = vcombine.low (!%p411_p7), %v450_v4, %v466_v6  ;;  %v482_v13 = vld [vmem:[%s2807_s4 + $0x108] sm:$0xff] (!%p411_p7)  ;;  %v452_v34 = vld [vmem:[%s2807_s4 + $0x18] sm:$0xff] (!%p411_p7) }
  0x5b   : > { %v497_v9 = vld [vmem:[%s2807_s4 + $0x180] sm:$0xff] (!%p411_p7)  ;;  %v498_v14 = vld [vmem:[%s2807_s4 + $0x188] sm:$0xff] (!%p411_p7)  ;;  %v468_v35 = vld [vmem:[%s2807_s4 + $0x98] sm:$0xff] (!%p411_p7)  ;;  %v2273_v38 = vcombine.high (!%p411_p7), %v451_v32, %v467_v33  ;;  %v2272_v45 = vcombine.low (!%p411_p7), %v451_v32, %v467_v33 }
  0x5c   : > { %v2301_v12 = vcombine.high (!%p411_p7), %v481_v8, %v497_v9  ;;  %v513_v15 = vld [vmem:[%s2807_s4 + $0x200] sm:$0xff] (!%p411_p7)  ;;  %1227 = vmatprep.subr.bf16.mxu0 (!%p411_p7), %v2269_v5  ;;  %v2303_v16 = vcombine.high (!%p411_p7), %v482_v13, %v498_v14  ;;  %v514_v18 = vld [vmem:[%s2807_s4 + $0x208] sm:$0xff] (!%p411_p7)  ;;  %1268 = vmatprep.subr.bf16.mxu1 (!%p411_p7), %v2271_v10  ;;  %v2300_v20 = vcombine.low (!%p411_p7), %v481_v8, %v497_v9  ;;  %v483_v40 = vld [vmem:[%s2807_s4 + $0x110] sm:$0xff] (!%p411_p7) }
  0x5d   : > { %v529_v17 = vld [vmem:[%s2807_s4 + $0x280] sm:$0xff]  ;;  %v530_v19 = vld [vmem:[%s2807_s4 + $0x288] sm:$0xff]  ;;  %1228 = vmatpush1.bf16.msra.mxu0 %v2268_v7  ;;  %1269 = vmatpush1.bf16.msra.mxu1 %v2270_v11  ;;  %v2302_v21 = vcombine.low %v482_v13, %v498_v14  ;;  %v2275_v39 = vcombine.high %v452_v34, %v468_v35  ;;  %v499_v41 = vld [vmem:[%s2807_s4 + $0x190] sm:$0xff]  ;;  %v2274_v46 = vcombine.low %v452_v34, %v468_v35  ;;  %s3073_s7 = smov (!%p442_p8, %s2266_s7), 63 }
  0x5e   : > { %1229 = vmatprep.subr.bf16.mxu0 %v2301_v12  ;;  %v2333_v22 = vcombine.high %v513_v15, %v529_v17  ;;  %1270 = vmatprep.subr.bf16.mxu1 %v2303_v16  ;;  %v2335_v23 = vcombine.high %v514_v18, %v530_v19  ;;  %v545_v24 = vld [vmem:[%s2807_s4 + $0x300] sm:$0xff]  ;;  %v546_v26 = vld [vmem:[%s2807_s4 + $0x308] sm:$0xff]  ;;  %v2332_v28 = vcombine.low %v513_v15, %v529_v17  ;;  %v484_v42 = vld [vmem:[%s2807_s4 + $0x118] sm:$0xff]  ;;  %s2267_s8 = sshll.u32 %s3073_s7, 1 }
  0x5f   : > { %v561_v25 = vld [vmem:[%s2807_s4 + $0x380] sm:$0xff]  ;;  %v562_v27 = vld [vmem:[%s2807_s4 + $0x388] sm:$0xff]  ;;  %v2334_v29 = vcombine.low %v514_v18, %v530_v19  ;;  %v500_v43 = vld [vmem:[%s2807_s4 + $0x198] sm:$0xff]  ;;  %v2305_v47 = vcombine.high %v483_v40, %v499_v41  ;;  %v2304_v53 = vcombine.low %v483_v40, %v499_v41  ;;  %s3003_s11 = scalar_lea.vmem %s3068_s3, %s2267_s8 }
  0x60   : > { %v2365_v30 = vcombine.high %v545_v24, %v561_v25  ;;  %v2367_v31 = vcombine.high %v546_v26, %v562_v27  ;;  %v2364_v36 = vcombine.low %v545_v24, %v561_v25  ;;  %v2366_v37 = vcombine.low %v546_v26, %v562_v27  ;;  %v515_v49 = vld [vmem:[%s2807_s4 + $0x210] sm:$0xff]  ;;  %v516_v51 = vld [vmem:[%s2807_s4 + $0x218] sm:$0xff]  ;;  %v453_v2 = vld [vmem:[%s2807_s4 + $0x20] sm:$0xff] }
  0x61   : > { %1230 = vmatpush1.bf16.msra.mxu0 %v2300_v20  ;;  %1271 = vmatpush1.bf16.msra.mxu1 %v2302_v21  ;;  %v2307_v48 = vcombine.high %v484_v42, %v500_v43  ;;  %v531_v50 = vld [vmem:[%s2807_s4 + $0x290] sm:$0xff]  ;;  %v532_v52 = vld [vmem:[%s2807_s4 + $0x298] sm:$0xff]  ;;  %v2306_v54 = vcombine.low %v484_v42, %v500_v43  ;;  %v469_v3 = vld [vmem:[%s2807_s4 + $0xa0] sm:$0xff] }
  0x62   : > { %1231 = vmatprep.subr.bf16.mxu0 %v2333_v22  ;;  %1272 = vmatprep.subr.bf16.mxu1 %v2335_v23  ;;  %v2337_v55 = vcombine.high %v515_v49, %v531_v50  ;;  %v2339_v56 = vcombine.high %v516_v51, %v532_v52  ;;  %v547_v57 = vld [vmem:[%s2807_s4 + $0x310] sm:$0xff]  ;;  %v548_v59 = vld [vmem:[%s2807_s4 + $0x318] sm:$0xff]  ;;  %v2336_v61 = vcombine.low %v515_v49, %v531_v50  ;;  %v454_v4 = vld [vmem:[%s2807_s4 + $0x28] sm:$0xff] }
  0x63   : > { %v563_v58 = vld [vmem:[%s2807_s4 + $0x390] sm:$0xff]  ;;  %v564_v60 = vld [vmem:[%s2807_s4 + $0x398] sm:$0xff]  ;;  %v2338_v62 = vcombine.low %v516_v51, %v532_v52  ;;  %v470_v5 = vld [vmem:[%s2807_s4 + $0xa8] sm:$0xff]  ;;  %v2277_v8 = vcombine.high %v453_v2, %v469_v3  ;;  %v2276_v14 = vcombine.low %v453_v2, %v469_v3 }
  0x64   : > { %v2369_v63 = vcombine.high %v547_v57, %v563_v58  ;;  %v2371_v1 = vcombine.high %v548_v59, %v564_v60  ;;  %v2368_v6 = vcombine.low %v547_v57, %v563_v58  ;;  %v2370_v7 = vcombine.low %v548_v59, %v564_v60  ;;  %v485_v10 = vld [vmem:[%s2807_s4 + $0x120] sm:$0xff]  ;;  %v486_v12 = vld [vmem:[%s2807_s4 + $0x128] sm:$0xff]  ;;  %v455_v34 = vld [vmem:[%s2807_s4 + $0x30] sm:$0xff] }
  0x65   : > { %1232 = vmatpush1.bf16.msra.mxu0 %v2332_v28  ;;  %1273 = vmatpush1.bf16.msra.mxu1 %v2334_v29  ;;  %v2279_v9 = vcombine.high %v454_v4, %v470_v5  ;;  %v501_v11 = vld [vmem:[%s2807_s4 + $0x1a0] sm:$0xff]  ;;  %v502_v13 = vld [vmem:[%s2807_s4 + $0x1a8] sm:$0xff]  ;;  %v2278_v15 = vcombine.low %v454_v4, %v470_v5  ;;  %v471_v35 = vld [vmem:[%s2807_s4 + $0xb0] sm:$0xff] }
  0x66   : > { %1233 = vmatprep.subr.bf16.mxu0 %v2365_v30  ;;  %1274 = vmatprep.subr.bf16.mxu1 %v2367_v31  ;;  %v2309_v16 = vcombine.high %v485_v10, %v501_v11  ;;  %v2311_v17 = vcombine.high %v486_v12, %v502_v13  ;;  %v517_v18 = vld [vmem:[%s2807_s4 + $0x220] sm:$0xff]  ;;  %v518_v20 = vld [vmem:[%s2807_s4 + $0x228] sm:$0xff]  ;;  %v2308_v22 = vcombine.low %v485_v10, %v501_v11  ;;  %v487_v42 = vld [vmem:[%s2807_s4 + $0x130] sm:$0xff] }
  0x67   : > { %v533_v19 = vld [vmem:[%s2807_s4 + $0x2a0] sm:$0xff]  ;;  %v534_v21 = vld [vmem:[%s2807_s4 + $0x2a8] sm:$0xff]  ;;  %v2310_v23 = vcombine.low %v486_v12, %v502_v13  ;;  %v2281_v40 = vcombine.high %v455_v34, %v471_v35  ;;  %v503_v43 = vld [vmem:[%s2807_s4 + $0x1b0] sm:$0xff] }
  0x68   : > { %v2341_v24 = vcombine.high %v517_v18, %v533_v19  ;;  %v2343_v25 = vcombine.high %v518_v20, %v534_v21  ;;  %v549_v26 = vld [vmem:[%s2807_s4 + $0x320] sm:$0xff]  ;;  %v550_v28 = vld [vmem:[%s2807_s4 + $0x328] sm:$0xff]  ;;  %v2340_v30 = vcombine.low %v517_v18, %v533_v19  ;;  %v2342_v31 = vcombine.low %v518_v20, %v534_v21  ;;  %v519_v51 = vld [vmem:[%s2807_s4 + $0x230] sm:$0xff] }
  0x69   : > { %1234 = vmatpush1.bf16.msra.mxu0 %v2364_v36  ;;  %1275 = vmatpush1.bf16.msra.mxu1 %v2366_v37  ;;  %v565_v27 = vld [vmem:[%s2807_s4 + $0x3a0] sm:$0xff]  ;;  %v566_v29 = vld [vmem:[%s2807_s4 + $0x3a8] sm:$0xff]  ;;  %v456_v36 = vld [vmem:[%s2807_s4 + $0x38] sm:$0xff]  ;;  %v2313_v49 = vcombine.high %v487_v42, %v503_v43 }
  0x6a   : > { %1309 = vmatprep.subr.bf16.mxu0 %v2273_v38  ;;  %1350 = vmatprep.subr.bf16.mxu1 %v2275_v39  ;;  %v2373_v32 = vcombine.high %v549_v26, %v565_v27  ;;  %v2375_v33 = vcombine.high %v550_v28, %v566_v29  ;;  %v472_v37 = vld [vmem:[%s2807_s4 + $0xb8] sm:$0xff]  ;;  %v2372_v38 = vcombine.low %v549_v26, %v565_v27  ;;  %v535_v52 = vld [vmem:[%s2807_s4 + $0x2b0] sm:$0xff]  ;;  %v457_v4 = vld [vmem:[%s2807_s4 + $0x40] sm:$0xff] }
  0x6b   : > { %v2374_v39 = vcombine.low %v550_v28, %v566_v29  ;;  %v2283_v41 = vcombine.high %v456_v36, %v472_v37  ;;  %v2345_v57 = vcombine.high %v519_v51, %v535_v52  ;;  %v551_v59 = vld [vmem:[%s2807_s4 + $0x330] sm:$0xff]  ;;  %v473_v5 = vld [vmem:[%s2807_s4 + $0xc0] sm:$0xff] }
  0x6c   : > { %2396 = vmatmul.mubr.msk.bf16.vlgmr.msra.gmra.mrb[0].mxu0 %vm1223_vm0, %v2836_v44  ;;  %2397 = vmatmul.mubr.msk.bf16.vlgmr.msra.gmra.mrb[0].mxu1 %vm1223_vm0, %v2836_v44  ;;  %v567_v60 = vld [vmem:[%s2807_s4 + $0x3b0] sm:$0xff]  ;;  %v2285_v10 = vcombine.high %v457_v4, %v473_v5  ;;  %v489_v12 = vld [vmem:[%s2807_s4 + $0x140] sm:$0xff] }
  0x6d   : > { %1310 = vmatpush1.bf16.msra.mxu0 %v2272_v45  ;;  %1351 = vmatpush1.bf16.msra.mxu1 %v2274_v46  ;;  %v488_v45 = vld [vmem:[%s2807_s4 + $0x138] sm:$0xff]  ;;  %v2377_v2 = vcombine.high %v551_v59, %v567_v60  ;;  %v505_v13 = vld [vmem:[%s2807_s4 + $0x1c0] sm:$0xff] }
  0x6e   : > { %1311 = vmatprep.subr.bf16.mxu0 %v2305_v47  ;;  %1352 = vmatprep.subr.bf16.mxu1 %v2307_v48  ;;  %v504_v46 = vld [vmem:[%s2807_s4 + $0x1b8] sm:$0xff]  ;;  %v2280_v47 = vcombine.low %v455_v34, %v471_v35  ;;  %v2282_v48 = vcombine.low %v456_v36, %v472_v37  ;;  %v2317_v18 = vcombine.high %v489_v12, %v505_v13  ;;  %v521_v20 = vld [vmem:[%s2807_s4 + $0x240] sm:$0xff]  ;;  %v459_v36 = vld [vmem:[%s2807_s4 + $0x50] sm:$0xff] }
  0x6f   : > { %1341 = vmatprep.mubr.bf16.mxu0 %v2482_v0  ;;  %1382 = vmatprep.mubr.bf16.mxu1 %v2482_v0  ;;  %v2315_v50 = vcombine.high %v488_v45, %v504_v46  ;;  %v537_v21 = vld [vmem:[%s2807_s4 + $0x2c0] sm:$0xff]  ;;  %v475_v37 = vld [vmem:[%s2807_s4 + $0xd0] sm:$0xff] }
  0x70   : > { %v2349_v26 = vcombine.high %v521_v20, %v537_v21  ;;  %v553_v28 = vld [vmem:[%s2807_s4 + $0x340] sm:$0xff] }
  0x71   : > { %1312 = vmatpush1.bf16.msra.mxu0 %v2304_v53  ;;  %1353 = vmatpush1.bf16.msra.mxu1 %v2306_v54  ;;  %v520_v53 = vld [vmem:[%s2807_s4 + $0x238] sm:$0xff]  ;;  %v569_v29 = vld [vmem:[%s2807_s4 + $0x3c0] sm:$0xff] }
  0x72   : > { %1313 = vmatprep.subr.bf16.mxu0 %v2337_v55  ;;  %1354 = vmatprep.subr.bf16.mxu1 %v2339_v56  ;;  %v536_v54 = vld [vmem:[%s2807_s4 + $0x2b8] sm:$0xff]  ;;  %v2312_v55 = vcombine.low %v487_v42, %v503_v43  ;;  %v2314_v56 = vcombine.low %v488_v45, %v504_v46  ;;  %v2381_v34 = vcombine.high %v553_v28, %v569_v29  ;;  %v491_v45 = vld [vmem:[%s2807_s4 + $0x150] sm:$0xff] }
  0x73   : > { %v2347_v58 = vcombine.high %v520_v53, %v536_v54  ;;  %v2289_v42 = vcombine.high %v459_v36, %v475_v37  ;;  %v507_v46 = vld [vmem:[%s2807_s4 + $0x1d0] sm:$0xff] }
  0x75   : > { %1314 = vmatpush1.bf16.msra.mxu0 %v2336_v61  ;;  %1355 = vmatpush1.bf16.msra.mxu1 %v2338_v62  ;;  %v552_v61 = vld [vmem:[%s2807_s4 + $0x338] sm:$0xff] }
  0x76   : > { %1315 = vmatprep.subr.bf16.mxu0 %v2369_v63  ;;  %1356 = vmatprep.subr.bf16.mxu1 %v2371_v1  ;;  %v568_v62 = vld [vmem:[%s2807_s4 + $0x3b8] sm:$0xff]  ;;  %v2344_v63 = vcombine.low %v519_v51, %v535_v52  ;;  %v2346_v1 = vcombine.low %v520_v53, %v536_v54  ;;  %v2321_v51 = vcombine.high %v491_v45, %v507_v46  ;;  %v523_v53 = vld [vmem:[%s2807_s4 + $0x250] sm:$0xff] }
  0x77   : > { %v2379_v3 = vcombine.high %v552_v61, %v568_v62  ;;  %v539_v54 = vld [vmem:[%s2807_s4 + $0x2d0] sm:$0xff] }
  0x79   : > { %1316 = vmatpush1.bf16.msra.mxu0 %v2368_v6  ;;  %1357 = vmatpush1.bf16.msra.mxu1 %v2370_v7  ;;  %v458_v6 = vld [vmem:[%s2807_s4 + $0x48] sm:$0xff] }
  0x7a   : > { %1391 = vmatprep.subr.bf16.mxu0 %v2277_v8  ;;  %1432 = vmatprep.subr.bf16.mxu1 %v2279_v9  ;;  %v474_v7 = vld [vmem:[%s2807_s4 + $0xc8] sm:$0xff]  ;;  %v2376_v8 = vcombine.low %v551_v59, %v567_v60  ;;  %v2378_v9 = vcombine.low %v552_v61, %v568_v62  ;;  %v2353_v59 = vcombine.high %v523_v53, %v539_v54  ;;  %v555_v61 = vld [vmem:[%s2807_s4 + $0x350] sm:$0xff] }
  0x7b   : > { %v2287_v11 = vcombine.high %v458_v6, %v474_v7  ;;  %v571_v62 = vld [vmem:[%s2807_s4 + $0x3d0] sm:$0xff] }
  0x7c   : > { %2398 = vmatmul.mubr.msk.bf16.vlgmr.msra.gmra.mrb[4].mxu0 %vm1223_vm0, %v2836_v44  ;;  %2399 = vmatmul.mubr.msk.bf16.vlgmr.msra.gmra.mrb[4].mxu1 %vm1223_vm0, %v2836_v44 }
  0x7d   : > { %1392 = vmatpush1.bf16.msra.mxu0 %v2276_v14  ;;  %1433 = vmatpush1.bf16.msra.mxu1 %v2278_v15  ;;  %v490_v14 = vld [vmem:[%s2807_s4 + $0x148] sm:$0xff] }
  0x7e   : > { %1393 = vmatprep.subr.bf16.mxu0 %v2309_v16  ;;  %1434 = vmatprep.subr.bf16.mxu1 %v2311_v17  ;;  %v506_v15 = vld [vmem:[%s2807_s4 + $0x1c8] sm:$0xff]  ;;  %v2284_v16 = vcombine.low %v457_v4, %v473_v5  ;;  %v2286_v17 = vcombine.low %v458_v6, %v474_v7  ;;  %v2385_v4 = vcombine.high %v555_v61, %v571_v62  ;;  %v461_v6 = vld [vmem:[%s2807_s4 + $0x60] sm:$0xff] }
  0x7f   : > { %1423 = vmatprep.mubr.bf16.mxu0 %v2482_v0  ;;  %1464 = vmatprep.mubr.bf16.mxu1 %v2482_v0  ;;  %v2319_v19 = vcombine.high %v490_v14, %v506_v15  ;;  %v477_v7 = vld [vmem:[%s2807_s4 + $0xe0] sm:$0xff] }
  0x81   : > { %1394 = vmatpush1.bf16.msra.mxu0 %v2308_v22  ;;  %1435 = vmatpush1.bf16.msra.mxu1 %v2310_v23  ;;  %v522_v22 = vld [vmem:[%s2807_s4 + $0x248] sm:$0xff] }
  0x82   : > { %1395 = vmatprep.subr.bf16.mxu0 %v2341_v24  ;;  %1436 = vmatprep.subr.bf16.mxu1 %v2343_v25  ;;  %v538_v23 = vld [vmem:[%s2807_s4 + $0x2c8] sm:$0xff]  ;;  %v2316_v24 = vcombine.low %v489_v12, %v505_v13  ;;  %v2318_v25 = vcombine.low %v490_v14, %v506_v15  ;;  %v2293_v12 = vcombine.high %v461_v6, %v477_v7  ;;  %v493_v14 = vld [vmem:[%s2807_s4 + $0x160] sm:$0xff] }
  0x83   : > { %v2351_v27 = vcombine.high %v522_v22, %v538_v23  ;;  %v509_v15 = vld [vmem:[%s2807_s4 + $0x1e0] sm:$0xff] }
  0x85   : > { %1396 = vmatpush1.bf16.msra.mxu0 %v2340_v30  ;;  %1437 = vmatpush1.bf16.msra.mxu1 %v2342_v31  ;;  %v554_v30 = vld [vmem:[%s2807_s4 + $0x348] sm:$0xff] }
  0x86   : > { %1397 = vmatprep.subr.bf16.mxu0 %v2373_v32  ;;  %1438 = vmatprep.subr.bf16.mxu1 %v2375_v33  ;;  %v570_v31 = vld [vmem:[%s2807_s4 + $0x3c8] sm:$0xff]  ;;  %v2348_v32 = vcombine.low %v521_v20, %v537_v21  ;;  %v2350_v33 = vcombine.low %v522_v22, %v538_v23  ;;  %v2325_v20 = vcombine.high %v493_v14, %v509_v15  ;;  %v525_v22 = vld [vmem:[%s2807_s4 + $0x260] sm:$0xff] }
  0x87   : > { %v2383_v35 = vcombine.high %v554_v30, %v570_v31  ;;  %v541_v23 = vld [vmem:[%s2807_s4 + $0x2e0] sm:$0xff] }
  0x89   : > { %1398 = vmatpush1.bf16.msra.mxu0 %v2372_v38  ;;  %1439 = vmatpush1.bf16.msra.mxu1 %v2374_v39  ;;  %v460_v38 = vld [vmem:[%s2807_s4 + $0x58] sm:$0xff] }
  0x8a   : > { %1473 = vmatprep.subr.bf16.mxu0 %v2281_v40  ;;  %1514 = vmatprep.subr.bf16.mxu1 %v2283_v41  ;;  %v476_v39 = vld [vmem:[%s2807_s4 + $0xd8] sm:$0xff]  ;;  %v2380_v40 = vcombine.low %v553_v28, %v569_v29  ;;  %v2382_v41 = vcombine.low %v554_v30, %v570_v31  ;;  %v2357_v28 = vcombine.high %v525_v22, %v541_v23  ;;  %v557_v30 = vld [vmem:[%s2807_s4 + $0x360] sm:$0xff] }
  0x8b   : > { %v2291_v43 = vcombine.high %v460_v38, %v476_v39  ;;  %v573_v31 = vld [vmem:[%s2807_s4 + $0x3e0] sm:$0xff] }
  0x8c   : > { %2400 = vmatmul.mubr.msk.bf16.vlgmr.msra.gmra.mrb[8].mxu0 %vm1223_vm0, %v2836_v44  ;;  %2401 = vmatmul.mubr.msk.bf16.vlgmr.msra.gmra.mrb[8].mxu1 %vm1223_vm0, %v2836_v44 }
  0x8d   : > { %1474 = vmatpush1.bf16.msra.mxu0 %v2280_v47  ;;  %1515 = vmatpush1.bf16.msra.mxu1 %v2282_v48  ;;  %v492_v47 = vld [vmem:[%s2807_s4 + $0x158] sm:$0xff] }
  0x8e   : > { %1475 = vmatprep.subr.bf16.mxu0 %v2313_v49  ;;  %1516 = vmatprep.subr.bf16.mxu1 %v2315_v50  ;;  %v508_v48 = vld [vmem:[%s2807_s4 + $0x1d8] sm:$0xff]  ;;  %v2288_v49 = vcombine.low %v459_v36, %v475_v37  ;;  %v2290_v50 = vcombine.low %v460_v38, %v476_v39  ;;  %v2389_v36 = vcombine.high %v557_v30, %v573_v31  ;;  %v463_v38 = vld [vmem:[%s2807_s4 + $0x70] sm:$0xff] }
  0x8f   : > { %1505 = vmatprep.mubr.bf16.mxu0 %v2482_v0  ;;  %1546 = vmatprep.mubr.bf16.mxu1 %v2482_v0  ;;  %v2323_v52 = vcombine.high %v492_v47, %v508_v48  ;;  %v479_v39 = vld [vmem:[%s2807_s4 + $0xf0] sm:$0xff] }
  0x91   : > { %1476 = vmatpush1.bf16.msra.mxu0 %v2312_v55  ;;  %1517 = vmatpush1.bf16.msra.mxu1 %v2314_v56  ;;  %v524_v55 = vld [vmem:[%s2807_s4 + $0x258] sm:$0xff] }
  0x92   : > { %1477 = vmatprep.subr.bf16.mxu0 %v2345_v57  ;;  %1518 = vmatprep.subr.bf16.mxu1 %v2347_v58  ;;  %v540_v56 = vld [vmem:[%s2807_s4 + $0x2d8] sm:$0xff]  ;;  %v2320_v57 = vcombine.low %v491_v45, %v507_v46  ;;  %v2322_v58 = vcombine.low %v492_v47, %v508_v48  ;;  %v2297_v45 = vcombine.high %v463_v38, %v479_v39  ;;  %v495_v47 = vld [vmem:[%s2807_s4 + $0x170] sm:$0xff] }
  0x93   : > { %v2355_v60 = vcombine.high %v524_v55, %v540_v56  ;;  %v511_v48 = vld [vmem:[%s2807_s4 + $0x1f0] sm:$0xff] }
  0x95   : > { %1478 = vmatpush1.bf16.msra.mxu0 %v2344_v63  ;;  %1519 = vmatpush1.bf16.msra.mxu1 %v2346_v1  ;;  %v556_v63 = vld [vmem:[%s2807_s4 + $0x358] sm:$0xff] }
  0x96   : > { %1479 = vmatprep.subr.bf16.mxu0 %v2377_v2  ;;  %1520 = vmatprep.subr.bf16.mxu1 %v2379_v3  ;;  %v572_v1 = vld [vmem:[%s2807_s4 + $0x3d8] sm:$0xff]  ;;  %v2352_v2 = vcombine.low %v523_v53, %v539_v54  ;;  %v2354_v3 = vcombine.low %v524_v55, %v540_v56  ;;  %v2329_v53 = vcombine.high %v495_v47, %v511_v48  ;;  %v527_v55 = vld [vmem:[%s2807_s4 + $0x270] sm:$0xff] }
  0x97   : > { %v2387_v5 = vcombine.high %v556_v63, %v572_v1  ;;  %v543_v56 = vld [vmem:[%s2807_s4 + $0x2f0] sm:$0xff] }
  0x99   : > { %1480 = vmatpush1.bf16.msra.mxu0 %v2376_v8  ;;  %1521 = vmatpush1.bf16.msra.mxu1 %v2378_v9  ;;  %v462_v8 = vld [vmem:[%s2807_s4 + $0x68] sm:$0xff] }
  0x9a   : > { %1555 = vmatprep.subr.bf16.mxu0 %v2285_v10  ;;  %1596 = vmatprep.subr.bf16.mxu1 %v2287_v11  ;;  %v478_v9 = vld [vmem:[%s2807_s4 + $0xe8] sm:$0xff]  ;;  %v2384_v10 = vcombine.low %v555_v61, %v571_v62  ;;  %v2386_v11 = vcombine.low %v556_v63, %v572_v1  ;;  %v2361_v61 = vcombine.high %v527_v55, %v543_v56  ;;  %v559_v63 = vld [vmem:[%s2807_s4 + $0x370] sm:$0xff] }
  0x9b   : > { %v2295_v13 = vcombine.high %v462_v8, %v478_v9  ;;  %v575_v1 = vld [vmem:[%s2807_s4 + $0x3f0] sm:$0xff] }
  0x9c   : > { %2402 = vmatmul.mubr.msk.bf16.vlgmr.msra.gmra.mrb[12].mxu0 %vm1223_vm0, %v2836_v44  ;;  %2403 = vmatmul.mubr.msk.bf16.vlgmr.msra.gmra.mrb[12].mxu1 %vm1223_vm0, %v2836_v44 }
  0x9d   : > { %1556 = vmatpush1.bf16.msra.mxu0 %v2284_v16  ;;  %1597 = vmatpush1.bf16.msra.mxu1 %v2286_v17  ;;  %v494_v16 = vld [vmem:[%s2807_s4 + $0x168] sm:$0xff] }
  0x9e   : > { %1557 = vmatprep.subr.bf16.mxu0 %v2317_v18  ;;  %1598 = vmatprep.subr.bf16.mxu1 %v2319_v19  ;;  %v510_v17 = vld [vmem:[%s2807_s4 + $0x1e8] sm:$0xff]  ;;  %v2292_v18 = vcombine.low %v461_v6, %v477_v7  ;;  %v2294_v19 = vcombine.low %v462_v8, %v478_v9  ;;  %v2393_v6 = vcombine.high %v559_v63, %v575_v1 }
  0x9f   : > { %1587 = vmatprep.mubr.bf16.mxu0 %v2482_v0  ;;  %1628 = vmatprep.mubr.bf16.mxu1 %v2482_v0  ;;  %v2327_v21 = vcombine.high %v494_v16, %v510_v17  ;;  %v2392_v8 = vcombine.low %v559_v63, %v575_v1 }
  0xa1   : > { %1558 = vmatpush1.bf16.msra.mxu0 %v2316_v24  ;;  %1599 = vmatpush1.bf16.msra.mxu1 %v2318_v25  ;;  %v526_v24 = vld [vmem:[%s2807_s4 + $0x268] sm:$0xff] }
  0xa2   : > { %1559 = vmatprep.subr.bf16.mxu0 %v2349_v26  ;;  %1600 = vmatprep.subr.bf16.mxu1 %v2351_v27  ;;  %v542_v25 = vld [vmem:[%s2807_s4 + $0x2e8] sm:$0xff]  ;;  %v2324_v26 = vcombine.low %v493_v14, %v509_v15  ;;  %v2326_v27 = vcombine.low %v494_v16, %v510_v17 }
  0xa3   : > { %v2359_v29 = vcombine.high %v526_v24, %v542_v25 }
  0xa5   : > { %1560 = vmatpush1.bf16.msra.mxu0 %v2348_v32  ;;  %1601 = vmatpush1.bf16.msra.mxu1 %v2350_v33  ;;  %v558_v32 = vld [vmem:[%s2807_s4 + $0x368] sm:$0xff] }
  0xa6   : > { %1561 = vmatprep.subr.bf16.mxu0 %v2381_v34  ;;  %1602 = vmatprep.subr.bf16.mxu1 %v2383_v35  ;;  %v574_v33 = vld [vmem:[%s2807_s4 + $0x3e8] sm:$0xff]  ;;  %v2356_v34 = vcombine.low %v525_v22, %v541_v23  ;;  %v2358_v35 = vcombine.low %v526_v24, %v542_v25 }
  0xa7   : > { %v2391_v37 = vcombine.high %v558_v32, %v574_v33 }
  0xa9   : > { %1562 = vmatpush1.bf16.msra.mxu0 %v2380_v40  ;;  %1603 = vmatpush1.bf16.msra.mxu1 %v2382_v41  ;;  %v464_v40 = vld [vmem:[%s2807_s4 + $0x78] sm:$0xff] }
  0xaa   : > { %1637 = vmatprep.subr.bf16.mxu0 %v2289_v42  ;;  %1678 = vmatprep.subr.bf16.mxu1 %v2291_v43  ;;  %v480_v41 = vld [vmem:[%s2807_s4 + $0xf8] sm:$0xff]  ;;  %v2388_v42 = vcombine.low %v557_v30, %v573_v31  ;;  %v2390_v43 = vcombine.low %v558_v32, %v574_v33 }
  0xab   : > { %v2299_v46 = vcombine.high %v464_v40, %v480_v41 }
  0xac   : > { %2404 = vmatmul.mubr.msk.bf16.vlgmr.msra.gmra.mrb[16].mxu0 %vm1223_vm0, %v2836_v44  ;;  %2405 = vmatmul.mubr.msk.bf16.vlgmr.msra.gmra.mrb[16].mxu1 %vm1223_vm0, %v2836_v44 }
  0xad   : > { %1638 = vmatpush1.bf16.msra.mxu0 %v2288_v49  ;;  %1679 = vmatpush1.bf16.msra.mxu1 %v2290_v50  ;;  %v496_v49 = vld [vmem:[%s2807_s4 + $0x178] sm:$0xff] }
  0xae   : > { %1639 = vmatprep.subr.bf16.mxu0 %v2321_v51  ;;  %1680 = vmatprep.subr.bf16.mxu1 %v2323_v52  ;;  %v512_v50 = vld [vmem:[%s2807_s4 + $0x1f8] sm:$0xff]  ;;  %v2296_v51 = vcombine.low %v463_v38, %v479_v39  ;;  %v2298_v52 = vcombine.low %v464_v40, %v480_v41 }
  0xaf   : > { %1669 = vmatprep.mubr.bf16.mxu0 %v2482_v0  ;;  %1710 = vmatprep.mubr.bf16.mxu1 %v2482_v0  ;;  %v2331_v54 = vcombine.high %v496_v49, %v512_v50 }
  0xb1   : > { %1640 = vmatpush1.bf16.msra.mxu0 %v2320_v57  ;;  %1681 = vmatpush1.bf16.msra.mxu1 %v2322_v58  ;;  %v528_v57 = vld [vmem:[%s2807_s4 + $0x278] sm:$0xff] }
  0xb2   : > { %1641 = vmatprep.subr.bf16.mxu0 %v2353_v59  ;;  %1682 = vmatprep.subr.bf16.mxu1 %v2355_v60  ;;  %v544_v58 = vld [vmem:[%s2807_s4 + $0x2f8] sm:$0xff]  ;;  %v2328_v59 = vcombine.low %v495_v47, %v511_v48  ;;  %v2330_v60 = vcombine.low %v496_v49, %v512_v50 }
  0xb3   : > { %v2363_v62 = vcombine.high %v528_v57, %v544_v58 }
  0xb5   : > { %1642 = vmatpush1.bf16.msra.mxu0 %v2352_v2  ;;  %1683 = vmatpush1.bf16.msra.mxu1 %v2354_v3  ;;  %v560_v2 = vld [vmem:[%s2807_s4 + $0x378] sm:$0xff] }
  0xb6   : > { %1643 = vmatprep.subr.bf16.mxu0 %v2385_v4  ;;  %1684 = vmatprep.subr.bf16.mxu1 %v2387_v5  ;;  %v576_v3 = vld [vmem:[%s2807_s4 + $0x3f8] sm:$0xff]  ;;  %v2360_v4 = vcombine.low %v527_v55, %v543_v56  ;;  %v2362_v5 = vcombine.low %v528_v57, %v544_v58 }
  0xb7   : > { %v2395_v7 = vcombine.high %v560_v2, %v576_v3  ;;  %v2394_v9 = vcombine.low %v560_v2, %v576_v3 }
  0xb9   : > { %1644 = vmatpush1.bf16.msra.mxu0 %v2384_v10  ;;  %1685 = vmatpush1.bf16.msra.mxu1 %v2386_v11  ;;  %v2048_v11 = vlaneseq }
  0xba   : > { %1719 = vmatprep.subr.bf16.mxu0 %v2293_v12  ;;  %1760 = vmatprep.subr.bf16.mxu1 %v2295_v13 }
  0xbc   : > { %2406 = vmatmul.mubr.msk.bf16.vlgmr.msra.gmra.mrb[20].mxu0 %vm1223_vm0, %v2836_v44  ;;  %2407 = vmatmul.mubr.msk.bf16.vlgmr.msra.gmra.mrb[20].mxu1 %vm1223_vm0, %v2836_v44 }
  0xbd   : > { %1720 = vmatpush1.bf16.msra.mxu0 %v2292_v18  ;;  %1761 = vmatpush1.bf16.msra.mxu1 %v2294_v19  ;;  %v2049_v18 = vshrl.u32 %v2048_v11, 7 }
  0xbe   : > { %1721 = vmatprep.subr.bf16.mxu0 %v2325_v20  ;;  %1762 = vmatprep.subr.bf16.mxu1 %v2327_v21 }
  0xbf   : > { %1751 = vmatprep.mubr.bf16.mxu0 %v2482_v0  ;;  %1792 = vmatprep.mubr.bf16.mxu1 %v2482_v0 }
  0xc1   : > { %1722 = vmatpush1.bf16.msra.mxu0 %v2324_v26  ;;  %1763 = vmatpush1.bf16.msra.mxu1 %v2326_v27 }
  0xc2   : > { %1723 = vmatprep.subr.bf16.mxu0 %v2357_v28  ;;  %1764 = vmatprep.subr.bf16.mxu1 %v2359_v29 }
  0xc5   : > { %1724 = vmatpush1.bf16.msra.mxu0 %v2356_v34  ;;  %1765 = vmatpush1.bf16.msra.mxu1 %v2358_v35 }
  0xc6   : > { %1725 = vmatprep.subr.bf16.mxu0 %v2389_v36  ;;  %1766 = vmatprep.subr.bf16.mxu1 %v2391_v37 }
  0xc9   : > { %1726 = vmatpush1.bf16.msra.mxu0 %v2388_v42  ;;  %1767 = vmatpush1.bf16.msra.mxu1 %v2390_v43 }
  0xca   : > { %1801 = vmatprep.subr.bf16.mxu0 %v2297_v45  ;;  %1842 = vmatprep.subr.bf16.mxu1 %v2299_v46 }
  0xcc   : > { %2408 = vmatmul.mubr.msk.bf16.vlgmr.msra.gmra.mrb[24].mxu0 %vm1223_vm0, %v2836_v44  ;;  %2409 = vmatmul.mubr.msk.bf16.vlgmr.msra.gmra.mrb[24].mxu1 %vm1223_vm0, %v2836_v44 }
  0xcd   : > { %1802 = vmatpush1.bf16.msra.mxu0 %v2296_v51  ;;  %1843 = vmatpush1.bf16.msra.mxu1 %v2298_v52 }
  0xce   : > { %1803 = vmatprep.subr.bf16.mxu0 %v2329_v53  ;;  %1844 = vmatprep.subr.bf16.mxu1 %v2331_v54 }
  0xcf   : > { %1833 = vmatprep.mubr.bf16.mxu0 %v2482_v0  ;;  %1874 = vmatprep.mubr.bf16.mxu1 %v2482_v0  ;;  %v2483_v0 = vmov 1983009808  }
  0xd0   : > { %v2046_v10 = vunpack.c.l.s4 %v2483_v0 }
  0xd1   : > { %1804 = vmatpush1.bf16.msra.mxu0 %v2328_v59  ;;  %1845 = vmatpush1.bf16.msra.mxu1 %v2330_v60 }
  0xd2   : > { %1805 = vmatprep.subr.bf16.mxu0 %v2361_v61  ;;  %1846 = vmatprep.subr.bf16.mxu1 %v2363_v62  ;;  %v2047_v17 = vunpack.c.0.s8 %v2046_v10 }
  0xd4   : > { %v2996_v29 = vsub.s32 %v2047_v17, %v2049_v18 }
  0xd5   : > { %1806 = vmatpush1.bf16.msra.mxu0 %v2360_v4  ;;  %1847 = vmatpush1.bf16.msra.mxu1 %v2362_v5 }
  0xd6   : > { %1807 = vmatprep.subr.bf16.mxu0 %v2393_v6  ;;  %1848 = vmatprep.subr.bf16.mxu1 %v2395_v7 }
  0xd7   : > { %v2990_v12 = vpop.permute.xlu0 %580 }
  0xd9   : > { %1808 = vmatpush1.bf16.msra.mxu0 %v2392_v8  ;;  %1849 = vmatpush1.bf16.msra.mxu1 %v2394_v9 }
  0xdc   : > { %2410 = vmatmul.mubr.msk.bf16.vlgmr.msra.gmra.mrb[28].mxu0 %vm1223_vm0, %v2836_v44  ;;  %2411 = vmatmul.mubr.msk.bf16.vlgmr.msra.gmra.mrb[28].mxu1 %vm1223_vm0, %v2836_v44 }
 0x13f   : > { %v1261_v13 = vpop.f32.mrb[0].mxu0  ;;  %v1302_v15 = vpop.f32.mrb[0].mxu1 }
 0x140   : > { %v1262_v14 = vadd.f32 %v1261_v13, %v2990_v12  ;;  %v1263_v16 = vpop.f32.mrb[1].mxu0  ;;  %v1303_v19 = vadd.f32 %v1302_v15, %v2990_v12  ;;  %v1304_v44 = vpop.f32.mrb[1].mxu1 }
 0x141   : > { %v1264_v20 = vadd.f32 %v1263_v16, %v2990_v12  ;;  %v1265_v21 = vpop.f32.mrb[2].mxu0  ;;  %v1305_v23 = vadd.f32 %v1304_v44, %v2990_v12  ;;  %v1306_v24 = vpop.f32.mrb[2].mxu1 }
 0x142   : > { %vm1883_vm1 = vcmp.gt.f32.partialorder %v1262_v14, 0.0  ;;  %v1915_v22 = vmul.f32 0.2, %v1262_v14  ;;  %v1266_v25 = vpop.f32.mrb[3].mxu0  ;;  %vm1885_vm2 = vcmp.gt.f32.partialorder %v1303_v19, 0.0  ;;  %v1307_v31 = vpop.f32.mrb[3].mxu1 }
 0x143   : > { %v1917_v26 = vmul.f32 0.2, %v1303_v19  ;;  %vm1884_vm3 = vcmp.gt.f32.partialorder %v1264_v20, 0.0  ;;  %v1916_v27 = vmul.f32 0.2, %v1264_v20  ;;  %vm1886_vm4 = vcmp.gt.f32.partialorder %v1305_v23, 0.0 }
 0x144   : > { %v1947_v28 = vsel %vm1883_vm1, %v1262_v14, %v1915_v22  ;;  %v1918_v30 = vmul.f32 0.2, %v1305_v23 }
 0x145   : > { %v1949_v32 = vsel %vm1885_vm2, %v1303_v19, %v1917_v26  ;;  %v1948_v33 = vsel %vm1884_vm3, %v1264_v20, %v1916_v27 }
 0x146   : > { %v2412_v34 = vpack.c.bf16 %v1948_v33, %v1947_v28  ;;  %v1950_v35 = vsel %vm1886_vm4, %v1305_v23, %v1918_v30 }
 0x147   : > { %v2413_v36 = vpack.c.bf16 %v1950_v35, %v1949_v32 }
 0x148   : > { %v2051_v37 = vrot.slane %v2412_v34, %v2996_v29 }
 0x149   : > { %v2058_v38 = vrot.slane %v2413_v36, %v2996_v29 }
 0x14b   : > { %v2059_v39 = vcombine.low %v2051_v37, %v2058_v38 }
 0x14d   : > { %2187 = vst [vmem:[%s3003_s11] sm:$0xff] %v2059_v39 }
 0x14f   : > { %v1343_v40 = vpop.f32.mrb[4].mxu0  ;;  %v1384_v42 = vpop.f32.mrb[4].mxu1 }
 0x150   : > { %v1344_v41 = vadd.f32 %v1343_v40, %v2990_v12  ;;  %v1345_v43 = vpop.f32.mrb[5].mxu0  ;;  %v1385_v45 = vadd.f32 %v1384_v42, %v2990_v12  ;;  %v1386_v47 = vpop.f32.mrb[5].mxu1 }
 0x151   : > { %v1346_v46 = vadd.f32 %v1345_v43, %v2990_v12  ;;  %v1347_v48 = vpop.f32.mrb[6].mxu0  ;;  %v1387_v50 = vadd.f32 %v1386_v47, %v2990_v12  ;;  %v1388_v51 = vpop.f32.mrb[6].mxu1 }
 0x152   : > { %vm1887_vm5 = vcmp.gt.f32.partialorder %v1344_v41, 0.0  ;;  %v1919_v49 = vmul.f32 0.2, %v1344_v41  ;;  %v1348_v52 = vpop.f32.mrb[7].mxu0  ;;  %vm1889_vm6 = vcmp.gt.f32.partialorder %v1385_v45, 0.0  ;;  %v1389_v57 = vpop.f32.mrb[7].mxu1 }
 0x153   : > { %v1921_v53 = vmul.f32 0.2, %v1385_v45  ;;  %vm1888_vm7 = vcmp.gt.f32.partialorder %v1346_v46, 0.0  ;;  %v1920_v54 = vmul.f32 0.2, %v1346_v46  ;;  %vm1890_vm8 = vcmp.gt.f32.partialorder %v1387_v50, 0.0 }
 0x154   : > { %v1951_v55 = vsel %vm1887_vm5, %v1344_v41, %v1919_v49  ;;  %v1922_v56 = vmul.f32 0.2, %v1387_v50 }
 0x155   : > { %v1953_v58 = vsel %vm1889_vm6, %v1385_v45, %v1921_v53  ;;  %v1952_v59 = vsel %vm1888_vm7, %v1346_v46, %v1920_v54 }
 0x156   : > { %v2414_v60 = vpack.c.bf16 %v1952_v59, %v1951_v55  ;;  %v1954_v61 = vsel %vm1890_vm8, %v1387_v50, %v1922_v56 }
 0x157   : > { %v2415_v62 = vpack.c.bf16 %v1954_v61, %v1953_v58 }
 0x158   : > { %v2068_v63 = vrot.slane %v2414_v60, %v2996_v29 }
 0x159   : > { %v2075_v1 = vrot.slane %v2415_v62, %v2996_v29 }
 0x15b   : > { %v2076_v2 = vcombine.low %v2068_v63, %v2075_v1 }
 0x15d   : > { %2188 = vst [vmem:[%s3003_s11 + $0x8] sm:$0xff] %v2076_v2 }
 0x15f   : > { %v1425_v3 = vpop.f32.mrb[8].mxu0  ;;  %v1466_v5 = vpop.f32.mrb[8].mxu1 }
 0x160   : > { %v1426_v4 = vadd.f32 %v1425_v3, %v2990_v12  ;;  %v1427_v6 = vpop.f32.mrb[9].mxu0  ;;  %v1467_v7 = vadd.f32 %v1466_v5, %v2990_v12  ;;  %v1468_v9 = vpop.f32.mrb[9].mxu1 }
 0x161   : > { %v1428_v8 = vadd.f32 %v1427_v6, %v2990_v12  ;;  %v1429_v0 = vpop.f32.mrb[10].mxu0  ;;  %v1469_v11 = vadd.f32 %v1468_v9, %v2990_v12  ;;  %v1470_v13 = vpop.f32.mrb[10].mxu1 }
 0x162   : > { %vm1891_vm9 = vcmp.gt.f32.partialorder %v1426_v4, 0.0  ;;  %v1923_v10 = vmul.f32 0.2, %v1426_v4  ;;  %v1430_v14 = vpop.f32.mrb[11].mxu0  ;;  %vm1893_vm10 = vcmp.gt.f32.partialorder %v1467_v7, 0.0  ;;  %v1471_v19 = vpop.f32.mrb[11].mxu1 }
 0x163   : > { %v1925_v15 = vmul.f32 0.2, %v1467_v7  ;;  %vm1892_vm11 = vcmp.gt.f32.partialorder %v1428_v8, 0.0  ;;  %v1924_v16 = vmul.f32 0.2, %v1428_v8  ;;  %vm1894_vm12 = vcmp.gt.f32.partialorder %v1469_v11, 0.0 }
 0x164   : > { %v1955_v17 = vsel %vm1891_vm9, %v1426_v4, %v1923_v10  ;;  %v1926_v18 = vmul.f32 0.2, %v1469_v11 }
 0x165   : > { %v1957_v20 = vsel %vm1893_vm10, %v1467_v7, %v1925_v15  ;;  %v1956_v44 = vsel %vm1892_vm11, %v1428_v8, %v1924_v16 }
 0x166   : > { %v2416_v21 = vpack.c.bf16 %v1956_v44, %v1955_v17  ;;  %v1958_v22 = vsel %vm1894_vm12, %v1469_v11, %v1926_v18 }
 0x167   : > { %v2417_v23 = vpack.c.bf16 %v1958_v22, %v1957_v20 }
 0x168   : > { %v2085_v24 = vrot.slane %v2416_v21, %v2996_v29 }
 0x169   : > { %v2092_v25 = vrot.slane %v2417_v23, %v2996_v29 }
 0x16b   : > { %v2093_v26 = vcombine.low %v2085_v24, %v2092_v25 }
 0x16d   : > { %2189 = vst [vmem:[%s3003_s11 + $0x10] sm:$0xff] %v2093_v26 }
 0x16f   : > { %v1507_v27 = vpop.f32.mrb[12].mxu0  ;;  %v1548_v30 = vpop.f32.mrb[12].mxu1 }
 0x170   : > { %v1508_v28 = vadd.f32 %v1507_v27, %v2990_v12  ;;  %v1509_v31 = vpop.f32.mrb[13].mxu0  ;;  %v1549_v32 = vadd.f32 %v1548_v30, %v2990_v12  ;;  %v1550_v34 = vpop.f32.mrb[13].mxu1 }
 0x171   : > { %v1510_v33 = vadd.f32 %v1509_v31, %v2990_v12  ;;  %v1511_v35 = vpop.f32.mrb[14].mxu0  ;;  %v1551_v37 = vadd.f32 %v1550_v34, %v2990_v12  ;;  %v1552_v38 = vpop.f32.mrb[14].mxu1 }
 0x172   : > { %vm1895_vm13 = vcmp.gt.f32.partialorder %v1508_v28, 0.0  ;;  %v1927_v36 = vmul.f32 0.2, %v1508_v28  ;;  %v1512_v39 = vpop.f32.mrb[15].mxu0  ;;  %vm1897_vm14 = vcmp.gt.f32.partialorder %v1549_v32, 0.0  ;;  %v1553_v45 = vpop.f32.mrb[15].mxu1 }
 0x173   : > { %v1929_v40 = vmul.f32 0.2, %v1549_v32  ;;  %vm1896_vm15 = vcmp.gt.f32.partialorder %v1510_v33, 0.0  ;;  %v1928_v41 = vmul.f32 0.2, %v1510_v33  ;;  %vm1898_vm0 = vcmp.gt.f32.partialorder %v1551_v37, 0.0 }
 0x174   : > { %v1959_v42 = vsel %vm1895_vm13, %v1508_v28, %v1927_v36  ;;  %v1930_v43 = vmul.f32 0.2, %v1551_v37 }
 0x175   : > { %v1961_v46 = vsel %vm1897_vm14, %v1549_v32, %v1929_v40  ;;  %v1960_v47 = vsel %vm1896_vm15, %v1510_v33, %v1928_v41 }
 0x176   : > { %v2418_v48 = vpack.c.bf16 %v1960_v47, %v1959_v42  ;;  %v1962_v49 = vsel %vm1898_vm0, %v1551_v37, %v1930_v43 }
 0x177   : > { %v2419_v50 = vpack.c.bf16 %v1962_v49, %v1961_v46 }
 0x178   : > { %v2102_v51 = vrot.slane %v2418_v48, %v2996_v29 }
 0x179   : > { %v2109_v52 = vrot.slane %v2419_v50, %v2996_v29 }
 0x17b   : > { %v2110_v53 = vcombine.low %v2102_v51, %v2109_v52 }
 0x17d   : > { %2190 = vst [vmem:[%s3003_s11 + $0x18] sm:$0xff] %v2110_v53 }
 0x17f   : > { %v1589_v54 = vpop.f32.mrb[16].mxu0  ;;  %v1630_v56 = vpop.f32.mrb[16].mxu1 }
 0x180   : > { %v1590_v55 = vadd.f32 %v1589_v54, %v2990_v12  ;;  %v1591_v57 = vpop.f32.mrb[17].mxu0  ;;  %v1631_v58 = vadd.f32 %v1630_v56, %v2990_v12  ;;  %v1632_v60 = vpop.f32.mrb[17].mxu1 }
 0x181   : > { %v1592_v59 = vadd.f32 %v1591_v57, %v2990_v12  ;;  %v1593_v61 = vpop.f32.mrb[18].mxu0  ;;  %v1633_v63 = vadd.f32 %v1632_v60, %v2990_v12  ;;  %v1634_v1 = vpop.f32.mrb[18].mxu1 }
 0x182   : > { %vm1899_vm1 = vcmp.gt.f32.partialorder %v1590_v55, 0.0  ;;  %v1931_v62 = vmul.f32 0.2, %v1590_v55  ;;  %v1594_v2 = vpop.f32.mrb[19].mxu0  ;;  %vm1901_vm2 = vcmp.gt.f32.partialorder %v1631_v58, 0.0  ;;  %v1635_v7 = vpop.f32.mrb[19].mxu1 }
 0x183   : > { %v1933_v3 = vmul.f32 0.2, %v1631_v58  ;;  %vm1900_vm3 = vcmp.gt.f32.partialorder %v1592_v59, 0.0  ;;  %v1932_v4 = vmul.f32 0.2, %v1592_v59  ;;  %vm1902_vm4 = vcmp.gt.f32.partialorder %v1633_v63, 0.0 }
 0x184   : > { %v1963_v5 = vsel %vm1899_vm1, %v1590_v55, %v1931_v62  ;;  %v1934_v6 = vmul.f32 0.2, %v1633_v63 }
 0x185   : > { %v1965_v8 = vsel %vm1901_vm2, %v1631_v58, %v1933_v3  ;;  %v1964_v9 = vsel %vm1900_vm3, %v1592_v59, %v1932_v4 }
 0x186   : > { %v2420_v0 = vpack.c.bf16 %v1964_v9, %v1963_v5  ;;  %v1966_v10 = vsel %vm1902_vm4, %v1633_v63, %v1934_v6 }
 0x187   : > { %v2421_v11 = vpack.c.bf16 %v1966_v10, %v1965_v8 }
 0x188   : > { %v2119_v13 = vrot.slane %v2420_v0, %v2996_v29 }
 0x189   : > { %v2126_v14 = vrot.slane %v2421_v11, %v2996_v29 }
 0x18b   : > { %v2127_v15 = vcombine.low %v2119_v13, %v2126_v14 }
 0x18d   : > { %2191 = vst [vmem:[%s3003_s11 + $0x20] sm:$0xff] %v2127_v15 }
 0x18f   : > { %v1671_v16 = vpop.f32.mrb[20].mxu0  ;;  %v1712_v18 = vpop.f32.mrb[20].mxu1 }
 0x190   : > { %v1672_v17 = vadd.f32 %v1671_v16, %v2990_v12  ;;  %v1673_v19 = vpop.f32.mrb[21].mxu0  ;;  %v1713_v20 = vadd.f32 %v1712_v18, %v2990_v12  ;;  %v1714_v21 = vpop.f32.mrb[21].mxu1 }
 0x191   : > { %v1674_v44 = vadd.f32 %v1673_v19, %v2990_v12  ;;  %v1675_v22 = vpop.f32.mrb[22].mxu0  ;;  %v1715_v24 = vadd.f32 %v1714_v21, %v2990_v12  ;;  %v1716_v25 = vpop.f32.mrb[22].mxu1 }
 0x192   : > { %vm1903_vm5 = vcmp.gt.f32.partialorder %v1672_v17, 0.0  ;;  %v1935_v23 = vmul.f32 0.2, %v1672_v17  ;;  %v1676_v26 = vpop.f32.mrb[23].mxu0  ;;  %vm1905_vm6 = vcmp.gt.f32.partialorder %v1713_v20, 0.0  ;;  %v1717_v32 = vpop.f32.mrb[23].mxu1 }
 0x193   : > { %v1937_v27 = vmul.f32 0.2, %v1713_v20  ;;  %vm1904_vm7 = vcmp.gt.f32.partialorder %v1674_v44, 0.0  ;;  %v1936_v28 = vmul.f32 0.2, %v1674_v44  ;;  %vm1906_vm8 = vcmp.gt.f32.partialorder %v1715_v24, 0.0 }
 0x194   : > { %v1967_v30 = vsel %vm1903_vm5, %v1672_v17, %v1935_v23  ;;  %v1938_v31 = vmul.f32 0.2, %v1715_v24 }
 0x195   : > { %v1969_v33 = vsel %vm1905_vm6, %v1713_v20, %v1937_v27  ;;  %v1968_v34 = vsel %vm1904_vm7, %v1674_v44, %v1936_v28 }
 0x196   : > { %v2422_v35 = vpack.c.bf16 %v1968_v34, %v1967_v30  ;;  %v1970_v36 = vsel %vm1906_vm8, %v1715_v24, %v1938_v31 }
 0x197   : > { %v2423_v37 = vpack.c.bf16 %v1970_v36, %v1969_v33 }
 0x198   : > { %v2136_v38 = vrot.slane %v2422_v35, %v2996_v29 }
 0x199   : > { %v2143_v39 = vrot.slane %v2423_v37, %v2996_v29 }
 0x19b   : > { %v2144_v40 = vcombine.low %v2136_v38, %v2143_v39 }
 0x19d   : > { %2192 = vst [vmem:[%s3003_s11 + $0x28] sm:$0xff] %v2144_v40 }
 0x19f   : > { %v1753_v41 = vpop.f32.mrb[24].mxu0  ;;  %v1794_v43 = vpop.f32.mrb[24].mxu1 }
 0x1a0   : > { %v1754_v42 = vadd.f32 %v1753_v41, %v2990_v12  ;;  %v1755_v45 = vpop.f32.mrb[25].mxu0  ;;  %v1795_v46 = vadd.f32 %v1794_v43, %v2990_v12  ;;  %v1796_v48 = vpop.f32.mrb[25].mxu1 }
 0x1a1   : > { %v1756_v47 = vadd.f32 %v1755_v45, %v2990_v12  ;;  %v1757_v49 = vpop.f32.mrb[26].mxu0  ;;  %v1797_v51 = vadd.f32 %v1796_v48, %v2990_v12  ;;  %v1798_v52 = vpop.f32.mrb[26].mxu1 }
 0x1a2   : > { %vm1907_vm9 = vcmp.gt.f32.partialorder %v1754_v42, 0.0  ;;  %v1939_v50 = vmul.f32 0.2, %v1754_v42  ;;  %v1758_v53 = vpop.f32.mrb[27].mxu0  ;;  %vm1909_vm10 = vcmp.gt.f32.partialorder %v1795_v46, 0.0  ;;  %v1799_v58 = vpop.f32.mrb[27].mxu1 }
 0x1a3   : > { %v1941_v54 = vmul.f32 0.2, %v1795_v46  ;;  %vm1908_vm11 = vcmp.gt.f32.partialorder %v1756_v47, 0.0  ;;  %v1940_v55 = vmul.f32 0.2, %v1756_v47  ;;  %vm1910_vm12 = vcmp.gt.f32.partialorder %v1797_v51, 0.0 }
 0x1a4   : > { %v1971_v56 = vsel %vm1907_vm9, %v1754_v42, %v1939_v50  ;;  %v1942_v57 = vmul.f32 0.2, %v1797_v51 }
 0x1a5   : > { %v1973_v59 = vsel %vm1909_vm10, %v1795_v46, %v1941_v54  ;;  %v1972_v60 = vsel %vm1908_vm11, %v1756_v47, %v1940_v55 }
 0x1a6   : > { %v2424_v61 = vpack.c.bf16 %v1972_v60, %v1971_v56  ;;  %v1974_v62 = vsel %vm1910_vm12, %v1797_v51, %v1942_v57 }
 0x1a7   : > { %v2425_v63 = vpack.c.bf16 %v1974_v62, %v1973_v59 }
 0x1a8   : > { %v2153_v1 = vrot.slane %v2424_v61, %v2996_v29 }
 0x1a9   : > { %v2160_v2 = vrot.slane %v2425_v63, %v2996_v29 }
 0x1ab   : > { %v2161_v3 = vcombine.low %v2153_v1, %v2160_v2 }
 0x1ad   : > { %2193 = vst [vmem:[%s3003_s11 + $0x30] sm:$0xff] %v2161_v3 }
 0x1af   : > { %v1835_v4 = vpop.f32.mrb[28].mxu0  ;;  %v1876_v6 = vpop.f32.mrb[28].mxu1 }
 0x1b0   : > { %v1836_v5 = vadd.f32 %v1835_v4, %v2990_v12  ;;  %v1837_v7 = vpop.f32.mrb[29].mxu0  ;;  %v1877_v8 = vadd.f32 %v1876_v6, %v2990_v12  ;;  %v1878_v0 = vpop.f32.mrb[29].mxu1 }
 0x1b1   : > { %v1838_v9 = vadd.f32 %v1837_v7, %v2990_v12  ;;  %v1839_v10 = vpop.f32.mrb[30].mxu0  ;;  %v1879_v13 = vadd.f32 %v1878_v0, %v2990_v12  ;;  %v1880_v14 = vpop.f32.mrb[30].mxu1 }
 0x1b2   : > { %vm1911_vm13 = vcmp.gt.f32.partialorder %v1836_v5, 0.0  ;;  %v1943_v11 = vmul.f32 0.2, %v1836_v5  ;;  %v1840_v15 = vpop.f32.mrb[31].mxu0  ;;  %vm1913_vm14 = vcmp.gt.f32.partialorder %v1877_v8, 0.0  ;;  %v1881_v20 = vpop.f32.mrb[31].mxu1 }
 0x1b3   : > { %v1945_v16 = vmul.f32 0.2, %v1877_v8  ;;  %vm1912_vm15 = vcmp.gt.f32.partialorder %v1838_v9, 0.0  ;;  %v1944_v17 = vmul.f32 0.2, %v1838_v9  ;;  %vm1914_vm0 = vcmp.gt.f32.partialorder %v1879_v13, 0.0 }
 0x1b4   : > { %v1975_v18 = vsel %vm1911_vm13, %v1836_v5, %v1943_v11  ;;  %v1946_v19 = vmul.f32 0.2, %v1879_v13 }
 0x1b5   : > { %v1977_v44 = vsel %vm1913_vm14, %v1877_v8, %v1945_v16  ;;  %v1976_v21 = vsel %vm1912_vm15, %v1838_v9, %v1944_v17 }
 0x1b6   : > { %v2426_v22 = vpack.c.bf16 %v1976_v21, %v1975_v18  ;;  %v1978_v23 = vsel %vm1914_vm0, %v1879_v13, %v1946_v19 }
 0x1b7   : > { %v2427_v24 = vpack.c.bf16 %v1978_v23, %v1977_v44 }
 0x1b8   : > { %v2170_v25 = vrot.slane %v2426_v22, %v2996_v29 }
 0x1b9   : > { %v2177_v12 = vrot.slane %v2427_v24, %v2996_v29 }
 0x1bb   : > { %v2178_v26 = vcombine.low %v2170_v25, %v2177_v12 }
 0x1bd   : > { %2194 = vst [vmem:[%s3003_s11 + $0x38] sm:$0xff] %v2178_v26 }
 0x1be PF: > { %p10_p9 = scmp.ge.s32.totalorder %s2521_s16, 4   ;;  %s3069_s12 = smov %s2476_s13 }
 0x1bf   : > { %s3070_s13 = smov %s2530_s19  ;;  %s3071_s14 = smov %s2521_s16 }
 0x1c0   :  { %12 = sbr.rel (!%p10_p9) target bundleno = 2 (0x2), region = 90 }

// kernel: _lambda_.11
= control target key start
LH: loop header
LB: loop body
LE: loop exit
PB: predicated region body
PF: predicated region fallthrough
CT: control target
= control target key end

     0   :  { %s890_s12 = smov 0   ;;  %s892_s13 = smov 0   ;;  %s1063_s0 = inlined_call_operand.vmem [shape: bf16[4,64], index: 0, kind: input, shape index: {}]   ;;  %s1064_s1 = inlined_call_operand.vmem [shape: bf16[64,2048], index: 1, kind: input, shape index: {}]   ;;  %s1065_s2 = inlined_call_operand.vmem [shape: f32[4,1], index: 2, kind: input, shape index: {}]   ;;  %s1066_s3 = inlined_call_operand.vmem [shape: bf16[4,2048], index: 3, kind: output, shape index: {}]  }
   0x1   :  { %s894_s14 = smov 0  }
   0x2 LB: > { %s763_s15 = sadd.s32 4294967295, %s866_s14   ;;  %s907_s16 = sadd.s32 1, %s866_s14   ;;  %s866_s14 = sphi %s894_s14, %s1069_s14   ;;  %s862_s13 = sphi %s892_s13, %s1068_s13   ;;  %s858_s12 = sphi %s890_s12, %s1067_s12  }
   0x3   : > { %s38_s17 = ssub.s32 %s866_s14, %s907_s16  ;;  %s41_s18 = sadd.s32 1, %s862_s13 }
   0x4   : > { %p39_p0 = scmp.eq.s32.totalorder %s38_s17, 0  ;;  %p48_p1 = scmp.ne.s32.totalorder %s862_s13, %s858_s12 }
   0x5   : > { %p49_p2 = scmp.eq.s32.totalorder %s866_s14, 0  ;;  %p766_p4 = scmp.ge.s32.totalorder %s866_s14, 2 }
   0x6   : > { %s916_s19 = scalar_select %p39_p0, %s862_s13, %s41_s18  }
   0x7   : > { %p50_p3 = por %p49_p2, %p48_p1  ;;  %127 = sbr.rel (%p766_p4) target bundleno = 34 (0x22), region = 24 }
   0xe   : > { %130 = sbr.rel (!%p50_p3) target bundleno = 34 (0x22), region = 28  ;;  %s132_s20 = sand.u32 (%p50_p3), 1, %s862_s13  }
   0xf   : > { %s816_s21 = sshll.u32 (%p50_p3), %s866_s14, 5  ;;  %s767_s22 = sshll.u32 (%p50_p3), %s132_s20, 8 }
  0x10   : > { %s924_s25 = scalar_lea.vmem (%p50_p3), %s1064_s1, %s816_s21  ;;  %s929_s26 = scalar_lea.vmem (%p50_p3), [#allocation2], %s767_s22 }
  0x11   : > { %v150_v0 = vld [vmem:[%s924_s25] sm:$0xff] (%p50_p3)  ;;  %v152_v1 = vld [vmem:[%s924_s25 + $0x8] sm:$0xff] (%p50_p3)  ;;  %v154_v2 = vld [vmem:[%s924_s25 + $0x10] sm:$0xff] (%p50_p3) }
  0x12   : > { %151 = vst [vmem:[%s929_s26] sm:$0xff] (%p50_p3), %v150_v0  ;;  %153 = vst [vmem:[%s929_s26 + $0x8] sm:$0xff] (%p50_p3), %v152_v1  ;;  %v156_v3 = vld [vmem:[%s924_s25 + $0x18] sm:$0xff] (%p50_p3)  ;;  %v158_v4 = vld [vmem:[%s924_s25 + $0x40] sm:$0xff] (%p50_p3) }
  0x13   : > { %155 = vst [vmem:[%s929_s26 + $0x10] sm:$0xff] (%p50_p3), %v154_v2  ;;  %v160_v5 = vld [vmem:[%s924_s25 + $0x48] sm:$0xff] (%p50_p3)  ;;  %157 = vst [vmem:[%s929_s26 + $0x18] sm:$0xff] (%p50_p3), %v156_v3  ;;  %v162_v6 = vld [vmem:[%s924_s25 + $0x50] sm:$0xff] (%p50_p3) }
  0x14   : > { %159 = vst [vmem:[%s929_s26 + $0x20] sm:$0xff] (%p50_p3), %v158_v4  ;;  %161 = vst [vmem:[%s929_s26 + $0x28] sm:$0xff] (%p50_p3), %v160_v5  ;;  %v164_v7 = vld [vmem:[%s924_s25 + $0x58] sm:$0xff] (%p50_p3)  ;;  %v166_v8 = vld [vmem:[%s924_s25 + $0x80] sm:$0xff] (%p50_p3) }
  0x15   : > { %163 = vst [vmem:[%s929_s26 + $0x30] sm:$0xff] %v162_v6  ;;  %165 = vst [vmem:[%s929_s26 + $0x38] sm:$0xff] %v164_v7  ;;  %v168_v9 = vld [vmem:[%s924_s25 + $0x88] sm:$0xff]  ;;  %v170_v10 = vld [vmem:[%s924_s25 + $0x90] sm:$0xff] }
  0x16   : > { %167 = vst [vmem:[%s929_s26 + $0x40] sm:$0xff] %v166_v8  ;;  %v172_v11 = vld [vmem:[%s924_s25 + $0x98] sm:$0xff]  ;;  %169 = vst [vmem:[%s929_s26 + $0x48] sm:$0xff] %v168_v9  ;;  %v174_v12 = vld [vmem:[%s924_s25 + $0xc0] sm:$0xff] }
  0x17   : > { %171 = vst [vmem:[%s929_s26 + $0x50] sm:$0xff] %v170_v10  ;;  %173 = vst [vmem:[%s929_s26 + $0x58] sm:$0xff] %v172_v11  ;;  %v176_v13 = vld [vmem:[%s924_s25 + $0xc8] sm:$0xff]  ;;  %v178_v14 = vld [vmem:[%s924_s25 + $0xd0] sm:$0xff] }
  0x18   : > { %175 = vst [vmem:[%s929_s26 + $0x60] sm:$0xff] %v174_v12  ;;  %177 = vst [vmem:[%s929_s26 + $0x68] sm:$0xff] %v176_v13  ;;  %v180_v15 = vld [vmem:[%s924_s25 + $0xd8] sm:$0xff]  ;;  %v182_v16 = vld [vmem:[%s924_s25 + $0x100] sm:$0xff] }
  0x19   : > { %179 = vst [vmem:[%s929_s26 + $0x70] sm:$0xff] %v178_v14  ;;  %v184_v17 = vld [vmem:[%s924_s25 + $0x108] sm:$0xff]  ;;  %181 = vst [vmem:[%s929_s26 + $0x78] sm:$0xff] %v180_v15  ;;  %v186_v18 = vld [vmem:[%s924_s25 + $0x110] sm:$0xff] }
  0x1a   : > { %183 = vst [vmem:[%s929_s26 + $0x80] sm:$0xff] %v182_v16  ;;  %185 = vst [vmem:[%s929_s26 + $0x88] sm:$0xff] %v184_v17  ;;  %v188_v19 = vld [vmem:[%s924_s25 + $0x118] sm:$0xff]  ;;  %v190_v20 = vld [vmem:[%s924_s25 + $0x140] sm:$0xff] }
  0x1b   : > { %187 = vst [vmem:[%s929_s26 + $0x90] sm:$0xff] %v186_v18  ;;  %189 = vst [vmem:[%s929_s26 + $0x98] sm:$0xff] %v188_v19  ;;  %v192_v21 = vld [vmem:[%s924_s25 + $0x148] sm:$0xff]  ;;  %v194_v22 = vld [vmem:[%s924_s25 + $0x150] sm:$0xff] }
  0x1c   : > { %191 = vst [vmem:[%s929_s26 + $0xa0] sm:$0xff] %v190_v20  ;;  %v196_v23 = vld [vmem:[%s924_s25 + $0x158] sm:$0xff]  ;;  %193 = vst [vmem:[%s929_s26 + $0xa8] sm:$0xff] %v192_v21  ;;  %v198_v24 = vld [vmem:[%s924_s25 + $0x180] sm:$0xff] }
  0x1d   : > { %195 = vst [vmem:[%s929_s26 + $0xb0] sm:$0xff] %v194_v22  ;;  %197 = vst [vmem:[%s929_s26 + $0xb8] sm:$0xff] %v196_v23  ;;  %v200_v25 = vld [vmem:[%s924_s25 + $0x188] sm:$0xff]  ;;  %v202_v26 = vld [vmem:[%s924_s25 + $0x190] sm:$0xff] }
  0x1e   : > { %199 = vst [vmem:[%s929_s26 + $0xc0] sm:$0xff] %v198_v24  ;;  %201 = vst [vmem:[%s929_s26 + $0xc8] sm:$0xff] %v200_v25  ;;  %v204_v27 = vld [vmem:[%s924_s25 + $0x198] sm:$0xff]  ;;  %v206_v28 = vld [vmem:[%s924_s25 + $0x1c0] sm:$0xff] }
  0x1f   : > { %203 = vst [vmem:[%s929_s26 + $0xd0] sm:$0xff] %v202_v26  ;;  %v208_v29 = vld [vmem:[%s924_s25 + $0x1c8] sm:$0xff]  ;;  %205 = vst [vmem:[%s929_s26 + $0xd8] sm:$0xff] %v204_v27  ;;  %v210_v30 = vld [vmem:[%s924_s25 + $0x1d0] sm:$0xff] }
  0x20   : > { %207 = vst [vmem:[%s929_s26 + $0xe0] sm:$0xff] %v206_v28  ;;  %209 = vst [vmem:[%s929_s26 + $0xe8] sm:$0xff] %v208_v29  ;;  %v212_v31 = vld [vmem:[%s924_s25 + $0x1d8] sm:$0xff] }
  0x21   : > { %211 = vst [vmem:[%s929_s26 + $0xf0] sm:$0xff] %v210_v30  ;;  %213 = vst [vmem:[%s929_s26 + $0xf8] sm:$0xff] %v212_v31 }
  0x22 PF: > { %p770_p5 = scmp.ge.s32.totalorder %s866_s14, 1  ;;  %p218_p6 = scmp.lt.s32.totalorder %s866_s14, 3 }
  0x24   : > { %p219_p7 = pnand %p770_p5, %p218_p6 }
  0x25   : > { %s225_s27 = sand.u32 (!%p219_p7), 1, %s858_s12   ;;  %v868_v32 = vmov (!%p219_p7), 0   ;;  %v289_v33 = vld [vmem:[%s1065_s2] sm:$0xf] (!%p219_p7)  ;;  %vm455_vm0 = vcmask (!%p219_p7), 523264   ;;  %s772_s7 = sshll.u32 (!%p219_p7), %s763_s15, 3 }
  0x26   : > { %222 = sbr.rel (%p219_p7) target bundleno = 302 (0x12e), region = 51  ;;  %s771_s28 = sshll.u32 (!%p219_p7), %s225_s27, 8  ;;  %491 = vmatprep.mubr.bf16.mxu0 (!%p219_p7), %v868_v32  ;;  %532 = vmatprep.mubr.bf16.mxu1 (!%p219_p7), %v868_v32  ;;  %v256_v12 = vld [vmem:[%s1063_s0] sm:$0x3] (!%p219_p7) }
  0x27   : > { %843 = vset.pattern.permute.xlu0 (!%p219_p7), %v868_v32  ;;  %s1001_s4 = scalar_lea.vmem (!%p219_p7), [#allocation2], %s771_s28  ;;  %p250_p8 = scmp.lt.s32.totalorder (!%p219_p7), %s772_s7, 15 }
  0x28   : > { %v257_v34 = vld [vmem:[%s1001_s4] sm:$0xff] (!%p219_p7)  ;;  %v258_v36 = vld [vmem:[%s1001_s4 + $0x8] sm:$0xff] (!%p219_p7)  ;;  %292 = vperm.xlu0 (!%p219_p7), %843, %v289_v33   ;;  %v259_v0 = vld [vmem:[%s1001_s4 + $0x10] sm:$0xff] (!%p219_p7) }
  0x29   : > { %v261_v35 = vld [vmem:[%s1001_s4 + $0x20] sm:$0xff] (!%p219_p7)  ;;  %v262_v38 = vld [vmem:[%s1001_s4 + $0x28] sm:$0xff] (!%p219_p7)  ;;  %v263_v1 = vld [vmem:[%s1001_s4 + $0x30] sm:$0xff] (!%p219_p7) }
  0x2a   : > { %v775_v37 = vcombine.high (!%p219_p7), %v257_v34, %v261_v35  ;;  %v774_v39 = vcombine.low (!%p219_p7), %v257_v34, %v261_v35  ;;  %v265_v40 = vld [vmem:[%s1001_s4 + $0x40] sm:$0xff] (!%p219_p7)  ;;  %v777_v42 = vcombine.high (!%p219_p7), %v258_v36, %v262_v38  ;;  %v776_v43 = vcombine.low (!%p219_p7), %v258_v36, %v262_v38  ;;  %v266_v45 = vld [vmem:[%s1001_s4 + $0x48] sm:$0xff] (!%p219_p7)  ;;  %v260_v2 = vld [vmem:[%s1001_s4 + $0x18] sm:$0xff] (!%p219_p7) }
  0x2b   : > { %v269_v41 = vld [vmem:[%s1001_s4 + $0x60] sm:$0xff] (!%p219_p7)  ;;  %v270_v46 = vld [vmem:[%s1001_s4 + $0x68] sm:$0xff] (!%p219_p7)  ;;  %v264_v3 = vld [vmem:[%s1001_s4 + $0x38] sm:$0xff] (!%p219_p7)  ;;  %v779_v6 = vcombine.high (!%p219_p7), %v259_v0, %v263_v1  ;;  %v778_v13 = vcombine.low (!%p219_p7), %v259_v0, %v263_v1 }
  0x2c   : > { %v783_v44 = vcombine.high (!%p219_p7), %v265_v40, %v269_v41  ;;  %v273_v47 = vld [vmem:[%s1001_s4 + $0x80] sm:$0xff] (!%p219_p7)  ;;  %459 = vmatprep.subr.bf16.mxu0 (!%p219_p7), %v775_v37  ;;  %v785_v48 = vcombine.high (!%p219_p7), %v266_v45, %v270_v46  ;;  %v274_v50 = vld [vmem:[%s1001_s4 + $0x88] sm:$0xff] (!%p219_p7)  ;;  %500 = vmatprep.subr.bf16.mxu1 (!%p219_p7), %v777_v42  ;;  %v782_v52 = vcombine.low (!%p219_p7), %v265_v40, %v269_v41  ;;  %v267_v8 = vld [vmem:[%s1001_s4 + $0x50] sm:$0xff] (!%p219_p7)  ;;  %v668_v37 = vlaneseq (!%p219_p7) }
  0x2d   : > { %v277_v49 = vld [vmem:[%s1001_s4 + $0xa0] sm:$0xff]  ;;  %v278_v51 = vld [vmem:[%s1001_s4 + $0xa8] sm:$0xff]  ;;  %460 = vmatpush1.bf16.msra.mxu0 %v774_v39  ;;  %501 = vmatpush1.bf16.msra.mxu1 %v776_v43  ;;  %v784_v53 = vcombine.low %v266_v45, %v270_v46  ;;  %v781_v7 = vcombine.high %v260_v2, %v264_v3  ;;  %v271_v9 = vld [vmem:[%s1001_s4 + $0x70] sm:$0xff]  ;;  %v780_v14 = vcombine.low %v260_v2, %v264_v3  ;;  %s1071_s7 = smov (!%p250_p8, %s772_s7), 15 }
  0x2e   : > { %461 = vmatprep.subr.bf16.mxu0 %v783_v44  ;;  %v791_v54 = vcombine.high %v273_v47, %v277_v49  ;;  %502 = vmatprep.subr.bf16.mxu1 %v785_v48  ;;  %v793_v55 = vcombine.high %v274_v50, %v278_v51  ;;  %v281_v56 = vld [vmem:[%s1001_s4 + $0xc0] sm:$0xff]  ;;  %v282_v58 = vld [vmem:[%s1001_s4 + $0xc8] sm:$0xff]  ;;  %v790_v60 = vcombine.low %v273_v47, %v277_v49  ;;  %v268_v10 = vld [vmem:[%s1001_s4 + $0x58] sm:$0xff]  ;;  %v669_v44 = vshrl.u32 %v668_v37, 7  ;;  %s773_s8 = sshll.u32 %s1071_s7, 1 }
  0x2f   : > { %v285_v57 = vld [vmem:[%s1001_s4 + $0xe0] sm:$0xff]  ;;  %v286_v59 = vld [vmem:[%s1001_s4 + $0xe8] sm:$0xff]  ;;  %v792_v61 = vcombine.low %v274_v50, %v278_v51  ;;  %v272_v11 = vld [vmem:[%s1001_s4 + $0x78] sm:$0xff]  ;;  %v787_v15 = vcombine.high %v267_v8, %v271_v9  ;;  %v786_v21 = vcombine.low %v267_v8, %v271_v9  ;;  %s1049_s11 = scalar_lea.vmem %s1066_s3, %s773_s8 }
  0x30   : > { %v799_v62 = vcombine.high %v281_v56, %v285_v57  ;;  %v801_v63 = vcombine.high %v282_v58, %v286_v59  ;;  %v798_v4 = vcombine.low %v281_v56, %v285_v57  ;;  %v800_v5 = vcombine.low %v282_v58, %v286_v59  ;;  %v275_v17 = vld [vmem:[%s1001_s4 + $0x90] sm:$0xff]  ;;  %v276_v19 = vld [vmem:[%s1001_s4 + $0x98] sm:$0xff] }
  0x31   : > { %462 = vmatpush1.bf16.msra.mxu0 %v782_v52  ;;  %503 = vmatpush1.bf16.msra.mxu1 %v784_v53  ;;  %v789_v16 = vcombine.high %v268_v10, %v272_v11  ;;  %v279_v18 = vld [vmem:[%s1001_s4 + $0xb0] sm:$0xff]  ;;  %v280_v20 = vld [vmem:[%s1001_s4 + $0xb8] sm:$0xff]  ;;  %v788_v22 = vcombine.low %v268_v10, %v272_v11 }
  0x32   : > { %463 = vmatprep.subr.bf16.mxu0 %v791_v54  ;;  %504 = vmatprep.subr.bf16.mxu1 %v793_v55  ;;  %v795_v23 = vcombine.high %v275_v17, %v279_v18  ;;  %v797_v24 = vcombine.high %v276_v19, %v280_v20  ;;  %v283_v25 = vld [vmem:[%s1001_s4 + $0xd0] sm:$0xff]  ;;  %v284_v27 = vld [vmem:[%s1001_s4 + $0xd8] sm:$0xff]  ;;  %v794_v29 = vcombine.low %v275_v17, %v279_v18 }
  0x33   : > { %v287_v26 = vld [vmem:[%s1001_s4 + $0xf0] sm:$0xff]  ;;  %v288_v28 = vld [vmem:[%s1001_s4 + $0xf8] sm:$0xff]  ;;  %v796_v30 = vcombine.low %v276_v19, %v280_v20 }
  0x34   : > { %v803_v31 = vcombine.high %v283_v25, %v287_v26  ;;  %v805_v33 = vcombine.high %v284_v27, %v288_v28  ;;  %v802_v34 = vcombine.low %v283_v25, %v287_v26  ;;  %v804_v35 = vcombine.low %v284_v27, %v288_v28 }
  0x35   : > { %464 = vmatpush1.bf16.msra.mxu0 %v790_v60  ;;  %505 = vmatpush1.bf16.msra.mxu1 %v792_v61 }
  0x36   : > { %465 = vmatprep.subr.bf16.mxu0 %v799_v62  ;;  %506 = vmatprep.subr.bf16.mxu1 %v801_v63 }
  0x39   : > { %466 = vmatpush1.bf16.msra.mxu0 %v798_v4  ;;  %507 = vmatpush1.bf16.msra.mxu1 %v800_v5 }
  0x3a   : > { %541 = vmatprep.subr.bf16.mxu0 %v779_v6  ;;  %582 = vmatprep.subr.bf16.mxu1 %v781_v7 }
  0x3c   : > { %806 = vmatmul.mubr.msk.bf16.vlgmr.msra.gmra.mrb[0].mxu0 %vm455_vm0, %v256_v12  ;;  %807 = vmatmul.mubr.msk.bf16.vlgmr.msra.gmra.mrb[0].mxu1 %vm455_vm0, %v256_v12 }
  0x3d   : > { %542 = vmatpush1.bf16.msra.mxu0 %v778_v13  ;;  %583 = vmatpush1.bf16.msra.mxu1 %v780_v14 }
  0x3e   : > { %543 = vmatprep.subr.bf16.mxu0 %v787_v15  ;;  %584 = vmatprep.subr.bf16.mxu1 %v789_v16 }
  0x3f   : > { %573 = vmatprep.mubr.bf16.mxu0 %v868_v32  ;;  %614 = vmatprep.mubr.bf16.mxu1 %v868_v32  ;;  %v869_v32 = vmov 1983009808  }
  0x40   : > { %v666_v36 = vunpack.c.l.s4 %v869_v32 }
  0x41   : > { %544 = vmatpush1.bf16.msra.mxu0 %v786_v21  ;;  %585 = vmatpush1.bf16.msra.mxu1 %v788_v22 }
  0x42   : > { %545 = vmatprep.subr.bf16.mxu0 %v795_v23  ;;  %586 = vmatprep.subr.bf16.mxu1 %v797_v24  ;;  %v667_v43 = vunpack.c.0.s8 %v666_v36 }
  0x44   : > { %v670_v56 = vsub.s32 %v667_v43, %v669_v44 }
  0x45   : > { %546 = vmatpush1.bf16.msra.mxu0 %v794_v29  ;;  %587 = vmatpush1.bf16.msra.mxu1 %v796_v30 }
  0x46   : > { %547 = vmatprep.subr.bf16.mxu0 %v803_v31  ;;  %588 = vmatprep.subr.bf16.mxu1 %v805_v33 }
  0x49   : > { %548 = vmatpush1.bf16.msra.mxu0 %v802_v34  ;;  %589 = vmatpush1.bf16.msra.mxu1 %v804_v35 }
  0x4c   : > { %808 = vmatmul.mubr.msk.bf16.vlgmr.msra.gmra.mrb[4].mxu0 %vm455_vm0, %v256_v12  ;;  %809 = vmatmul.mubr.msk.bf16.vlgmr.msra.gmra.mrb[4].mxu1 %vm455_vm0, %v256_v12 }
  0xa7   : > { %v293_v38 = vpop.permute.xlu0 %292 }
 0x10f   : > { %v493_v39 = vpop.f32.mrb[0].mxu0  ;;  %v534_v41 = vpop.f32.mrb[0].mxu1 }
 0x110   : > { %v494_v40 = vadd.f32 %v493_v39, %v293_v38  ;;  %v495_v42 = vpop.f32.mrb[1].mxu0  ;;  %v535_v45 = vadd.f32 %v534_v41, %v293_v38  ;;  %v536_v47 = vpop.f32.mrb[1].mxu1 }
 0x111   : > { %v496_v46 = vadd.f32 %v495_v42, %v293_v38  ;;  %v497_v48 = vpop.f32.mrb[2].mxu0  ;;  %v537_v50 = vadd.f32 %v536_v47, %v293_v38  ;;  %v538_v51 = vpop.f32.mrb[2].mxu1 }
 0x112   : > { %vm623_vm1 = vcmp.gt.f32.partialorder %v494_v40, 0.0  ;;  %v631_v49 = vmul.f32 0.2, %v494_v40  ;;  %v498_v52 = vpop.f32.mrb[3].mxu0  ;;  %vm625_vm2 = vcmp.gt.f32.partialorder %v535_v45, 0.0  ;;  %v539_v58 = vpop.f32.mrb[3].mxu1 }
 0x113   : > { %v633_v53 = vmul.f32 0.2, %v535_v45  ;;  %vm624_vm3 = vcmp.gt.f32.partialorder %v496_v46, 0.0  ;;  %v632_v54 = vmul.f32 0.2, %v496_v46  ;;  %vm626_vm4 = vcmp.gt.f32.partialorder %v537_v50, 0.0 }
 0x114   : > { %v639_v55 = vsel %vm623_vm1, %v494_v40, %v631_v49  ;;  %v634_v57 = vmul.f32 0.2, %v537_v50 }
 0x115   : > { %v641_v59 = vsel %vm625_vm2, %v535_v45, %v633_v53  ;;  %v640_v60 = vsel %vm624_vm3, %v496_v46, %v632_v54 }
 0x116   : > { %v810_v61 = vpack.c.bf16 %v640_v60, %v639_v55  ;;  %v642_v62 = vsel %vm626_vm4, %v537_v50, %v634_v57 }
 0x117   : > { %v811_v63 = vpack.c.bf16 %v642_v62, %v641_v59 }
 0x118   : > { %v671_v0 = vrot.slane %v810_v61, %v670_v56 }
 0x119   : > { %v678_v1 = vrot.slane %v811_v63, %v670_v56 }
 0x11b   : > { %v679_v2 = vcombine.low %v671_v0, %v678_v1 }
 0x11d   : > { %699 = vst [vmem:[%s1049_s11] sm:$0xff] %v679_v2 }
 0x11f   : > { %v575_v3 = vpop.f32.mrb[4].mxu0  ;;  %v616_v5 = vpop.f32.mrb[4].mxu1 }
 0x120   : > { %v576_v4 = vadd.f32 %v575_v3, %v293_v38  ;;  %v577_v6 = vpop.f32.mrb[5].mxu0  ;;  %v617_v7 = vadd.f32 %v616_v5, %v293_v38  ;;  %v618_v9 = vpop.f32.mrb[5].mxu1 }
 0x121   : > { %v578_v8 = vadd.f32 %v577_v6, %v293_v38  ;;  %v579_v10 = vpop.f32.mrb[6].mxu0  ;;  %v619_v12 = vadd.f32 %v618_v9, %v293_v38  ;;  %v620_v13 = vpop.f32.mrb[6].mxu1 }
 0x122   : > { %vm627_vm5 = vcmp.gt.f32.partialorder %v576_v4, 0.0  ;;  %v635_v11 = vmul.f32 0.2, %v576_v4  ;;  %v580_v14 = vpop.f32.mrb[7].mxu0  ;;  %vm629_vm6 = vcmp.gt.f32.partialorder %v617_v7, 0.0  ;;  %v621_v19 = vpop.f32.mrb[7].mxu1 }
 0x123   : > { %v637_v15 = vmul.f32 0.2, %v617_v7  ;;  %vm628_vm7 = vcmp.gt.f32.partialorder %v578_v8, 0.0  ;;  %v636_v16 = vmul.f32 0.2, %v578_v8  ;;  %vm630_vm8 = vcmp.gt.f32.partialorder %v619_v12, 0.0 }
 0x124   : > { %v643_v17 = vsel %vm627_vm5, %v576_v4, %v635_v11  ;;  %v638_v18 = vmul.f32 0.2, %v619_v12 }
 0x125   : > { %v645_v20 = vsel %vm629_vm6, %v617_v7, %v637_v15  ;;  %v644_v21 = vsel %vm628_vm7, %v578_v8, %v636_v16 }
 0x126   : > { %v812_v22 = vpack.c.bf16 %v644_v21, %v643_v17  ;;  %v646_v23 = vsel %vm630_vm8, %v619_v12, %v638_v18 }
 0x127   : > { %v813_v24 = vpack.c.bf16 %v646_v23, %v645_v20 }
 0x128   : > { %v688_v25 = vrot.slane %v812_v22, %v670_v56 }
 0x129   : > { %v695_v26 = vrot.slane %v813_v24, %v670_v56 }
 0x12b   : > { %v696_v27 = vcombine.low %v688_v25, %v695_v26 }
 0x12d   : > { %700 = vst [vmem:[%s1049_s11 + $0x8] sm:$0xff] %v696_v27 }
 0x12e PF: > { %p10_p9 = scmp.ge.s32.totalorder %s907_s16, 4   ;;  %s1067_s12 = smov %s862_s13 }
 0x12f   : > { %s1068_s13 = smov %s916_s19  ;;  %s1069_s14 = smov %s907_s16 }
 0x130   :  { %12 = sbr.rel (!%p10_p9) target bundleno = 2 (0x2), region = 90 }

// kernel: _lambda_.12
= control target key start
LH: loop header
LB: loop body
LE: loop exit
PB: predicated region body
PF: predicated region fallthrough
CT: control target
= control target key end

     0   :  { %s527_s12 = smov 0   ;;  %s529_s13 = smov 0   ;;  %s585_s0 = inlined_call_operand.vmem [shape: bf16[4,64], index: 0, kind: input, shape index: {}]   ;;  %s586_s1 = inlined_call_operand.vmem [shape: bf16[64,512], index: 1, kind: input, shape index: {}]   ;;  %s587_s2 = inlined_call_operand.vmem [shape: f32[4,1], index: 2, kind: input, shape index: {}]   ;;  %s588_s3 = inlined_call_operand.vmem [shape: bf16[4,512], index: 3, kind: output, shape index: {}]  }
   0x1   :  { %s531_s14 = smov 0  }
   0x2 LB: > { %s419_s15 = sadd.s32 4294967295, %s504_s14   ;;  %s544_s16 = sadd.s32 1, %s504_s14   ;;  %s504_s14 = sphi %s531_s14, %s591_s14   ;;  %s500_s13 = sphi %s529_s13, %s590_s13   ;;  %s496_s12 = sphi %s527_s12, %s589_s12  }
   0x3   : > { %s38_s17 = ssub.s32 %s504_s14, %s544_s16  ;;  %s41_s18 = sadd.s32 1, %s500_s13 }
   0x4   : > { %p39_p0 = scmp.eq.s32.totalorder %s38_s17, 0  ;;  %p48_p1 = scmp.ne.s32.totalorder %s500_s13, %s496_s12 }
   0x5   : > { %p49_p2 = scmp.eq.s32.totalorder %s504_s14, 0  ;;  %p422_p4 = scmp.ge.s32.totalorder %s504_s14, 2 }
   0x6   : > { %s553_s19 = scalar_select %p39_p0, %s500_s13, %s41_s18  }
   0x7   : > { %p50_p3 = por %p49_p2, %p48_p1  ;;  %127 = sbr.rel (%p422_p4) target bundleno = 22 (0x16), region = 24 }
   0xe   : > { %130 = sbr.rel (!%p50_p3) target bundleno = 22 (0x16), region = 28  ;;  %s132_s20 = sand.u32 (%p50_p3), 1, %s500_s13  }
   0xf   : > { %s443_s21 = sshll.u32 (%p50_p3), %s504_s14, 3  ;;  %s423_s22 = sshll.u32 (%p50_p3), %s132_s20, 6 }
  0x10   : > { %s137_s25 = scalar_lea.vmem (%p50_p3), %s586_s1, %s443_s21  ;;  %s134_s26 = scalar_lea.vmem (%p50_p3), [#allocation2], %s423_s22 }
  0x11   : > { %v179_v0 = vld [vmem:[%s137_s25] sm:$0xff] (%p50_p3)  ;;  %v181_v1 = vld [vmem:[%s137_s25 + $0x10] sm:$0xff] (%p50_p3) }
  0x12   : > { %v183_v2 = vld [vmem:[%s137_s25 + $0x20] sm:$0xff] (%p50_p3)  ;;  %180 = vst [vmem:[%s134_s26] sm:$0xff] (%p50_p3), %v179_v0  ;;  %182 = vst [vmem:[%s134_s26 + $0x8] sm:$0xff] (%p50_p3), %v181_v1  ;;  %v185_v3 = vld [vmem:[%s137_s25 + $0x30] sm:$0xff] (%p50_p3) }
  0x13   : > { %184 = vst [vmem:[%s134_s26 + $0x10] sm:$0xff] (%p50_p3), %v183_v2  ;;  %v187_v4 = vld [vmem:[%s137_s25 + $0x40] sm:$0xff] (%p50_p3)  ;;  %v189_v5 = vld [vmem:[%s137_s25 + $0x50] sm:$0xff] (%p50_p3)  ;;  %186 = vst [vmem:[%s134_s26 + $0x18] sm:$0xff] (%p50_p3), %v185_v3 }
  0x14   : > { %188 = vst [vmem:[%s134_s26 + $0x20] sm:$0xff] (%p50_p3), %v187_v4  ;;  %190 = vst [vmem:[%s134_s26 + $0x28] sm:$0xff] (%p50_p3), %v189_v5  ;;  %v191_v6 = vld [vmem:[%s137_s25 + $0x60] sm:$0xff] (%p50_p3)  ;;  %v193_v7 = vld [vmem:[%s137_s25 + $0x70] sm:$0xff] (%p50_p3) }
  0x15   : > { %192 = vst [vmem:[%s134_s26 + $0x30] sm:$0xff] %v191_v6  ;;  %194 = vst [vmem:[%s134_s26 + $0x38] sm:$0xff] %v193_v7 }
  0x16 PF: > { %p426_p5 = scmp.ge.s32.totalorder %s504_s14, 1  ;;  %p199_p6 = scmp.lt.s32.totalorder %s504_s14, 3 }
  0x18   : > { %p200_p7 = pnand %p426_p5, %p199_p6 }
  0x19   : > { %s206_s27 = sand.u32 (!%p200_p7), 1, %s496_s12   ;;  %v506_v8 = vmov (!%p200_p7), 0   ;;  %v246_v9 = vld [vmem:[%s587_s2] sm:$0xf] (!%p200_p7)  ;;  %vm292_vm0 = vcmask (!%p200_p7), 523264   ;;  %s428_s7 = sshll.u32 (!%p200_p7), %s419_s15, 1 }
  0x1a   : > { %203 = sbr.rel (%p200_p7) target bundleno = 266 (0x10a), region = 66  ;;  %s427_s28 = sshll.u32 (!%p200_p7), %s206_s27, 6  ;;  %328 = vmatprep.mubr.bf16.mxu0 (!%p200_p7), %v506_v8  ;;  %469 = vset.pattern.permute.xlu0 (!%p200_p7), %v506_v8  ;;  %v237_v18 = vld [vmem:[%s585_s0] sm:$0x3] (!%p200_p7) }
  0x1b   : > { %249 = vperm.xlu0 (!%p200_p7), %469, %v246_v9   ;;  %s208_s4 = scalar_lea.vmem (!%p200_p7), [#allocation2], %s427_s28  ;;  %p231_p8 = scmp.lt.s32.totalorder (!%p200_p7), %s428_s7, 3 }
  0x1c   : > { %v470_v10 = vld [vmem:[%s208_s4 + $0x4] ss:$8 sps:$4 sm:$0xff] (!%p200_p7)   ;;  %v472_v11 = vld [vmem:[%s208_s4] ss:$8 sps:$4 sm:$0xff] (!%p200_p7)   ;;  %v473_v12 = vld [vmem:[%s208_s4 + $0x14] ss:$8 sps:$4 sm:$0xff] (!%p200_p7)  }
  0x1d   : > { %296 = vmatprep.subr.bf16.mxu0 (!%p200_p7), %v470_v10  ;;  %v475_v13 = vld [vmem:[%s208_s4 + $0x10] ss:$8 sps:$4 sm:$0xff] (!%p200_p7)   ;;  %v476_v14 = vld [vmem:[%s208_s4 + $0x24] ss:$8 sps:$4 sm:$0xff] (!%p200_p7)   ;;  %v478_v15 = vld [vmem:[%s208_s4 + $0x20] ss:$8 sps:$4 sm:$0xff] (!%p200_p7)  }
  0x1e   : > { %297 = vmatpush1.bf16.msra.mxu0 (!%p200_p7), %v472_v11  ;;  %v479_v16 = vld [vmem:[%s208_s4 + $0x34] ss:$8 sps:$4 sm:$0xff] (!%p200_p7)   ;;  %v481_v17 = vld [vmem:[%s208_s4 + $0x30] ss:$8 sps:$4 sm:$0xff] (!%p200_p7)  }
  0x1f   : > { %298 = vmatprep.subr.bf16.mxu0 (!%p200_p7), %v473_v12 }
  0x21   : > { %s593_s7 = smov (!%p231_p8, %s428_s7), 3 }
  0x22   : > { %299 = vmatpush1.bf16.msra.mxu0 %v475_v13  ;;  %s429_s8 = sshll.u32 %s593_s7, 1 }
  0x23   : > { %300 = vmatprep.subr.bf16.mxu0 %v476_v14  ;;  %s234_s11 = scalar_lea.vmem %s588_s3, %s429_s8 }
  0x26   : > { %301 = vmatpush1.bf16.msra.mxu0 %v478_v15 }
  0x27   : > { %302 = vmatprep.subr.bf16.mxu0 %v479_v16 }
  0x2a   : > { %303 = vmatpush1.bf16.msra.mxu0 %v481_v17 }
  0x2d   : > { %438 = vmatmul.mubr.msk.bf16.vlgmr.msra.gmra.mrb[0].mxu0 %vm292_vm0, %v237_v18 }
  0x9a   : > { %v250_v19 = vpop.permute.xlu0 %249 }
 0x100   : > { %v330_v20 = vpop.f32.mrb[0].mxu0 }
 0x101   : > { %v331_v21 = vadd.f32 %v330_v20, %v250_v19  ;;  %v332_v22 = vpop.f32.mrb[1].mxu0 }
 0x102   : > { %v333_v23 = vadd.f32 %v332_v22, %v250_v19  ;;  %v334_v24 = vpop.f32.mrb[2].mxu0 }
 0x103   : > { %vm337_vm1 = vcmp.gt.f32.partialorder %v331_v21, 0.0  ;;  %v339_v25 = vmul.f32 0.2, %v331_v21  ;;  %v335_v26 = vpop.f32.mrb[3].mxu0 }
 0x104   : > { %vm338_vm2 = vcmp.gt.f32.partialorder %v333_v23, 0.0  ;;  %v340_v27 = vmul.f32 0.2, %v333_v23 }
 0x105   : > { %v341_v28 = vsel %vm337_vm1, %v331_v21, %v339_v25 }
 0x106   : > { %v342_v29 = vsel %vm338_vm2, %v333_v23, %v340_v27 }
 0x107   : > { %v439_v30 = vpack.c.bf16 %v342_v29, %v341_v28 }
 0x109   : > { %440 = vst.sshfl [vmem:[%s234_s11] sm:$0x33 pattern:$0x76325410] %v439_v30 }
 0x10a PF: > { %p10_p9 = scmp.ge.s32.totalorder %s544_s16, 4   ;;  %s589_s12 = smov %s500_s13 }
 0x10b   : > { %s590_s13 = smov %s553_s19  ;;  %s591_s14 = smov %s544_s16 }
 0x10c   :  { %12 = sbr.rel (!%p10_p9) target bundleno = 2 (0x2), region = 105 }

// kernel: _lambda_.13
= control target key start
LH: loop header
LB: loop body
LE: loop exit
PB: predicated region body
PF: predicated region fallthrough
CT: control target
= control target key end

     0   :  { %v137_v0 = vmov 0.0   ;;  %vm138_vm0 = vmmov 0   ;;  %v139_v2 = vmov 0   ;;  %vm54_vm1 = vcmask 523264   ;;  %s181_s1 = inlined_call_operand.vmem [shape: bf16[64,128], index: 1, kind: input, shape index: {}]   ;;  %s182_s2 = inlined_call_operand.vmem [shape: f32[4,1], index: 2, kind: input, shape index: {}]   ;;  %s183_s0 = inlined_call_operand.vmem [shape: bf16[4,64], index: 0, kind: input, shape index: {}]   ;;  %s184_s3 = inlined_call_operand.vmem [shape: bf16[4,128], index: 3, kind: output, shape index: {}]  }
   0x1   :  { %117 = vmatprep.subr.bf16.mxu0 %v137_v0  ;;  %v133_v1 = vld [vmem:[%s181_s1] sm:$0xff]   ;;  %125 = vmatprep.mubr.msk.bf16.mxu0 %vm138_vm0, %v137_v0  ;;  %v134_v3 = vld [vmem:[%s181_s1 + $0x8] sm:$0xff]   ;;  %v135_v5 = vld [vmem:[%s181_s1 + $0x10] sm:$0xff]  }
   0x2   :  { %132 = vset.pattern.permute.xlu0 %v139_v2  ;;  %118 = vmatpush3.bf16.msra.mxu0 %v133_v1  ;;  %v24_v4 = vld [vmem:[%s182_s2] sm:$0xf]  ;;  %v136_v6 = vld [vmem:[%s181_s1 + $0x18] sm:$0xff]  }
   0x3   :  { %119 = vmatprep.subr.bf16.mxu0 %v137_v0  ;;  %27 = vperm.xlu0 %132, %v24_v4   ;;  %v15_v7 = vld [vmem:[%s183_s0] sm:$0x3] }
   0x6   :  { %120 = vmatpush3.bf16.msra.mxu0 %v134_v3 }
   0x7   :  { %121 = vmatprep.subr.bf16.mxu0 %v137_v0 }
   0xa   :  { %122 = vmatpush3.bf16.msra.mxu0 %v135_v5 }
   0xb   :  { %123 = vmatprep.subr.bf16.mxu0 %v137_v0 }
   0xe   :  { %124 = vmatpush3.bf16.msra.mxu0 %v136_v6 }
  0x11   :  { %126 = vmatmul.mubr.msk.bf16.vlgmr.msra.gmra.mrb[0].mxu0 %vm54_vm1, %v15_v7 }
  0x82   :  { %v28_v8 = vpop.permute.xlu0 %27 }
  0xe4   :  { %v92_v9 = vpop.f32.mrb[0].mxu0 }
  0xe5   :  { %v93_v10 = vadd.f32 %v92_v9, %v28_v8  ;;  %v127_v11 = vpop.f32.mrb[1].mxu0 }
  0xe6   :  { %v95_v12 = vpop.f32.mrb[2].mxu0 }
  0xe7   :  { %vm98_vm2 = vcmp.gt.f32.partialorder %v93_v10, 0.0  ;;  %v99_v13 = vmul.f32 0.2, %v93_v10  ;;  %v128_v14 = vpop.f32.mrb[3].mxu0 }
  0xe9   :  { %v100_v15 = vsel %vm98_vm2, %v93_v10, %v99_v13 }
  0xea   :  { %v101_v16 = vpack.c.bf16 %v100_v15, %v100_v15 }
  0xec   :  { %102 = vst [vmem:[%s184_s3] sm:$0x3] %v101_v16 }

// kernel: _lambda_.14
= control target key start
LH: loop header
LB: loop body
LE: loop exit
PB: predicated region body
PF: predicated region fallthrough
CT: control target
= control target key end

     0   :  { %v138_v0 = vmov 0.0   ;;  %vm139_vm0 = vmmov 0   ;;  %v140_v2 = vmov 0   ;;  %vm54_vm1 = vcmask 523264   ;;  %s182_s1 = inlined_call_operand.vmem [shape: bf16[64,32], index: 1, kind: input, shape index: {}]   ;;  %s183_s2 = inlined_call_operand.vmem [shape: f32[4,1], index: 2, kind: input, shape index: {}]   ;;  %s184_s0 = inlined_call_operand.vmem [shape: bf16[4,64], index: 0, kind: input, shape index: {}]   ;;  %s185_s3 = inlined_call_operand.vmem [shape: bf16[4,32], index: 3, kind: output, shape index: {}]  }
   0x1   :  { %118 = vmatprep.subr.bf16.mxu0 %v138_v0  ;;  %v134_v1 = vld [vmem:[%s182_s1] sm:$0xff]   ;;  %126 = vmatprep.mubr.msk.bf16.mxu0 %vm139_vm0, %v138_v0  ;;  %v135_v3 = vld [vmem:[%s182_s1 + $0x8] sm:$0xff]   ;;  %v136_v5 = vld [vmem:[%s182_s1 + $0x10] sm:$0xff]   ;;  %vm102_vm3 = vcmask 254976  }
   0x2   :  { %133 = vset.pattern.permute.xlu0 %v140_v2  ;;  %119 = vmatpush3.bf16.msra.mxu0 %v134_v1  ;;  %v24_v4 = vld [vmem:[%s183_s2] sm:$0xf]  ;;  %v137_v6 = vld [vmem:[%s182_s1 + $0x18] sm:$0xff]  }
   0x3   :  { %120 = vmatprep.subr.bf16.mxu0 %v138_v0  ;;  %27 = vperm.xlu0 %133, %v24_v4   ;;  %v15_v7 = vld [vmem:[%s184_s0] sm:$0x3] }
   0x6   :  { %121 = vmatpush3.bf16.msra.mxu0 %v135_v3 }
   0x7   :  { %122 = vmatprep.subr.bf16.mxu0 %v138_v0 }
   0xa   :  { %123 = vmatpush3.bf16.msra.mxu0 %v136_v5 }
   0xb   :  { %124 = vmatprep.subr.bf16.mxu0 %v138_v0 }
   0xe   :  { %125 = vmatpush3.bf16.msra.mxu0 %v137_v6 }
  0x11   :  { %127 = vmatmul.mubr.msk.bf16.vlgmr.msra.gmra.mrb[0].mxu0 %vm54_vm1, %v15_v7 }
  0x82   :  { %v28_v8 = vpop.permute.xlu0 %27 }
  0xe4   :  { %v92_v9 = vpop.f32.mrb[0].mxu0 }
  0xe5   :  { %v93_v10 = vadd.f32 %v92_v9, %v28_v8  ;;  %v128_v11 = vpop.f32.mrb[1].mxu0 }
  0xe6   :  { %v95_v12 = vpop.f32.mrb[2].mxu0 }
  0xe7   :  { %vm98_vm2 = vcmp.gt.f32.partialorder %v93_v10, 0.0  ;;  %v99_v13 = vmul.f32 0.2, %v93_v10  ;;  %v129_v14 = vpop.f32.mrb[3].mxu0 }
  0xe9   :  { %v100_v15 = vsel %vm98_vm2, %v93_v10, %v99_v13 }
  0xea   :  { %v101_v16 = vpack.c.bf16 %v100_v15, %v100_v15 }
  0xec   :  { %103 = vst.msk [vmem:[%s185_s3] sm:$0x3] %vm102_vm3, %v101_v16 }

// kernel: _lambda_.15
= control target key start
LH: loop header
LB: loop body
LE: loop exit
PB: predicated region body
PF: predicated region fallthrough
CT: control target
= control target key end

     0   :  { %s240_s0 = inlined_call_operand.vmem [shape: bf16[1,64], index: 0, kind: input, shape index: {}]   ;;  %s241_s1 = inlined_call_operand.vmem [shape: bf16[64,2], index: 1, kind: input, shape index: {}]   ;;  %s242_s2 = inlined_call_operand.<no memory space> [shape: f32[1,1], index: 2, kind: input, shape index: {}]   ;;  %s243_s3 = inlined_call_operand.hbm [shape: f32[1,2], index: 3, kind: output, shape index: {}]  }
   0x1   :  { %v8_v0 = vstv %s242_s2 }
   0x2   :  { %9 = vst [vmem:[#allocation2] sm:$0x1] %v8_v0 }
   0x3   :  { %v154_v1 = vld [vmem:[%s241_s1] sm:$0xff]   ;;  %v186_v2 = vmov 0.0   ;;  %v155_v3 = vld [vmem:[%s241_s1 + $0x8] sm:$0xff]   ;;  %vm187_vm0 = vmmov 0   ;;  %v188_v4 = vmov 0  }
   0x4   :  { %137 = vmatprep.subr.bf16.mxu0 %v186_v2  ;;  %145 = vmatprep.mubr.msk.bf16.mxu0 %vm187_vm0, %v186_v2 }
   0x5   :  { %138 = vmatpush3.bf16.msra.mxu0 %v154_v1  ;;  %153 = vset.pattern.permute.xlu0 %v188_v4 }
   0x6   :  { %139 = vmatprep.subr.bf16.mxu0 %v186_v2 }
   0x9   :  { %v27_v5 = vld [vmem:[#allocation2] sm:$0x1] }
   0xa   :  { %30 = vperm.xlu0 %153, %v27_v5  }
   0xb   :  { %10 = vsyncpa [#allocation4], 0  ;;  %140 = vmatpush3.bf16.msra.mxu0 %v155_v3  ;;  %v156_v6 = vld [vmem:[%s241_s1 + $0x10] sm:$0xff]   ;;  %v157_v7 = vld [vmem:[%s241_s1 + $0x18] sm:$0xff]   ;;  %vm61_vm1 = vcmask 523264   ;;  %v33_v9 = vlaneseq  ;;  %s189_s1 = smov [#allocation3]  }
   0xc   :  { %141 = vmatprep.subr.bf16.mxu0 %v186_v2  ;;  %v18_v8 = vld [vmem:[%s240_s0] sm:$0x1]  ;;  %s119_s0 = sshll.u32 %s189_s1, 4  ;;  %vm111_vm2 = vcmask 8192   ;;  %s120_s0 = int_to_ptr.vmem [resolvable:$true] %s119_s0 }
   0xd   :  { %v34_v10 = vshrl.u32 %v33_v9, 7  ;;  %s162_s23 = scalar_lea.vmem %s120_s0, 16  ;;  %s166_s24 = scalar_lea.vmem %s120_s0, 32 }
   0xe   :  { %p163_p0 = scmp.ne.s32.totalorder %s120_s0, %s162_s23  ;;  %p167_p1 = scmp.lt.s32.totalorder %s120_s0, %s120_s0 }
   0xf   :  { %142 = vmatpush3.bf16.msra.mxu0 %v156_v6  ;;  %v35_v11 = vsub.s32 0, %v34_v10  ;;  %p168_p2 = scmp.lt.s32.totalorder %s166_s24, %s162_s23 }
  0x10   :  { %143 = vmatprep.subr.bf16.mxu0 %v186_v2 }
  0x11   :  { %p169_p3 = por %p168_p2, %p167_p1 }
  0x13   :  { %144 = vmatpush3.bf16.msra.mxu0 %v157_v7  ;;  %p170_p4 = pnand %p169_p3, %p163_p0 }
  0x16   :  { %146 = vmatmul.mubr.msk.bf16.vlgmr.msra.gmra.mrb[0].mxu0 %vm61_vm1, %v18_v8 }
  0x89   :  { %v31_v12 = vpop.permute.xlu0 %30 }
  0x8a   :  { %v36_v13 = vrot.slane %v31_v12, %v35_v11 }
  0xe9   :  { %v99_v14 = vpop.f32.mrb[0].mxu0 }
  0xea   :  { %v100_v15 = vadd.f32 %v99_v14, %v36_v13  ;;  %v147_v16 = vpop.f32.mrb[1].mxu0 }
  0xeb   :  { %v102_v17 = vpop.f32.mrb[2].mxu0 }
  0xec   :  { %v105_v18 = vsub.f32 0.0, %v100_v15  ;;  %v148_v19 = vpop.f32.mrb[3].mxu0 }
  0xee   :  { %v106_v20 = vmul.f32 1.442695, %v105_v18 }
  0xf0   :  { %158 = vpow2.f32 %v106_v20 }
  0xfa   :  { %v159_v21 = vpop.eup %158 }
  0xfb   :  { %v108_v22 = vadd.f32 1.0, %v159_v21 }
  0xfd   :  { %160 = vrcp.f32 %v108_v22 }
 0x107   :  { %v161_v23 = vpop.eup %160 }
 0x108   :  { %112 = vst.msk [vmem:[#allocation3] sm:$0x1] %vm111_vm2, %v161_v23 }
 0x109   :  { %173 = shalt.err (!%p170_p4)
}
 0x10a   :  { %s174_s27 = scalar_lea.hbm %s243_s3, 16 }
 0x10b   :  { %p175_p5 = scmp.ne.s32.totalorder %s243_s3, %s174_s27  ;;  %p178_p6 = scmp.lt.u32.totalorder %s174_s27, %s243_s3 }
 0x10d   :  { %p180_p7 = pnand %p178_p6, %p175_p5 }
 0x10f   :  { %183 = shalt.err (!%p180_p7)
}
 0x110   :  { %122 = dma.vmem_to_hbm [thread:$0]  %s120_s0, 16, %s243_s3, [#allocation4]  }
 0x111   :  { %184 = dma.done.wait [#allocation4], 16  }
 0x112   :  { %185 = vsyncadd [#allocation4], 4294967280 }
 0x113   :  { %126 = vsyncpa [#allocation4], 1 }

</bundles_post_ra>
